<compile_context>
chip_gen: v7x
topology: tpu7x:2x2x1
jax: 0.10.0
libtpu: 0.0.40
codegen_flags: <defaults>
</compile_context>

<pallas_src>
import functools

import numpy as np

import jax
import jax.numpy as jnp
from jax.experimental import pallas as pl
from jax.experimental.pallas import tpu as pltpu


_CHUNK = 256            # lane stride of one conv2 output row in the feature vector
_FEAT = 10 * _CHUNK     # 2560 lane-padded features per image (2000 real + 560 zeros)
_NCLS = 128             # lane-padded logits (10 real + 118 at -1e30)


# ----------------------------------------------------------------------------
# Fused kernel: conv1 -> ReLU -> pool -> conv2 -> ReLU -> fc1 -> ReLU -> fc2
#               -> log_softmax, for one block of `bb` images per grid step.
# ----------------------------------------------------------------------------
def _digit_kernel(x_ref, w1_ref, b1_ref, w2_ref, b2_ref,
                  w3_ref, b3_ref, w4_ref, b4_ref,
                  o_ref, feats_ref, *, bb):
    """Per-image layouts (everything stays in VMEM / vregs):
       x  : (28, 28)                 rows = H, lanes = W
       y1 : (24, 240)  lanes = w*10 + oc          (conv1 out, channels minor)
       pw : (23, 230)  2x2 max pool, uncompacted: valid rows are even, valid
                       lanes are 2*pw*10 + ic (stride-2 folded into w2 layout)
       y2 : (19, 256)  lanes = ow*20 + oc (cols 200..255 are zero pad),
                       valid rows are even (r = 2*oh)
       feature row : (1, 2560), chunk h = conv2 row 2h (all 256-lane aligned)
    """
    # Hoist weight / bias loads out of the per-image loop.
    w1 = [w1_ref[i] for i in range(5)]           # each (28, 240) bf16
    w2 = [w2_ref[i] for i in range(3)]           # each (230, 256) bf16
    b1 = b1_ref[...]                             # (1, 240) f32
    b2 = b2_ref[...]                             # (1, 256) f32

    for b in range(bb):                          # static unroll over the block
        x = x_ref[b].astype(jnp.bfloat16)        # (28, 28)

        # conv1 (1->10, 5x5) + ReLU as 5 shifted bf16 MXU matmuls (f32 acc).
        acc1 = jnp.dot(x[0:24, :], w1[0], preferred_element_type=jnp.float32)
        for i in range(1, 5):
            acc1 = acc1 + jnp.dot(x[i:i + 24, :], w1[i],
                                  preferred_element_type=jnp.float32)
        y1 = jnp.maximum(acc1 + b1, 0.0)         # (24, 240) f32

        # 2x2 max pool (stride 2), uncompacted: plain static slices only.
        ph = jnp.maximum(y1[0:23, :], y1[1:24, :])          # (23, 240)
        pw = jnp.maximum(ph[:, 0:230], ph[:, 10:240])       # (23, 230) f32
        pwb = pw.astype(jnp.bfloat16)

        # conv2 (10->20, 3x3) + ReLU as 3 shifted bf16 MXU matmuls.  The output
        # is pre-padded to 256 lanes (zero weight/bias columns), so all later
        # slice/concat boundaries are 128-aligned.
        acc2 = jnp.dot(pwb[0:19, :], w2[0], preferred_element_type=jnp.float32)
        for i in range(1, 3):
            acc2 = acc2 + jnp.dot(pwb[2 * i:2 * i + 19, :], w2[i],
                                  preferred_element_type=jnp.float32)
        y2 = jnp.maximum(acc2 + b2, 0.0)         # (19, 256) f32

        # One lane-aligned feature row per image (chunk h = conv2 row 2h).
        feat = jnp.concatenate([y2[2 * h:2 * h + 1, :] for h in range(10)],
                               axis=1)           # (1, 2560)
        feats_ref[b:b + 1, :] = feat

    # --- MLP head on the whole image block; features never leave VMEM. ---
    feats = feats_ref[...].astype(jnp.bfloat16)                    # (bb, 2560)
    h1 = jnp.dot(feats, w3_ref[...], preferred_element_type=jnp.float32)
    h1 = jnp.maximum(h1 + b3_ref[...], 0.0)                        # (bb, 500) f32
    logits = jnp.dot(h1, w4_ref[...],
                     preferred_element_type=jnp.float32) + b4_ref[...]  # (bb, 128)
    m = jnp.max(logits, axis=-1, keepdims=True)
    z = logits - m
    lse = jnp.log(jnp.sum(jnp.exp(z), axis=-1, keepdims=True))
    o_ref[...] = (z - lse).astype(o_ref.dtype)   # single lane-dense store


# ----------------------------------------------------------------------------
# pallas_call wrapper
# ----------------------------------------------------------------------------
def _images_per_step(batch):
    """Images per grid step: amortize step overhead, keep >=2 steps when B>=16."""
    return 16 if batch >= 32 else 8


@jax.jit
def digit_forward(packed, x):
    """x: (B, 1, 28, 28) float32 NCHW -> (B, 10) log-probabilities."""
    B = x.shape[0]
    bb = _images_per_step(B)
    n_steps = -(-B // bb)
    Bp = n_steps * bb
    x2 = x.reshape(B, 28, 28)                    # drop the unit channel (free)
    if Bp != B:
        x2 = jnp.pad(x2, ((0, Bp - B), (0, 0), (0, 0)))

    out = pl.pallas_call(
        functools.partial(_digit_kernel, bb=bb),
        out_shape=jax.ShapeDtypeStruct((Bp, _NCLS), jnp.float32),
        grid=(n_steps,),
        in_specs=[
            pl.BlockSpec((bb, 28, 28), lambda i: (i, 0, 0)),      # image block
            pl.BlockSpec((5, 28, 240), lambda i: (0, 0, 0)),      # w1 (bf16)
            pl.BlockSpec((1, 240), lambda i: (0, 0)),             # b1
            pl.BlockSpec((3, 230, 256), lambda i: (0, 0, 0)),     # w2 (bf16)
            pl.BlockSpec((1, 256), lambda i: (0, 0)),             # b2
            pl.BlockSpec((_FEAT, 500), lambda i: (0, 0)),         # w3 (bf16)
            pl.BlockSpec((1, 500), lambda i: (0, 0)),             # b3
            pl.BlockSpec((500, _NCLS), lambda i: (0, 0)),         # w4 (padded)
            pl.BlockSpec((1, _NCLS), lambda i: (0, 0)),           # b4 (padded)
        ],
        out_specs=pl.BlockSpec((bb, _NCLS), lambda i: (i, 0)),
        scratch_shapes=[pltpu.VMEM((bb, _FEAT), jnp.float32)],
        compiler_params=pltpu.CompilerParams(
            dimension_semantics=("parallel",),
            vmem_limit_bytes=32 * 1024 * 1024),
    )(x2, packed["w1"], packed["b1"], packed["w2"], packed["b2"],
      packed["w3"], packed["b3"], packed["w4"], packed["b4"])
    return out[:B, :10]


# ----------------------------------------------------------------------------
# Parameter handling (one-time host-side repack into the kernel layouts)
# ----------------------------------------------------------------------------
def init_params(key):
    """Deterministic synthetic parameters with PyTorch Conv2d/Linear shapes."""
    ks = jax.random.split(key, 8)

    def u(k, shape, fan_in):
        bound = 1.0 / jnp.sqrt(jnp.float32(fan_in))
        return jax.random.uniform(k, shape, jnp.float32, -bound, bound)

    return {
        "conv1_w": u(ks[0], (10, 1, 5, 5), 1 * 5 * 5),
        "conv1_b": u(ks[1], (10,), 1 * 5 * 5),
        "conv2_w": u(ks[2], (20, 10, 3, 3), 10 * 3 * 3),
        "conv2_b": u(ks[3], (20,), 10 * 3 * 3),
        "fc1_w":   u(ks[4], (500, 2000), 2000),
        "fc1_b":   u(ks[5], (500,), 2000),
        "fc2_w":   u(ks[6], (10, 500), 500),
        "fc2_b":   u(ks[7], (10,), 500),
    }


def pack_params(params):
    """Repack PyTorch-layout weights into the fused-kernel layouts (host, once)."""
    w1 = np.asarray(params["conv1_w"], np.float32)   # (10, 1, 5, 5) [oc, ic, i, j]
    b1 = np.asarray(params["conv1_b"], np.float32)
    w2 = np.asarray(params["conv2_w"], np.float32)   # (20, 10, 3, 3)
    b2 = np.asarray(params["conv2_b"], np.float32)
    w3 = np.asarray(params["fc1_w"], np.float32)     # (500, 2000)
    b3 = np.asarray(params["fc1_b"], np.float32)
    w4 = np.asarray(params["fc2_w"], np.float32)     # (10, 500)
    b4 = np.asarray(params["fc2_b"], np.float32)

    # conv1 as 5 shifted matmuls over the 28 input columns:
    #   w1row[i, w + j, w*10 + oc] = w1[oc, 0, i, j]
    w1row = np.zeros((5, 28, 240), np.float32)
    for i in range(5):
        for j in range(5):
            for w in range(24):
                w1row[i, w + j, w * 10:(w + 1) * 10] = w1[:, 0, i, j]
    b1f = np.tile(b1, 24).reshape(1, 240)

    # conv2 as 3 shifted matmuls over the uncompacted pooled rows; pooled value
    # (pw, ic) lives at lane 2*pw*10 + ic.  Output lane-padded 200 -> 256 with
    # zero weight/bias columns so the kernel's feature assembly stays aligned.
    w2row = np.zeros((3, 230, 256), np.float32)
    for i in range(3):
        for j in range(3):
            for ow in range(10):
                l0 = 2 * (ow + j) * 10
                w2row[i, l0:l0 + 10, ow * 20:(ow + 1) * 20] = w2[:, :, i, j].T
    b2f = np.zeros((1, 256), np.float32)
    b2f[0, :200] = np.tile(b2, 10)

    # fc1: fold the PyTorch (C, H, W) flatten order + the 256-lane chunk
    # padding into the weight: row h*256 + w*20 + c <- fc1_w[:, c*100 + h*10 + w]
    w3r = w3.reshape(500, 20, 10, 10)                       # (n, c, h, w)
    w3pad = np.zeros((_FEAT, 500), np.float32)
    for h in range(10):
        blk = np.transpose(w3r[:, :, h, :], (2, 1, 0))      # (w, c, n)
        w3pad[h * _CHUNK:h * _CHUNK + 200, :] = blk.reshape(200, 500)
    b3f = b3.reshape(1, 500)

    # fc2: lane-pad to 128 output columns; padded columns get zero weight and
    # a large negative finite bias so they vanish under log_softmax.
    w4p = np.zeros((500, _NCLS), np.float32)
    w4p[:, :10] = w4.T
    b4p = np.full((1, _NCLS), -1e30, np.float32)
    b4p[0, :10] = b4

    return {
        "w1": jnp.asarray(w1row, dtype=jnp.bfloat16),
        "b1": jnp.asarray(b1f),
        "w2": jnp.asarray(w2row, dtype=jnp.bfloat16),
        "b2": jnp.asarray(b2f),
        "w3": jnp.asarray(w3pad, dtype=jnp.bfloat16),
        "b3": jnp.asarray(b3f),
        "w4": jnp.asarray(w4p),
        "b4": jnp.asarray(b4p),
    }


# ----------------------------------------------------------------------------
# Pure-JAX reference (mirrors the kernel's bf16 rounding of conv + fc1 inputs)
# ----------------------------------------------------------------------------
def reference_forward(params, x):
    def rnd(v):
        return v.astype(jnp.bfloat16).astype(jnp.float32)

    y = jax.lax.conv_general_dilated(
        rnd(x), rnd(params["conv1_w"]), (1, 1), "VALID",
        dimension_numbers=("NCHW", "OIHW", "NCHW"))
    y = jnp.maximum(y + params["conv1_b"][None, :, None, None], 0.0)
    y = jax.lax.reduce_window(y, -jnp.inf, jax.lax.max,
                              (1, 1, 2, 2), (1, 1, 2, 2), "VALID")
    y = jax.lax.conv_general_dilated(
        rnd(y), rnd(params["conv2_w"]), (1, 1), "VALID",
        dimension_numbers=("NCHW", "OIHW", "NCHW"))
    y = jnp.maximum(y + params["conv2_b"][None, :, None, None], 0.0)
    flat = y.reshape(x.shape[0], -1)
    h = jnp.maximum(rnd(flat) @ rnd(params["fc1_w"].T) + params["fc1_b"], 0.0)
    logits = h @ params["fc2_w"].T + params["fc2_b"]
    return jax.nn.log_softmax(logits, axis=-1)


if __name__ == "__main__":
    key = jax.random.PRNGKey(0)
    k_params, k_x = jax.random.split(key)
    params = init_params(k_params)
    packed = pack_params(params)

    # Two batch sizes: B=2 exercises batch padding (single grid step);
    # B=19 exercises a ragged batch with a multi-step "parallel" grid.
    for batch in (2, 19):
        kx = jax.random.fold_in(k_x, batch)
        x = jax.random.normal(kx, (batch, 1, 28, 28), dtype=jnp.float32)
        out = digit_forward(packed, x)
        jax.block_until_ready(out)
        assert out.shape == (batch, 10)
        # log_softmax rows must sum to 1 in probability space.
        assert bool(jnp.allclose(jnp.exp(out).sum(axis=1), 1.0, atol=1e-4))
        # Matches the pure-JAX reference of the PyTorch forward.
        ref = reference_forward(params, x)
        err = float(jnp.max(jnp.abs(out - ref)))
        assert err < 3e-2, f"batch={batch} max abs err {err}"
    print("KERNEL_OK")
</pallas_src>

<mosaic_0001>
module attributes {stable_mosaic.version = 11 : i64} {
  func.func @_digit_kernel(%arg0: i32, %arg1: memref<8x28x28xf32, #tpu.memory_space<vmem>>, %arg2: memref<5x28x240xbf16, #tpu.memory_space<vmem>>, %arg3: memref<1x240xf32, #tpu.memory_space<vmem>>, %arg4: memref<3x230x256xbf16, #tpu.memory_space<vmem>>, %arg5: memref<1x256xf32, #tpu.memory_space<vmem>>, %arg6: memref<2560x500xbf16, #tpu.memory_space<vmem>>, %arg7: memref<1x500xf32, #tpu.memory_space<vmem>>, %arg8: memref<500x128xf32, #tpu.memory_space<vmem>>, %arg9: memref<1x128xf32, #tpu.memory_space<vmem>>, %arg10: memref<8x128xf32, #tpu.memory_space<vmem>>, %arg11: memref<8x2560xf32, #tpu.memory_space<vmem>>) attributes {dimension_semantics = [#tpu.dimension_semantics<parallel>], iteration_bounds = array<i64: 1>, scalar_prefetch = 0 : i64, scratch_operands = 1 : i64, tpu.core_type = #tpu.core_type<tc>, window_params = [{transform_indices = @transform_0, window_bounds = array<i64: 8, 28, 28>}, {pipeline_mode = #tpu.pipeline_mode<synchronous>, transform_indices = @transform_1, window_bounds = array<i64: 5, 28, 240>}, {pipeline_mode = #tpu.pipeline_mode<synchronous>, transform_indices = @transform_2, window_bounds = array<i64: 1, 240>}, {pipeline_mode = #tpu.pipeline_mode<synchronous>, transform_indices = @transform_3, window_bounds = array<i64: 3, 230, 256>}, {pipeline_mode = #tpu.pipeline_mode<synchronous>, transform_indices = @transform_4, window_bounds = array<i64: 1, 256>}, {pipeline_mode = #tpu.pipeline_mode<synchronous>, transform_indices = @transform_5, window_bounds = array<i64: 2560, 500>}, {pipeline_mode = #tpu.pipeline_mode<synchronous>, transform_indices = @transform_6, window_bounds = array<i64: 1, 500>}, {pipeline_mode = #tpu.pipeline_mode<synchronous>, transform_indices = @transform_7, window_bounds = array<i64: 500, 128>}, {pipeline_mode = #tpu.pipeline_mode<synchronous>, transform_indices = @transform_8, window_bounds = array<i64: 1, 128>}, {transform_indices = @transform_9, window_bounds = array<i64: 8, 128>}]} {
    %c0 = arith.constant 0 : index
    %c0_0 = arith.constant 0 : index
    %c0_1 = arith.constant 0 : index
    %0 = vector.load %arg2[%c0, %c0_0, %c0_1] : memref<5x28x240xbf16, #tpu.memory_space<vmem>>, vector<1x28x240xbf16>
    %1 = vector.shape_cast %0 : vector<1x28x240xbf16> to vector<28x240xbf16>
    %c1 = arith.constant 1 : index
    %c0_2 = arith.constant 0 : index
    %c0_3 = arith.constant 0 : index
    %2 = vector.load %arg2[%c1, %c0_2, %c0_3] : memref<5x28x240xbf16, #tpu.memory_space<vmem>>, vector<1x28x240xbf16>
    %3 = vector.shape_cast %2 : vector<1x28x240xbf16> to vector<28x240xbf16>
    %c2 = arith.constant 2 : index
    %c0_4 = arith.constant 0 : index
    %c0_5 = arith.constant 0 : index
    %4 = vector.load %arg2[%c2, %c0_4, %c0_5] : memref<5x28x240xbf16, #tpu.memory_space<vmem>>, vector<1x28x240xbf16>
    %5 = vector.shape_cast %4 : vector<1x28x240xbf16> to vector<28x240xbf16>
    %c3 = arith.constant 3 : index
    %c0_6 = arith.constant 0 : index
    %c0_7 = arith.constant 0 : index
    %6 = vector.load %arg2[%c3, %c0_6, %c0_7] : memref<5x28x240xbf16, #tpu.memory_space<vmem>>, vector<1x28x240xbf16>
    %7 = vector.shape_cast %6 : vector<1x28x240xbf16> to vector<28x240xbf16>
    %c4 = arith.constant 4 : index
    %c0_8 = arith.constant 0 : index
    %c0_9 = arith.constant 0 : index
    %8 = vector.load %arg2[%c4, %c0_8, %c0_9] : memref<5x28x240xbf16, #tpu.memory_space<vmem>>, vector<1x28x240xbf16>
    %9 = vector.shape_cast %8 : vector<1x28x240xbf16> to vector<28x240xbf16>
    %c0_10 = arith.constant 0 : index
    %c0_11 = arith.constant 0 : index
    %c0_12 = arith.constant 0 : index
    %10 = vector.load %arg4[%c0_10, %c0_11, %c0_12] : memref<3x230x256xbf16, #tpu.memory_space<vmem>>, vector<1x230x256xbf16>
    %11 = vector.shape_cast %10 : vector<1x230x256xbf16> to vector<230x256xbf16>
    %c1_13 = arith.constant 1 : index
    %c0_14 = arith.constant 0 : index
    %c0_15 = arith.constant 0 : index
    %12 = vector.load %arg4[%c1_13, %c0_14, %c0_15] : memref<3x230x256xbf16, #tpu.memory_space<vmem>>, vector<1x230x256xbf16>
    %13 = vector.shape_cast %12 : vector<1x230x256xbf16> to vector<230x256xbf16>
    %c2_16 = arith.constant 2 : index
    %c0_17 = arith.constant 0 : index
    %c0_18 = arith.constant 0 : index
    %14 = vector.load %arg4[%c2_16, %c0_17, %c0_18] : memref<3x230x256xbf16, #tpu.memory_space<vmem>>, vector<1x230x256xbf16>
    %15 = vector.shape_cast %14 : vector<1x230x256xbf16> to vector<230x256xbf16>
    %c0_19 = arith.constant 0 : index
    %c0_20 = arith.constant 0 : index
    %16 = vector.load %arg3[%c0_19, %c0_20] : memref<1x240xf32, #tpu.memory_space<vmem>>, vector<1x240xf32>
    %c0_21 = arith.constant 0 : index
    %c0_22 = arith.constant 0 : index
    %17 = vector.load %arg5[%c0_21, %c0_22] : memref<1x256xf32, #tpu.memory_space<vmem>>, vector<1x256xf32>
    %c0_23 = arith.constant 0 : index
    %c0_24 = arith.constant 0 : index
    %c0_25 = arith.constant 0 : index
    %18 = vector.load %arg1[%c0_23, %c0_24, %c0_25] : memref<8x28x28xf32, #tpu.memory_space<vmem>>, vector<1x28x28xf32>
    %19 = vector.shape_cast %18 : vector<1x28x28xf32> to vector<28x28xf32>
    %20 = arith.truncf %19 : vector<28x28xf32> to vector<28x28xbf16>
    %21 = vector.extract_strided_slice %20 {offsets = [0, 0], sizes = [24, 28], strides = [1, 1]} : vector<28x28xbf16> to vector<24x28xbf16>
    %cst = arith.constant dense<0.000000e+00> : vector<24x240xf32>
    %22 = tpu.matmul %21, %1, %cst {dimension_numbers = #tpu.dot_dimension_numbers<[1], [0], [0], [1], [0, 0, 1, 1], [], []>} : vector<24x28xbf16>, vector<28x240xbf16>, vector<24x240xf32> -> vector<24x240xf32>
    %23 = vector.extract_strided_slice %20 {offsets = [1, 0], sizes = [24, 28], strides = [1, 1]} : vector<28x28xbf16> to vector<24x28xbf16>
    %cst_26 = arith.constant dense<0.000000e+00> : vector<24x240xf32>
    %24 = tpu.matmul %23, %3, %cst_26 {dimension_numbers = #tpu.dot_dimension_numbers<[1], [0], [0], [1], [0, 0, 1, 1], [], []>} : vector<24x28xbf16>, vector<28x240xbf16>, vector<24x240xf32> -> vector<24x240xf32>
    %25 = arith.addf %22, %24 : vector<24x240xf32>
    %26 = vector.extract_strided_slice %20 {offsets = [2, 0], sizes = [24, 28], strides = [1, 1]} : vector<28x28xbf16> to vector<24x28xbf16>
    %cst_27 = arith.constant dense<0.000000e+00> : vector<24x240xf32>
    %27 = tpu.matmul %26, %5, %cst_27 {dimension_numbers = #tpu.dot_dimension_numbers<[1], [0], [0], [1], [0, 0, 1, 1], [], []>} : vector<24x28xbf16>, vector<28x240xbf16>, vector<24x240xf32> -> vector<24x240xf32>
    %28 = arith.addf %25, %27 : vector<24x240xf32>
    %29 = vector.extract_strided_slice %20 {offsets = [3, 0], sizes = [24, 28], strides = [1, 1]} : vector<28x28xbf16> to vector<24x28xbf16>
    %cst_28 = arith.constant dense<0.000000e+00> : vector<24x240xf32>
    %30 = tpu.matmul %29, %7, %cst_28 {dimension_numbers = #tpu.dot_dimension_numbers<[1], [0], [0], [1], [0, 0, 1, 1], [], []>} : vector<24x28xbf16>, vector<28x240xbf16>, vector<24x240xf32> -> vector<24x240xf32>
    %31 = arith.addf %28, %30 : vector<24x240xf32>
    %32 = vector.extract_strided_slice %20 {offsets = [4, 0], sizes = [24, 28], strides = [1, 1]} : vector<28x28xbf16> to vector<24x28xbf16>
    %cst_29 = arith.constant dense<0.000000e+00> : vector<24x240xf32>
    %33 = tpu.matmul %32, %9, %cst_29 {dimension_numbers = #tpu.dot_dimension_numbers<[1], [0], [0], [1], [0, 0, 1, 1], [], []>} : vector<24x28xbf16>, vector<28x240xbf16>, vector<24x240xf32> -> vector<24x240xf32>
    %34 = arith.addf %31, %33 : vector<24x240xf32>
    %35 = vector.broadcast %16 : vector<1x240xf32> to vector<24x240xf32>
    %36 = arith.addf %34, %35 : vector<24x240xf32>
    %cst_30 = arith.constant 0.000000e+00 : f32
    %37 = vector.broadcast %cst_30 : f32 to vector<24x240xf32>
    %38 = arith.maximumf %36, %37 : vector<24x240xf32>
    %39 = vector.extract_strided_slice %38 {offsets = [0, 0], sizes = [23, 240], strides = [1, 1]} : vector<24x240xf32> to vector<23x240xf32>
    %40 = vector.extract_strided_slice %38 {offsets = [1, 0], sizes = [23, 240], strides = [1, 1]} : vector<24x240xf32> to vector<23x240xf32>
    %41 = arith.maximumf %39, %40 : vector<23x240xf32>
    %42 = vector.extract_strided_slice %41 {offsets = [0, 0], sizes = [23, 230], strides = [1, 1]} : vector<23x240xf32> to vector<23x230xf32>
    %43 = vector.extract_strided_slice %41 {offsets = [0, 10], sizes = [23, 230], strides = [1, 1]} : vector<23x240xf32> to vector<23x230xf32>
    %44 = arith.maximumf %42, %43 : vector<23x230xf32>
    %45 = arith.truncf %44 : vector<23x230xf32> to vector<23x230xbf16>
    %46 = vector.extract_strided_slice %45 {offsets = [0, 0], sizes = [19, 230], strides = [1, 1]} : vector<23x230xbf16> to vector<19x230xbf16>
    %cst_31 = arith.constant dense<0.000000e+00> : vector<19x256xf32>
    %47 = tpu.matmul %46, %11, %cst_31 {dimension_numbers = #tpu.dot_dimension_numbers<[1], [0], [0], [1], [0, 0, 1, 1], [], []>} : vector<19x230xbf16>, vector<230x256xbf16>, vector<19x256xf32> -> vector<19x256xf32>
    %48 = vector.extract_strided_slice %45 {offsets = [2, 0], sizes = [19, 230], strides = [1, 1]} : vector<23x230xbf16> to vector<19x230xbf16>
    %cst_32 = arith.constant dense<0.000000e+00> : vector<19x256xf32>
    %49 = tpu.matmul %48, %13, %cst_32 {dimension_numbers = #tpu.dot_dimension_numbers<[1], [0], [0], [1], [0, 0, 1, 1], [], []>} : vector<19x230xbf16>, vector<230x256xbf16>, vector<19x256xf32> -> vector<19x256xf32>
    %50 = arith.addf %47, %49 : vector<19x256xf32>
    %51 = vector.extract_strided_slice %45 {offsets = [4, 0], sizes = [19, 230], strides = [1, 1]} : vector<23x230xbf16> to vector<19x230xbf16>
    %cst_33 = arith.constant dense<0.000000e+00> : vector<19x256xf32>
    %52 = tpu.matmul %51, %15, %cst_33 {dimension_numbers = #tpu.dot_dimension_numbers<[1], [0], [0], [1], [0, 0, 1, 1], [], []>} : vector<19x230xbf16>, vector<230x256xbf16>, vector<19x256xf32> -> vector<19x256xf32>
    %53 = arith.addf %50, %52 : vector<19x256xf32>
    %54 = vector.broadcast %17 : vector<1x256xf32> to vector<19x256xf32>
    %55 = arith.addf %53, %54 : vector<19x256xf32>
    %cst_34 = arith.constant 0.000000e+00 : f32
    %56 = vector.broadcast %cst_34 : f32 to vector<19x256xf32>
    %57 = arith.maximumf %55, %56 : vector<19x256xf32>
    %58 = vector.extract_strided_slice %57 {offsets = [0, 0], sizes = [1, 256], strides = [1, 1]} : vector<19x256xf32> to vector<1x256xf32>
    %59 = vector.extract_strided_slice %57 {offsets = [2, 0], sizes = [1, 256], strides = [1, 1]} : vector<19x256xf32> to vector<1x256xf32>
    %60 = vector.extract_strided_slice %57 {offsets = [4, 0], sizes = [1, 256], strides = [1, 1]} : vector<19x256xf32> to vector<1x256xf32>
    %61 = vector.extract_strided_slice %57 {offsets = [6, 0], sizes = [1, 256], strides = [1, 1]} : vector<19x256xf32> to vector<1x256xf32>
    %62 = vector.extract_strided_slice %57 {offsets = [8, 0], sizes = [1, 256], strides = [1, 1]} : vector<19x256xf32> to vector<1x256xf32>
    %63 = vector.extract_strided_slice %57 {offsets = [10, 0], sizes = [1, 256], strides = [1, 1]} : vector<19x256xf32> to vector<1x256xf32>
    %64 = vector.extract_strided_slice %57 {offsets = [12, 0], sizes = [1, 256], strides = [1, 1]} : vector<19x256xf32> to vector<1x256xf32>
    %65 = vector.extract_strided_slice %57 {offsets = [14, 0], sizes = [1, 256], strides = [1, 1]} : vector<19x256xf32> to vector<1x256xf32>
    %66 = vector.extract_strided_slice %57 {offsets = [16, 0], sizes = [1, 256], strides = [1, 1]} : vector<19x256xf32> to vector<1x256xf32>
    %67 = vector.extract_strided_slice %57 {offsets = [18, 0], sizes = [1, 256], strides = [1, 1]} : vector<19x256xf32> to vector<1x256xf32>
    %68 = tpu.concatenate %58, %59, %60, %61, %62, %63, %64, %65, %66, %67 in 1 : vector<1x256xf32>, vector<1x256xf32>, vector<1x256xf32>, vector<1x256xf32>, vector<1x256xf32>, vector<1x256xf32>, vector<1x256xf32>, vector<1x256xf32>, vector<1x256xf32>, vector<1x256xf32> -> vector<1x2560xf32>
    %c0_35 = arith.constant 0 : index
    %c0_36 = arith.constant 0 : index
    %69 = vector.load %arg11[%c0_35, %c0_36] : memref<8x2560xf32, #tpu.memory_space<vmem>>, vector<1x2560xf32>
    tpu.vector_store %arg11[%c0_35, %c0_36], %68 {strides = array<i32>} : memref<8x2560xf32, #tpu.memory_space<vmem>>, vector<1x2560xf32>,
    %c1_37 = arith.constant 1 : index
    %c0_38 = arith.constant 0 : index
    %c0_39 = arith.constant 0 : index
    %70 = vector.load %arg1[%c1_37, %c0_38, %c0_39] : memref<8x28x28xf32, #tpu.memory_space<vmem>>, vector<1x28x28xf32>
    %71 = vector.shape_cast %70 : vector<1x28x28xf32> to vector<28x28xf32>
    %72 = arith.truncf %71 : vector<28x28xf32> to vector<28x28xbf16>
    %73 = vector.extract_strided_slice %72 {offsets = [0, 0], sizes = [24, 28], strides = [1, 1]} : vector<28x28xbf16> to vector<24x28xbf16>
    %cst_40 = arith.constant dense<0.000000e+00> : vector<24x240xf32>
    %74 = tpu.matmul %73, %1, %cst_40 {dimension_numbers = #tpu.dot_dimension_numbers<[1], [0], [0], [1], [0, 0, 1, 1], [], []>} : vector<24x28xbf16>, vector<28x240xbf16>, vector<24x240xf32> -> vector<24x240xf32>
    %75 = vector.extract_strided_slice %72 {offsets = [1, 0], sizes = [24, 28], strides = [1, 1]} : vector<28x28xbf16> to vector<24x28xbf16>
    %cst_41 = arith.constant dense<0.000000e+00> : vector<24x240xf32>
    %76 = tpu.matmul %75, %3, %cst_41 {dimension_numbers = #tpu.dot_dimension_numbers<[1], [0], [0], [1], [0, 0, 1, 1], [], []>} : vector<24x28xbf16>, vector<28x240xbf16>, vector<24x240xf32> -> vector<24x240xf32>
    %77 = arith.addf %74, %76 : vector<24x240xf32>
    %78 = vector.extract_strided_slice %72 {offsets = [2, 0], sizes = [24, 28], strides = [1, 1]} : vector<28x28xbf16> to vector<24x28xbf16>
    %cst_42 = arith.constant dense<0.000000e+00> : vector<24x240xf32>
    %79 = tpu.matmul %78, %5, %cst_42 {dimension_numbers = #tpu.dot_dimension_numbers<[1], [0], [0], [1], [0, 0, 1, 1], [], []>} : vector<24x28xbf16>, vector<28x240xbf16>, vector<24x240xf32> -> vector<24x240xf32>
    %80 = arith.addf %77, %79 : vector<24x240xf32>
    %81 = vector.extract_strided_slice %72 {offsets = [3, 0], sizes = [24, 28], strides = [1, 1]} : vector<28x28xbf16> to vector<24x28xbf16>
    %cst_43 = arith.constant dense<0.000000e+00> : vector<24x240xf32>
    %82 = tpu.matmul %81, %7, %cst_43 {dimension_numbers = #tpu.dot_dimension_numbers<[1], [0], [0], [1], [0, 0, 1, 1], [], []>} : vector<24x28xbf16>, vector<28x240xbf16>, vector<24x240xf32> -> vector<24x240xf32>
    %83 = arith.addf %80, %82 : vector<24x240xf32>
    %84 = vector.extract_strided_slice %72 {offsets = [4, 0], sizes = [24, 28], strides = [1, 1]} : vector<28x28xbf16> to vector<24x28xbf16>
    %cst_44 = arith.constant dense<0.000000e+00> : vector<24x240xf32>
    %85 = tpu.matmul %84, %9, %cst_44 {dimension_numbers = #tpu.dot_dimension_numbers<[1], [0], [0], [1], [0, 0, 1, 1], [], []>} : vector<24x28xbf16>, vector<28x240xbf16>, vector<24x240xf32> -> vector<24x240xf32>
    %86 = arith.addf %83, %85 : vector<24x240xf32>
    %87 = vector.broadcast %16 : vector<1x240xf32> to vector<24x240xf32>
    %88 = arith.addf %86, %87 : vector<24x240xf32>
    %cst_45 = arith.constant 0.000000e+00 : f32
    %89 = vector.broadcast %cst_45 : f32 to vector<24x240xf32>
    %90 = arith.maximumf %88, %89 : vector<24x240xf32>
    %91 = vector.extract_strided_slice %90 {offsets = [0, 0], sizes = [23, 240], strides = [1, 1]} : vector<24x240xf32> to vector<23x240xf32>
    %92 = vector.extract_strided_slice %90 {offsets = [1, 0], sizes = [23, 240], strides = [1, 1]} : vector<24x240xf32> to vector<23x240xf32>
    %93 = arith.maximumf %91, %92 : vector<23x240xf32>
    %94 = vector.extract_strided_slice %93 {offsets = [0, 0], sizes = [23, 230], strides = [1, 1]} : vector<23x240xf32> to vector<23x230xf32>
    %95 = vector.extract_strided_slice %93 {offsets = [0, 10], sizes = [23, 230], strides = [1, 1]} : vector<23x240xf32> to vector<23x230xf32>
    %96 = arith.maximumf %94, %95 : vector<23x230xf32>
    %97 = arith.truncf %96 : vector<23x230xf32> to vector<23x230xbf16>
    %98 = vector.extract_strided_slice %97 {offsets = [0, 0], sizes = [19, 230], strides = [1, 1]} : vector<23x230xbf16> to vector<19x230xbf16>
    %cst_46 = arith.constant dense<0.000000e+00> : vector<19x256xf32>
    %99 = tpu.matmul %98, %11, %cst_46 {dimension_numbers = #tpu.dot_dimension_numbers<[1], [0], [0], [1], [0, 0, 1, 1], [], []>} : vector<19x230xbf16>, vector<230x256xbf16>, vector<19x256xf32> -> vector<19x256xf32>
    %100 = vector.extract_strided_slice %97 {offsets = [2, 0], sizes = [19, 230], strides = [1, 1]} : vector<23x230xbf16> to vector<19x230xbf16>
    %cst_47 = arith.constant dense<0.000000e+00> : vector<19x256xf32>
    %101 = tpu.matmul %100, %13, %cst_47 {dimension_numbers = #tpu.dot_dimension_numbers<[1], [0], [0], [1], [0, 0, 1, 1], [], []>} : vector<19x230xbf16>, vector<230x256xbf16>, vector<19x256xf32> -> vector<19x256xf32>
    %102 = arith.addf %99, %101 : vector<19x256xf32>
    %103 = vector.extract_strided_slice %97 {offsets = [4, 0], sizes = [19, 230], strides = [1, 1]} : vector<23x230xbf16> to vector<19x230xbf16>
    %cst_48 = arith.constant dense<0.000000e+00> : vector<19x256xf32>
    %104 = tpu.matmul %103, %15, %cst_48 {dimension_numbers = #tpu.dot_dimension_numbers<[1], [0], [0], [1], [0, 0, 1, 1], [], []>} : vector<19x230xbf16>, vector<230x256xbf16>, vector<19x256xf32> -> vector<19x256xf32>
    %105 = arith.addf %102, %104 : vector<19x256xf32>
    %106 = vector.broadcast %17 : vector<1x256xf32> to vector<19x256xf32>
    %107 = arith.addf %105, %106 : vector<19x256xf32>
    %cst_49 = arith.constant 0.000000e+00 : f32
    %108 = vector.broadcast %cst_49 : f32 to vector<19x256xf32>
    %109 = arith.maximumf %107, %108 : vector<19x256xf32>
    %110 = vector.extract_strided_slice %109 {offsets = [0, 0], sizes = [1, 256], strides = [1, 1]} : vector<19x256xf32> to vector<1x256xf32>
    %111 = vector.extract_strided_slice %109 {offsets = [2, 0], sizes = [1, 256], strides = [1, 1]} : vector<19x256xf32> to vector<1x256xf32>
    %112 = vector.extract_strided_slice %109 {offsets = [4, 0], sizes = [1, 256], strides = [1, 1]} : vector<19x256xf32> to vector<1x256xf32>
    %113 = vector.extract_strided_slice %109 {offsets = [6, 0], sizes = [1, 256], strides = [1, 1]} : vector<19x256xf32> to vector<1x256xf32>
    %114 = vector.extract_strided_slice %109 {offsets = [8, 0], sizes = [1, 256], strides = [1, 1]} : vector<19x256xf32> to vector<1x256xf32>
    %115 = vector.extract_strided_slice %109 {offsets = [10, 0], sizes = [1, 256], strides = [1, 1]} : vector<19x256xf32> to vector<1x256xf32>
    %116 = vector.extract_strided_slice %109 {offsets = [12, 0], sizes = [1, 256], strides = [1, 1]} : vector<19x256xf32> to vector<1x256xf32>
    %117 = vector.extract_strided_slice %109 {offsets = [14, 0], sizes = [1, 256], strides = [1, 1]} : vector<19x256xf32> to vector<1x256xf32>
    %118 = vector.extract_strided_slice %109 {offsets = [16, 0], sizes = [1, 256], strides = [1, 1]} : vector<19x256xf32> to vector<1x256xf32>
    %119 = vector.extract_strided_slice %109 {offsets = [18, 0], sizes = [1, 256], strides = [1, 1]} : vector<19x256xf32> to vector<1x256xf32>
    %120 = tpu.concatenate %110, %111, %112, %113, %114, %115, %116, %117, %118, %119 in 1 : vector<1x256xf32>, vector<1x256xf32>, vector<1x256xf32>, vector<1x256xf32>, vector<1x256xf32>, vector<1x256xf32>, vector<1x256xf32>, vector<1x256xf32>, vector<1x256xf32>, vector<1x256xf32> -> vector<1x2560xf32>
    %c1_50 = arith.constant 1 : index
    %c0_51 = arith.constant 0 : index
    %121 = vector.load %arg11[%c1_50, %c0_51] : memref<8x2560xf32, #tpu.memory_space<vmem>>, vector<1x2560xf32>
    tpu.vector_store %arg11[%c1_50, %c0_51], %120 {strides = array<i32>} : memref<8x2560xf32, #tpu.memory_space<vmem>>, vector<1x2560xf32>,
    %c2_52 = arith.constant 2 : index
    %c0_53 = arith.constant 0 : index
    %c0_54 = arith.constant 0 : index
    %122 = vector.load %arg1[%c2_52, %c0_53, %c0_54] : memref<8x28x28xf32, #tpu.memory_space<vmem>>, vector<1x28x28xf32>
    %123 = vector.shape_cast %122 : vector<1x28x28xf32> to vector<28x28xf32>
    %124 = arith.truncf %123 : vector<28x28xf32> to vector<28x28xbf16>
    %125 = vector.extract_strided_slice %124 {offsets = [0, 0], sizes = [24, 28], strides = [1, 1]} : vector<28x28xbf16> to vector<24x28xbf16>
    %cst_55 = arith.constant dense<0.000000e+00> : vector<24x240xf32>
    %126 = tpu.matmul %125, %1, %cst_55 {dimension_numbers = #tpu.dot_dimension_numbers<[1], [0], [0], [1], [0, 0, 1, 1], [], []>} : vector<24x28xbf16>, vector<28x240xbf16>, vector<24x240xf32> -> vector<24x240xf32>
    %127 = vector.extract_strided_slice %124 {offsets = [1, 0], sizes = [24, 28], strides = [1, 1]} : vector<28x28xbf16> to vector<24x28xbf16>
    %cst_56 = arith.constant dense<0.000000e+00> : vector<24x240xf32>
    %128 = tpu.matmul %127, %3, %cst_56 {dimension_numbers = #tpu.dot_dimension_numbers<[1], [0], [0], [1], [0, 0, 1, 1], [], []>} : vector<24x28xbf16>, vector<28x240xbf16>, vector<24x240xf32> -> vector<24x240xf32>
    %129 = arith.addf %126, %128 : vector<24x240xf32>
    %130 = vector.extract_strided_slice %124 {offsets = [2, 0], sizes = [24, 28], strides = [1, 1]} : vector<28x28xbf16> to vector<24x28xbf16>
    %cst_57 = arith.constant dense<0.000000e+00> : vector<24x240xf32>
    %131 = tpu.matmul %130, %5, %cst_57 {dimension_numbers = #tpu.dot_dimension_numbers<[1], [0], [0], [1], [0, 0, 1, 1], [], []>} : vector<24x28xbf16>, vector<28x240xbf16>, vector<24x240xf32> -> vector<24x240xf32>
    %132 = arith.addf %129, %131 : vector<24x240xf32>
    %133 = vector.extract_strided_slice %124 {offsets = [3, 0], sizes = [24, 28], strides = [1, 1]} : vector<28x28xbf16> to vector<24x28xbf16>
    %cst_58 = arith.constant dense<0.000000e+00> : vector<24x240xf32>
    %134 = tpu.matmul %133, %7, %cst_58 {dimension_numbers = #tpu.dot_dimension_numbers<[1], [0], [0], [1], [0, 0, 1, 1], [], []>} : vector<24x28xbf16>, vector<28x240xbf16>, vector<24x240xf32> -> vector<24x240xf32>
    %135 = arith.addf %132, %134 : vector<24x240xf32>
    %136 = vector.extract_strided_slice %124 {offsets = [4, 0], sizes = [24, 28], strides = [1, 1]} : vector<28x28xbf16> to vector<24x28xbf16>
    %cst_59 = arith.constant dense<0.000000e+00> : vector<24x240xf32>
    %137 = tpu.matmul %136, %9, %cst_59 {dimension_numbers = #tpu.dot_dimension_numbers<[1], [0], [0], [1], [0, 0, 1, 1], [], []>} : vector<24x28xbf16>, vector<28x240xbf16>, vector<24x240xf32> -> vector<24x240xf32>
    %138 = arith.addf %135, %137 : vector<24x240xf32>
    %139 = vector.broadcast %16 : vector<1x240xf32> to vector<24x240xf32>
    %140 = arith.addf %138, %139 : vector<24x240xf32>
    %cst_60 = arith.constant 0.000000e+00 : f32
    %141 = vector.broadcast %cst_60 : f32 to vector<24x240xf32>
    %142 = arith.maximumf %140, %141 : vector<24x240xf32>
    %143 = vector.extract_strided_slice %142 {offsets = [0, 0], sizes = [23, 240], strides = [1, 1]} : vector<24x240xf32> to vector<23x240xf32>
    %144 = vector.extract_strided_slice %142 {offsets = [1, 0], sizes = [23, 240], strides = [1, 1]} : vector<24x240xf32> to vector<23x240xf32>
    %145 = arith.maximumf %143, %144 : vector<23x240xf32>
    %146 = vector.extract_strided_slice %145 {offsets = [0, 0], sizes = [23, 230], strides = [1, 1]} : vector<23x240xf32> to vector<23x230xf32>
    %147 = vector.extract_strided_slice %145 {offsets = [0, 10], sizes = [23, 230], strides = [1, 1]} : vector<23x240xf32> to vector<23x230xf32>
    %148 = arith.maximumf %146, %147 : vector<23x230xf32>
    %149 = arith.truncf %148 : vector<23x230xf32> to vector<23x230xbf16>
    %150 = vector.extract_strided_slice %149 {offsets = [0, 0], sizes = [19, 230], strides = [1, 1]} : vector<23x230xbf16> to vector<19x230xbf16>
    %cst_61 = arith.constant dense<0.000000e+00> : vector<19x256xf32>
    %151 = tpu.matmul %150, %11, %cst_61 {dimension_numbers = #tpu.dot_dimension_numbers<[1], [0], [0], [1], [0, 0, 1, 1], [], []>} : vector<19x230xbf16>, vector<230x256xbf16>, vector<19x256xf32> -> vector<19x256xf32>
    %152 = vector.extract_strided_slice %149 {offsets = [2, 0], sizes = [19, 230], strides = [1, 1]} : vector<23x230xbf16> to vector<19x230xbf16>
    %cst_62 = arith.constant dense<0.000000e+00> : vector<19x256xf32>
    %153 = tpu.matmul %152, %13, %cst_62 {dimension_numbers = #tpu.dot_dimension_numbers<[1], [0], [0], [1], [0, 0, 1, 1], [], []>} : vector<19x230xbf16>, vector<230x256xbf16>, vector<19x256xf32> -> vector<19x256xf32>
    %154 = arith.addf %151, %153 : vector<19x256xf32>
    %155 = vector.extract_strided_slice %149 {offsets = [4, 0], sizes = [19, 230], strides = [1, 1]} : vector<23x230xbf16> to vector<19x230xbf16>
    %cst_63 = arith.constant dense<0.000000e+00> : vector<19x256xf32>
    %156 = tpu.matmul %155, %15, %cst_63 {dimension_numbers = #tpu.dot_dimension_numbers<[1], [0], [0], [1], [0, 0, 1, 1], [], []>} : vector<19x230xbf16>, vector<230x256xbf16>, vector<19x256xf32> -> vector<19x256xf32>
    %157 = arith.addf %154, %156 : vector<19x256xf32>
    %158 = vector.broadcast %17 : vector<1x256xf32> to vector<19x256xf32>
    %159 = arith.addf %157, %158 : vector<19x256xf32>
    %cst_64 = arith.constant 0.000000e+00 : f32
    %160 = vector.broadcast %cst_64 : f32 to vector<19x256xf32>
    %161 = arith.maximumf %159, %160 : vector<19x256xf32>
    %162 = vector.extract_strided_slice %161 {offsets = [0, 0], sizes = [1, 256], strides = [1, 1]} : vector<19x256xf32> to vector<1x256xf32>
    %163 = vector.extract_strided_slice %161 {offsets = [2, 0], sizes = [1, 256], strides = [1, 1]} : vector<19x256xf32> to vector<1x256xf32>
    %164 = vector.extract_strided_slice %161 {offsets = [4, 0], sizes = [1, 256], strides = [1, 1]} : vector<19x256xf32> to vector<1x256xf32>
    %165 = vector.extract_strided_slice %161 {offsets = [6, 0], sizes = [1, 256], strides = [1, 1]} : vector<19x256xf32> to vector<1x256xf32>
    %166 = vector.extract_strided_slice %161 {offsets = [8, 0], sizes = [1, 256], strides = [1, 1]} : vector<19x256xf32> to vector<1x256xf32>
    %167 = vector.extract_strided_slice %161 {offsets = [10, 0], sizes = [1, 256], strides = [1, 1]} : vector<19x256xf32> to vector<1x256xf32>
    %168 = vector.extract_strided_slice %161 {offsets = [12, 0], sizes = [1, 256], strides = [1, 1]} : vector<19x256xf32> to vector<1x256xf32>
    %169 = vector.extract_strided_slice %161 {offsets = [14, 0], sizes = [1, 256], strides = [1, 1]} : vector<19x256xf32> to vector<1x256xf32>
    %170 = vector.extract_strided_slice %161 {offsets = [16, 0], sizes = [1, 256], strides = [1, 1]} : vector<19x256xf32> to vector<1x256xf32>
    %171 = vector.extract_strided_slice %161 {offsets = [18, 0], sizes = [1, 256], strides = [1, 1]} : vector<19x256xf32> to vector<1x256xf32>
    %172 = tpu.concatenate %162, %163, %164, %165, %166, %167, %168, %169, %170, %171 in 1 : vector<1x256xf32>, vector<1x256xf32>, vector<1x256xf32>, vector<1x256xf32>, vector<1x256xf32>, vector<1x256xf32>, vector<1x256xf32>, vector<1x256xf32>, vector<1x256xf32>, vector<1x256xf32> -> vector<1x2560xf32>
    %c2_65 = arith.constant 2 : index
    %c0_66 = arith.constant 0 : index
    %173 = vector.load %arg11[%c2_65, %c0_66] : memref<8x2560xf32, #tpu.memory_space<vmem>>, vector<1x2560xf32>
    tpu.vector_store %arg11[%c2_65, %c0_66], %172 {strides = array<i32>} : memref<8x2560xf32, #tpu.memory_space<vmem>>, vector<1x2560xf32>,
    %c3_67 = arith.constant 3 : index
    %c0_68 = arith.constant 0 : index
    %c0_69 = arith.constant 0 : index
    %174 = vector.load %arg1[%c3_67, %c0_68, %c0_69] : memref<8x28x28xf32, #tpu.memory_space<vmem>>, vector<1x28x28xf32>
    %175 = vector.shape_cast %174 : vector<1x28x28xf32> to vector<28x28xf32>
    %176 = arith.truncf %175 : vector<28x28xf32> to vector<28x28xbf16>
    %177 = vector.extract_strided_slice %176 {offsets = [0, 0], sizes = [24, 28], strides = [1, 1]} : vector<28x28xbf16> to vector<24x28xbf16>
    %cst_70 = arith.constant dense<0.000000e+00> : vector<24x240xf32>
    %178 = tpu.matmul %177, %1, %cst_70 {dimension_numbers = #tpu.dot_dimension_numbers<[1], [0], [0], [1], [0, 0, 1, 1], [], []>} : vector<24x28xbf16>, vector<28x240xbf16>, vector<24x240xf32> -> vector<24x240xf32>
    %179 = vector.extract_strided_slice %176 {offsets = [1, 0], sizes = [24, 28], strides = [1, 1]} : vector<28x28xbf16> to vector<24x28xbf16>
    %cst_71 = arith.constant dense<0.000000e+00> : vector<24x240xf32>
    %180 = tpu.matmul %179, %3, %cst_71 {dimension_numbers = #tpu.dot_dimension_numbers<[1], [0], [0], [1], [0, 0, 1, 1], [], []>} : vector<24x28xbf16>, vector<28x240xbf16>, vector<24x240xf32> -> vector<24x240xf32>
    %181 = arith.addf %178, %180 : vector<24x240xf32>
    %182 = vector.extract_strided_slice %176 {offsets = [2, 0], sizes = [24, 28], strides = [1, 1]} : vector<28x28xbf16> to vector<24x28xbf16>
    %cst_72 = arith.constant dense<0.000000e+00> : vector<24x240xf32>
    %183 = tpu.matmul %182, %5, %cst_72 {dimension_numbers = #tpu.dot_dimension_numbers<[1], [0], [0], [1], [0, 0, 1, 1], [], []>} : vector<24x28xbf16>, vector<28x240xbf16>, vector<24x240xf32> -> vector<24x240xf32>
    %184 = arith.addf %181, %183 : vector<24x240xf32>
    %185 = vector.extract_strided_slice %176 {offsets = [3, 0], sizes = [24, 28], strides = [1, 1]} : vector<28x28xbf16> to vector<24x28xbf16>
    %cst_73 = arith.constant dense<0.000000e+00> : vector<24x240xf32>
    %186 = tpu.matmul %185, %7, %cst_73 {dimension_numbers = #tpu.dot_dimension_numbers<[1], [0], [0], [1], [0, 0, 1, 1], [], []>} : vector<24x28xbf16>, vector<28x240xbf16>, vector<24x240xf32> -> vector<24x240xf32>
    %187 = arith.addf %184, %186 : vector<24x240xf32>
    %188 = vector.extract_strided_slice %176 {offsets = [4, 0], sizes = [24, 28], strides = [1, 1]} : vector<28x28xbf16> to vector<24x28xbf16>
    %cst_74 = arith.constant dense<0.000000e+00> : vector<24x240xf32>
    %189 = tpu.matmul %188, %9, %cst_74 {dimension_numbers = #tpu.dot_dimension_numbers<[1], [0], [0], [1], [0, 0, 1, 1], [], []>} : vector<24x28xbf16>, vector<28x240xbf16>, vector<24x240xf32> -> vector<24x240xf32>
    %190 = arith.addf %187, %189 : vector<24x240xf32>
    %191 = vector.broadcast %16 : vector<1x240xf32> to vector<24x240xf32>
    %192 = arith.addf %190, %191 : vector<24x240xf32>
    %cst_75 = arith.constant 0.000000e+00 : f32
    %193 = vector.broadcast %cst_75 : f32 to vector<24x240xf32>
    %194 = arith.maximumf %192, %193 : vector<24x240xf32>
    %195 = vector.extract_strided_slice %194 {offsets = [0, 0], sizes = [23, 240], strides = [1, 1]} : vector<24x240xf32> to vector<23x240xf32>
    %196 = vector.extract_strided_slice %194 {offsets = [1, 0], sizes = [23, 240], strides = [1, 1]} : vector<24x240xf32> to vector<23x240xf32>
    %197 = arith.maximumf %195, %196 : vector<23x240xf32>
    %198 = vector.extract_strided_slice %197 {offsets = [0, 0], sizes = [23, 230], strides = [1, 1]} : vector<23x240xf32> to vector<23x230xf32>
    %199 = vector.extract_strided_slice %197 {offsets = [0, 10], sizes = [23, 230], strides = [1, 1]} : vector<23x240xf32> to vector<23x230xf32>
    %200 = arith.maximumf %198, %199 : vector<23x230xf32>
    %201 = arith.truncf %200 : vector<23x230xf32> to vector<23x230xbf16>
    %202 = vector.extract_strided_slice %201 {offsets = [0, 0], sizes = [19, 230], strides = [1, 1]} : vector<23x230xbf16> to vector<19x230xbf16>
    %cst_76 = arith.constant dense<0.000000e+00> : vector<19x256xf32>
    %203 = tpu.matmul %202, %11, %cst_76 {dimension_numbers = #tpu.dot_dimension_numbers<[1], [0], [0], [1], [0, 0, 1, 1], [], []>} : vector<19x230xbf16>, vector<230x256xbf16>, vector<19x256xf32> -> vector<19x256xf32>
    %204 = vector.extract_strided_slice %201 {offsets = [2, 0], sizes = [19, 230], strides = [1, 1]} : vector<23x230xbf16> to vector<19x230xbf16>
    %cst_77 = arith.constant dense<0.000000e+00> : vector<19x256xf32>
    %205 = tpu.matmul %204, %13, %cst_77 {dimension_numbers = #tpu.dot_dimension_numbers<[1], [0], [0], [1], [0, 0, 1, 1], [], []>} : vector<19x230xbf16>, vector<230x256xbf16>, vector<19x256xf32> -> vector<19x256xf32>
    %206 = arith.addf %203, %205 : vector<19x256xf32>
    %207 = vector.extract_strided_slice %201 {offsets = [4, 0], sizes = [19, 230], strides = [1, 1]} : vector<23x230xbf16> to vector<19x230xbf16>
    %cst_78 = arith.constant dense<0.000000e+00> : vector<19x256xf32>
    %208 = tpu.matmul %207, %15, %cst_78 {dimension_numbers = #tpu.dot_dimension_numbers<[1], [0], [0], [1], [0, 0, 1, 1], [], []>} : vector<19x230xbf16>, vector<230x256xbf16>, vector<19x256xf32> -> vector<19x256xf32>
    %209 = arith.addf %206, %208 : vector<19x256xf32>
    %210 = vector.broadcast %17 : vector<1x256xf32> to vector<19x256xf32>
    %211 = arith.addf %209, %210 : vector<19x256xf32>
    %cst_79 = arith.constant 0.000000e+00 : f32
    %212 = vector.broadcast %cst_79 : f32 to vector<19x256xf32>
    %213 = arith.maximumf %211, %212 : vector<19x256xf32>
    %214 = vector.extract_strided_slice %213 {offsets = [0, 0], sizes = [1, 256], strides = [1, 1]} : vector<19x256xf32> to vector<1x256xf32>
    %215 = vector.extract_strided_slice %213 {offsets = [2, 0], sizes = [1, 256], strides = [1, 1]} : vector<19x256xf32> to vector<1x256xf32>
    %216 = vector.extract_strided_slice %213 {offsets = [4, 0], sizes = [1, 256], strides = [1, 1]} : vector<19x256xf32> to vector<1x256xf32>
    %217 = vector.extract_strided_slice %213 {offsets = [6, 0], sizes = [1, 256], strides = [1, 1]} : vector<19x256xf32> to vector<1x256xf32>
    %218 = vector.extract_strided_slice %213 {offsets = [8, 0], sizes = [1, 256], strides = [1, 1]} : vector<19x256xf32> to vector<1x256xf32>
    %219 = vector.extract_strided_slice %213 {offsets = [10, 0], sizes = [1, 256], strides = [1, 1]} : vector<19x256xf32> to vector<1x256xf32>
    %220 = vector.extract_strided_slice %213 {offsets = [12, 0], sizes = [1, 256], strides = [1, 1]} : vector<19x256xf32> to vector<1x256xf32>
    %221 = vector.extract_strided_slice %213 {offsets = [14, 0], sizes = [1, 256], strides = [1, 1]} : vector<19x256xf32> to vector<1x256xf32>
    %222 = vector.extract_strided_slice %213 {offsets = [16, 0], sizes = [1, 256], strides = [1, 1]} : vector<19x256xf32> to vector<1x256xf32>
    %223 = vector.extract_strided_slice %213 {offsets = [18, 0], sizes = [1, 256], strides = [1, 1]} : vector<19x256xf32> to vector<1x256xf32>
    %224 = tpu.concatenate %214, %215, %216, %217, %218, %219, %220, %221, %222, %223 in 1 : vector<1x256xf32>, vector<1x256xf32>, vector<1x256xf32>, vector<1x256xf32>, vector<1x256xf32>, vector<1x256xf32>, vector<1x256xf32>, vector<1x256xf32>, vector<1x256xf32>, vector<1x256xf32> -> vector<1x2560xf32>
    %c3_80 = arith.constant 3 : index
    %c0_81 = arith.constant 0 : index
    %225 = vector.load %arg11[%c3_80, %c0_81] : memref<8x2560xf32, #tpu.memory_space<vmem>>, vector<1x2560xf32>
    tpu.vector_store %arg11[%c3_80, %c0_81], %224 {strides = array<i32>} : memref<8x2560xf32, #tpu.memory_space<vmem>>, vector<1x2560xf32>,
    %c4_82 = arith.constant 4 : index
    %c0_83 = arith.constant 0 : index
    %c0_84 = arith.constant 0 : index
    %226 = vector.load %arg1[%c4_82, %c0_83, %c0_84] : memref<8x28x28xf32, #tpu.memory_space<vmem>>, vector<1x28x28xf32>
    %227 = vector.shape_cast %226 : vector<1x28x28xf32> to vector<28x28xf32>
    %228 = arith.truncf %227 : vector<28x28xf32> to vector<28x28xbf16>
    %229 = vector.extract_strided_slice %228 {offsets = [0, 0], sizes = [24, 28], strides = [1, 1]} : vector<28x28xbf16> to vector<24x28xbf16>
    %cst_85 = arith.constant dense<0.000000e+00> : vector<24x240xf32>
    %230 = tpu.matmul %229, %1, %cst_85 {dimension_numbers = #tpu.dot_dimension_numbers<[1], [0], [0], [1], [0, 0, 1, 1], [], []>} : vector<24x28xbf16>, vector<28x240xbf16>, vector<24x240xf32> -> vector<24x240xf32>
    %231 = vector.extract_strided_slice %228 {offsets = [1, 0], sizes = [24, 28], strides = [1, 1]} : vector<28x28xbf16> to vector<24x28xbf16>
    %cst_86 = arith.constant dense<0.000000e+00> : vector<24x240xf32>
    %232 = tpu.matmul %231, %3, %cst_86 {dimension_numbers = #tpu.dot_dimension_numbers<[1], [0], [0], [1], [0, 0, 1, 1], [], []>} : vector<24x28xbf16>, vector<28x240xbf16>, vector<24x240xf32> -> vector<24x240xf32>
    %233 = arith.addf %230, %232 : vector<24x240xf32>
    %234 = vector.extract_strided_slice %228 {offsets = [2, 0], sizes = [24, 28], strides = [1, 1]} : vector<28x28xbf16> to vector<24x28xbf16>
    %cst_87 = arith.constant dense<0.000000e+00> : vector<24x240xf32>
    %235 = tpu.matmul %234, %5, %cst_87 {dimension_numbers = #tpu.dot_dimension_numbers<[1], [0], [0], [1], [0, 0, 1, 1], [], []>} : vector<24x28xbf16>, vector<28x240xbf16>, vector<24x240xf32> -> vector<24x240xf32>
    %236 = arith.addf %233, %235 : vector<24x240xf32>
    %237 = vector.extract_strided_slice %228 {offsets = [3, 0], sizes = [24, 28], strides = [1, 1]} : vector<28x28xbf16> to vector<24x28xbf16>
    %cst_88 = arith.constant dense<0.000000e+00> : vector<24x240xf32>
    %238 = tpu.matmul %237, %7, %cst_88 {dimension_numbers = #tpu.dot_dimension_numbers<[1], [0], [0], [1], [0, 0, 1, 1], [], []>} : vector<24x28xbf16>, vector<28x240xbf16>, vector<24x240xf32> -> vector<24x240xf32>
    %239 = arith.addf %236, %238 : vector<24x240xf32>
    %240 = vector.extract_strided_slice %228 {offsets = [4, 0], sizes = [24, 28], strides = [1, 1]} : vector<28x28xbf16> to vector<24x28xbf16>
    %cst_89 = arith.constant dense<0.000000e+00> : vector<24x240xf32>
    %241 = tpu.matmul %240, %9, %cst_89 {dimension_numbers = #tpu.dot_dimension_numbers<[1], [0], [0], [1], [0, 0, 1, 1], [], []>} : vector<24x28xbf16>, vector<28x240xbf16>, vector<24x240xf32> -> vector<24x240xf32>
    %242 = arith.addf %239, %241 : vector<24x240xf32>
    %243 = vector.broadcast %16 : vector<1x240xf32> to vector<24x240xf32>
    %244 = arith.addf %242, %243 : vector<24x240xf32>
    %cst_90 = arith.constant 0.000000e+00 : f32
    %245 = vector.broadcast %cst_90 : f32 to vector<24x240xf32>
    %246 = arith.maximumf %244, %245 : vector<24x240xf32>
    %247 = vector.extract_strided_slice %246 {offsets = [0, 0], sizes = [23, 240], strides = [1, 1]} : vector<24x240xf32> to vector<23x240xf32>
    %248 = vector.extract_strided_slice %246 {offsets = [1, 0], sizes = [23, 240], strides = [1, 1]} : vector<24x240xf32> to vector<23x240xf32>
    %249 = arith.maximumf %247, %248 : vector<23x240xf32>
    %250 = vector.extract_strided_slice %249 {offsets = [0, 0], sizes = [23, 230], strides = [1, 1]} : vector<23x240xf32> to vector<23x230xf32>
    %251 = vector.extract_strided_slice %249 {offsets = [0, 10], sizes = [23, 230], strides = [1, 1]} : vector<23x240xf32> to vector<23x230xf32>
    %252 = arith.maximumf %250, %251 : vector<23x230xf32>
    %253 = arith.truncf %252 : vector<23x230xf32> to vector<23x230xbf16>
    %254 = vector.extract_strided_slice %253 {offsets = [0, 0], sizes = [19, 230], strides = [1, 1]} : vector<23x230xbf16> to vector<19x230xbf16>
    %cst_91 = arith.constant dense<0.000000e+00> : vector<19x256xf32>
    %255 = tpu.matmul %254, %11, %cst_91 {dimension_numbers = #tpu.dot_dimension_numbers<[1], [0], [0], [1], [0, 0, 1, 1], [], []>} : vector<19x230xbf16>, vector<230x256xbf16>, vector<19x256xf32> -> vector<19x256xf32>
    %256 = vector.extract_strided_slice %253 {offsets = [2, 0], sizes = [19, 230], strides = [1, 1]} : vector<23x230xbf16> to vector<19x230xbf16>
    %cst_92 = arith.constant dense<0.000000e+00> : vector<19x256xf32>
    %257 = tpu.matmul %256, %13, %cst_92 {dimension_numbers = #tpu.dot_dimension_numbers<[1], [0], [0], [1], [0, 0, 1, 1], [], []>} : vector<19x230xbf16>, vector<230x256xbf16>, vector<19x256xf32> -> vector<19x256xf32>
    %258 = arith.addf %255, %257 : vector<19x256xf32>
    %259 = vector.extract_strided_slice %253 {offsets = [4, 0], sizes = [19, 230], strides = [1, 1]} : vector<23x230xbf16> to vector<19x230xbf16>
    %cst_93 = arith.constant dense<0.000000e+00> : vector<19x256xf32>
    %260 = tpu.matmul %259, %15, %cst_93 {dimension_numbers = #tpu.dot_dimension_numbers<[1], [0], [0], [1], [0, 0, 1, 1], [], []>} : vector<19x230xbf16>, vector<230x256xbf16>, vector<19x256xf32> -> vector<19x256xf32>
    %261 = arith.addf %258, %260 : vector<19x256xf32>
    %262 = vector.broadcast %17 : vector<1x256xf32> to vector<19x256xf32>
    %263 = arith.addf %261, %262 : vector<19x256xf32>
    %cst_94 = arith.constant 0.000000e+00 : f32
    %264 = vector.broadcast %cst_94 : f32 to vector<19x256xf32>
    %265 = arith.maximumf %263, %264 : vector<19x256xf32>
    %266 = vector.extract_strided_slice %265 {offsets = [0, 0], sizes = [1, 256], strides = [1, 1]} : vector<19x256xf32> to vector<1x256xf32>
    %267 = vector.extract_strided_slice %265 {offsets = [2, 0], sizes = [1, 256], strides = [1, 1]} : vector<19x256xf32> to vector<1x256xf32>
    %268 = vector.extract_strided_slice %265 {offsets = [4, 0], sizes = [1, 256], strides = [1, 1]} : vector<19x256xf32> to vector<1x256xf32>
    %269 = vector.extract_strided_slice %265 {offsets = [6, 0], sizes = [1, 256], strides = [1, 1]} : vector<19x256xf32> to vector<1x256xf32>
    %270 = vector.extract_strided_slice %265 {offsets = [8, 0], sizes = [1, 256], strides = [1, 1]} : vector<19x256xf32> to vector<1x256xf32>
    %271 = vector.extract_strided_slice %265 {offsets = [10, 0], sizes = [1, 256], strides = [1, 1]} : vector<19x256xf32> to vector<1x256xf32>
    %272 = vector.extract_strided_slice %265 {offsets = [12, 0], sizes = [1, 256], strides = [1, 1]} : vector<19x256xf32> to vector<1x256xf32>
    %273 = vector.extract_strided_slice %265 {offsets = [14, 0], sizes = [1, 256], strides = [1, 1]} : vector<19x256xf32> to vector<1x256xf32>
    %274 = vector.extract_strided_slice %265 {offsets = [16, 0], sizes = [1, 256], strides = [1, 1]} : vector<19x256xf32> to vector<1x256xf32>
    %275 = vector.extract_strided_slice %265 {offsets = [18, 0], sizes = [1, 256], strides = [1, 1]} : vector<19x256xf32> to vector<1x256xf32>
    %276 = tpu.concatenate %266, %267, %268, %269, %270, %271, %272, %273, %274, %275 in 1 : vector<1x256xf32>, vector<1x256xf32>, vector<1x256xf32>, vector<1x256xf32>, vector<1x256xf32>, vector<1x256xf32>, vector<1x256xf32>, vector<1x256xf32>, vector<1x256xf32>, vector<1x256xf32> -> vector<1x2560xf32>
    %c4_95 = arith.constant 4 : index
    %c0_96 = arith.constant 0 : index
    %277 = vector.load %arg11[%c4_95, %c0_96] : memref<8x2560xf32, #tpu.memory_space<vmem>>, vector<1x2560xf32>
    tpu.vector_store %arg11[%c4_95, %c0_96], %276 {strides = array<i32>} : memref<8x2560xf32, #tpu.memory_space<vmem>>, vector<1x2560xf32>,
    %c5 = arith.constant 5 : index
    %c0_97 = arith.constant 0 : index
    %c0_98 = arith.constant 0 : index
    %278 = vector.load %arg1[%c5, %c0_97, %c0_98] : memref<8x28x28xf32, #tpu.memory_space<vmem>>, vector<1x28x28xf32>
    %279 = vector.shape_cast %278 : vector<1x28x28xf32> to vector<28x28xf32>
    %280 = arith.truncf %279 : vector<28x28xf32> to vector<28x28xbf16>
    %281 = vector.extract_strided_slice %280 {offsets = [0, 0], sizes = [24, 28], strides = [1, 1]} : vector<28x28xbf16> to vector<24x28xbf16>
    %cst_99 = arith.constant dense<0.000000e+00> : vector<24x240xf32>
    %282 = tpu.matmul %281, %1, %cst_99 {dimension_numbers = #tpu.dot_dimension_numbers<[1], [0], [0], [1], [0, 0, 1, 1], [], []>} : vector<24x28xbf16>, vector<28x240xbf16>, vector<24x240xf32> -> vector<24x240xf32>
    %283 = vector.extract_strided_slice %280 {offsets = [1, 0], sizes = [24, 28], strides = [1, 1]} : vector<28x28xbf16> to vector<24x28xbf16>
    %cst_100 = arith.constant dense<0.000000e+00> : vector<24x240xf32>
    %284 = tpu.matmul %283, %3, %cst_100 {dimension_numbers = #tpu.dot_dimension_numbers<[1], [0], [0], [1], [0, 0, 1, 1], [], []>} : vector<24x28xbf16>, vector<28x240xbf16>, vector<24x240xf32> -> vector<24x240xf32>
    %285 = arith.addf %282, %284 : vector<24x240xf32>
    %286 = vector.extract_strided_slice %280 {offsets = [2, 0], sizes = [24, 28], strides = [1, 1]} : vector<28x28xbf16> to vector<24x28xbf16>
    %cst_101 = arith.constant dense<0.000000e+00> : vector<24x240xf32>
    %287 = tpu.matmul %286, %5, %cst_101 {dimension_numbers = #tpu.dot_dimension_numbers<[1], [0], [0], [1], [0, 0, 1, 1], [], []>} : vector<24x28xbf16>, vector<28x240xbf16>, vector<24x240xf32> -> vector<24x240xf32>
    %288 = arith.addf %285, %287 : vector<24x240xf32>
    %289 = vector.extract_strided_slice %280 {offsets = [3, 0], sizes = [24, 28], strides = [1, 1]} : vector<28x28xbf16> to vector<24x28xbf16>
    %cst_102 = arith.constant dense<0.000000e+00> : vector<24x240xf32>
    %290 = tpu.matmul %289, %7, %cst_102 {dimension_numbers = #tpu.dot_dimension_numbers<[1], [0], [0], [1], [0, 0, 1, 1], [], []>} : vector<24x28xbf16>, vector<28x240xbf16>, vector<24x240xf32> -> vector<24x240xf32>
    %291 = arith.addf %288, %290 : vector<24x240xf32>
    %292 = vector.extract_strided_slice %280 {offsets = [4, 0], sizes = [24, 28], strides = [1, 1]} : vector<28x28xbf16> to vector<24x28xbf16>
    %cst_103 = arith.constant dense<0.000000e+00> : vector<24x240xf32>
    %293 = tpu.matmul %292, %9, %cst_103 {dimension_numbers = #tpu.dot_dimension_numbers<[1], [0], [0], [1], [0, 0, 1, 1], [], []>} : vector<24x28xbf16>, vector<28x240xbf16>, vector<24x240xf32> -> vector<24x240xf32>
    %294 = arith.addf %291, %293 : vector<24x240xf32>
    %295 = vector.broadcast %16 : vector<1x240xf32> to vector<24x240xf32>
    %296 = arith.addf %294, %295 : vector<24x240xf32>
    %cst_104 = arith.constant 0.000000e+00 : f32
    %297 = vector.broadcast %cst_104 : f32 to vector<24x240xf32>
    %298 = arith.maximumf %296, %297 : vector<24x240xf32>
    %299 = vector.extract_strided_slice %298 {offsets = [0, 0], sizes = [23, 240], strides = [1, 1]} : vector<24x240xf32> to vector<23x240xf32>
    %300 = vector.extract_strided_slice %298 {offsets = [1, 0], sizes = [23, 240], strides = [1, 1]} : vector<24x240xf32> to vector<23x240xf32>
    %301 = arith.maximumf %299, %300 : vector<23x240xf32>
    %302 = vector.extract_strided_slice %301 {offsets = [0, 0], sizes = [23, 230], strides = [1, 1]} : vector<23x240xf32> to vector<23x230xf32>
    %303 = vector.extract_strided_slice %301 {offsets = [0, 10], sizes = [23, 230], strides = [1, 1]} : vector<23x240xf32> to vector<23x230xf32>
    %304 = arith.maximumf %302, %303 : vector<23x230xf32>
    %305 = arith.truncf %304 : vector<23x230xf32> to vector<23x230xbf16>
    %306 = vector.extract_strided_slice %305 {offsets = [0, 0], sizes = [19, 230], strides = [1, 1]} : vector<23x230xbf16> to vector<19x230xbf16>
    %cst_105 = arith.constant dense<0.000000e+00> : vector<19x256xf32>
    %307 = tpu.matmul %306, %11, %cst_105 {dimension_numbers = #tpu.dot_dimension_numbers<[1], [0], [0], [1], [0, 0, 1, 1], [], []>} : vector<19x230xbf16>, vector<230x256xbf16>, vector<19x256xf32> -> vector<19x256xf32>
    %308 = vector.extract_strided_slice %305 {offsets = [2, 0], sizes = [19, 230], strides = [1, 1]} : vector<23x230xbf16> to vector<19x230xbf16>
    %cst_106 = arith.constant dense<0.000000e+00> : vector<19x256xf32>
    %309 = tpu.matmul %308, %13, %cst_106 {dimension_numbers = #tpu.dot_dimension_numbers<[1], [0], [0], [1], [0, 0, 1, 1], [], []>} : vector<19x230xbf16>, vector<230x256xbf16>, vector<19x256xf32> -> vector<19x256xf32>
    %310 = arith.addf %307, %309 : vector<19x256xf32>
    %311 = vector.extract_strided_slice %305 {offsets = [4, 0], sizes = [19, 230], strides = [1, 1]} : vector<23x230xbf16> to vector<19x230xbf16>
    %cst_107 = arith.constant dense<0.000000e+00> : vector<19x256xf32>
    %312 = tpu.matmul %311, %15, %cst_107 {dimension_numbers = #tpu.dot_dimension_numbers<[1], [0], [0], [1], [0, 0, 1, 1], [], []>} : vector<19x230xbf16>, vector<230x256xbf16>, vector<19x256xf32> -> vector<19x256xf32>
    %313 = arith.addf %310, %312 : vector<19x256xf32>
    %314 = vector.broadcast %17 : vector<1x256xf32> to vector<19x256xf32>
    %315 = arith.addf %313, %314 : vector<19x256xf32>
    %cst_108 = arith.constant 0.000000e+00 : f32
    %316 = vector.broadcast %cst_108 : f32 to vector<19x256xf32>
    %317 = arith.maximumf %315, %316 : vector<19x256xf32>
    %318 = vector.extract_strided_slice %317 {offsets = [0, 0], sizes = [1, 256], strides = [1, 1]} : vector<19x256xf32> to vector<1x256xf32>
    %319 = vector.extract_strided_slice %317 {offsets = [2, 0], sizes = [1, 256], strides = [1, 1]} : vector<19x256xf32> to vector<1x256xf32>
    %320 = vector.extract_strided_slice %317 {offsets = [4, 0], sizes = [1, 256], strides = [1, 1]} : vector<19x256xf32> to vector<1x256xf32>
    %321 = vector.extract_strided_slice %317 {offsets = [6, 0], sizes = [1, 256], strides = [1, 1]} : vector<19x256xf32> to vector<1x256xf32>
    %322 = vector.extract_strided_slice %317 {offsets = [8, 0], sizes = [1, 256], strides = [1, 1]} : vector<19x256xf32> to vector<1x256xf32>
    %323 = vector.extract_strided_slice %317 {offsets = [10, 0], sizes = [1, 256], strides = [1, 1]} : vector<19x256xf32> to vector<1x256xf32>
    %324 = vector.extract_strided_slice %317 {offsets = [12, 0], sizes = [1, 256], strides = [1, 1]} : vector<19x256xf32> to vector<1x256xf32>
    %325 = vector.extract_strided_slice %317 {offsets = [14, 0], sizes = [1, 256], strides = [1, 1]} : vector<19x256xf32> to vector<1x256xf32>
    %326 = vector.extract_strided_slice %317 {offsets = [16, 0], sizes = [1, 256], strides = [1, 1]} : vector<19x256xf32> to vector<1x256xf32>
    %327 = vector.extract_strided_slice %317 {offsets = [18, 0], sizes = [1, 256], strides = [1, 1]} : vector<19x256xf32> to vector<1x256xf32>
    %328 = tpu.concatenate %318, %319, %320, %321, %322, %323, %324, %325, %326, %327 in 1 : vector<1x256xf32>, vector<1x256xf32>, vector<1x256xf32>, vector<1x256xf32>, vector<1x256xf32>, vector<1x256xf32>, vector<1x256xf32>, vector<1x256xf32>, vector<1x256xf32>, vector<1x256xf32> -> vector<1x2560xf32>
    %c5_109 = arith.constant 5 : index
    %c0_110 = arith.constant 0 : index
    %329 = vector.load %arg11[%c5_109, %c0_110] : memref<8x2560xf32, #tpu.memory_space<vmem>>, vector<1x2560xf32>
    tpu.vector_store %arg11[%c5_109, %c0_110], %328 {strides = array<i32>} : memref<8x2560xf32, #tpu.memory_space<vmem>>, vector<1x2560xf32>,
    %c6 = arith.constant 6 : index
    %c0_111 = arith.constant 0 : index
    %c0_112 = arith.constant 0 : index
    %330 = vector.load %arg1[%c6, %c0_111, %c0_112] : memref<8x28x28xf32, #tpu.memory_space<vmem>>, vector<1x28x28xf32>
    %331 = vector.shape_cast %330 : vector<1x28x28xf32> to vector<28x28xf32>
    %332 = arith.truncf %331 : vector<28x28xf32> to vector<28x28xbf16>
    %333 = vector.extract_strided_slice %332 {offsets = [0, 0], sizes = [24, 28], strides = [1, 1]} : vector<28x28xbf16> to vector<24x28xbf16>
    %cst_113 = arith.constant dense<0.000000e+00> : vector<24x240xf32>
    %334 = tpu.matmul %333, %1, %cst_113 {dimension_numbers = #tpu.dot_dimension_numbers<[1], [0], [0], [1], [0, 0, 1, 1], [], []>} : vector<24x28xbf16>, vector<28x240xbf16>, vector<24x240xf32> -> vector<24x240xf32>
    %335 = vector.extract_strided_slice %332 {offsets = [1, 0], sizes = [24, 28], strides = [1, 1]} : vector<28x28xbf16> to vector<24x28xbf16>
    %cst_114 = arith.constant dense<0.000000e+00> : vector<24x240xf32>
    %336 = tpu.matmul %335, %3, %cst_114 {dimension_numbers = #tpu.dot_dimension_numbers<[1], [0], [0], [1], [0, 0, 1, 1], [], []>} : vector<24x28xbf16>, vector<28x240xbf16>, vector<24x240xf32> -> vector<24x240xf32>
    %337 = arith.addf %334, %336 : vector<24x240xf32>
    %338 = vector.extract_strided_slice %332 {offsets = [2, 0], sizes = [24, 28], strides = [1, 1]} : vector<28x28xbf16> to vector<24x28xbf16>
    %cst_115 = arith.constant dense<0.000000e+00> : vector<24x240xf32>
    %339 = tpu.matmul %338, %5, %cst_115 {dimension_numbers = #tpu.dot_dimension_numbers<[1], [0], [0], [1], [0, 0, 1, 1], [], []>} : vector<24x28xbf16>, vector<28x240xbf16>, vector<24x240xf32> -> vector<24x240xf32>
    %340 = arith.addf %337, %339 : vector<24x240xf32>
    %341 = vector.extract_strided_slice %332 {offsets = [3, 0], sizes = [24, 28], strides = [1, 1]} : vector<28x28xbf16> to vector<24x28xbf16>
    %cst_116 = arith.constant dense<0.000000e+00> : vector<24x240xf32>
    %342 = tpu.matmul %341, %7, %cst_116 {dimension_numbers = #tpu.dot_dimension_numbers<[1], [0], [0], [1], [0, 0, 1, 1], [], []>} : vector<24x28xbf16>, vector<28x240xbf16>, vector<24x240xf32> -> vector<24x240xf32>
    %343 = arith.addf %340, %342 : vector<24x240xf32>
    %344 = vector.extract_strided_slice %332 {offsets = [4, 0], sizes = [24, 28], strides = [1, 1]} : vector<28x28xbf16> to vector<24x28xbf16>
    %cst_117 = arith.constant dense<0.000000e+00> : vector<24x240xf32>
    %345 = tpu.matmul %344, %9, %cst_117 {dimension_numbers = #tpu.dot_dimension_numbers<[1], [0], [0], [1], [0, 0, 1, 1], [], []>} : vector<24x28xbf16>, vector<28x240xbf16>, vector<24x240xf32> -> vector<24x240xf32>
    %346 = arith.addf %343, %345 : vector<24x240xf32>
    %347 = vector.broadcast %16 : vector<1x240xf32> to vector<24x240xf32>
    %348 = arith.addf %346, %347 : vector<24x240xf32>
    %cst_118 = arith.constant 0.000000e+00 : f32
    %349 = vector.broadcast %cst_118 : f32 to vector<24x240xf32>
    %350 = arith.maximumf %348, %349 : vector<24x240xf32>
    %351 = vector.extract_strided_slice %350 {offsets = [0, 0], sizes = [23, 240], strides = [1, 1]} : vector<24x240xf32> to vector<23x240xf32>
    %352 = vector.extract_strided_slice %350 {offsets = [1, 0], sizes = [23, 240], strides = [1, 1]} : vector<24x240xf32> to vector<23x240xf32>
    %353 = arith.maximumf %351, %352 : vector<23x240xf32>
    %354 = vector.extract_strided_slice %353 {offsets = [0, 0], sizes = [23, 230], strides = [1, 1]} : vector<23x240xf32> to vector<23x230xf32>
    %355 = vector.extract_strided_slice %353 {offsets = [0, 10], sizes = [23, 230], strides = [1, 1]} : vector<23x240xf32> to vector<23x230xf32>
    %356 = arith.maximumf %354, %355 : vector<23x230xf32>
    %357 = arith.truncf %356 : vector<23x230xf32> to vector<23x230xbf16>
    %358 = vector.extract_strided_slice %357 {offsets = [0, 0], sizes = [19, 230], strides = [1, 1]} : vector<23x230xbf16> to vector<19x230xbf16>
    %cst_119 = arith.constant dense<0.000000e+00> : vector<19x256xf32>
    %359 = tpu.matmul %358, %11, %cst_119 {dimension_numbers = #tpu.dot_dimension_numbers<[1], [0], [0], [1], [0, 0, 1, 1], [], []>} : vector<19x230xbf16>, vector<230x256xbf16>, vector<19x256xf32> -> vector<19x256xf32>
    %360 = vector.extract_strided_slice %357 {offsets = [2, 0], sizes = [19, 230], strides = [1, 1]} : vector<23x230xbf16> to vector<19x230xbf16>
    %cst_120 = arith.constant dense<0.000000e+00> : vector<19x256xf32>
    %361 = tpu.matmul %360, %13, %cst_120 {dimension_numbers = #tpu.dot_dimension_numbers<[1], [0], [0], [1], [0, 0, 1, 1], [], []>} : vector<19x230xbf16>, vector<230x256xbf16>, vector<19x256xf32> -> vector<19x256xf32>
    %362 = arith.addf %359, %361 : vector<19x256xf32>
    %363 = vector.extract_strided_slice %357 {offsets = [4, 0], sizes = [19, 230], strides = [1, 1]} : vector<23x230xbf16> to vector<19x230xbf16>
    %cst_121 = arith.constant dense<0.000000e+00> : vector<19x256xf32>
    %364 = tpu.matmul %363, %15, %cst_121 {dimension_numbers = #tpu.dot_dimension_numbers<[1], [0], [0], [1], [0, 0, 1, 1], [], []>} : vector<19x230xbf16>, vector<230x256xbf16>, vector<19x256xf32> -> vector<19x256xf32>
    %365 = arith.addf %362, %364 : vector<19x256xf32>
    %366 = vector.broadcast %17 : vector<1x256xf32> to vector<19x256xf32>
    %367 = arith.addf %365, %366 : vector<19x256xf32>
    %cst_122 = arith.constant 0.000000e+00 : f32
    %368 = vector.broadcast %cst_122 : f32 to vector<19x256xf32>
    %369 = arith.maximumf %367, %368 : vector<19x256xf32>
    %370 = vector.extract_strided_slice %369 {offsets = [0, 0], sizes = [1, 256], strides = [1, 1]} : vector<19x256xf32> to vector<1x256xf32>
    %371 = vector.extract_strided_slice %369 {offsets = [2, 0], sizes = [1, 256], strides = [1, 1]} : vector<19x256xf32> to vector<1x256xf32>
    %372 = vector.extract_strided_slice %369 {offsets = [4, 0], sizes = [1, 256], strides = [1, 1]} : vector<19x256xf32> to vector<1x256xf32>
    %373 = vector.extract_strided_slice %369 {offsets = [6, 0], sizes = [1, 256], strides = [1, 1]} : vector<19x256xf32> to vector<1x256xf32>
    %374 = vector.extract_strided_slice %369 {offsets = [8, 0], sizes = [1, 256], strides = [1, 1]} : vector<19x256xf32> to vector<1x256xf32>
    %375 = vector.extract_strided_slice %369 {offsets = [10, 0], sizes = [1, 256], strides = [1, 1]} : vector<19x256xf32> to vector<1x256xf32>
    %376 = vector.extract_strided_slice %369 {offsets = [12, 0], sizes = [1, 256], strides = [1, 1]} : vector<19x256xf32> to vector<1x256xf32>
    %377 = vector.extract_strided_slice %369 {offsets = [14, 0], sizes = [1, 256], strides = [1, 1]} : vector<19x256xf32> to vector<1x256xf32>
    %378 = vector.extract_strided_slice %369 {offsets = [16, 0], sizes = [1, 256], strides = [1, 1]} : vector<19x256xf32> to vector<1x256xf32>
    %379 = vector.extract_strided_slice %369 {offsets = [18, 0], sizes = [1, 256], strides = [1, 1]} : vector<19x256xf32> to vector<1x256xf32>
    %380 = tpu.concatenate %370, %371, %372, %373, %374, %375, %376, %377, %378, %379 in 1 : vector<1x256xf32>, vector<1x256xf32>, vector<1x256xf32>, vector<1x256xf32>, vector<1x256xf32>, vector<1x256xf32>, vector<1x256xf32>, vector<1x256xf32>, vector<1x256xf32>, vector<1x256xf32> -> vector<1x2560xf32>
    %c6_123 = arith.constant 6 : index
    %c0_124 = arith.constant 0 : index
    %381 = vector.load %arg11[%c6_123, %c0_124] : memref<8x2560xf32, #tpu.memory_space<vmem>>, vector<1x2560xf32>
    tpu.vector_store %arg11[%c6_123, %c0_124], %380 {strides = array<i32>} : memref<8x2560xf32, #tpu.memory_space<vmem>>, vector<1x2560xf32>,
    %c7 = arith.constant 7 : index
    %c0_125 = arith.constant 0 : index
    %c0_126 = arith.constant 0 : index
    %382 = vector.load %arg1[%c7, %c0_125, %c0_126] : memref<8x28x28xf32, #tpu.memory_space<vmem>>, vector<1x28x28xf32>
    %383 = vector.shape_cast %382 : vector<1x28x28xf32> to vector<28x28xf32>
    %384 = arith.truncf %383 : vector<28x28xf32> to vector<28x28xbf16>
    %385 = vector.extract_strided_slice %384 {offsets = [0, 0], sizes = [24, 28], strides = [1, 1]} : vector<28x28xbf16> to vector<24x28xbf16>
    %cst_127 = arith.constant dense<0.000000e+00> : vector<24x240xf32>
    %386 = tpu.matmul %385, %1, %cst_127 {dimension_numbers = #tpu.dot_dimension_numbers<[1], [0], [0], [1], [0, 0, 1, 1], [], []>} : vector<24x28xbf16>, vector<28x240xbf16>, vector<24x240xf32> -> vector<24x240xf32>
    %387 = vector.extract_strided_slice %384 {offsets = [1, 0], sizes = [24, 28], strides = [1, 1]} : vector<28x28xbf16> to vector<24x28xbf16>
    %cst_128 = arith.constant dense<0.000000e+00> : vector<24x240xf32>
    %388 = tpu.matmul %387, %3, %cst_128 {dimension_numbers = #tpu.dot_dimension_numbers<[1], [0], [0], [1], [0, 0, 1, 1], [], []>} : vector<24x28xbf16>, vector<28x240xbf16>, vector<24x240xf32> -> vector<24x240xf32>
    %389 = arith.addf %386, %388 : vector<24x240xf32>
    %390 = vector.extract_strided_slice %384 {offsets = [2, 0], sizes = [24, 28], strides = [1, 1]} : vector<28x28xbf16> to vector<24x28xbf16>
    %cst_129 = arith.constant dense<0.000000e+00> : vector<24x240xf32>
    %391 = tpu.matmul %390, %5, %cst_129 {dimension_numbers = #tpu.dot_dimension_numbers<[1], [0], [0], [1], [0, 0, 1, 1], [], []>} : vector<24x28xbf16>, vector<28x240xbf16>, vector<24x240xf32> -> vector<24x240xf32>
    %392 = arith.addf %389, %391 : vector<24x240xf32>
    %393 = vector.extract_strided_slice %384 {offsets = [3, 0], sizes = [24, 28], strides = [1, 1]} : vector<28x28xbf16> to vector<24x28xbf16>
    %cst_130 = arith.constant dense<0.000000e+00> : vector<24x240xf32>
    %394 = tpu.matmul %393, %7, %cst_130 {dimension_numbers = #tpu.dot_dimension_numbers<[1], [0], [0], [1], [0, 0, 1, 1], [], []>} : vector<24x28xbf16>, vector<28x240xbf16>, vector<24x240xf32> -> vector<24x240xf32>
    %395 = arith.addf %392, %394 : vector<24x240xf32>
    %396 = vector.extract_strided_slice %384 {offsets = [4, 0], sizes = [24, 28], strides = [1, 1]} : vector<28x28xbf16> to vector<24x28xbf16>
    %cst_131 = arith.constant dense<0.000000e+00> : vector<24x240xf32>
    %397 = tpu.matmul %396, %9, %cst_131 {dimension_numbers = #tpu.dot_dimension_numbers<[1], [0], [0], [1], [0, 0, 1, 1], [], []>} : vector<24x28xbf16>, vector<28x240xbf16>, vector<24x240xf32> -> vector<24x240xf32>
    %398 = arith.addf %395, %397 : vector<24x240xf32>
    %399 = vector.broadcast %16 : vector<1x240xf32> to vector<24x240xf32>
    %400 = arith.addf %398, %399 : vector<24x240xf32>
    %cst_132 = arith.constant 0.000000e+00 : f32
    %401 = vector.broadcast %cst_132 : f32 to vector<24x240xf32>
    %402 = arith.maximumf %400, %401 : vector<24x240xf32>
    %403 = vector.extract_strided_slice %402 {offsets = [0, 0], sizes = [23, 240], strides = [1, 1]} : vector<24x240xf32> to vector<23x240xf32>
    %404 = vector.extract_strided_slice %402 {offsets = [1, 0], sizes = [23, 240], strides = [1, 1]} : vector<24x240xf32> to vector<23x240xf32>
    %405 = arith.maximumf %403, %404 : vector<23x240xf32>
    %406 = vector.extract_strided_slice %405 {offsets = [0, 0], sizes = [23, 230], strides = [1, 1]} : vector<23x240xf32> to vector<23x230xf32>
    %407 = vector.extract_strided_slice %405 {offsets = [0, 10], sizes = [23, 230], strides = [1, 1]} : vector<23x240xf32> to vector<23x230xf32>
    %408 = arith.maximumf %406, %407 : vector<23x230xf32>
    %409 = arith.truncf %408 : vector<23x230xf32> to vector<23x230xbf16>
    %410 = vector.extract_strided_slice %409 {offsets = [0, 0], sizes = [19, 230], strides = [1, 1]} : vector<23x230xbf16> to vector<19x230xbf16>
    %cst_133 = arith.constant dense<0.000000e+00> : vector<19x256xf32>
    %411 = tpu.matmul %410, %11, %cst_133 {dimension_numbers = #tpu.dot_dimension_numbers<[1], [0], [0], [1], [0, 0, 1, 1], [], []>} : vector<19x230xbf16>, vector<230x256xbf16>, vector<19x256xf32> -> vector<19x256xf32>
    %412 = vector.extract_strided_slice %409 {offsets = [2, 0], sizes = [19, 230], strides = [1, 1]} : vector<23x230xbf16> to vector<19x230xbf16>
    %cst_134 = arith.constant dense<0.000000e+00> : vector<19x256xf32>
    %413 = tpu.matmul %412, %13, %cst_134 {dimension_numbers = #tpu.dot_dimension_numbers<[1], [0], [0], [1], [0, 0, 1, 1], [], []>} : vector<19x230xbf16>, vector<230x256xbf16>, vector<19x256xf32> -> vector<19x256xf32>
    %414 = arith.addf %411, %413 : vector<19x256xf32>
    %415 = vector.extract_strided_slice %409 {offsets = [4, 0], sizes = [19, 230], strides = [1, 1]} : vector<23x230xbf16> to vector<19x230xbf16>
    %cst_135 = arith.constant dense<0.000000e+00> : vector<19x256xf32>
    %416 = tpu.matmul %415, %15, %cst_135 {dimension_numbers = #tpu.dot_dimension_numbers<[1], [0], [0], [1], [0, 0, 1, 1], [], []>} : vector<19x230xbf16>, vector<230x256xbf16>, vector<19x256xf32> -> vector<19x256xf32>
    %417 = arith.addf %414, %416 : vector<19x256xf32>
    %418 = vector.broadcast %17 : vector<1x256xf32> to vector<19x256xf32>
    %419 = arith.addf %417, %418 : vector<19x256xf32>
    %cst_136 = arith.constant 0.000000e+00 : f32
    %420 = vector.broadcast %cst_136 : f32 to vector<19x256xf32>
    %421 = arith.maximumf %419, %420 : vector<19x256xf32>
    %422 = vector.extract_strided_slice %421 {offsets = [0, 0], sizes = [1, 256], strides = [1, 1]} : vector<19x256xf32> to vector<1x256xf32>
    %423 = vector.extract_strided_slice %421 {offsets = [2, 0], sizes = [1, 256], strides = [1, 1]} : vector<19x256xf32> to vector<1x256xf32>
    %424 = vector.extract_strided_slice %421 {offsets = [4, 0], sizes = [1, 256], strides = [1, 1]} : vector<19x256xf32> to vector<1x256xf32>
    %425 = vector.extract_strided_slice %421 {offsets = [6, 0], sizes = [1, 256], strides = [1, 1]} : vector<19x256xf32> to vector<1x256xf32>
    %426 = vector.extract_strided_slice %421 {offsets = [8, 0], sizes = [1, 256], strides = [1, 1]} : vector<19x256xf32> to vector<1x256xf32>
    %427 = vector.extract_strided_slice %421 {offsets = [10, 0], sizes = [1, 256], strides = [1, 1]} : vector<19x256xf32> to vector<1x256xf32>
    %428 = vector.extract_strided_slice %421 {offsets = [12, 0], sizes = [1, 256], strides = [1, 1]} : vector<19x256xf32> to vector<1x256xf32>
    %429 = vector.extract_strided_slice %421 {offsets = [14, 0], sizes = [1, 256], strides = [1, 1]} : vector<19x256xf32> to vector<1x256xf32>
    %430 = vector.extract_strided_slice %421 {offsets = [16, 0], sizes = [1, 256], strides = [1, 1]} : vector<19x256xf32> to vector<1x256xf32>
    %431 = vector.extract_strided_slice %421 {offsets = [18, 0], sizes = [1, 256], strides = [1, 1]} : vector<19x256xf32> to vector<1x256xf32>
    %432 = tpu.concatenate %422, %423, %424, %425, %426, %427, %428, %429, %430, %431 in 1 : vector<1x256xf32>, vector<1x256xf32>, vector<1x256xf32>, vector<1x256xf32>, vector<1x256xf32>, vector<1x256xf32>, vector<1x256xf32>, vector<1x256xf32>, vector<1x256xf32>, vector<1x256xf32> -> vector<1x2560xf32>
    %c7_137 = arith.constant 7 : index
    %c0_138 = arith.constant 0 : index
    %433 = vector.load %arg11[%c7_137, %c0_138] : memref<8x2560xf32, #tpu.memory_space<vmem>>, vector<1x2560xf32>
    tpu.vector_store %arg11[%c7_137, %c0_138], %432 {strides = array<i32>} : memref<8x2560xf32, #tpu.memory_space<vmem>>, vector<1x2560xf32>,
    %c0_139 = arith.constant 0 : index
    %c0_140 = arith.constant 0 : index
    %434 = vector.load %arg11[%c0_139, %c0_140] : memref<8x2560xf32, #tpu.memory_space<vmem>>, vector<8x2560xf32>
    %435 = arith.truncf %434 : vector<8x2560xf32> to vector<8x2560xbf16>
    %c0_141 = arith.constant 0 : index
    %c0_142 = arith.constant 0 : index
    %436 = vector.load %arg6[%c0_141, %c0_142] : memref<2560x500xbf16, #tpu.memory_space<vmem>>, vector<2560x500xbf16>
    %cst_143 = arith.constant dense<0.000000e+00> : vector<8x500xf32>
    %437 = tpu.matmul %435, %436, %cst_143 {dimension_numbers = #tpu.dot_dimension_numbers<[1], [0], [0], [1], [0, 0, 1, 1], [], []>} : vector<8x2560xbf16>, vector<2560x500xbf16>, vector<8x500xf32> -> vector<8x500xf32>
    %c0_144 = arith.constant 0 : index
    %c0_145 = arith.constant 0 : index
    %438 = vector.load %arg7[%c0_144, %c0_145] : memref<1x500xf32, #tpu.memory_space<vmem>>, vector<1x500xf32>
    %439 = vector.broadcast %438 : vector<1x500xf32> to vector<8x500xf32>
    %440 = arith.addf %437, %439 : vector<8x500xf32>
    %cst_146 = arith.constant 0.000000e+00 : f32
    %441 = vector.broadcast %cst_146 : f32 to vector<8x500xf32>
    %442 = arith.maximumf %440, %441 : vector<8x500xf32>
    %c0_147 = arith.constant 0 : index
    %c0_148 = arith.constant 0 : index
    %443 = vector.load %arg8[%c0_147, %c0_148] : memref<500x128xf32, #tpu.memory_space<vmem>>, vector<500x128xf32>
    %cst_149 = arith.constant dense<0.000000e+00> : vector<8x128xf32>
    %444 = tpu.matmul %442, %443, %cst_149 {dimension_numbers = #tpu.dot_dimension_numbers<[1], [0], [0], [1], [0, 0, 1, 1], [], []>} : vector<8x500xf32>, vector<500x128xf32>, vector<8x128xf32> -> vector<8x128xf32>
    %c0_150 = arith.constant 0 : index
    %c0_151 = arith.constant 0 : index
    %445 = vector.load %arg9[%c0_150, %c0_151] : memref<1x128xf32, #tpu.memory_space<vmem>>, vector<1x128xf32>
    %446 = vector.broadcast %445 : vector<1x128xf32> to vector<8x128xf32>
    %447 = arith.addf %444, %446 : vector<8x128xf32>
    %cst_152 = arith.constant dense<0xFF800000> : vector<8xf32>
    %448 = vector.multi_reduction <maximumf>, %447, %cst_152 [1] : vector<8x128xf32> to vector<8xf32>
    %449 = vector.shape_cast %448 : vector<8xf32> to vector<8x1xf32>
    %450 = vector.broadcast %449 : vector<8x1xf32> to vector<8x128xf32>
    %451 = arith.subf %447, %450 : vector<8x128xf32>
    %452 = math.exp %451 : vector<8x128xf32>
    %cst_153 = arith.constant dense<0.000000e+00> : vector<8xf32>
    %453 = vector.multi_reduction <add>, %452, %cst_153 [1] : vector<8x128xf32> to vector<8xf32>
    %454 = vector.shape_cast %453 : vector<8xf32> to vector<8x1xf32>
    %455 = math.log %454 : vector<8x1xf32>
    %456 = vector.broadcast %455 : vector<8x1xf32> to vector<8x128xf32>
    %457 = arith.subf %451, %456 : vector<8x128xf32>
    %c0_154 = arith.constant 0 : index
    %c0_155 = arith.constant 0 : index
    %458 = vector.load %arg10[%c0_154, %c0_155] : memref<8x128xf32, #tpu.memory_space<vmem>>, vector<8x128xf32>
    tpu.vector_store %arg10[%c0_154, %c0_155], %457 {strides = array<i32>} : memref<8x128xf32, #tpu.memory_space<vmem>>, vector<8x128xf32>,
    return
  }
  func.func @transform_0(%arg0: i32) -> (i32, i32, i32) {
    %c0_i32 = arith.constant 0 : i32
    %c0_i32_0 = arith.constant 0 : i32
    %c0_i32_1 = arith.constant 0 : i32
    return %arg0, %c0_i32, %c0_i32_0 : i32, i32, i32
  }
  func.func @transform_1(%arg0: i32) -> (i32, i32, i32) {
    %c0_i32 = arith.constant 0 : i32
    %c0_i32_0 = arith.constant 0 : i32
    %c0_i32_1 = arith.constant 0 : i32
    %c0_i32_2 = arith.constant 0 : i32
    return %c0_i32, %c0_i32_0, %c0_i32_1 : i32, i32, i32
  }
  func.func @transform_2(%arg0: i32) -> (i32, i32) {
    %c0_i32 = arith.constant 0 : i32
    %c0_i32_0 = arith.constant 0 : i32
    %c0_i32_1 = arith.constant 0 : i32
    return %c0_i32, %c0_i32_0 : i32, i32
  }
  func.func @transform_3(%arg0: i32) -> (i32, i32, i32) {
    %c0_i32 = arith.constant 0 : i32
    %c0_i32_0 = arith.constant 0 : i32
    %c0_i32_1 = arith.constant 0 : i32
    %c0_i32_2 = arith.constant 0 : i32
    return %c0_i32, %c0_i32_0, %c0_i32_1 : i32, i32, i32
  }
  func.func @transform_4(%arg0: i32) -> (i32, i32) {
    %c0_i32 = arith.constant 0 : i32
    %c0_i32_0 = arith.constant 0 : i32
    %c0_i32_1 = arith.constant 0 : i32
    return %c0_i32, %c0_i32_0 : i32, i32
  }
  func.func @transform_5(%arg0: i32) -> (i32, i32) {
    %c0_i32 = arith.constant 0 : i32
    %c0_i32_0 = arith.constant 0 : i32
    %c0_i32_1 = arith.constant 0 : i32
    return %c0_i32, %c0_i32_0 : i32, i32
  }
  func.func @transform_6(%arg0: i32) -> (i32, i32) {
    %c0_i32 = arith.constant 0 : i32
    %c0_i32_0 = arith.constant 0 : i32
    %c0_i32_1 = arith.constant 0 : i32
    return %c0_i32, %c0_i32_0 : i32, i32
  }
  func.func @transform_7(%arg0: i32) -> (i32, i32) {
    %c0_i32 = arith.constant 0 : i32
    %c0_i32_0 = arith.constant 0 : i32
    %c0_i32_1 = arith.constant 0 : i32
    return %c0_i32, %c0_i32_0 : i32, i32
  }
  func.func @transform_8(%arg0: i32) -> (i32, i32) {
    %c0_i32 = arith.constant 0 : i32
    %c0_i32_0 = arith.constant 0 : i32
    %c0_i32_1 = arith.constant 0 : i32
    return %c0_i32, %c0_i32_0 : i32, i32
  }
  func.func @transform_9(%arg0: i32) -> (i32, i32) {
    %c0_i32 = arith.constant 0 : i32
    %c0_i32_0 = arith.constant 0 : i32
    return %arg0, %c0_i32 : i32, i32
  }
}

</mosaic_0001>

<bundles_post_ra>
// kernel: digit_forward.1
= control target key start
LH: loop header
LB: loop body
LE: loop exit
PB: predicated region body
PF: predicated region fallthrough
CT: control target
= control target key end

     0   :  { %v21374_v1 = vmov 0   ;;  %vm195_vm0 = vcmask 1045504   ;;  %vm334_vm1 = vcmask 1046528   ;;  %vm188_vm2 = vcmask 228352   ;;  %s14914_s19 = smov 118   ;;  %s21363_s1 = inlined_call_operand.vmem [shape: bf16[5,28,240], index: 1, kind: input, shape index: {}]   ;;  %s21364_s0 = inlined_call_operand.vmem [shape: f32[8,28,28], index: 0, kind: input, shape index: {}]   ;;  %s21365_s3 = inlined_call_operand.vmem [shape: bf16[3,230,256], index: 3, kind: input, shape index: {}]   ;;  %s21366_s2 = inlined_call_operand.vmem [shape: f32[1,240], index: 2, kind: input, shape index: {}]   ;;  %s21367_s4 = inlined_call_operand.vmem [shape: f32[1,256], index: 4, kind: input, shape index: {}]   ;;  %s21368_s5 = inlined_call_operand.vmem [shape: bf16[2560,500], index: 5, kind: input, shape index: {}]   ;;  %s21369_s7 = inlined_call_operand.vmem [shape: f32[500,128], index: 7, kind: input, shape index: {}]   ;;  %s21370_s6 = inlined_call_operand.vmem [shape: f32[1,500], index: 6, kind: input, shape index: {}]   ;;  %s21371_s8 = inlined_call_operand.vmem [shape: f32[1,128], index: 8, kind: input, shape index: {}]   ;;  %s21372_s9 = inlined_call_operand.vmem [shape: f32[8,128], index: 9, kind: output, shape index: {}]  }
   0x1   :  { %v14971_v0 = vld [vmem:[%s21363_s1 + $0x24] ss:$8 sps:$4 sm:$0xff]   ;;  %234 = vmatprep.mubr.bf16.mxu1 %v21374_v1  ;;  %400 = vmatprep.mubr.bf16.mxu0 %v21374_v1  ;;  %v14984_v3 = vld [vmem:[%s21363_s1 + $0x20] ss:$8 sps:$4 sm:$0xff]   ;;  %v150_v11 = vld [vmem:[%s21364_s0 + $0x10] sm:$0xff]  ;;  %vm865_vm5 = vcmask 1042432  }
   0x2   :  { %v14978_v2 = vld [vmem:[%s21363_s1 + $0x44] ss:$8 sps:$4 sm:$0xff]   ;;  %202 = vmatprep.subr.bf16.mxu1 %v14971_v0  ;;  %v14989_v4 = vld [vmem:[%s21363_s1 + $0x40] ss:$8 sps:$4 sm:$0xff]   ;;  %v151_v12 = vld [vmem:[%s21364_s0 + $0x18] sm:$0xf] }
   0x3   :  { %368 = vmatprep.subr.bf16.mxu0 %v14978_v2  ;;  %v14995_v5 = vld [vmem:[%s21363_s1 + $0x34] ss:$8 sps:$4 sm:$0x3f]   ;;  %203 = vmatpush1.bf16.msra.mxu1 %v14984_v3  ;;  %v148_v7 = vld [vmem:[%s21364_s0] sm:$0xff]  ;;  %v149_v10 = vld [vmem:[%s21364_s0 + $0x8] sm:$0xff]  ;;  %v15034_v16 = vpack.c.bf16 %v151_v12, %v150_v11  ;;  %vm681_vm6 = vcmask 965632  }
   0x4   :  { %369 = vmatpush1.bf16.msra.mxu0 %v14989_v4  ;;  %v15002_v6 = vld [vmem:[%s21363_s1 + $0x54] ss:$8 sps:$4 sm:$0x3f]   ;;  %12016 = vmatprep.subr.msk.bf16.mxu1 %vm195_vm0, %v14995_v5  ;;  %v13500_v8 = vld [vmem:[%s21363_s1 + $0x30] ss:$8 sps:$4 sm:$0x3f]   ;;  %v15032_v15 = vpack.c.bf16 %v149_v10, %v148_v7 }
   0x5   :  { %v13501_v9 = vld [vmem:[%s21363_s1 + $0x50] ss:$8 sps:$4 sm:$0x3f]   ;;  %12030 = vmatprep.subr.msk.bf16.mxu0 %vm195_vm0, %v15002_v6  ;;  %v15027_v13 = vsel %vm195_vm0, %v13500_v8, 0  ;;  %v15039_v17 = vld [vmem:[%s21363_s1 + $0x64] ss:$8 sps:$4 sm:$0xff]  }
   0x6   :  { %v15030_v14 = vsel %vm195_vm0, %v13501_v9, 0  ;;  %v15046_v18 = vld [vmem:[%s21363_s1 + $0x60] ss:$8 sps:$4 sm:$0xff]   ;;  %v156_v19 = vshrl.u32 %v15032_v15, 16  ;;  %v158_v20 = vshll.u32 %v15032_v15, 16  ;;  %v163_v21 = vshll.u32 %v15034_v16, 16 }
   0x7   :  { %21423 = vst [vmem:[#allocation3_spill] sm:$0xff] %v15030_v14  ;;  %205 = vmatpush1.bf16.msra.mxu1 %v15027_v13  ;;  %v335_v22 = vrot.slane %v15032_v15, 1  ;;  %v15056_v23 = vld [vmem:[%s21363_s1 + $0x4] ss:$8 sps:$4 sm:$0xff]   ;;  %v336_v24 = vrot.slane %v15034_v16, 1  ;;  %v167_v37 = vshrl.u32 %v15034_v16, 16 }
   0x8   :  { %371 = vmatpush1.bf16.msra.mxu0 %v15030_v14  ;;  %vm154_vm3 = vsmask.f32 7424  ;;  %v160_v25 = vrot.slane %v158_v20, 1  ;;  %v165_v26 = vrot.slane %v163_v21, 1  ;;  %281 = vmatprep.subr.bf16.mxu1 %v15056_v23  ;;  %v15069_v29 = vld [vmem:[%s21363_s1] ss:$8 sps:$4 sm:$0xff]  }
   0x9   :  { %463 = vmatprep.subr.bf16.mxu0 %v15039_v17  ;;  %v337_v27 = vsel %vm334_vm1, %v335_v22, %v336_v24  ;;  %v15064_v28 = vld [vmem:[%s21363_s1 + $0x74] ss:$8 sps:$4 sm:$0x3f]   ;;  %v13510_v31 = vld [vmem:[%s21363_s1 + $0x70] ss:$8 sps:$4 sm:$0x3f]  }
   0xa   :  { %v161_v30 = vor.u32 %v160_v25, %v156_v19  ;;  %v15080_v32 = vld [vmem:[%s21363_s1 + $0x14] ss:$8 sps:$4 sm:$0x3f]   ;;  %v13513_v33 = vld [vmem:[%s21363_s1 + $0x10] ss:$8 sps:$4 sm:$0x3f]   ;;  %v169_v47 = vor.u32 %v167_v37, %v165_v26 }
   0xb   :  { %12031 = vmatmul.mubr.msk.bf16.vlgmr.msra.gmra.mrb[0].mxu0 %vm188_vm2, %v337_v27  ;;  %v15089_v35 = vsel %vm195_vm0, %v13510_v31, 0  ;;  %v15094_v36 = vld [vmem:[%s21363_s1 + $0x84] ss:$8 sps:$4 sm:$0xff]   ;;  %v426_v38 = vrot.slane %v156_v19, 1  ;;  %v427_v39 = vrot.slane %v158_v20, 2  ;;  %v430_v40 = vrot.slane %v163_v21, 2 }
   0xc   :  { %464 = vmatpush1.bf16.msra.mxu0 %v15046_v18  ;;  %410 = vmatprep.mubr.bf16.mxu0 %v21374_v1  ;;  %v166_v34 = vsel %vm154_vm3, %v161_v30, %v165_v26  ;;  %21424 = vst [vmem:[#allocation4_spill] sm:$0xff] %v15089_v35  ;;  %v12146_v41 = vld [vmem:[%s21364_s0 + $0x20] sm:$0xff]  ;;  %v429_v42 = vrot.slane %v167_v37, 1  ;;  %v15107_v43 = vsel %vm195_vm0, %v13513_v33, 0  ;;  %v12147_v44 = vld [vmem:[%s21364_s0 + $0x28] sm:$0xff]  ;;  %v12148_v45 = vld [vmem:[%s21364_s0 + $0x30] sm:$0xff] }
   0xd   :  { %12037 = vmatprep.subr.msk.bf16.mxu0 %vm195_vm0, %v15064_v28  ;;  %12017 = vmatmul.mubr.msk.bf16.vlgmr.msra.gmra.mrb[0].mxu1 %vm188_vm2, %v166_v34  ;;  %v12149_v46 = vld [vmem:[%s21364_s0 + $0x38] sm:$0xf]  ;;  %v15119_v48 = vpack.c.bf16 %v12147_v44, %v12146_v41  ;;  %v428_v50 = vor.u32 %v427_v39, %v426_v38  ;;  %vm425_vm4 = vsmask.f32 6400  ;;  %v15139_v56 = vld [vmem:[%s21363_s1 + $0x80] ss:$8 sps:$4 sm:$0xff]  }
   0xe   :  { %244 = vmatprep.mubr.bf16.mxu1 %v21374_v1  ;;  %282 = vmatpush1.bf16.msra.mxu1 %v15069_v29  ;;  %v15121_v49 = vpack.c.bf16 %v12149_v46, %v12148_v45  ;;  %v431_v51 = vor.u32 %v430_v40, %v429_v42  ;;  %v15144_v57 = vld [vmem:[%s21363_s1 + $0x94] ss:$8 sps:$4 sm:$0x3f]   ;;  %v13519_v58 = vld [vmem:[%s21363_s1 + $0x90] ss:$8 sps:$4 sm:$0x3f]  }
   0xf   :  { %12023 = vmatprep.subr.msk.bf16.mxu1 %vm195_vm0, %v15080_v32  ;;  %v1805_v52 = vrot.slane %v15119_v48, 2  ;;  %v15155_v59 = vsel %vm195_vm0, %v13519_v58, 0  ;;  %v521_v60 = vrot.slane %v15032_v15, 2  ;;  %v522_v61 = vrot.slane %v15034_v16, 2  ;;  %v13520_v21 = vld [vmem:[%s21365_s3 + $0xec] ss:$8 sps:$4 sm:$0xff]  }
  0x10   :  { %466 = vmatpush1.bf16.msra.mxu0 %v15089_v35  ;;  %v1806_v53 = vrot.slane %v15121_v49, 2  ;;  %v432_v55 = vsel %vm425_vm4, %v428_v50, %v431_v51  ;;  %21425 = vst [vmem:[#allocation5_spill] sm:$0xff] %v15155_v59  ;;  %v1543_v63 = vshll.u32 %v15119_v48, 16  ;;  %v1548_v8 = vshll.u32 %v15121_v49, 16  ;;  %v13522_v22 = vld [vmem:[%s21365_s3 + $0xe8] ss:$8 sps:$4 sm:$0xff]  }
  0x11   :  { %554 = vmatprep.subr.bf16.mxu0 %v15094_v36  ;;  %v523_v62 = vsel %vm195_vm0, %v521_v60, %v522_v61  ;;  %v1670_v12 = vrot.slane %v15121_v49, 1  ;;  %v13526_v25 = vld [vmem:[%s21365_s3 + $0x10c] ss:$8 sps:$4 sm:$0xff]   ;;  %v13528_v26 = vld [vmem:[%s21365_s3 + $0x108] ss:$8 sps:$4 sm:$0xff]   ;;  %vm858_vm7 = vcmask 834560  }
  0x12   :  { %284 = vmatpush1.bf16.msra.mxu1 %v15107_v43  ;;  %v15132_v54 = vsel %vm195_vm0, %v1805_v52, %v1806_v53  ;;  %v1545_v7 = vrot.slane %v1543_v63, 1  ;;  %v1550_v9 = vrot.slane %v1548_v8, 1  ;;  %v13529_v27 = vld [vmem:[%s21365_s3 + $0x11c] ss:$8 sps:$4 sm:$0xff]   ;;  %v13534_v30 = vld [vmem:[%s21365_s3 + $0x128] ss:$8 sps:$4 sm:$0xff]  }
  0x13   :  { %12032 = vmatmul.mubr.msk.bf16.gmra.mrb[4].mxu0 %vm188_vm2, %v336_v24  ;;  %872 = vmatprep.subr.bf16.mxu1 %v13520_v21  ;;  %v13525_v24 = vld [vmem:[%s21365_s3 + $0xf8] ss:$8 sps:$4 sm:$0xff]   ;;  %v13538_v40 = vld [vmem:[%s21365_s3 + $0x14c] ss:$8 sps:$4 sm:$0xff]   ;;  %v13540_v42 = vld [vmem:[%s21365_s3 + $0x148] ss:$8 sps:$4 sm:$0xff]  }
  0x14   :  { %495 = vmatprep.mubr.bf16.mxu0 %v21374_v1  ;;  %v13537_v38 = vld [vmem:[%s21365_s3 + $0x138] ss:$8 sps:$4 sm:$0xff]   ;;  %v13541_v45 = vld [vmem:[%s21365_s3 + $0x15c] ss:$8 sps:$4 sm:$0xff]   ;;  %v13546_v52 = vld [vmem:[%s21365_s3 + $0x168] ss:$8 sps:$4 sm:$0xff]  }
  0x15   :  { %12018 = vmatmul.mubr.msk.bf16.gmra.mrb[4].mxu1 %vm188_vm2, %v169_v47  ;;  %v13543_v46 = vld [vmem:[%s21365_s3 + $0x158] ss:$8 sps:$4 sm:$0xff]   ;;  %v13544_v47 = vld [vmem:[%s21365_s3 + $0x16c] ss:$8 sps:$4 sm:$0xff]   ;;  %vm11775_vm9 = vcmask 949248   ;;  %vm11779_vm10 = vcmask 1043456  }
  0x16   :  { %313 = vmatprep.mubr.bf16.mxu1 %v21374_v1  ;;  %v13549_v58 = vld [vmem:[%s21365_s3 + $0x178] ss:$8 sps:$4 sm:$0xff]  }
  0x1b   :  { %12038 = vmatmul.mubr.msk.bf16.vlgmr.msra.gmra.mrb[0].mxu0 %vm188_vm2, %v432_v55 }
  0x1c   :  { %555 = vmatpush1.bf16.msra.mxu0 %v15139_v56  ;;  %505 = vmatprep.mubr.bf16.mxu0 %v21374_v1 }
  0x1d   :  { %12044 = vmatprep.subr.msk.bf16.mxu0 %vm195_vm0, %v15144_v57  ;;  %12024 = vmatmul.mubr.msk.bf16.vlgmr.msra.gmra.mrb[0].mxu1 %vm188_vm2, %v15032_v15 }
  0x1e   :  { %323 = vmatprep.mubr.bf16.mxu1 %v21374_v1  ;;  %873 = vmatpush1.bf16.msra.mxu1 %v13522_v22 }
  0x20   :  { %557 = vmatpush1.bf16.msra.mxu0 %v15155_v59 }
  0x21   :  { %1561 = vmatprep.subr.bf16.mxu0 %v14971_v0  ;;  %v1541_v0 = vshrl.u32 %v15119_v48, 16 }
  0x23   :  { %12039 = vmatmul.mubr.msk.bf16.gmra.mrb[8].mxu0 %vm188_vm2, %v431_v51  ;;  %v1735_v15 = vrot.slane %v1541_v0, 1 }
  0x24   :  { %586 = vmatprep.mubr.bf16.mxu0 %v21374_v1 }
  0x25   :  { %12025 = vmatmul.mubr.msk.bf16.gmra.mrb[8].mxu1 %vm188_vm2, %v15034_v16  ;;  %v1736_v16 = vrot.slane %v1543_v63, 2 }
  0x27   :  { %v1737_v19 = vor.u32 %v1736_v16, %v1735_v15 }
  0x2b   :  { %12045 = vmatmul.mubr.msk.bf16.vlgmr.msra.gmra.mrb[0].mxu0 %vm188_vm2, %v523_v62 }
  0x2c   :  { %1562 = vmatpush1.bf16.msra.mxu0 %v14984_v3  ;;  %596 = vmatprep.mubr.bf16.mxu0 %v21374_v1  ;;  %v1546_v3 = vor.u32 %v1545_v7, %v1541_v0 }
  0x2d   :  { %12150 = vmatprep.subr.msk.bf16.mxu0 %vm195_vm0, %v14995_v5  ;;  %v1552_v5 = vshrl.u32 %v15121_v49, 16 }
  0x2e   :  { %v1551_v10 = vsel %vm154_vm3, %v1546_v3, %v1550_v9 }
  0x2f   :  { %v1554_v11 = vor.u32 %v1552_v5, %v1550_v9  ;;  %v13550_v9 = vld [vmem:[%s21365_s3 + $0x18c] ss:$8 sps:$4 sm:$0xff]  }
  0x30   :  { %1564 = vmatpush1.bf16.msra.mxu0 %v15027_v13 }
  0x31   :  { %1616 = vmatprep.subr.bf16.mxu0 %v15056_v23  ;;  %v13523_v23 = vld [vmem:[%s21365_s3 + $0xfc] ss:$8 sps:$4 sm:$0xff]  }
  0x32   :  { %874 = vmatprep.subr.bf16.mxu1 %v13523_v23 }
  0x33   :  { %12046 = vmatmul.mubr.msk.bf16.gmra.mrb[12].mxu0 %vm188_vm2, %v522_v61  ;;  %875 = vmatpush1.bf16.msra.mxu1 %v13525_v24  ;;  %v146_v61 = vld [vmem:[%s21366_s2] sm:$0x3] }
  0x34   :  { %1593 = vmatprep.mubr.bf16.mxu0 %v21374_v1  ;;  %876 = vmatprep.subr.bf16.mxu1 %v13526_v25 }
  0x37   :  { %877 = vmatpush1.bf16.msra.mxu1 %v13528_v26 }
  0x38   :  { %878 = vmatprep.subr.bf16.mxu1 %v13529_v27 }
  0x3b   :  { %12151 = vmatmul.mubr.msk.bf16.vlgmr.msra.gmra.mrb[16].mxu0 %vm188_vm2, %v1551_v10 }
  0x3c   :  { %1617 = vmatpush1.bf16.msra.mxu0 %v15069_v29  ;;  %1603 = vmatprep.mubr.bf16.mxu0 %v21374_v1  ;;  %v13532_v29 = vld [vmem:[%s21365_s3 + $0x12c] ss:$8 sps:$4 sm:$0xff]  }
  0x3d   :  { %12153 = vmatprep.subr.msk.bf16.mxu0 %vm195_vm0, %v15080_v32  ;;  %v13535_v32 = vld [vmem:[%s21365_s3 + $0x13c] ss:$8 sps:$4 sm:$0xff]  }
  0x40   :  { %1619 = vmatpush1.bf16.msra.mxu0 %v15107_v43 }
  0x41   :  { %1678 = vmatprep.subr.bf16.mxu0 %v14978_v2  ;;  %v1669_v2 = vrot.slane %v15119_v48, 1 }
  0x43   :  { %12152 = vmatmul.mubr.msk.bf16.gmra.mrb[20].mxu0 %vm188_vm2, %v1554_v11 }
  0x44   :  { %1648 = vmatprep.mubr.bf16.mxu0 %v21374_v1 }
  0x4b   :  { %12154 = vmatmul.mubr.msk.bf16.vlgmr.msra.gmra.mrb[16].mxu0 %vm188_vm2, %v15119_v48 }
  0x4c   :  { %1679 = vmatpush1.bf16.msra.mxu0 %v14989_v4  ;;  %1658 = vmatprep.mubr.bf16.mxu0 %v21374_v1  ;;  %v1671_v4 = vsel %vm334_vm1, %v1669_v2, %v1670_v12 }
  0x4d   :  { %12156 = vmatprep.subr.msk.bf16.mxu0 %vm195_vm0, %v15002_v6  ;;  %v1738_v6 = vrot.slane %v1552_v5, 1 }
  0x50   :  { %1681 = vmatpush1.bf16.msra.mxu0 %v15030_v14 }
  0x51   :  { %1748 = vmatprep.subr.bf16.mxu0 %v15039_v17  ;;  %v1739_v17 = vrot.slane %v1548_v8, 2 }
  0x53   :  { %12155 = vmatmul.mubr.msk.bf16.gmra.mrb[24].mxu0 %vm188_vm2, %v15121_v49  ;;  %v1740_v20 = vor.u32 %v1739_v17, %v1738_v6  ;;  %v21373_v49 = vlaneseq  ;;  %v13552_v6 = vld [vmem:[%s21365_s3 + $0x188] ss:$8 sps:$4 sm:$0xff]  }
  0x54   :  { %1710 = vmatprep.mubr.bf16.mxu0 %v21374_v1 }
  0x55   :  { %v15288_v55 = vshrl.u32 %v21373_v49, 7 }
  0x57   :  { %21426 = vst [vmem:[#allocation6_spill] sm:$0xff] %v15288_v55  ;;  %v15297_v0 = vsub.s32 0, %v15288_v55  ;;  %v15300_v3 = vsub.s32 1, %v15288_v55 }
  0x59   :  { %21427 = vst [vmem:[#allocation7_spill] sm:$0xff] %v15297_v0  ;;  %21428 = vst [vmem:[#allocation8_spill] sm:$0xff] %v15300_v3  ;;  %v15312_v17 = vrot.slane %v146_v61, %v15300_v3  ;;  %v15669_v3 = vld [vmem:[%s21365_s3 + $0x200] ss:$8 sps:$4 sm:$0xff]  }
  0x5b   :  { %12157 = vmatmul.mubr.msk.bf16.vlgmr.msra.gmra.mrb[16].mxu0 %vm188_vm2, %v1671_v4  ;;  %v15306_v4 = vrot.slane %v146_v61, %v15297_v0  ;;  %21430 = vst [vmem:[#allocation10_spill] sm:$0xff] %v15312_v17  ;;  %v13561_v61 = vld [vmem:[%s21365_s3 + $0x1b8] ss:$8 sps:$4 sm:$0xff]  }
  0x5c   :  { %1749 = vmatpush1.bf16.msra.mxu0 %v15046_v18  ;;  %1720 = vmatprep.mubr.bf16.mxu0 %v21374_v1  ;;  %v1741_v18 = vsel %vm425_vm4, %v1737_v19, %v1740_v20  ;;  %v13553_v19 = vld [vmem:[%s21365_s3 + $0x19c] ss:$8 sps:$4 sm:$0xff]  }
  0x5d   :  { %12159 = vmatprep.subr.msk.bf16.mxu0 %vm195_vm0, %v15064_v28  ;;  %v13531_v28 = vld [vmem:[%s21365_s3 + $0x118] ss:$8 sps:$4 sm:$0xff]   ;;  %21429 = vst [vmem:[#allocation9_spill] sm:$0xff] %v15306_v4 }
  0x5e   :  { %879 = vmatpush1.bf16.msra.mxu1 %v13531_v28 }
  0x5f   :  { %880 = vmatprep.subr.bf16.mxu1 %v13532_v29 }
  0x60   :  { %1751 = vmatpush1.bf16.msra.mxu0 %v15089_v35 }
  0x61   :  { %1814 = vmatprep.subr.bf16.mxu0 %v15094_v36 }
  0x62   :  { %881 = vmatpush1.bf16.msra.mxu1 %v13534_v30 }
  0x63   :  { %12158 = vmatmul.mubr.msk.bf16.gmra.mrb[28].mxu0 %vm188_vm2, %v1670_v12  ;;  %882 = vmatprep.subr.bf16.mxu1 %v13535_v32 }
  0x64   :  { %1780 = vmatprep.mubr.bf16.mxu0 %v21374_v1 }
  0x66   :  { %883 = vmatpush1.bf16.msra.mxu1 %v13537_v38 }
  0x67   :  { %884 = vmatprep.subr.bf16.mxu1 %v13538_v40 }
  0x6a   :  { %885 = vmatpush1.bf16.msra.mxu1 %v13540_v42 }
  0x6b   :  { %12160 = vmatmul.mubr.msk.bf16.vlgmr.msra.gmra.mrb[16].mxu0 %vm188_vm2, %v1741_v18  ;;  %886 = vmatprep.subr.bf16.mxu1 %v13541_v45 }
  0x6c   :  { %1815 = vmatpush1.bf16.msra.mxu0 %v15139_v56  ;;  %1790 = vmatprep.mubr.bf16.mxu0 %v21374_v1 }
  0x6d   :  { %12162 = vmatprep.subr.msk.bf16.mxu0 %vm195_vm0, %v15144_v57 }
  0x6e   :  { %887 = vmatpush1.bf16.msra.mxu1 %v13543_v46 }
  0x6f   :  { %888 = vmatprep.subr.bf16.mxu1 %v13544_v47 }
  0x70   :  { %1817 = vmatpush1.bf16.msra.mxu0 %v15155_v59 }
  0x71   :  { %1966 = vmatprep.subr.bf16.mxu0 %v13520_v21 }
  0x72   :  { %889 = vmatpush1.bf16.msra.mxu1 %v13546_v52 }
  0x73   :  { %12161 = vmatmul.mubr.msk.bf16.gmra.mrb[32].mxu0 %vm188_vm2, %v1740_v20 }
  0x74   :  { %1846 = vmatprep.mubr.bf16.mxu0 %v21374_v1 }
  0x7b   :  { %12163 = vmatmul.mubr.msk.bf16.vlgmr.msra.gmra.mrb[16].mxu0 %vm188_vm2, %v15132_v54  ;;  %v13547_v54 = vld [vmem:[%s21365_s3 + $0x17c] ss:$8 sps:$4 sm:$0xff]  }
  0x7c   :  { %1856 = vmatprep.mubr.bf16.mxu0 %v21374_v1  ;;  %1967 = vmatpush1.bf16.msra.mxu0 %v13522_v22  ;;  %v15658_v1 = vld [vmem:[%s21365_s3 + $0x204] ss:$8 sps:$4 sm:$0xff]  }
  0x7d   :  { %1968 = vmatprep.subr.bf16.mxu0 %v13523_v23  ;;  %890 = vmatprep.subr.bf16.mxu1 %v13547_v54 }
  0x7e   :  { %891 = vmatpush1.bf16.msra.mxu1 %v13549_v58 }
  0x7f   :  { %892 = vmatprep.subr.bf16.mxu1 %v13550_v9 }
  0x80   :  { %1969 = vmatpush1.bf16.msra.mxu0 %v13525_v24 }
  0x81   :  { %1970 = vmatprep.subr.bf16.mxu0 %v13526_v25 }
  0x82   :  { %893 = vmatpush1.bf16.msra.mxu1 %v13552_v6 }
  0x83   :  { %12164 = vmatmul.mubr.msk.bf16.gmra.mrb[36].mxu0 %vm188_vm2, %v1806_v53  ;;  %894 = vmatprep.subr.bf16.mxu1 %v13553_v19 }
  0x84   :  { %1971 = vmatpush1.bf16.msra.mxu0 %v13528_v26 }
  0x85   :  { %1972 = vmatprep.subr.bf16.mxu0 %v13529_v27 }
  0x88   :  { %1973 = vmatpush1.bf16.msra.mxu0 %v13531_v28 }
  0x89   :  { %1974 = vmatprep.subr.bf16.mxu0 %v13532_v29 }
  0x8c   :  { %1975 = vmatpush1.bf16.msra.mxu0 %v13534_v30 }
  0x8d   :  { %1976 = vmatprep.subr.bf16.mxu0 %v13535_v32 }
  0x90   :  { %1977 = vmatpush1.bf16.msra.mxu0 %v13537_v38 }
  0x91   :  { %1978 = vmatprep.subr.bf16.mxu0 %v13538_v40 }
  0x94   :  { %1979 = vmatpush1.bf16.msra.mxu0 %v13540_v42 }
  0x95   :  { %1980 = vmatprep.subr.bf16.mxu0 %v13541_v45 }
  0x98   :  { %1981 = vmatpush1.bf16.msra.mxu0 %v13543_v46 }
  0x99   :  { %1982 = vmatprep.subr.bf16.mxu0 %v13544_v47 }
  0x9c   :  { %1983 = vmatpush1.bf16.msra.mxu0 %v13546_v52 }
  0x9d   :  { %1984 = vmatprep.subr.bf16.mxu0 %v13547_v54 }
  0xa0   :  { %1985 = vmatpush1.bf16.msra.mxu0 %v13549_v58 }
  0xa1   :  { %1986 = vmatprep.subr.bf16.mxu0 %v13550_v9 }
  0xa4   :  { %1987 = vmatpush1.bf16.msra.mxu0 %v13552_v6 }
  0xa5   :  { %1988 = vmatprep.subr.bf16.mxu0 %v13553_v19 }
  0xe6   :  { %v412_v31 = vpop.f32.mrb[4].mxu0 }
  0xe7   :  { %v414_v33 = vpop.f32.mrb[5].mxu0 }
  0xe8   :  { %v416_v34 = vpop.f32.mrb[6].mxu0  ;;  %v246_v37 = vpop.f32.mrb[4].mxu1 }
  0xe9   :  { %v417_v36 = vpop.f32.mrb[7].mxu0  ;;  %v248_v39 = vpop.f32.mrb[5].mxu1 }
  0xea   :  { %v250_v41 = vpop.f32.mrb[6].mxu1  ;;  %v13556_v36 = vld [vmem:[%s21365_s3 + $0x1ac] ss:$8 sps:$4 sm:$0xff]  }
  0xeb   :  { %v251_v44 = vpop.f32.mrb[7].mxu1 }
  0xf0   :  { %v315_v48 = vpop.f32.mrb[0].mxu1 }
  0xf1   :  { %v317_v50 = vpop.f32.mrb[1].mxu1 }
  0xf2   :  { %v319_v51 = vpop.f32.mrb[2].mxu1 }
  0xf3   :  { %v321_v53 = vpop.f32.mrb[3].mxu1 }
  0xf6   :  { %v507_v56 = vpop.f32.mrb[8].mxu0 }
  0xf7   :  { %v509_v57 = vpop.f32.mrb[9].mxu0 }
  0xf8   :  { %v511_v60 = vpop.f32.mrb[10].mxu0  ;;  %v325_v62 = vpop.f32.mrb[8].mxu1 }
  0xf9   :  { %v512_v63 = vpop.f32.mrb[11].mxu0  ;;  %v326_v7 = vadd.f32 %v325_v62, %v246_v37  ;;  %v327_v8 = vpop.f32.mrb[9].mxu1  ;;  %v13558_v37 = vld [vmem:[%s21365_s3 + $0x1a8] ss:$8 sps:$4 sm:$0xff]  }
  0xfa   :  { %v328_v10 = vadd.f32 %v327_v8, %v248_v39  ;;  %v329_v5 = vpop.f32.mrb[10].mxu1  ;;  %v11982_v8 = vld [vmem:[%s21365_s3 + $0x1c8] sm:$0x77] }
  0xfb   :  { %v423_v11 = vadd.f32 %v412_v31, %v326_v7  ;;  %v330_v2 = vpop.f32.mrb[11].mxu1  ;;  %v13555_v31 = vld [vmem:[%s21365_s3 + $0x198] ss:$8 sps:$4 sm:$0xff]   ;;  %v12075_v5 = vcombine.low %v11982_v8, %v11982_v8 }
  0xfc   :  { %v424_v12 = vadd.f32 %v414_v33, %v328_v10  ;;  %895 = vmatpush1.bf16.msra.mxu1 %v13555_v31  ;;  %1989 = vmatpush1.bf16.msra.mxu0 %v13555_v31  ;;  %v15349_v10 = vcombine.high %v11982_v8, %v11982_v8 }
  0xfd   :  { %v518_v15 = vadd.f32 %v507_v56, %v423_v11  ;;  %896 = vmatprep.subr.bf16.mxu1 %v13556_v36  ;;  %1990 = vmatprep.subr.bf16.mxu0 %v13556_v36 }
  0xfe   :  { %v588_v16 = vpop.f32.mrb[0].mxu0  ;;  %v519_v20 = vadd.f32 %v509_v57, %v424_v12  ;;  %v13559_v57 = vld [vmem:[%s21365_s3 + $0x1bc] ss:$8 sps:$4 sm:$0xff]   ;;  %21431 = vst [vmem:[#allocation11_spill] sm:$0xff] %v15349_v10 }
  0xff   :  { %v13097_v18 = vadd.f32 %v588_v16, %v315_v48  ;;  %v590_v21 = vpop.f32.mrb[1].mxu0  ;;  %v15363_v16 = vsel %vm865_vm5, %v12075_v5, 0 }
 0x100   :  { %v13098_v22 = vadd.f32 %v590_v21, %v317_v50  ;;  %v592_v23 = vpop.f32.mrb[2].mxu0  ;;  %897 = vmatpush1.bf16.msra.mxu1 %v13558_v37  ;;  %1991 = vmatpush1.bf16.msra.mxu0 %v13558_v37  ;;  %21432 = vst [vmem:[#allocation12_spill] sm:$0xff] %v15363_v16 }
 0x101   :  { %v622_v24 = vadd.f32 %v13097_v18, %v15306_v4  ;;  %v13099_v25 = vadd.f32 %v592_v23, %v319_v51  ;;  %v594_v26 = vpop.f32.mrb[3].mxu0  ;;  %898 = vmatprep.subr.bf16.mxu1 %v13559_v57  ;;  %1992 = vmatprep.subr.bf16.mxu0 %v13559_v57 }
 0x102   :  { %v623_v27 = vadd.f32 %v13098_v22, %v15312_v17  ;;  %v13100_v28 = vadd.f32 %v594_v26, %v321_v53 }
 0x103   :  { %v628_v29 = vmax.f32 %v622_v24, 0.0  ;;  %v624_v30 = vadd.f32 %v13099_v25, %v15306_v4 }
 0x104   :  { %v629_v32 = vmax.f32 %v623_v27, 0.0  ;;  %v625_v33 = vadd.f32 %v13100_v28, %v15312_v17  ;;  %899 = vmatpush1.bf16.msra.mxu1 %v13561_v61  ;;  %1993 = vmatpush1.bf16.msra.mxu0 %v13561_v61 }
 0x105   :  { %v630_v34 = vmax.f32 %v624_v30, 0.0  ;;  %v641_v40 = vrot.slane %v628_v29, 1  ;;  %12077 = vmatprep.subr.msk.bf16.mxu1 %vm865_vm5, %v15349_v10  ;;  %12165 = vmatprep.subr.msk.bf16.mxu0 %vm865_vm5, %v15349_v10 }
 0x106   :  { %v631_v38 = vmax.f32 %v625_v33, 0.0  ;;  %v598_v39 = vpop.f32.mrb[12].mxu0  ;;  %v644_v45 = vrot.slane %v629_v32, 1 }
 0x107   :  { %v642_v41 = vrot.slane %v630_v34, 1  ;;  %v609_v42 = vadd.f32 %v598_v39, %v518_v15  ;;  %v600_v44 = vpop.f32.mrb[13].mxu0 }
 0x108   :  { %v645_v46 = vrot.slane %v631_v38, 1  ;;  %v610_v47 = vadd.f32 %v600_v44, %v519_v20  ;;  %v602_v48 = vpop.f32.mrb[14].mxu0  ;;  %901 = vmatpush1.bf16.msra.mxu1 %v15363_v16  ;;  %v15373_v20 = vld [vmem:[%s21365_s3 + $0x4] ss:$8 sps:$4 sm:$0xff]   ;;  %1995 = vmatpush1.bf16.msra.mxu0 %v15363_v16 }
 0x109   :  { %v626_v50 = vadd.f32 %v15306_v4, %v609_v42  ;;  %v603_v51 = vpop.f32.mrb[15].mxu0  ;;  %v643_v52 = vsel %vm334_vm1, %v641_v40, %v642_v41  ;;  %21433 = vst [vmem:[#allocation13_spill] sm:$0xff] %v15373_v20  ;;  %1080 = vmatprep.subr.bf16.mxu1 %v15373_v20  ;;  %2023 = vmatprep.subr.bf16.mxu0 %v15373_v20 }
 0x10a   :  { %v627_v53 = vadd.f32 %v15312_v17, %v610_v47  ;;  %v646_v54 = vsel %vm334_vm1, %v644_v45, %v645_v46  ;;  %v15334_v56 = vmax.f32 %v628_v29, %v643_v52 }
 0x10b   :  { %v632_v58 = vmax.f32 %v626_v50, 0.0  ;;  %v15339_v60 = vmax.f32 %v629_v32, %v646_v54 }
 0x10c   :  { %v633_v62 = vmax.f32 %v627_v53, 0.0 }
 0x10d   :  { %v647_v63 = vrot.slane %v632_v58, 1  ;;  %v13370_v7 = vpack.i.bf16 %v15339_v60, %v15334_v56 }
 0x10e   :  { %v649_v9 = vrot.slane %v633_v62, 1 }
 0x10f   :  { %13371 = vrot.lane.b32.xlu0 %v13370_v7, %s14914_s19  ;;  %v15352_v11 = vmax.f32 %v632_v58, %v647_v63  ;;  %v648_v2 = vsel %vm334_vm1, %v642_v41, %v647_v63 }
 0x110   :  { %v15355_v12 = vmax.f32 %v633_v62, %v649_v9  ;;  %v650_v6 = vsel %vm334_vm1, %v645_v46, %v649_v9  ;;  %v15358_v15 = vmax.f32 %v630_v34, %v648_v2 }
 0x111   :  { %v15367_v19 = vmax.f32 %v631_v38, %v650_v6 }
 0x112   :  { %v13375_v18 = vpack.i.bf16 %v15355_v12, %v15352_v11 }
 0x113   :  { %v13380_v21 = vpack.i.bf16 %v15367_v19, %v15358_v15 }
 0x114   :  { %13376 = vrot.lane.b32.xlu1 %v13375_v18, %s14914_s19 }
 0x115   :  { %13381 = vrot.lane.b32.xlu0 %v13380_v21, %s14914_s19 }
 0x116   :  { %v1605_v22 = vpop.f32.mrb[20].mxu0 }
 0x117   :  { %v1607_v23 = vpop.f32.mrb[21].mxu0 }
 0x118   :  { %v1609_v24 = vpop.f32.mrb[22].mxu0 }
 0x119   :  { %v1610_v25 = vpop.f32.mrb[23].mxu0 }
 0x126   :  { %v1660_v26 = vpop.f32.mrb[24].mxu0 }
 0x127   :  { %v1661_v27 = vadd.f32 %v1660_v26, %v1605_v22  ;;  %v1662_v28 = vpop.f32.mrb[25].mxu0 }
 0x128   :  { %v1663_v29 = vadd.f32 %v1662_v28, %v1607_v23  ;;  %v1664_v30 = vpop.f32.mrb[26].mxu0 }
 0x129   :  { %v1665_v31 = vpop.f32.mrb[27].mxu0 }
 0x136   :  { %v1722_v32 = vpop.f32.mrb[28].mxu0 }
 0x137   :  { %v1733_v33 = vadd.f32 %v1722_v32, %v1661_v27  ;;  %v1724_v34 = vpop.f32.mrb[29].mxu0 }
 0x138   :  { %v1734_v36 = vadd.f32 %v1724_v34, %v1663_v29  ;;  %v1726_v37 = vpop.f32.mrb[30].mxu0 }
 0x139   :  { %v1727_v38 = vpop.f32.mrb[31].mxu0 }
 0x146   :  { %v1792_v39 = vpop.f32.mrb[32].mxu0 }
 0x147   :  { %v1803_v40 = vadd.f32 %v1792_v39, %v1733_v33  ;;  %v1794_v41 = vpop.f32.mrb[33].mxu0 }
 0x148   :  { %v1804_v42 = vadd.f32 %v1794_v41, %v1734_v36  ;;  %v1796_v44 = vpop.f32.mrb[34].mxu0 }
 0x149   :  { %v1797_v45 = vpop.f32.mrb[35].mxu0 }
 0x14e   :  { %v1848_v46 = vpop.f32.mrb[16].mxu0 }
 0x14f   :  { %v1871_v47 = vadd.f32 %v1848_v46, %v15306_v4  ;;  %v1850_v48 = vpop.f32.mrb[17].mxu0 }
 0x150   :  { %v1872_v50 = vadd.f32 %v1850_v48, %v15312_v17  ;;  %v1852_v51 = vpop.f32.mrb[18].mxu0 }
 0x151   :  { %v1877_v52 = vmax.f32 %v1871_v47, 0.0  ;;  %v1873_v53 = vadd.f32 %v1852_v51, %v15306_v4  ;;  %v1854_v54 = vpop.f32.mrb[19].mxu0 }
 0x152   :  { %v1878_v57 = vmax.f32 %v1872_v50, 0.0  ;;  %v1874_v58 = vadd.f32 %v1854_v54, %v15312_v17 }
 0x153   :  { %v1879_v61 = vmax.f32 %v1873_v53, 0.0  ;;  %v1889_v63 = vrot.slane %v1877_v52, 1 }
 0x154   :  { %v1880_v62 = vmax.f32 %v1874_v58, 0.0  ;;  %v1892_v8 = vrot.slane %v1878_v57, 1 }
 0x155   :  { %v1890_v7 = vrot.slane %v1879_v61, 1 }
 0x156   :  { %v1893_v9 = vrot.slane %v1880_v62, 1  ;;  %v1858_v5 = vpop.f32.mrb[36].mxu0 }
 0x157   :  { %v1869_v2 = vadd.f32 %v1858_v5, %v1803_v40  ;;  %v1860_v6 = vpop.f32.mrb[37].mxu0  ;;  %v1891_v18 = vsel %vm334_vm1, %v1889_v63, %v1890_v7 }
 0x158   :  { %v1870_v21 = vadd.f32 %v1860_v6, %v1804_v42  ;;  %v1862_v22 = vpop.f32.mrb[38].mxu0  ;;  %v1894_v23 = vsel %vm334_vm1, %v1892_v8, %v1893_v9  ;;  %v15390_v24 = vmax.f32 %v1877_v52, %v1891_v18 }
 0x159   :  { %v1875_v25 = vadd.f32 %v1869_v2, %v15306_v4  ;;  %v1863_v26 = vpop.f32.mrb[39].mxu0  ;;  %v15393_v27 = vmax.f32 %v1878_v57, %v1894_v23  ;;  %v15454_v23 = vld [vmem:[%s21365_s3 + $0x10] ss:$8 sps:$4 sm:$0xff]  }
 0x15a   :  { %v1876_v28 = vadd.f32 %v1870_v21, %v15312_v17  ;;  %v15445_v21 = vld [vmem:[%s21365_s3 + $0x14] ss:$8 sps:$4 sm:$0xff]   ;;  %v15466_v26 = vld [vmem:[%s21365_s3 + $0x20] ss:$8 sps:$4 sm:$0xff]  }
 0x15b   :  { %v1881_v29 = vmax.f32 %v1875_v25, 0.0  ;;  %v13385_v30 = vpack.i.bf16 %v15393_v27, %v15390_v24  ;;  %v15460_v25 = vld [vmem:[%s21365_s3 + $0x24] ss:$8 sps:$4 sm:$0xff]  }
 0x15c   :  { %v1882_v31 = vmax.f32 %v1876_v28, 0.0  ;;  %v15472_v28 = vld [vmem:[%s21365_s3 + $0x34] ss:$8 sps:$4 sm:$0xff]  }
 0x15d   :  { %v1895_v32 = vrot.slane %v1881_v29, 1  ;;  %13386 = vrot.lane.b32.xlu1 %v13385_v30, %s14914_s19  ;;  %v15486_v30 = vld [vmem:[%s21365_s3 + $0x44] ss:$8 sps:$4 sm:$0xff]  }
 0x15e   :  { %v1897_v33 = vrot.slane %v1882_v31, 1 }
 0x15f   :  { %v15399_v34 = vmax.f32 %v1881_v29, %v1895_v32  ;;  %v1896_v36 = vsel %vm334_vm1, %v1890_v7, %v1895_v32  ;;  %v15480_v29 = vld [vmem:[%s21365_s3 + $0x30] ss:$8 sps:$4 sm:$0xff]   ;;  %v15498_v32 = vld [vmem:[%s21365_s3 + $0x54] ss:$8 sps:$4 sm:$0xff]  }
 0x160   :  { %v15402_v37 = vmax.f32 %v1882_v31, %v1897_v33  ;;  %v1898_v38 = vsel %vm334_vm1, %v1893_v9, %v1897_v33  ;;  %v15405_v39 = vmax.f32 %v1879_v61, %v1896_v36  ;;  %v15492_v31 = vld [vmem:[%s21365_s3 + $0x40] ss:$8 sps:$4 sm:$0xff]   ;;  %v15504_v33 = vld [vmem:[%s21365_s3 + $0x50] ss:$8 sps:$4 sm:$0xff]   ;;  %v15510_v36 = vld [vmem:[%s21365_s3 + $0x64] ss:$8 sps:$4 sm:$0xff]  }
 0x161   :  { %v15407_v40 = vmax.f32 %v1880_v62, %v1898_v38  ;;  %v15516_v38 = vld [vmem:[%s21365_s3 + $0x60] ss:$8 sps:$4 sm:$0xff]  }
 0x162   :  { %v13395_v41 = vpack.i.bf16 %v15402_v37, %v15399_v34 }
 0x163   :  { %v13390_v42 = vpack.i.bf16 %v15407_v40, %v15405_v39 }
 0x164   :  { %13396 = vrot.lane.b32.xlu1 %v13395_v41, %s14914_s19  ;;  %v15522_v41 = vld [vmem:[%s21365_s3 + $0x74] ss:$8 sps:$4 sm:$0xff]  }
 0x165   :  { %13391 = vrot.lane.b32.xlu0 %v13390_v42, %s14914_s19  ;;  %v15528_v42 = vld [vmem:[%s21365_s3 + $0x70] ss:$8 sps:$4 sm:$0xff]  }
 0x181   :  { %v13372_v44 = vpop.permute.xlu0 %13371 }
 0x182   :  { %v13374_v45 = vunpack.i.h.bf16 %v13372_v44  ;;  %v13373_v46 = vunpack.i.l.bf16 %v13372_v44  ;;  %v15534_v44 = vld [vmem:[%s21365_s3 + $0x84] ss:$8 sps:$4 sm:$0xff]  }
 0x184   :  { %v682_v52 = vsel %vm681_vm6, %v13373_v46, %v13374_v45  ;;  %v692_v61 = vmax.f32 %v15339_v60, %v13374_v45  ;;  %v15540_v45 = vld [vmem:[%s21365_s3 + $0x80] ss:$8 sps:$4 sm:$0xff]   ;;  %v15546_v46 = vld [vmem:[%s21365_s3 + $0x94] ss:$8 sps:$4 sm:$0xff]  }
 0x185   :  { %v691_v8 = vmax.f32 %v15334_v56, %v682_v52  ;;  %v15439_v56 = vld [vmem:[%s21365_s3] ss:$8 sps:$4 sm:$0xff]   ;;  %v15576_v52 = vld [vmem:[%s21365_s3 + $0xb0] ss:$8 sps:$4 sm:$0xff]  }
 0x186   :  { %v13377_v47 = vpop.permute.xlu1 %13376 }
 0x187   :  { %v13379_v48 = vunpack.i.h.bf16 %v13377_v47  ;;  %v13378_v50 = vunpack.i.l.bf16 %v13377_v47  ;;  %v13382_v51 = vpop.permute.xlu0 %13381  ;;  %v15552_v47 = vld [vmem:[%s21365_s3 + $0x90] ss:$8 sps:$4 sm:$0xff]  }
 0x188   :  { %v13384_v53 = vunpack.i.h.bf16 %v13382_v51  ;;  %v13383_v54 = vunpack.i.l.bf16 %v13382_v51  ;;  %v15570_v51 = vld [vmem:[%s21365_s3 + $0xb4] ss:$8 sps:$4 sm:$0xff]  }
 0x189   :  { %v696_v57 = vmax.f32 %v15355_v12, %v13379_v48  ;;  %v684_v58 = vsel %vm681_vm6, %v13378_v50, %v13379_v48  ;;  %v15558_v48 = vld [vmem:[%s21365_s3 + $0xa4] ss:$8 sps:$4 sm:$0xff]   ;;  %v15564_v50 = vld [vmem:[%s21365_s3 + $0xa0] ss:$8 sps:$4 sm:$0xff]  }
 0x18a   :  { %v695_v62 = vmax.f32 %v15352_v11, %v684_v58  ;;  %v694_v63 = vmax.f32 %v15367_v19, %v13384_v53  ;;  %v683_v7 = vsel %vm681_vm6, %v13383_v54, %v13384_v53  ;;  %v15582_v53 = vld [vmem:[%s21365_s3 + $0xc4] ss:$8 sps:$4 sm:$0xff]   ;;  %v15588_v54 = vld [vmem:[%s21365_s3 + $0xc0] ss:$8 sps:$4 sm:$0xff]  }
 0x18b   :  { %v15423_v9 = vpack.c.bf16 %v696_v57, %v696_v57  ;;  %v693_v5 = vmax.f32 %v15358_v15, %v683_v7  ;;  %v15594_v57 = vld [vmem:[%s21365_s3 + $0xd4] ss:$8 sps:$4 sm:$0xff]   ;;  %v85_v58 = vld [vmem:[%s21365_s3 + $0xe0] sm:$0x77] }
 0x18c   :  { %v15426_v2 = vpack.c.bf16 %v695_v62, %v695_v62  ;;  %v15428_v6 = vpack.c.bf16 %v694_v63, %v692_v61  ;;  %v15603_v61 = vld [vmem:[%s21365_s3 + $0xd0] ss:$8 sps:$4 sm:$0xff]   ;;  %v15606_v62 = vcombine.high %v85_v58, %v85_v58  ;;  %v12108_v63 = vcombine.low %v85_v58, %v85_v58 }
 0x18d   :  { %v15430_v12 = vpack.c.bf16 %v693_v5, %v691_v8  ;;  %v709_v60 = vrot.slane %v15423_v9, 1  ;;  %v15617_v8 = vld [vmem:[%s21365_s3 + $0x1d4] ss:$8 sps:$4 sm:$0xff]   ;;  %v15623_v5 = vld [vmem:[%s21365_s3 + $0x1d0] ss:$8 sps:$4 sm:$0xff]  }
 0x18e   :  { %v708_v11 = vrot.slane %v15428_v6, 1  ;;  %v706_v19 = vrot.slane %v15426_v2, 1  ;;  %v15612_v7 = vsel %vm865_vm5, %v12108_v63, 0  ;;  %v15652_v58 = vld [vmem:[%s21365_s3 + $0x1f0] ss:$8 sps:$4 sm:$0xff]  }
 0x18f   :  { %v705_v18 = vrot.slane %v15430_v12, 1 }
 0x190   :  { %v710_v15 = vsel %vm334_vm1, %v708_v11, %v709_v60  ;;  %v15638_v11 = vld [vmem:[%s21365_s3 + $0x1e0] ss:$8 sps:$4 sm:$0xff]  }
 0x191   :  { %12078 = vmatprep.mubr.msk.bf16.mxu1 %vm858_vm7, %v710_v15  ;;  %v707_v22 = vsel %vm334_vm1, %v705_v18, %v706_v19  ;;  %v1134_v15 = vrot.slane %v15428_v6, 2 }
 0x192   :  { %905 = vmatmul.mubr.bf16.vlgmr.msra.gmra.mrb[12].mxu1 %v707_v22  ;;  %v21389_v22 = vrot.slane %v15423_v9, 2 }
 0x193   :  { %1081 = vmatpush1.bf16.msra.mxu1 %v15439_v56  ;;  %12079 = vmatprep.mubr.msk.bf16.mxu1 %vm858_vm7, %v709_v60  ;;  %v15629_v60 = vld [vmem:[%s21365_s3 + $0x1e4] ss:$8 sps:$4 sm:$0xff]  }
 0x194   :  { %1082 = vmatprep.subr.bf16.mxu1 %v15445_v21  ;;  %v1136_v17 = vsel %vm195_vm0, %v1134_v15, %v21389_v22  ;;  %v15676_v15 = vld [vmem:[%s21365_s3 + $0x214] ss:$8 sps:$4 sm:$0xff]  }
 0x197   :  { %1083 = vmatpush1.bf16.msra.mxu1 %v15454_v23 }
 0x198   :  { %1084 = vmatprep.subr.bf16.mxu1 %v15460_v25 }
 0x19a   :  { %915 = vmatmul.mubr.bf16.gmra.mrb[16].mxu1 %v706_v19  ;;  %v15644_v19 = vld [vmem:[%s21365_s3 + $0x1f4] ss:$8 sps:$4 sm:$0xff]  }
 0x19b   :  { %1085 = vmatpush1.bf16.msra.mxu1 %v15466_v26  ;;  %12111 = vmatprep.mubr.msk.bf16.mxu1 %vm858_vm7, %v15428_v6 }
 0x19c   :  { %1086 = vmatprep.subr.bf16.mxu1 %v15472_v28 }
 0x19f   :  { %1087 = vmatpush1.bf16.msra.mxu1 %v15480_v29 }
 0x1a0   :  { %1088 = vmatprep.subr.bf16.mxu1 %v15486_v30 }
 0x1a3   :  { %1089 = vmatpush1.bf16.msra.mxu1 %v15492_v31 }
 0x1a4   :  { %1090 = vmatprep.subr.bf16.mxu1 %v15498_v32 }
 0x1a7   :  { %1091 = vmatpush1.bf16.msra.mxu1 %v15504_v33 }
 0x1a8   :  { %1092 = vmatprep.subr.bf16.mxu1 %v15510_v36 }
 0x1ab   :  { %1093 = vmatpush1.bf16.msra.mxu1 %v15516_v38 }
 0x1ac   :  { %1094 = vmatprep.subr.bf16.mxu1 %v15522_v41 }
 0x1af   :  { %1095 = vmatpush1.bf16.msra.mxu1 %v15528_v42 }
 0x1b0   :  { %1096 = vmatprep.subr.bf16.mxu1 %v15534_v44 }
 0x1b3   :  { %1097 = vmatpush1.bf16.msra.mxu1 %v15540_v45 }
 0x1b4   :  { %1098 = vmatprep.subr.bf16.mxu1 %v15546_v46 }
 0x1b7   :  { %1099 = vmatpush1.bf16.msra.mxu1 %v15552_v47 }
 0x1b8   :  { %1100 = vmatprep.subr.bf16.mxu1 %v15558_v48 }
 0x1bb   :  { %1101 = vmatpush1.bf16.msra.mxu1 %v15564_v50 }
 0x1bc   :  { %1102 = vmatprep.subr.bf16.mxu1 %v15570_v51 }
 0x1bf   :  { %1103 = vmatpush1.bf16.msra.mxu1 %v15576_v52 }
 0x1c0   :  { %1104 = vmatprep.subr.bf16.mxu1 %v15582_v53 }
 0x1c3   :  { %1105 = vmatpush1.bf16.msra.mxu1 %v15588_v54 }
 0x1c4   :  { %1106 = vmatprep.subr.bf16.mxu1 %v15594_v57 }
 0x1c7   :  { %1107 = vmatpush1.bf16.msra.mxu1 %v15603_v61 }
 0x1c8   :  { %12110 = vmatprep.subr.msk.bf16.mxu1 %vm865_vm5, %v15606_v62 }
 0x1cb   :  { %1109 = vmatpush1.bf16.msra.mxu1 %v15612_v7 }
 0x1cc   :  { %1296 = vmatprep.subr.bf16.mxu1 %v15617_v8 }
 0x1ce   :  { %1113 = vmatmul.mubr.bf16.vlgmr.msra.gmra.mrb[12].mxu1 %v15430_v12 }
 0x1cf   :  { %12112 = vmatprep.mubr.msk.bf16.mxu1 %vm858_vm7, %v15423_v9  ;;  %1297 = vmatpush1.bf16.msra.mxu1 %v15623_v5  ;;  %v13387_v18 = vpop.permute.xlu1 %13386 }
 0x1d0   :  { %1298 = vmatprep.subr.bf16.mxu1 %v15629_v60  ;;  %v13389_v63 = vunpack.i.h.bf16 %v13387_v18  ;;  %v13388_v49 = vunpack.i.l.bf16 %v13387_v18 }
 0x1d2   :  { %v1929_v0 = vsel %vm681_vm6, %v13388_v49, %v13389_v63  ;;  %v1939_v22 = vmax.f32 %v15393_v27, %v13389_v63  ;;  %v15752_v63 = vld [vmem:[%s21365_s3 + $0x254] ss:$8 sps:$4 sm:$0xff]  }
 0x1d3   :  { %1299 = vmatpush1.bf16.msra.mxu1 %v15638_v11 }
 0x1d4   :  { %1300 = vmatprep.subr.bf16.mxu1 %v15644_v19 }
 0x1d6   :  { %1123 = vmatmul.mubr.bf16.gmra.mrb[20].mxu1 %v15426_v2  ;;  %v13397_v6 = vpop.permute.xlu1 %13396 }
 0x1d7   :  { %v13399_v4 = vunpack.i.h.bf16 %v13397_v6  ;;  %v13398_v55 = vunpack.i.l.bf16 %v13397_v6  ;;  %1301 = vmatpush1.bf16.msra.mxu1 %v15652_v58  ;;  %12144 = vmatprep.mubr.msk.bf16.mxu1 %vm858_vm7, %v1136_v17  ;;  %v13392_v18 = vpop.permute.xlu0 %13391 }
 0x1d8   :  { %v13394_v20 = vunpack.i.h.bf16 %v13392_v18  ;;  %v13393_v16 = vunpack.i.l.bf16 %v13392_v18  ;;  %1302 = vmatprep.subr.bf16.mxu1 %v15658_v1  ;;  %v1938_v18 = vmax.f32 %v15390_v24, %v1929_v0  ;;  %v15702_v0 = vld [vmem:[%s21365_s3 + $0x224] ss:$8 sps:$4 sm:$0xff]  }
 0x1d9   :  { %v1943_v6 = vmax.f32 %v15402_v37, %v13399_v4  ;;  %v1931_v17 = vsel %vm681_vm6, %v13398_v55, %v13399_v4  ;;  %v15692_v55 = vld [vmem:[%s21365_s3 + $0x210] ss:$8 sps:$4 sm:$0xff]   ;;  %v15721_v37 = vld [vmem:[%s21365_s3 + $0x234] ss:$8 sps:$4 sm:$0xff]  }
 0x1da   :  { %v1942_v10 = vmax.f32 %v15399_v34, %v1931_v17  ;;  %v1941_v59 = vmax.f32 %v15407_v40, %v13394_v20  ;;  %v1930_v49 = vsel %vm681_vm6, %v13393_v16, %v13394_v20  ;;  %v15730_v40 = vld [vmem:[%s21365_s3 + $0x230] ss:$8 sps:$4 sm:$0xff]   ;;  %v12174_v17 = vld [vmem:[%s21364_s0 + $0x40] sm:$0xff] }
 0x1db   :  { %v15685_v35 = vpack.c.bf16 %v1943_v6, %v1943_v6  ;;  %v1940_v14 = vmax.f32 %v15405_v39, %v1930_v49  ;;  %1303 = vmatpush1.bf16.msra.mxu1 %v15669_v3  ;;  %v1131_v49 = vrot.slane %v15430_v12, 2  ;;  %v12176_v12 = vld [vmem:[%s21364_s0 + $0x50] sm:$0xff] }
 0x1dc   :  { %v15694_v4 = vpack.c.bf16 %v1942_v10, %v1942_v10  ;;  %v15696_v27 = vpack.c.bf16 %v1941_v59, %v1939_v22  ;;  %1304 = vmatprep.subr.bf16.mxu1 %v15676_v15  ;;  %v15713_v59 = vld [vmem:[%s21365_s3 + $0x220] ss:$8 sps:$4 sm:$0xff]   ;;  %v15737_v22 = vld [vmem:[%s21365_s3 + $0x244] ss:$8 sps:$4 sm:$0xff]  }
 0x1dd   :  { %v15704_v16 = vpack.c.bf16 %v1940_v14, %v1938_v18  ;;  %v1956_v20 = vrot.slane %v15685_v35, 1  ;;  %v15864_v18 = vld [vmem:[%s21363_s1 + $0x24] ss:$8 sps:$4 sm:$0xff]  }
 0x1de   :  { %v1955_v24 = vrot.slane %v15696_v27, 1  ;;  %v1953_v34 = vrot.slane %v15694_v4, 1 }
 0x1df   :  { %1305 = vmatpush1.bf16.msra.mxu1 %v15692_v55  ;;  %v1952_v10 = vrot.slane %v15704_v16, 1 }
 0x1e0   :  { %1306 = vmatprep.subr.bf16.mxu1 %v15702_v0  ;;  %v1957_v14 = vsel %vm334_vm1, %v1955_v24, %v1956_v20 }
 0x1e1   :  { %12166 = vmatprep.mubr.msk.bf16.mxu0 %vm858_vm7, %v1957_v14  ;;  %v1954_v39 = vsel %vm334_vm1, %v1952_v10, %v1953_v34  ;;  %v15905_v14 = vld [vmem:[%s21363_s1 + $0x4] ss:$8 sps:$4 sm:$0xff]  }
 0x1e2   :  { %1999 = vmatmul.mubr.bf16.vlgmr.msra.gmra.mrb[40].mxu0 %v1954_v39 }
 0x1e3   :  { %1307 = vmatpush1.bf16.msra.mxu1 %v15713_v59  ;;  %2024 = vmatpush1.bf16.msra.mxu0 %v15439_v56  ;;  %v15745_v56 = vld [vmem:[%s21365_s3 + $0x240] ss:$8 sps:$4 sm:$0xff]  }
 0x1e4   :  { %12167 = vmatprep.mubr.msk.bf16.mxu0 %vm858_vm7, %v1956_v20  ;;  %1308 = vmatprep.subr.bf16.mxu1 %v15721_v37 }
 0x1e5   :  { %2025 = vmatprep.subr.bf16.mxu0 %v15445_v21  ;;  %v15759_v21 = vld [vmem:[%s21365_s3 + $0x250] ss:$8 sps:$4 sm:$0xff]  }
 0x1e7   :  { %1309 = vmatpush1.bf16.msra.mxu1 %v15730_v40  ;;  %2026 = vmatpush1.bf16.msra.mxu0 %v15454_v23  ;;  %v15767_v23 = vld [vmem:[%s21365_s3 + $0x264] ss:$8 sps:$4 sm:$0xff]  }
 0x1e8   :  { %1310 = vmatprep.subr.bf16.mxu1 %v15737_v22  ;;  %2027 = vmatprep.subr.bf16.mxu0 %v15460_v25  ;;  %v15775_v25 = vld [vmem:[%s21365_s3 + $0x260] ss:$8 sps:$4 sm:$0xff]  }
 0x1ea   :  { %2009 = vmatmul.mubr.bf16.gmra.mrb[44].mxu0 %v1953_v34  ;;  %v15885_v34 = vld [vmem:[%s21363_s1 + $0x20] ss:$8 sps:$4 sm:$0xff]  }
 0x1eb   :  { %1311 = vmatpush1.bf16.msra.mxu1 %v15745_v56  ;;  %2028 = vmatpush1.bf16.msra.mxu0 %v15466_v26  ;;  %v15782_v26 = vld [vmem:[%s21365_s3 + $0x274] ss:$8 sps:$4 sm:$0xff]  }
 0x1ec   :  { %12169 = vmatprep.mubr.msk.bf16.mxu0 %vm858_vm7, %v15696_v27  ;;  %1312 = vmatprep.subr.bf16.mxu1 %v15752_v63 }
 0x1ed   :  { %2029 = vmatprep.subr.bf16.mxu0 %v15472_v28  ;;  %v15789_v28 = vld [vmem:[%s21365_s3 + $0x270] ss:$8 sps:$4 sm:$0xff]  }
 0x1ef   :  { %1313 = vmatpush1.bf16.msra.mxu1 %v15759_v21  ;;  %2030 = vmatpush1.bf16.msra.mxu0 %v15480_v29  ;;  %v15796_v29 = vld [vmem:[%s21365_s3 + $0x284] ss:$8 sps:$4 sm:$0xff]  }
 0x1f0   :  { %1314 = vmatprep.subr.bf16.mxu1 %v15767_v23  ;;  %2031 = vmatprep.subr.bf16.mxu0 %v15486_v30  ;;  %v15803_v30 = vld [vmem:[%s21365_s3 + $0x280] ss:$8 sps:$4 sm:$0xff]  }
 0x1f3   :  { %1315 = vmatpush1.bf16.msra.mxu1 %v15775_v25  ;;  %2032 = vmatpush1.bf16.msra.mxu0 %v15492_v31  ;;  %v15810_v31 = vld [vmem:[%s21365_s3 + $0x294] ss:$8 sps:$4 sm:$0xff]  }
 0x1f4   :  { %1316 = vmatprep.subr.bf16.mxu1 %v15782_v26  ;;  %2033 = vmatprep.subr.bf16.mxu0 %v15498_v32  ;;  %v15817_v32 = vld [vmem:[%s21365_s3 + $0x290] ss:$8 sps:$4 sm:$0xff]  }
 0x1f7   :  { %1317 = vmatpush1.bf16.msra.mxu1 %v15789_v28  ;;  %2034 = vmatpush1.bf16.msra.mxu0 %v15504_v33  ;;  %v15824_v33 = vld [vmem:[%s21365_s3 + $0x2a4] ss:$8 sps:$4 sm:$0xff]  }
 0x1f8   :  { %1318 = vmatprep.subr.bf16.mxu1 %v15796_v29  ;;  %2035 = vmatprep.subr.bf16.mxu0 %v15510_v36  ;;  %v12011_v36 = vld [vmem:[%s21365_s3 + $0x2b0] sm:$0x77] }
 0x1f9   :  { %v12141_v6 = vcombine.low %v12011_v36, %v12011_v36 }
 0x1fb   :  { %1319 = vmatpush1.bf16.msra.mxu1 %v15803_v30  ;;  %2036 = vmatpush1.bf16.msra.mxu0 %v15516_v38  ;;  %v15834_v38 = vld [vmem:[%s21365_s3 + $0x2a0] ss:$8 sps:$4 sm:$0xff]  }
 0x1fc   :  { %1320 = vmatprep.subr.bf16.mxu1 %v15810_v31  ;;  %2037 = vmatprep.subr.bf16.mxu0 %v15522_v41  ;;  %v15838_v41 = vcombine.high %v12011_v36, %v12011_v36 }
 0x1ff   :  { %1321 = vmatpush1.bf16.msra.mxu1 %v15817_v32  ;;  %2038 = vmatpush1.bf16.msra.mxu0 %v15528_v42  ;;  %v15846_v42 = vsel %vm865_vm5, %v12141_v6, 0 }
 0x200   :  { %1322 = vmatprep.subr.bf16.mxu1 %v15824_v33  ;;  %2039 = vmatprep.subr.bf16.mxu0 %v15534_v44  ;;  %v12175_v44 = vld [vmem:[%s21364_s0 + $0x48] sm:$0xff] }
 0x203   :  { %1323 = vmatpush1.bf16.msra.mxu1 %v15834_v38  ;;  %2040 = vmatpush1.bf16.msra.mxu0 %v15540_v45  ;;  %v1132_v45 = vrot.slane %v15426_v2, 2  ;;  %v12177_v2 = vld [vmem:[%s21364_s0 + $0x58] sm:$0xf] }
 0x204   :  { %12143 = vmatprep.subr.msk.bf16.mxu1 %vm865_vm5, %v15838_v41  ;;  %2041 = vmatprep.subr.bf16.mxu0 %v15546_v46  ;;  %v15858_v46 = vpack.c.bf16 %v12175_v44, %v12174_v17  ;;  %v15878_v20 = vpack.c.bf16 %v12177_v2, %v12176_v12  ;;  %v2077_v17 = vrot.slane %v15696_v27, 2  ;;  %v2078_v44 = vrot.slane %v15685_v35, 2  ;;  %v16012_v27 = vld [vmem:[%s21363_s1 + $0x74] ss:$8 sps:$4 sm:$0x3f]  }
 0x205   :  { %v12204_v12 = vld [vmem:[%s21364_s0 + $0x70] sm:$0xff]  ;;  %v12205_v2 = vld [vmem:[%s21364_s0 + $0x78] sm:$0xf] }
 0x206   :  { %v2321_v24 = vshll.u32 %v15858_v46, 16  ;;  %v2326_v10 = vshll.u32 %v15878_v20, 16 }
 0x207   :  { %1325 = vmatpush1.bf16.msra.mxu1 %v15846_v42  ;;  %2042 = vmatpush1.bf16.msra.mxu0 %v15552_v47  ;;  %v1133_v47 = vsel %vm195_vm0, %v1131_v49, %v1132_v45  ;;  %v2074_v49 = vrot.slane %v15704_v16, 2 }
 0x208   :  { %2043 = vmatprep.subr.bf16.mxu0 %v15558_v48  ;;  %2339 = vmatprep.subr.bf16.mxu1 %v15864_v18  ;;  %v21434_v48 = vrot.slane %v15423_v9, 2  ;;  %v15891_v9 = vld [vmem:[%s21363_s1 + $0x34] ss:$8 sps:$4 sm:$0x3f]  }
 0x20a   :  { %1329 = vmatmul.mubr.bf16.vlgmr.msra.gmra.mrb[12].mxu1 %v1133_v47  ;;  %v16105_v47 = vld [vmem:[%s21365_s3 + $0xe8] ss:$8 sps:$4 sm:$0xff]  }
 0x20b   :  { %12145 = vmatprep.mubr.msk.bf16.mxu1 %vm858_vm7, %v21434_v48  ;;  %2044 = vmatpush1.bf16.msra.mxu0 %v15564_v50  ;;  %v2319_v50 = vshrl.u32 %v15858_v46, 16 }
 0x20c   :  { %2045 = vmatprep.subr.bf16.mxu0 %v15570_v51  ;;  %2340 = vmatpush1.bf16.msra.mxu1 %v15885_v34  ;;  %v2323_v51 = vrot.slane %v2321_v24, 1 }
 0x20d   :  { %12178 = vmatprep.subr.msk.bf16.mxu1 %vm195_vm0, %v15891_v9 }
 0x20e   :  { %v2324_v39 = vor.u32 %v2323_v51, %v2319_v50  ;;  %v16135_v51 = vld [vmem:[%s21365_s3 + $0x10c] ss:$8 sps:$4 sm:$0xff]  }
 0x20f   :  { %2046 = vmatpush1.bf16.msra.mxu0 %v15576_v52  ;;  %v21435_v52 = vmov 0  }
 0x210   :  { %2047 = vmatprep.subr.bf16.mxu0 %v15582_v53  ;;  %2342 = vmatpush1.bf16.msra.mxu1 %v15027_v13  ;;  %v2328_v53 = vrot.slane %v2326_v10, 1 }
 0x211   :  { %2394 = vmatprep.subr.bf16.mxu1 %v15905_v14 }
 0x212   :  { %1339 = vmatmul.mubr.bf16.gmra.mrb[24].mxu1 %v1132_v45  ;;  %v2329_v36 = vsel %vm154_vm3, %v2324_v39, %v2328_v53 }
 0x213   :  { %2048 = vmatpush1.bf16.msra.mxu0 %v15588_v54  ;;  %2371 = vmatprep.mubr.bf16.mxu1 %v21435_v52  ;;  %v2330_v54 = vshrl.u32 %v15878_v20, 16 }
 0x214   :  { %2049 = vmatprep.subr.bf16.mxu0 %v15594_v57  ;;  %v15927_v57 = vld [vmem:[%s21363_s1] ss:$8 sps:$4 sm:$0xff]  }
 0x215   :  { %v2332_v6 = vor.u32 %v2330_v54, %v2328_v53  ;;  %v16154_v53 = vld [vmem:[%s21365_s3 + $0x118] ss:$8 sps:$4 sm:$0xff]  }
 0x217   :  { %2050 = vmatpush1.bf16.msra.mxu0 %v15603_v61  ;;  %v15933_v61 = vld [vmem:[%s21363_s1 + $0x14] ss:$8 sps:$4 sm:$0x3f]  }
 0x218   :  { %12168 = vmatprep.subr.msk.bf16.mxu0 %vm865_vm5, %v15606_v62 }
 0x21a   :  { %12179 = vmatmul.mubr.msk.bf16.vlgmr.msra.gmra.mrb[28].mxu1 %vm188_vm2, %v2329_v36 }
 0x21b   :  { %2052 = vmatpush1.bf16.msra.mxu0 %v15612_v7  ;;  %2381 = vmatprep.mubr.bf16.mxu1 %v21435_v52 }
 0x21c   :  { %2088 = vmatprep.subr.bf16.mxu0 %v15617_v8  ;;  %2395 = vmatpush1.bf16.msra.mxu1 %v15927_v57  ;;  %v15946_v8 = vld [vmem:[%s21363_s1 + $0x44] ss:$8 sps:$4 sm:$0xff]  }
 0x21d   :  { %12181 = vmatprep.subr.msk.bf16.mxu1 %vm195_vm0, %v15933_v61 }
 0x21e   :  { %2056 = vmatmul.mubr.bf16.vlgmr.msra.gmra.mrb[40].mxu0 %v15704_v16 }
 0x21f   :  { %12170 = vmatprep.mubr.msk.bf16.mxu0 %vm858_vm7, %v15685_v35  ;;  %2089 = vmatpush1.bf16.msra.mxu0 %v15623_v5  ;;  %v2079_v5 = vsel %vm195_vm0, %v2077_v17, %v2078_v44  ;;  %v16111_v35 = vld [vmem:[%s21365_s3 + $0xfc] ss:$8 sps:$4 sm:$0xff]   ;;  %v16174_v17 = vld [vmem:[%s21365_s3 + $0x128] ss:$8 sps:$4 sm:$0xff]  }
 0x220   :  { %2090 = vmatprep.subr.bf16.mxu0 %v15629_v60  ;;  %2397 = vmatpush1.bf16.msra.mxu1 %v15107_v43  ;;  %v15970_v60 = vld [vmem:[%s21363_s1 + $0x40] ss:$8 sps:$4 sm:$0xff]  }
 0x221   :  { %2456 = vmatprep.subr.bf16.mxu1 %v15946_v8 }
 0x222   :  { %12180 = vmatmul.mubr.msk.bf16.gmra.mrb[32].mxu1 %vm188_vm2, %v2332_v6 }
 0x223   :  { %2091 = vmatpush1.bf16.msra.mxu0 %v15638_v11  ;;  %2426 = vmatprep.mubr.bf16.mxu1 %v21435_v52  ;;  %v15986_v11 = vld [vmem:[%s21363_s1 + $0x64] ss:$8 sps:$4 sm:$0xff]  }
 0x224   :  { %2092 = vmatprep.subr.bf16.mxu0 %v15644_v19  ;;  %v2447_v19 = vrot.slane %v15858_v46, 1 }
 0x226   :  { %2066 = vmatmul.mubr.bf16.gmra.mrb[48].mxu0 %v15694_v4 }
 0x227   :  { %2093 = vmatpush1.bf16.msra.mxu0 %v15652_v58  ;;  %12172 = vmatprep.mubr.msk.bf16.mxu0 %vm858_vm7, %v2079_v5  ;;  %v2448_v58 = vrot.slane %v15878_v20, 1 }
 0x228   :  { %2094 = vmatprep.subr.bf16.mxu0 %v15658_v1  ;;  %v15976_v1 = vld [vmem:[%s21363_s1 + $0x54] ss:$8 sps:$4 sm:$0x3f]  }
 0x22a   :  { %12182 = vmatmul.mubr.msk.bf16.vlgmr.msra.gmra.mrb[28].mxu1 %vm188_vm2, %v15858_v46 }
 0x22b   :  { %2095 = vmatpush1.bf16.msra.mxu0 %v15669_v3  ;;  %2436 = vmatprep.mubr.bf16.mxu1 %v21435_v52  ;;  %v21436_v3 = vld [vmem:[#allocation3_spill] sm:$0xff] }
 0x22c   :  { %2096 = vmatprep.subr.bf16.mxu0 %v15676_v15  ;;  %2457 = vmatpush1.bf16.msra.mxu1 %v15970_v60  ;;  %v2449_v15 = vsel %vm334_vm1, %v2447_v19, %v2448_v58 }
 0x22d   :  { %12184 = vmatprep.subr.msk.bf16.mxu1 %vm195_vm0, %v15976_v1 }
 0x22f   :  { %2097 = vmatpush1.bf16.msra.mxu0 %v15692_v55  ;;  %v16006_v55 = vld [vmem:[%s21363_s1 + $0x60] ss:$8 sps:$4 sm:$0xff]  }
 0x230   :  { %2098 = vmatprep.subr.bf16.mxu0 %v15702_v0  ;;  %2459 = vmatpush1.bf16.msra.mxu1 %v21436_v3  ;;  %v2516_v0 = vrot.slane %v2330_v54, 1  ;;  %v16162_v54 = vld [vmem:[%s21365_s3 + $0x12c] ss:$8 sps:$4 sm:$0xff]  }
 0x231   :  { %2526 = vmatprep.subr.bf16.mxu1 %v15986_v11 }
 0x232   :  { %12183 = vmatmul.mubr.msk.bf16.gmra.mrb[36].mxu1 %vm188_vm2, %v15878_v20 }
 0x233   :  { %2099 = vmatpush1.bf16.msra.mxu0 %v15713_v59  ;;  %2488 = vmatprep.mubr.bf16.mxu1 %v21435_v52  ;;  %v2513_v59 = vrot.slane %v2319_v50, 1 }
 0x234   :  { %2100 = vmatprep.subr.bf16.mxu0 %v15721_v37  ;;  %v2514_v37 = vrot.slane %v2321_v24, 2 }
 0x237   :  { %2101 = vmatpush1.bf16.msra.mxu0 %v15730_v40  ;;  %v2517_v40 = vrot.slane %v2326_v10, 2  ;;  %v16141_v10 = vld [vmem:[%s21365_s3 + $0x108] ss:$8 sps:$4 sm:$0xff]  }
 0x238   :  { %2102 = vmatprep.subr.bf16.mxu0 %v15737_v22  ;;  %v21437_v22 = vld [vmem:[#allocation4_spill] sm:$0xff] }
 0x23a   :  { %12185 = vmatmul.mubr.msk.bf16.vlgmr.msra.gmra.mrb[28].mxu1 %vm188_vm2, %v2449_v15  ;;  %v16199_v15 = vld [vmem:[%s21365_s3 + $0x14c] ss:$8 sps:$4 sm:$0xff]  }
 0x23b   :  { %2103 = vmatpush1.bf16.msra.mxu0 %v15745_v56  ;;  %2498 = vmatprep.mubr.bf16.mxu1 %v21435_v52  ;;  %v16028_v56 = vld [vmem:[%s21363_s1 + $0x84] ss:$8 sps:$4 sm:$0xff]  }
 0x23c   :  { %2104 = vmatprep.subr.bf16.mxu0 %v15752_v63  ;;  %2527 = vmatpush1.bf16.msra.mxu1 %v16006_v55  ;;  %v2515_v63 = vor.u32 %v2514_v37, %v2513_v59  ;;  %v16218_v59 = vld [vmem:[%s21365_s3 + $0x158] ss:$8 sps:$4 sm:$0xff]   ;;  %v16226_v37 = vld [vmem:[%s21365_s3 + $0x16c] ss:$8 sps:$4 sm:$0xff]  }
 0x23d   :  { %12187 = vmatprep.subr.msk.bf16.mxu1 %vm195_vm0, %v16012_v27 }
 0x23f   :  { %2105 = vmatpush1.bf16.msra.mxu0 %v15759_v21  ;;  %v2518_v21 = vor.u32 %v2517_v40, %v2516_v0  ;;  %v16212_v0 = vld [vmem:[%s21365_s3 + $0x15c] ss:$8 sps:$4 sm:$0xff]   ;;  %v16236_v40 = vld [vmem:[%s21365_s3 + $0x168] ss:$8 sps:$4 sm:$0xff]  }
 0x240   :  { %2106 = vmatprep.subr.bf16.mxu0 %v15767_v23  ;;  %2529 = vmatpush1.bf16.msra.mxu1 %v21437_v22 }
 0x241   :  { %2592 = vmatprep.subr.bf16.mxu1 %v16028_v56  ;;  %v2519_v23 = vsel %vm425_vm4, %v2515_v63, %v2518_v21  ;;  %v16242_v63 = vld [vmem:[%s21365_s3 + $0x17c] ss:$8 sps:$4 sm:$0xff]  }
 0x242   :  { %12186 = vmatmul.mubr.msk.bf16.gmra.mrb[40].mxu1 %vm188_vm2, %v2448_v58  ;;  %v16192_v58 = vld [vmem:[%s21365_s3 + $0x138] ss:$8 sps:$4 sm:$0xff]  }
 0x243   :  { %2107 = vmatpush1.bf16.msra.mxu0 %v15775_v25  ;;  %2558 = vmatprep.mubr.bf16.mxu1 %v21435_v52  ;;  %v16045_v25 = vld [vmem:[%s21363_s1 + $0x80] ss:$8 sps:$4 sm:$0xff]  }
 0x244   :  { %2108 = vmatprep.subr.bf16.mxu0 %v15782_v26  ;;  %v16051_v26 = vld [vmem:[%s21363_s1 + $0x94] ss:$8 sps:$4 sm:$0x3f]  }
 0x247   :  { %2109 = vmatpush1.bf16.msra.mxu0 %v15789_v28  ;;  %v21438_v28 = vld [vmem:[#allocation5_spill] sm:$0xff] }
 0x248   :  { %2110 = vmatprep.subr.bf16.mxu0 %v15796_v29  ;;  %v16061_v29 = vld [vmem:[%s21365_s3 + $0xec] ss:$8 sps:$4 sm:$0xff]  }
 0x24a   :  { %12188 = vmatmul.mubr.msk.bf16.vlgmr.msra.gmra.mrb[28].mxu1 %vm188_vm2, %v2519_v23  ;;  %v16267_v23 = vld [vmem:[%s21365_s3 + $0x188] ss:$8 sps:$4 sm:$0xff]  }
 0x24b   :  { %2111 = vmatpush1.bf16.msra.mxu0 %v15803_v30  ;;  %2568 = vmatprep.mubr.bf16.mxu1 %v21435_v52  ;;  %v2583_v30 = vrot.slane %v15858_v46, 2 }
 0x24c   :  { %2112 = vmatprep.subr.bf16.mxu0 %v15810_v31  ;;  %2593 = vmatpush1.bf16.msra.mxu1 %v16045_v25  ;;  %v2584_v31 = vrot.slane %v15878_v20, 2 }
 0x24d   :  { %12190 = vmatprep.subr.msk.bf16.mxu1 %vm195_vm0, %v16051_v26 }
 0x24e   :  { %v2585_v45 = vsel %vm195_vm0, %v2583_v30, %v2584_v31  ;;  %v16273_v30 = vld [vmem:[%s21365_s3 + $0x19c] ss:$8 sps:$4 sm:$0xff]  }
 0x24f   :  { %2113 = vmatpush1.bf16.msra.mxu0 %v15817_v32  ;;  %v12202_v32 = vld [vmem:[%s21364_s0 + $0x60] sm:$0xff] }
 0x250   :  { %2114 = vmatprep.subr.bf16.mxu0 %v15824_v33  ;;  %2595 = vmatpush1.bf16.msra.mxu1 %v21438_v28  ;;  %v12203_v33 = vld [vmem:[%s21364_s0 + $0x68] sm:$0xff] }
 0x251   :  { %2744 = vmatprep.subr.bf16.mxu1 %v16061_v29  ;;  %v16081_v46 = vpack.c.bf16 %v12203_v33, %v12202_v32  ;;  %v16280_v32 = vld [vmem:[%s21365_s3 + $0x198] ss:$8 sps:$4 sm:$0xff]   ;;  %v16287_v33 = vld [vmem:[%s21365_s3 + $0x1ac] ss:$8 sps:$4 sm:$0xff]  }
 0x252   :  { %12189 = vmatmul.mubr.msk.bf16.gmra.mrb[44].mxu1 %vm188_vm2, %v2518_v21 }
 0x253   :  { %2115 = vmatpush1.bf16.msra.mxu0 %v15834_v38  ;;  %2624 = vmatprep.mubr.bf16.mxu1 %v21435_v52  ;;  %v2075_v38 = vrot.slane %v15694_v4, 2  ;;  %v16096_v4 = vpack.c.bf16 %v12205_v2, %v12204_v12  ;;  %v3097_v48 = vshrl.u32 %v16081_v46, 16  ;;  %v16319_v2 = vld [vmem:[%s21365_s3 + $0x1b8] ss:$8 sps:$4 sm:$0xff]  }
 0x254   :  { %12171 = vmatprep.subr.msk.bf16.mxu0 %vm865_vm5, %v15838_v41 }
 0x255   :  { %v2076_v16 = vsel %vm195_vm0, %v2074_v49, %v2075_v38  ;;  %v3104_v24 = vshll.u32 %v16096_v4, 16  ;;  %v3108_v36 = vshrl.u32 %v16096_v4, 16  ;;  %v3226_v21 = vrot.slane %v16096_v4, 1  ;;  %v16297_v49 = vld [vmem:[%s21365_s3 + $0x1a8] ss:$8 sps:$4 sm:$0xff]  }
 0x257   :  { %2117 = vmatpush1.bf16.msra.mxu0 %v15846_v42  ;;  %v3106_v50 = vrot.slane %v3104_v24, 1  ;;  %v3295_v12 = vrot.slane %v3104_v24, 2  ;;  %v21441_v24 = vld [vmem:[#allocation13_spill] sm:$0xff] }
 0x258   :  { %3117 = vmatprep.subr.bf16.mxu0 %v15864_v18  ;;  %v3099_v18 = vshll.u32 %v16081_v46, 16 }
 0x259   :  { %v3110_v5 = vor.u32 %v3108_v36, %v3106_v50 }
 0x25a   :  { %2121 = vmatmul.mubr.bf16.vlgmr.msra.gmra.mrb[40].mxu0 %v2076_v16  ;;  %12191 = vmatmul.mubr.msk.bf16.vlgmr.msra.gmra.mrb[28].mxu1 %vm188_vm2, %v2585_v45  ;;  %v3101_v20 = vrot.slane %v3099_v18, 1  ;;  %v3292_v45 = vrot.slane %v3099_v18, 2  ;;  %v21439_v16 = vld [vmem:[#allocation11_spill] sm:$0xff] }
 0x25b   :  { %12173 = vmatprep.mubr.msk.bf16.mxu0 %vm858_vm7, %v2078_v44  ;;  %3118 = vmatpush1.bf16.msra.mxu0 %v15885_v34  ;;  %v16123_v34 = vld [vmem:[%s21365_s3 + $0xf8] ss:$8 sps:$4 sm:$0xff]  }
 0x25c   :  { %2634 = vmatprep.mubr.bf16.mxu1 %v21435_v52  ;;  %12206 = vmatprep.subr.msk.bf16.mxu0 %vm195_vm0, %v15891_v9  ;;  %v3102_v9 = vor.u32 %v3101_v20, %v3097_v48  ;;  %v21440_v20 = vld [vmem:[#allocation12_spill] sm:$0xff] }
 0x25d   :  { %2745 = vmatpush1.bf16.msra.mxu1 %v16105_v47 }
 0x25e   :  { %2746 = vmatprep.subr.bf16.mxu1 %v16111_v35  ;;  %v3107_v39 = vsel %vm154_vm3, %v3102_v9, %v3106_v50  ;;  %v3361_v9 = vrot.slane %v16081_v46, 2  ;;  %v3362_v50 = vrot.slane %v16096_v4, 2 }
 0x25f   :  { %3120 = vmatpush1.bf16.msra.mxu0 %v15027_v13 }
 0x260   :  { %3172 = vmatprep.subr.bf16.mxu0 %v15905_v14  ;;  %v16147_v14 = vld [vmem:[%s21365_s3 + $0x11c] ss:$8 sps:$4 sm:$0xff]  }
 0x261   :  { %2747 = vmatpush1.bf16.msra.mxu1 %v16123_v34 }
 0x262   :  { %2131 = vmatmul.mubr.bf16.gmra.mrb[52].mxu0 %v2075_v38  ;;  %12192 = vmatmul.mubr.msk.bf16.gmra.mrb[48].mxu1 %vm188_vm2, %v2584_v31  ;;  %v16303_v38 = vld [vmem:[%s21365_s3 + $0x1bc] ss:$8 sps:$4 sm:$0xff]  }
 0x263   :  { %3149 = vmatprep.mubr.bf16.mxu0 %v21435_v52  ;;  %2748 = vmatprep.subr.bf16.mxu1 %v16135_v51 }
 0x265   :  { %2749 = vmatpush1.bf16.msra.mxu1 %v16141_v10 }
 0x266   :  { %2750 = vmatprep.subr.bf16.mxu1 %v16147_v14 }
 0x269   :  { %2751 = vmatpush1.bf16.msra.mxu1 %v16154_v53 }
 0x26a   :  { %12207 = vmatmul.mubr.msk.bf16.vlgmr.msra.gmra.mrb[56].mxu0 %vm188_vm2, %v3107_v39  ;;  %2752 = vmatprep.subr.bf16.mxu1 %v16162_v54  ;;  %v3363_v39 = vsel %vm195_vm0, %v3361_v9, %v3362_v50 }
 0x26b   :  { %3173 = vmatpush1.bf16.msra.mxu0 %v15927_v57  ;;  %3159 = vmatprep.mubr.bf16.mxu0 %v21435_v52  ;;  %v16184_v57 = vld [vmem:[%s21365_s3 + $0x13c] ss:$8 sps:$4 sm:$0xff]  }
 0x26c   :  { %12209 = vmatprep.subr.msk.bf16.mxu0 %vm195_vm0, %v15933_v61 }
 0x26d   :  { %v16169_v6 = vpop.f32.mrb[16].mxu1  ;;  %2753 = vmatpush1.bf16.msra.mxu1 %v16174_v17 }
 0x26e   :  { %v16177_v44 = vpop.f32.mrb[17].mxu1  ;;  %2754 = vmatprep.subr.bf16.mxu1 %v16184_v57 }
 0x26f   :  { %v920_v61 = vpop.f32.mrb[18].mxu1  ;;  %3175 = vmatpush1.bf16.msra.mxu0 %v15107_v43 }
 0x270   :  { %v921_v19 = vpop.f32.mrb[19].mxu1  ;;  %3234 = vmatprep.subr.bf16.mxu0 %v15946_v8  ;;  %v16206_v8 = vld [vmem:[%s21365_s3 + $0x148] ss:$8 sps:$4 sm:$0xff]  }
 0x271   :  { %2755 = vmatpush1.bf16.msra.mxu1 %v16192_v58 }
 0x272   :  { %12208 = vmatmul.mubr.msk.bf16.gmra.mrb[60].mxu0 %vm188_vm2, %v3110_v5  ;;  %2756 = vmatprep.subr.bf16.mxu1 %v16199_v15 }
 0x273   :  { %3204 = vmatprep.mubr.bf16.mxu0 %v21435_v52 }
 0x275   :  { %2757 = vmatpush1.bf16.msra.mxu1 %v16206_v8 }
 0x276   :  { %2758 = vmatprep.subr.bf16.mxu1 %v16212_v0 }
 0x279   :  { %2759 = vmatpush1.bf16.msra.mxu1 %v16218_v59 }
 0x27a   :  { %12210 = vmatmul.mubr.msk.bf16.vlgmr.msra.gmra.mrb[56].mxu0 %vm188_vm2, %v16081_v46  ;;  %2760 = vmatprep.subr.bf16.mxu1 %v16226_v37 }
 0x27b   :  { %3235 = vmatpush1.bf16.msra.mxu0 %v15970_v60  ;;  %3214 = vmatprep.mubr.bf16.mxu0 %v21435_v52  ;;  %v16250_v60 = vld [vmem:[%s21365_s3 + $0x178] ss:$8 sps:$4 sm:$0xff]  }
 0x27c   :  { %12212 = vmatprep.subr.msk.bf16.mxu0 %vm195_vm0, %v15976_v1  ;;  %v16258_v1 = vld [vmem:[%s21365_s3 + $0x18c] ss:$8 sps:$4 sm:$0xff]  }
 0x27d   :  { %2761 = vmatpush1.bf16.msra.mxu1 %v16236_v40 }
 0x27e   :  { %2762 = vmatprep.subr.bf16.mxu1 %v16242_v63 }
 0x27f   :  { %3237 = vmatpush1.bf16.msra.mxu0 %v21436_v3 }
 0x280   :  { %3304 = vmatprep.subr.bf16.mxu0 %v15986_v11  ;;  %v3225_v11 = vrot.slane %v16081_v46, 1 }
 0x281   :  { %2763 = vmatpush1.bf16.msra.mxu1 %v16250_v60 }
 0x282   :  { %12211 = vmatmul.mubr.msk.bf16.gmra.mrb[64].mxu0 %vm188_vm2, %v16096_v4  ;;  %2764 = vmatprep.subr.bf16.mxu1 %v16258_v1  ;;  %v3227_v31 = vsel %vm334_vm1, %v3225_v11, %v3226_v21 }
 0x283   :  { %3266 = vmatprep.mubr.bf16.mxu0 %v21435_v52 }
 0x285   :  { %2765 = vmatpush1.bf16.msra.mxu1 %v16267_v23 }
 0x286   :  { %2766 = vmatprep.subr.bf16.mxu1 %v16273_v30 }
 0x289   :  { %2767 = vmatpush1.bf16.msra.mxu1 %v16280_v32 }
 0x28a   :  { %12213 = vmatmul.mubr.msk.bf16.vlgmr.msra.gmra.mrb[56].mxu0 %vm188_vm2, %v3227_v31  ;;  %2768 = vmatprep.subr.bf16.mxu1 %v16287_v33 }
 0x28b   :  { %3305 = vmatpush1.bf16.msra.mxu0 %v16006_v55  ;;  %3276 = vmatprep.mubr.bf16.mxu0 %v21435_v52  ;;  %v3294_v55 = vrot.slane %v3108_v36, 1 }
 0x28c   :  { %12215 = vmatprep.subr.msk.bf16.mxu0 %vm195_vm0, %v16012_v27  ;;  %v3291_v27 = vrot.slane %v3097_v48, 1 }
 0x28d   :  { %2769 = vmatpush1.bf16.msra.mxu1 %v16297_v49  ;;  %v3296_v48 = vor.u32 %v3295_v12, %v3294_v55 }
 0x28e   :  { %2770 = vmatprep.subr.bf16.mxu1 %v16303_v38  ;;  %v3293_v18 = vor.u32 %v3292_v45, %v3291_v27  ;;  %v14659_v45 = vld [vmem:[%s21365_s3 + $0x4] ss:$8 sps:$4 sm:$0xff]  }
 0x28f   :  { %3307 = vmatpush1.bf16.msra.mxu0 %v21437_v22 }
 0x290   :  { %3370 = vmatprep.subr.bf16.mxu0 %v16028_v56  ;;  %v3297_v56 = vsel %vm425_vm4, %v3293_v18, %v3296_v48 }
 0x291   :  { %2771 = vmatpush1.bf16.msra.mxu1 %v16319_v2 }
 0x292   :  { %12214 = vmatmul.mubr.msk.bf16.gmra.mrb[68].mxu0 %vm188_vm2, %v3226_v21  ;;  %12193 = vmatprep.subr.msk.bf16.mxu1 %vm865_vm5, %v21439_v16 }
 0x293   :  { %3336 = vmatprep.mubr.bf16.mxu0 %v21435_v52 }
 0x295   :  { %2773 = vmatpush1.bf16.msra.mxu1 %v21440_v20 }
 0x296   :  { %2801 = vmatprep.subr.bf16.mxu1 %v21441_v24 }
 0x29a   :  { %12216 = vmatmul.mubr.msk.bf16.vlgmr.msra.gmra.mrb[56].mxu0 %vm188_vm2, %v3297_v56 }
 0x29b   :  { %3371 = vmatpush1.bf16.msra.mxu0 %v16045_v25  ;;  %3346 = vmatprep.mubr.bf16.mxu0 %v21435_v52 }
 0x29c   :  { %12218 = vmatprep.subr.msk.bf16.mxu0 %vm195_vm0, %v16051_v26 }
 0x29f   :  { %3373 = vmatpush1.bf16.msra.mxu0 %v21438_v28 }
 0x2a0   :  { %3522 = vmatprep.subr.bf16.mxu0 %v16061_v29 }
 0x2a2   :  { %12217 = vmatmul.mubr.msk.bf16.gmra.mrb[72].mxu0 %vm188_vm2, %v3296_v48 }
 0x2a3   :  { %3402 = vmatprep.mubr.bf16.mxu0 %v21435_v52 }
 0x2a9   :  { %v1124_v25 = vpop.f32.mrb[20].mxu1 }
 0x2aa   :  { %v16342_v36 = vadd.f32 %v1124_v25, %v16169_v6  ;;  %v1126_v5 = vpop.f32.mrb[21].mxu1  ;;  %12219 = vmatmul.mubr.msk.bf16.vlgmr.msra.gmra.mrb[56].mxu0 %vm188_vm2, %v3363_v39  ;;  %v21444_v6 = vld [vmem:[#allocation8_spill] sm:$0xff] }
 0x2ab   :  { %v16346_v26 = vadd.f32 %v1126_v5, %v16177_v44  ;;  %v1128_v29 = vpop.f32.mrb[22].mxu1  ;;  %3412 = vmatprep.mubr.bf16.mxu0 %v21435_v52  ;;  %3523 = vmatpush1.bf16.msra.mxu0 %v16105_v47 }
 0x2ac   :  { %v1129_v46 = vpop.f32.mrb[23].mxu1  ;;  %3524 = vmatprep.subr.bf16.mxu0 %v16111_v35 }
 0x2af   :  { %3525 = vmatpush1.bf16.msra.mxu0 %v16123_v34 }
 0x2b0   :  { %3526 = vmatprep.subr.bf16.mxu0 %v16135_v51  ;;  %v147_v51 = vld [vmem:[%s21367_s4] sm:$0x3] }
 0x2b2   :  { %12220 = vmatmul.mubr.msk.bf16.gmra.mrb[76].mxu0 %vm188_vm2, %v3362_v50 }
 0x2b3   :  { %3527 = vmatpush1.bf16.msra.mxu0 %v16141_v10  ;;  %v14915_v10 = vmov 1966171168  }
 0x2b4   :  { %3528 = vmatprep.subr.bf16.mxu0 %v16147_v14  ;;  %v1401_v14 = vunpack.c.l.s4 %v14915_v10 }
 0x2b6   :  { %v1402_v44 = vunpack.c.0.s8 %v1401_v14 }
 0x2b7   :  { %3529 = vmatpush1.bf16.msra.mxu0 %v16154_v53  ;;  %v21442_v53 = vld [vmem:[#allocation7_spill] sm:$0xff] }
 0x2b8   :  { %3530 = vmatprep.subr.bf16.mxu0 %v16162_v54  ;;  %v16382_v54 = vrot.slane %v147_v51, %v21442_v53 }
 0x2ba   :  { %21443 = vst [vmem:[#allocation3_spill] sm:$0xff] %v16382_v54 }
 0x2bb   :  { %3531 = vmatpush1.bf16.msra.mxu0 %v16174_v17  ;;  %v16385_v17 = vrot.slane %v147_v51, %v21444_v6 }
 0x2bc   :  { %3532 = vmatprep.subr.bf16.mxu0 %v16184_v57 }
 0x2bd   :  { %v16360_v4 = vpop.f32.mrb[44].mxu0  ;;  %21445 = vst [vmem:[#allocation13_spill] sm:$0xff] %v16385_v17 }
 0x2be   :  { %v16362_v47 = vpop.f32.mrb[45].mxu0 }
 0x2bf   :  { %v2014_v35 = vpop.f32.mrb[46].mxu0  ;;  %3533 = vmatpush1.bf16.msra.mxu0 %v16192_v58 }
 0x2c0   :  { %v2015_v34 = vpop.f32.mrb[47].mxu0  ;;  %3534 = vmatprep.subr.bf16.mxu0 %v16199_v15 }
 0x2c3   :  { %3535 = vmatpush1.bf16.msra.mxu0 %v16206_v8 }
 0x2c4   :  { %3536 = vmatprep.subr.bf16.mxu0 %v16212_v0 }
 0x2c7   :  { %3537 = vmatpush1.bf16.msra.mxu0 %v16218_v59 }
 0x2c8   :  { %3538 = vmatprep.subr.bf16.mxu0 %v16226_v37  ;;  %v21446_v37 = vld [vmem:[#allocation6_spill] sm:$0xff] }
 0x2cb   :  { %3539 = vmatpush1.bf16.msra.mxu0 %v16236_v40  ;;  %v16396_v40 = vsub.s32 %v1402_v44, %v21446_v37 }
 0x2cc   :  { %3540 = vmatprep.subr.bf16.mxu0 %v16242_v63 }
 0x2cd   :  { %21447 = vst [vmem:[#allocation14_spill] sm:$0xff] %v16396_v40 }
 0x2cf   :  { %3541 = vmatpush1.bf16.msra.mxu0 %v16250_v60 }
 0x2d0   :  { %3542 = vmatprep.subr.bf16.mxu0 %v16258_v1 }
 0x2d3   :  { %3543 = vmatpush1.bf16.msra.mxu0 %v16267_v23 }
 0x2d4   :  { %3544 = vmatprep.subr.bf16.mxu0 %v16273_v30 }
 0x2d7   :  { %3545 = vmatpush1.bf16.msra.mxu0 %v16280_v32 }
 0x2d8   :  { %3546 = vmatprep.subr.bf16.mxu0 %v16287_v33 }
 0x2db   :  { %3547 = vmatpush1.bf16.msra.mxu0 %v16297_v49 }
 0x2dc   :  { %3548 = vmatprep.subr.bf16.mxu0 %v16303_v38 }
 0x2dd   :  { %v1330_v57 = vpop.f32.mrb[12].mxu1 }
 0x2de   :  { %v1364_v61 = vadd.f32 %v16382_v54, %v1330_v57  ;;  %v1332_v19 = vpop.f32.mrb[13].mxu1 }
 0x2df   :  { %v1365_v58 = vadd.f32 %v16385_v17, %v1332_v19  ;;  %v1334_v15 = vpop.f32.mrb[14].mxu1  ;;  %3549 = vmatpush1.bf16.msra.mxu0 %v16319_v2 }
 0x2e0   :  { %v1370_v8 = vmax.f32 %v1364_v61, 0.0  ;;  %v1366_v0 = vadd.f32 %v16382_v54, %v1334_v15  ;;  %v1336_v59 = vpop.f32.mrb[15].mxu1  ;;  %12221 = vmatprep.subr.msk.bf16.mxu0 %vm865_vm5, %v21439_v16 }
 0x2e1   :  { %v1371_v63 = vmax.f32 %v1365_v58, 0.0  ;;  %v1367_v60 = vadd.f32 %v16385_v17, %v1336_v59 }
 0x2e2   :  { %v1378_v1 = vrot.slane %v1370_v8, 2  ;;  %v1380_v11 = vrot.slane %v1370_v8, 4  ;;  %v1382_v21 = vrot.slane %v1370_v8, 6  ;;  %v1372_v23 = vmax.f32 %v1366_v0, 0.0 }
 0x2e3   :  { %v1379_v30 = vrot.slane %v1371_v63, 2  ;;  %v1381_v31 = vrot.slane %v1371_v63, 4  ;;  %v1383_v32 = vrot.slane %v1371_v63, 6  ;;  %v1396_v33 = vcombine.low %v1370_v8, %v1371_v63  ;;  %3551 = vmatpush1.bf16.msra.mxu0 %v21440_v20 }
 0x2e4   :  { %v1386_v49 = vrot.slane %v1372_v23, 2  ;;  %v1388_v38 = vrot.slane %v1372_v23, 4  ;;  %v1390_v55 = vrot.slane %v1372_v23, 6  ;;  %v1373_v27 = vmax.f32 %v1367_v60, 0.0  ;;  %3579 = vmatprep.subr.bf16.mxu0 %v14659_v45 }
 0x2e5   :  { %v1397_v12 = vcombine.low %v1378_v1, %v1379_v30  ;;  %v1398_v2 = vcombine.low %v1380_v11, %v1381_v31  ;;  %v1399_v18 = vcombine.low %v1382_v21, %v1383_v32  ;;  %v1406_v48 = vrot.slane %v1396_v33, %v16396_v40  ;;  %v1340_v24 = vpop.f32.mrb[24].mxu1 }
 0x2e6   :  { %v1387_v56 = vrot.slane %v1373_v27, 2  ;;  %v1389_v9 = vrot.slane %v1373_v27, 4  ;;  %v1391_v50 = vrot.slane %v1373_v27, 6  ;;  %v1445_v39 = vcombine.low %v1372_v23, %v1373_v27  ;;  %v1342_v25 = vpop.f32.mrb[25].mxu1 }
 0x2e7   :  { %v1413_v5 = vrot.slane %v1397_v12, %v16396_v40  ;;  %v1420_v29 = vrot.slane %v1398_v2, %v16396_v40  ;;  %v1427_v46 = vrot.slane %v1399_v18, %v16396_v40  ;;  %v1351_v35 = vadd.f32 %v1340_v24, %v16342_v36  ;;  %v1344_v34 = vpop.f32.mrb[26].mxu1 }
 0x2e8   :  { %v1446_v51 = vcombine.low %v1386_v49, %v1387_v56  ;;  %v1447_v10 = vcombine.low %v1388_v38, %v1389_v9  ;;  %v1448_v14 = vcombine.low %v1390_v55, %v1391_v50  ;;  %v1345_v44 = vpop.f32.mrb[27].mxu1  ;;  %v1352_v58 = vadd.f32 %v1342_v25, %v16346_v26 }
 0x2e9   :  { %v1428_v57 = vcombine.low %v1406_v48, %v1413_v5  ;;  %v1429_v61 = vcombine.low %v1420_v29, %v1427_v46  ;;  %v1368_v19 = vadd.f32 %v16382_v54, %v1351_v35  ;;  %v1455_v15 = vrot.slane %v1445_v39, %v16396_v40 }
 0x2ea   :  { %v1462_v8 = vrot.slane %v1446_v51, %v16396_v40  ;;  %v1469_v0 = vrot.slane %v1447_v10, %v16396_v40  ;;  %v1476_v59 = vrot.slane %v1448_v14, %v16396_v40  ;;  %v1369_v1 = vadd.f32 %v16385_v17, %v1352_v58 }
 0x2eb   :  { %v1436_v36 = vrot.slane %v1428_v57, %v16396_v40  ;;  %v1443_v63 = vrot.slane %v1429_v61, %v16396_v40  ;;  %v1374_v60 = vmax.f32 %v1368_v19, 0.0  ;;  %v21448_v18 = vlaneseq }
 0x2ec   :  { %v1477_v11 = vcombine.low %v1455_v15, %v1462_v8  ;;  %v1478_v21 = vcombine.low %v1469_v0, %v1476_v59  ;;  %v1375_v26 = vmax.f32 %v1369_v1, 0.0  ;;  %v21449_v48 = vmov 0 }
 0x2ed   :  { %v1444_v23 = vcombine.low %v1436_v36, %v1443_v63  ;;  %v1394_v30 = vrot.slane %v1374_v60, 2  ;;  %vm16422_vm8 = vcmp.lt.s32.totalorder %v21448_v18, 512 }
 0x2ee   :  { %v1485_v31 = vrot.slane %v1477_v11, %v16396_v40  ;;  %v1492_v32 = vrot.slane %v1478_v21, %v16396_v40  ;;  %v1395_v33 = vrot.slane %v1375_v26, 2  ;;  %v1494_v49 = vcombine.low %v1374_v60, %v1375_v26 }
 0x2ef   :  { %1521 = vst [vmem:[#allocation2] ss:$8 sm:$0xf] %v1444_v23  ;;  %1522 = vst [vmem:[#allocation2] ss:$8 sm:$0xf0] %v1444_v23 }
 0x2f0   :  { %v1493_v38 = vcombine.low %v1485_v31, %v1492_v32  ;;  %v1495_v55 = vcombine.low %v1394_v30, %v1395_v33  ;;  %v1502_v27 = vrot.slane %v1494_v49, %v16396_v40  ;;  %v21450_v48 = vsel %vm16422_vm8, 4294967295, %v21449_v48  ;;  %v21452_v23 = vld [vmem:[#allocation9_spill] sm:$0xff]  ;;  %v21453_v33 = vld [vmem:[#allocation10_spill] sm:$0xff] }
 0x2f1   :  { %21451 = vst [vmem:[#allocation15_spill] sm:$0xff] %v21450_v48 }
 0x2f2   :  { %1524 = vst [vmem:[#allocation2 + $0x40] ss:$8 sm:$0xf] %v1493_v38  ;;  %1525 = vst [vmem:[#allocation2 + $0x40] ss:$8 sm:$0xf0] %v1493_v38  ;;  %v1509_v45 = vrot.slane %v1495_v55, %v16396_v40 }
 0x2f4   :  { %v1510_v12 = vcombine.low %v1502_v27, %v1509_v45 }
 0x2f5   :  { %v2383_v2 = vpop.f32.mrb[32].mxu1 }
 0x2f6   :  { %v2385_v24 = vpop.f32.mrb[33].mxu1  ;;  %v1517_v56 = vrot.slane %v1510_v12, %v16396_v40 }
 0x2f7   :  { %v2387_v9 = vpop.f32.mrb[34].mxu1 }
 0x2f8   :  { %v2388_v50 = vpop.f32.mrb[35].mxu1  ;;  %1531 = vst.msk [vmem:[#allocation2 + $0x80] ss:$8 sm:$0xf] %vm16422_vm8, %v1517_v56 }
 0x2f9   :  { %v2067_v39 = vpop.f32.mrb[48].mxu0 }
 0x2fa   :  { %v16430_v25 = vadd.f32 %v2067_v39, %v16360_v4  ;;  %v2069_v5 = vpop.f32.mrb[49].mxu0 }
 0x2fb   :  { %v16433_v29 = vadd.f32 %v2069_v5, %v16362_v47  ;;  %v2071_v46 = vpop.f32.mrb[50].mxu0 }
 0x2fc   :  { %v2072_v35 = vpop.f32.mrb[51].mxu0 }
 0x305   :  { %v2438_v34 = vpop.f32.mrb[36].mxu1 }
 0x306   :  { %v2439_v51 = vadd.f32 %v2438_v34, %v2383_v2  ;;  %v2440_v10 = vpop.f32.mrb[37].mxu1 }
 0x307   :  { %v2441_v14 = vadd.f32 %v2440_v10, %v2385_v24  ;;  %v2442_v44 = vpop.f32.mrb[38].mxu1 }
 0x308   :  { %v2443_v57 = vpop.f32.mrb[39].mxu1 }
 0x315   :  { %v2500_v61 = vpop.f32.mrb[40].mxu1 }
 0x316   :  { %v2511_v19 = vadd.f32 %v2500_v61, %v2439_v51  ;;  %v2502_v58 = vpop.f32.mrb[41].mxu1 }
 0x317   :  { %v2512_v15 = vadd.f32 %v2502_v58, %v2441_v14  ;;  %v2504_v8 = vpop.f32.mrb[42].mxu1 }
 0x318   :  { %v2505_v0 = vpop.f32.mrb[43].mxu1 }
 0x325   :  { %v2570_v4 = vpop.f32.mrb[44].mxu1 }
 0x326   :  { %v16435_v59 = vadd.f32 %v2570_v4, %v2511_v19  ;;  %v2572_v36 = vpop.f32.mrb[45].mxu1 }
 0x327   :  { %v16437_v47 = vadd.f32 %v2572_v36, %v2512_v15  ;;  %v2574_v63 = vpop.f32.mrb[46].mxu1 }
 0x328   :  { %v2575_v60 = vpop.f32.mrb[47].mxu1 }
 0x32d   :  { %v2122_v1 = vpop.f32.mrb[40].mxu0  ;;  %v2626_v11 = vpop.f32.mrb[28].mxu1 }
 0x32e   :  { %v2145_v21 = vadd.f32 %v2122_v1, %v16382_v54  ;;  %v16441_v30 = vadd.f32 %v2626_v11, %v21452_v23  ;;  %v2124_v26 = vpop.f32.mrb[41].mxu0  ;;  %v2628_v31 = vpop.f32.mrb[29].mxu1 }
 0x32f   :  { %v2146_v32 = vadd.f32 %v2124_v26, %v16385_v17  ;;  %v16445_v49 = vadd.f32 %v2628_v31, %v21453_v33  ;;  %v2126_v38 = vpop.f32.mrb[42].mxu0  ;;  %v2630_v55 = vpop.f32.mrb[30].mxu1 }
 0x330   :  { %v2151_v27 = vmax.f32 %v2145_v21, 0.0  ;;  %v2655_v45 = vmax.f32 %v16441_v30, 0.0  ;;  %v2147_v12 = vadd.f32 %v2126_v38, %v16382_v54  ;;  %v16450_v2 = vadd.f32 %v2630_v55, %v21452_v23  ;;  %v2128_v18 = vpop.f32.mrb[43].mxu0  ;;  %v2632_v24 = vpop.f32.mrb[31].mxu1 }
 0x331   :  { %v2152_v56 = vmax.f32 %v2146_v32, 0.0  ;;  %v2656_v9 = vmax.f32 %v16445_v49, 0.0  ;;  %v2148_v50 = vadd.f32 %v2128_v18, %v16385_v17  ;;  %v16455_v39 = vadd.f32 %v2632_v24, %v21453_v33 }
 0x332   :  { %v2159_v5 = vrot.slane %v2151_v27, 2  ;;  %v2161_v46 = vrot.slane %v2151_v27, 4  ;;  %v2163_v35 = vrot.slane %v2151_v27, 6  ;;  %v2667_v34 = vrot.slane %v2655_v45, 1 }
 0x333   :  { %v2160_v51 = vrot.slane %v2152_v56, 2  ;;  %v2162_v10 = vrot.slane %v2152_v56, 4  ;;  %v2164_v14 = vrot.slane %v2152_v56, 6  ;;  %v2177_v44 = vcombine.low %v2151_v27, %v2152_v56 }
 0x334   :  { %v2670_v57 = vrot.slane %v2656_v9, 1  ;;  %v2153_v61 = vmax.f32 %v2147_v12, 0.0  ;;  %v21398_v19 = vmax.f32 %v16450_v2, 0.0  ;;  %v2154_v58 = vmax.f32 %v2148_v50, 0.0 }
 0x335   :  { %v2178_v15 = vcombine.low %v2159_v5, %v2160_v51  ;;  %v2179_v8 = vcombine.low %v2161_v46, %v2162_v10  ;;  %v2180_v0 = vcombine.low %v2163_v35, %v2164_v14  ;;  %v2187_v4 = vrot.slane %v2177_v44, %v16396_v40  ;;  %v2132_v36 = vpop.f32.mrb[52].mxu0  ;;  %v2636_v63 = vpop.f32.mrb[48].mxu1 }
 0x336   :  { %v2167_v60 = vrot.slane %v2153_v61, 2  ;;  %v2169_v1 = vrot.slane %v2153_v61, 4  ;;  %v2171_v11 = vrot.slane %v2153_v61, 6  ;;  %v2668_v21 = vrot.slane %v21398_v19, 1  ;;  %v2134_v26 = vpop.f32.mrb[53].mxu0  ;;  %v2638_v31 = vpop.f32.mrb[49].mxu1 }
 0x337   :  { %v2194_v32 = vrot.slane %v2178_v15, %v16396_v40  ;;  %v2201_v38 = vrot.slane %v2179_v8, %v16396_v40  ;;  %v2208_v55 = vrot.slane %v2180_v0, %v16396_v40  ;;  %v2168_v27 = vrot.slane %v2154_v58, 2  ;;  %v2136_v12 = vpop.f32.mrb[54].mxu0  ;;  %v2640_v18 = vpop.f32.mrb[50].mxu1 }
 0x338   :  { %v2170_v24 = vrot.slane %v2154_v58, 4  ;;  %v2172_v56 = vrot.slane %v2154_v58, 6  ;;  %v2226_v50 = vcombine.low %v2153_v61, %v2154_v58  ;;  %v2658_v5 = vmax.f32 %v16455_v39, 0.0  ;;  %v2137_v46 = vpop.f32.mrb[55].mxu0  ;;  %v2641_v35 = vpop.f32.mrb[51].mxu1 }
 0x339   :  { %v2209_v51 = vcombine.low %v2187_v4, %v2194_v32  ;;  %v2210_v10 = vcombine.low %v2201_v38, %v2208_v55  ;;  %v2227_v14 = vcombine.low %v2167_v60, %v2168_v27  ;;  %v2143_v44 = vadd.f32 %v2132_v36, %v16430_v25 }
 0x33a   :  { %v2228_v15 = vcombine.low %v2169_v1, %v2170_v24  ;;  %v2229_v19 = vcombine.low %v2171_v11, %v2172_v56  ;;  %v2236_v8 = vrot.slane %v2226_v50, %v16396_v40  ;;  %v2671_v0 = vrot.slane %v2658_v5, 1 }
 0x33b   :  { %v2217_v12 = vrot.slane %v2209_v51, %v16396_v40  ;;  %v2224_v18 = vrot.slane %v2210_v10, %v16396_v40  ;;  %v2243_v61 = vrot.slane %v2227_v14, %v16396_v40  ;;  %v2149_v39 = vadd.f32 %v2143_v44, %v16382_v54  ;;  %v16771_v54 = vld [vmem:[%s21365_s3 + $0x1e0] ss:$8 sps:$4 sm:$0xff]  }
 0x33c   :  { %v2250_v58 = vrot.slane %v2228_v15, %v16396_v40  ;;  %v2257_v4 = vrot.slane %v2229_v19, %v16396_v40  ;;  %v2647_v60 = vadd.f32 %v2636_v63, %v16435_v59  ;;  %v2144_v25 = vadd.f32 %v2134_v26, %v16433_v29 }
 0x33d   :  { %v2225_v36 = vcombine.low %v2217_v12, %v2224_v18  ;;  %v2258_v1 = vcombine.low %v2236_v8, %v2243_v61  ;;  %v2155_v11 = vmax.f32 %v2149_v39, 0.0  ;;  %v2648_v32 = vadd.f32 %v2638_v31, %v16437_v47 }
 0x33e   :  { %v2259_v38 = vcombine.low %v2250_v58, %v2257_v4  ;;  %v2653_v55 = vadd.f32 %v2647_v60, %v21452_v23  ;;  %v2150_v27 = vadd.f32 %v2144_v25, %v16385_v17  ;;  %v2669_v24 = vsel %vm334_vm1, %v2667_v34, %v2668_v21 }
 0x33f   :  { %2303 = vst [vmem:[#allocation2 + $0x1] ss:$8 sm:$0xf] %v2225_v36  ;;  %2304 = vst [vmem:[#allocation2 + $0x1] ss:$8 sm:$0xf0] %v2225_v36  ;;  %v2266_v19 = vrot.slane %v2258_v1, %v16396_v40  ;;  %v2654_v59 = vadd.f32 %v2648_v32, %v21453_v33  ;;  %v2672_v29 = vsel %vm334_vm1, %v2670_v57, %v2671_v0 }
 0x340   :  { %v2175_v56 = vrot.slane %v2155_v11, 2  ;;  %v2273_v63 = vrot.slane %v2259_v38, %v16396_v40  ;;  %v2659_v26 = vmax.f32 %v2653_v55, 0.0  ;;  %v2156_v47 = vmax.f32 %v2150_v27, 0.0 }
 0x341   :  { %v16489_v31 = vmax.f32 %v2655_v45, %v2669_v24  ;;  %v2660_v50 = vmax.f32 %v2654_v59, 0.0  ;;  %v16493_v34 = vmax.f32 %v2656_v9, %v2672_v29  ;;  %v21454_v9 = vmax.f32 %v16450_v2, 0.0 }
 0x342   :  { %v2274_v46 = vcombine.low %v2266_v19, %v2273_v63  ;;  %v2673_v35 = vrot.slane %v2659_v26, 1  ;;  %v2176_v51 = vrot.slane %v2156_v47, 2  ;;  %v2275_v10 = vcombine.low %v2155_v11, %v2156_v47 }
 0x343   :  { %v2675_v14 = vrot.slane %v2660_v50, 1  ;;  %v13400_v57 = vpack.i.bf16 %v16493_v34, %v16489_v31 }
 0x344   :  { %2306 = vst [vmem:[#allocation2 + $0x41] ss:$8 sm:$0xf] %v2274_v46  ;;  %2307 = vst [vmem:[#allocation2 + $0x41] ss:$8 sm:$0xf0] %v2274_v46  ;;  %v16497_v44 = vmax.f32 %v2659_v26, %v2673_v35  ;;  %v2276_v30 = vcombine.low %v2175_v56, %v2176_v51  ;;  %v2674_v45 = vsel %vm334_vm1, %v2668_v21, %v2673_v35 }
 0x345   :  { %v16500_v15 = vmax.f32 %v2660_v50, %v2675_v14  ;;  %13401 = vrot.lane.b32.xlu0 %v13400_v57, %s14914_s19  ;;  %v2676_v49 = vsel %vm334_vm1, %v2671_v0, %v2675_v14  ;;  %v16506_v8 = vmax.f32 %v21454_v9, %v2674_v45  ;;  %v3161_v12 = vpop.f32.mrb[60].mxu0  ;;  %v2283_v18 = vrot.slane %v2275_v10, %v16396_v40 }
 0x346   :  { %v2290_v61 = vrot.slane %v2276_v30, %v16396_v40  ;;  %v16510_v39 = vmax.f32 %v2658_v5, %v2676_v49  ;;  %v3163_v58 = vpop.f32.mrb[61].mxu0 }
 0x347   :  { %v13405_v21 = vpack.i.bf16 %v16500_v15, %v16497_v44  ;;  %v3165_v4 = vpop.f32.mrb[62].mxu0 }
 0x348   :  { %v2291_v60 = vcombine.low %v2283_v18, %v2290_v61  ;;  %v13410_v0 = vpack.i.bf16 %v16510_v39, %v16506_v8  ;;  %v3166_v25 = vpop.f32.mrb[63].mxu0 }
 0x349   :  { %13406 = vrot.lane.b32.xlu0 %v13405_v21, %s14914_s19 }
 0x34a   :  { %v2298_v2 = vrot.slane %v2291_v60, %v16396_v40  ;;  %13411 = vrot.lane.b32.xlu1 %v13410_v0, %s14914_s19 }
 0x34c   :  { %2309 = vst.msk [vmem:[#allocation2 + $0x81] ss:$8 sm:$0xf] %vm16422_vm8, %v2298_v2 }
 0x355   :  { %v3216_v5 = vpop.f32.mrb[64].mxu0 }
 0x356   :  { %v3217_v36 = vadd.f32 %v3216_v5, %v3161_v12  ;;  %v3218_v1 = vpop.f32.mrb[65].mxu0 }
 0x357   :  { %v3219_v11 = vadd.f32 %v3218_v1, %v3163_v58  ;;  %v3220_v32 = vpop.f32.mrb[66].mxu0 }
 0x358   :  { %v3221_v38 = vpop.f32.mrb[67].mxu0 }
 0x365   :  { %v3278_v55 = vpop.f32.mrb[68].mxu0 }
 0x366   :  { %v3289_v27 = vadd.f32 %v3278_v55, %v3217_v36  ;;  %v3280_v24 = vpop.f32.mrb[69].mxu0 }
 0x367   :  { %v3290_v19 = vadd.f32 %v3280_v24, %v3219_v11  ;;  %v3282_v56 = vpop.f32.mrb[70].mxu0 }
 0x368   :  { %v3283_v59 = vpop.f32.mrb[71].mxu0 }
 0x375   :  { %v3348_v29 = vpop.f32.mrb[72].mxu0 }
 0x376   :  { %v3359_v63 = vadd.f32 %v3348_v29, %v3289_v27  ;;  %v3350_v26 = vpop.f32.mrb[73].mxu0 }
 0x377   :  { %v3360_v47 = vadd.f32 %v3350_v26, %v3290_v19  ;;  %v3352_v50 = vpop.f32.mrb[74].mxu0 }
 0x378   :  { %v3353_v46 = vpop.f32.mrb[75].mxu0 }
 0x37d   :  { %v3404_v35 = vpop.f32.mrb[56].mxu0 }
 0x37e   :  { %v3427_v51 = vadd.f32 %v3404_v35, %v21452_v23  ;;  %v3406_v10 = vpop.f32.mrb[57].mxu0 }
 0x37f   :  { %v3428_v14 = vadd.f32 %v3406_v10, %v21453_v33  ;;  %v3408_v57 = vpop.f32.mrb[58].mxu0 }
 0x380   :  { %v3433_v30 = vmax.f32 %v3427_v51, 0.0  ;;  %v3429_v45 = vadd.f32 %v3408_v57, %v21452_v23  ;;  %v3410_v49 = vpop.f32.mrb[59].mxu0 }
 0x381   :  { %v3434_v9 = vmax.f32 %v3428_v14, 0.0  ;;  %v3430_v12 = vadd.f32 %v3410_v49, %v21453_v33 }
 0x382   :  { %v3435_v18 = vmax.f32 %v3429_v45, 0.0  ;;  %v3445_v58 = vrot.slane %v3433_v30, 1 }
 0x383   :  { %v3436_v61 = vmax.f32 %v3430_v12, 0.0  ;;  %v3448_v4 = vrot.slane %v3434_v9, 1 }
 0x384   :  { %v3446_v21 = vrot.slane %v3435_v18, 1 }
 0x385   :  { %v3449_v60 = vrot.slane %v3436_v61, 1  ;;  %v3414_v0 = vpop.f32.mrb[76].mxu0 }
 0x386   :  { %v3425_v25 = vadd.f32 %v3414_v0, %v3359_v63  ;;  %v3416_v2 = vpop.f32.mrb[77].mxu0  ;;  %v3447_v5 = vsel %vm334_vm1, %v3445_v58, %v3446_v21 }
 0x387   :  { %v3426_v36 = vadd.f32 %v3416_v2, %v3360_v47  ;;  %v3418_v1 = vpop.f32.mrb[78].mxu0  ;;  %v3450_v11 = vsel %vm334_vm1, %v3448_v4, %v3449_v60  ;;  %v16527_v32 = vmax.f32 %v3433_v30, %v3447_v5 }
 0x388   :  { %v3431_v38 = vadd.f32 %v3425_v25, %v21452_v23  ;;  %v3419_v55 = vpop.f32.mrb[79].mxu0  ;;  %v16530_v27 = vmax.f32 %v3434_v9, %v3450_v11 }
 0x389   :  { %v3432_v24 = vadd.f32 %v3426_v36, %v21453_v33 }
 0x38a   :  { %v3437_v19 = vmax.f32 %v3431_v38, 0.0  ;;  %v13415_v56 = vpack.i.bf16 %v16530_v27, %v16527_v32 }
 0x38b   :  { %v3438_v59 = vmax.f32 %v3432_v24, 0.0 }
 0x38c   :  { %v3451_v29 = vrot.slane %v3437_v19, 1  ;;  %13416 = vrot.lane.b32.xlu1 %v13415_v56, %s14914_s19  ;;  %v16586_v56 = vld [vmem:[%s21365_s3 + $0x14] ss:$8 sps:$4 sm:$0xff]  }
 0x38d   :  { %v3453_v63 = vrot.slane %v3438_v59, 1 }
 0x38e   :  { %v16536_v26 = vmax.f32 %v3437_v19, %v3451_v29  ;;  %v3452_v47 = vsel %vm334_vm1, %v3446_v21, %v3451_v29  ;;  %v16579_v19 = vld [vmem:[%s21365_s3] ss:$8 sps:$4 sm:$0xff]   ;;  %v16598_v29 = vld [vmem:[%s21365_s3 + $0x24] ss:$8 sps:$4 sm:$0xff]  }
 0x38f   :  { %v16539_v50 = vmax.f32 %v3438_v59, %v3453_v63  ;;  %v3454_v46 = vsel %vm334_vm1, %v3449_v60, %v3453_v63  ;;  %v16542_v35 = vmax.f32 %v3435_v18, %v3452_v47  ;;  %v16592_v59 = vld [vmem:[%s21365_s3 + $0x10] ss:$8 sps:$4 sm:$0xff]   ;;  %v16604_v63 = vld [vmem:[%s21365_s3 + $0x20] ss:$8 sps:$4 sm:$0xff]   ;;  %v16612_v47 = vld [vmem:[%s21365_s3 + $0x34] ss:$8 sps:$4 sm:$0xff]  }
 0x390   :  { %v16544_v51 = vmax.f32 %v3436_v61, %v3454_v46  ;;  %v16618_v46 = vld [vmem:[%s21365_s3 + $0x30] ss:$8 sps:$4 sm:$0xff]  }
 0x391   :  { %v13425_v10 = vpack.i.bf16 %v16539_v50, %v16536_v26 }
 0x392   :  { %v13420_v14 = vpack.i.bf16 %v16544_v51, %v16542_v35 }
 0x393   :  { %13426 = vrot.lane.b32.xlu1 %v13425_v10, %s14914_s19  ;;  %v16624_v10 = vld [vmem:[%s21365_s3 + $0x44] ss:$8 sps:$4 sm:$0xff]  }
 0x394   :  { %13421 = vrot.lane.b32.xlu0 %v13420_v14, %s14914_s19  ;;  %v16630_v14 = vld [vmem:[%s21365_s3 + $0x40] ss:$8 sps:$4 sm:$0xff]  }
 0x3b7   :  { %v13402_v57 = vpop.permute.xlu0 %13401 }
 0x3b8   :  { %v13404_v30 = vunpack.i.h.bf16 %v13402_v57  ;;  %v13403_v45 = vunpack.i.l.bf16 %v13402_v57  ;;  %v16636_v57 = vld [vmem:[%s21365_s3 + $0x54] ss:$8 sps:$4 sm:$0xff]  }
 0x3ba   :  { %v2707_v61 = vsel %vm681_vm6, %v13403_v45, %v13404_v30  ;;  %v2717_v0 = vmax.f32 %v16493_v34, %v13404_v30  ;;  %v16642_v30 = vld [vmem:[%s21365_s3 + $0x50] ss:$8 sps:$4 sm:$0xff]   ;;  %v16648_v45 = vld [vmem:[%s21365_s3 + $0x64] ss:$8 sps:$4 sm:$0xff]  }
 0x3bb   :  { %v13407_v49 = vpop.permute.xlu0 %13406  ;;  %v2716_v36 = vmax.f32 %v16489_v31, %v2707_v61  ;;  %v16678_v61 = vld [vmem:[%s21365_s3 + $0x80] ss:$8 sps:$4 sm:$0xff]  }
 0x3bc   :  { %v13409_v9 = vunpack.i.h.bf16 %v13407_v49  ;;  %v13408_v12 = vunpack.i.l.bf16 %v13407_v49  ;;  %v13412_v18 = vpop.permute.xlu1 %13411  ;;  %v16654_v49 = vld [vmem:[%s21365_s3 + $0x60] ss:$8 sps:$4 sm:$0xff]  }
 0x3bd   :  { %v13414_v58 = vunpack.i.h.bf16 %v13412_v18  ;;  %v13413_v21 = vunpack.i.l.bf16 %v13412_v18  ;;  %v16672_v18 = vld [vmem:[%s21365_s3 + $0x84] ss:$8 sps:$4 sm:$0xff]  }
 0x3be   :  { %v2721_v4 = vmax.f32 %v16500_v15, %v13409_v9  ;;  %v2709_v60 = vsel %vm681_vm6, %v13408_v12, %v13409_v9  ;;  %v16660_v9 = vld [vmem:[%s21365_s3 + $0x74] ss:$8 sps:$4 sm:$0xff]   ;;  %v16666_v12 = vld [vmem:[%s21365_s3 + $0x70] ss:$8 sps:$4 sm:$0xff]  }
 0x3bf   :  { %v2720_v25 = vmax.f32 %v16497_v44, %v2709_v60  ;;  %v2719_v2 = vmax.f32 %v16510_v39, %v13414_v58  ;;  %v2708_v5 = vsel %vm681_vm6, %v13413_v21, %v13414_v58  ;;  %v16684_v58 = vld [vmem:[%s21365_s3 + $0x94] ss:$8 sps:$4 sm:$0xff]   ;;  %v16690_v21 = vld [vmem:[%s21365_s3 + $0x90] ss:$8 sps:$4 sm:$0xff]   ;;  %v16702_v60 = vld [vmem:[%s21365_s3 + $0xa0] ss:$8 sps:$4 sm:$0xff]  }
 0x3c0   :  { %v16560_v1 = vpack.c.bf16 %v2721_v4, %v2721_v4  ;;  %v2718_v11 = vmax.f32 %v16506_v8, %v2708_v5  ;;  %v16696_v4 = vld [vmem:[%s21365_s3 + $0xa4] ss:$8 sps:$4 sm:$0xff]   ;;  %v16726_v5 = vld [vmem:[%s21365_s3 + $0xc0] ss:$8 sps:$4 sm:$0xff]  }
 0x3c1   :  { %v16563_v38 = vpack.c.bf16 %v2720_v25, %v2720_v25  ;;  %v16565_v55 = vpack.c.bf16 %v2719_v2, %v2717_v0  ;;  %v16708_v0 = vld [vmem:[%s21365_s3 + $0xb4] ss:$8 sps:$4 sm:$0xff]   ;;  %v16714_v25 = vld [vmem:[%s21365_s3 + $0xb0] ss:$8 sps:$4 sm:$0xff]   ;;  %v16720_v2 = vld [vmem:[%s21365_s3 + $0xc4] ss:$8 sps:$4 sm:$0xff]  }
 0x3c2   :  { %v16567_v15 = vpack.c.bf16 %v2718_v11, %v2716_v36  ;;  %v2734_v34 = vrot.slane %v16560_v1, 1  ;;  %v16732_v36 = vld [vmem:[%s21365_s3 + $0xd4] ss:$8 sps:$4 sm:$0xff]   ;;  %v16738_v11 = vld [vmem:[%s21365_s3 + $0xd0] ss:$8 sps:$4 sm:$0xff]  }
 0x3c3   :  { %v2733_v44 = vrot.slane %v16565_v55, 1  ;;  %v2731_v39 = vrot.slane %v16563_v38, 1  ;;  %v2855_v48 = vrot.slane %v16565_v55, 2 }
 0x3c4   :  { %v2730_v24 = vrot.slane %v16567_v15, 1 }
 0x3c5   :  { %v2735_v31 = vsel %vm334_vm1, %v2733_v44, %v2734_v34  ;;  %v16747_v44 = vld [vmem:[%s21365_s3 + $0x1d4] ss:$8 sps:$4 sm:$0xff]  }
 0x3c6   :  { %12194 = vmatprep.mubr.msk.bf16.mxu1 %vm858_vm7, %v2735_v31  ;;  %v2732_v8 = vsel %vm334_vm1, %v2730_v24, %v2731_v39  ;;  %v16756_v31 = vld [vmem:[%s21365_s3 + $0x1d0] ss:$8 sps:$4 sm:$0xff]  }
 0x3c7   :  { %2777 = vmatmul.mubr.bf16.vlgmr.msra.gmra.mrb[52].mxu1 %v2732_v8  ;;  %v16762_v8 = vld [vmem:[%s21365_s3 + $0x1e4] ss:$8 sps:$4 sm:$0xff]  }
 0x3c8   :  { %2802 = vmatpush1.bf16.msra.mxu1 %v16579_v19  ;;  %12195 = vmatprep.mubr.msk.bf16.mxu1 %vm858_vm7, %v2734_v34 }
 0x3c9   :  { %2803 = vmatprep.subr.bf16.mxu1 %v16586_v56 }
 0x3cc   :  { %2804 = vmatpush1.bf16.msra.mxu1 %v16592_v59 }
 0x3cd   :  { %2805 = vmatprep.subr.bf16.mxu1 %v16598_v29 }
 0x3cf   :  { %2787 = vmatmul.mubr.bf16.gmra.mrb[56].mxu1 %v2731_v39 }
 0x3d0   :  { %2806 = vmatpush1.bf16.msra.mxu1 %v16604_v63  ;;  %12197 = vmatprep.mubr.msk.bf16.mxu1 %vm858_vm7, %v16565_v55 }
 0x3d1   :  { %2807 = vmatprep.subr.bf16.mxu1 %v16612_v47 }
 0x3d4   :  { %2808 = vmatpush1.bf16.msra.mxu1 %v16618_v46 }
 0x3d5   :  { %2809 = vmatprep.subr.bf16.mxu1 %v16624_v10 }
 0x3d8   :  { %2810 = vmatpush1.bf16.msra.mxu1 %v16630_v14 }
 0x3d9   :  { %2811 = vmatprep.subr.bf16.mxu1 %v16636_v57 }
 0x3dc   :  { %2812 = vmatpush1.bf16.msra.mxu1 %v16642_v30 }
 0x3dd   :  { %2813 = vmatprep.subr.bf16.mxu1 %v16648_v45 }
 0x3e0   :  { %2814 = vmatpush1.bf16.msra.mxu1 %v16654_v49 }
 0x3e1   :  { %2815 = vmatprep.subr.bf16.mxu1 %v16660_v9 }
 0x3e4   :  { %2816 = vmatpush1.bf16.msra.mxu1 %v16666_v12 }
 0x3e5   :  { %2817 = vmatprep.subr.bf16.mxu1 %v16672_v18 }
 0x3e8   :  { %2818 = vmatpush1.bf16.msra.mxu1 %v16678_v61 }
 0x3e9   :  { %2819 = vmatprep.subr.bf16.mxu1 %v16684_v58 }
 0x3ec   :  { %2820 = vmatpush1.bf16.msra.mxu1 %v16690_v21 }
 0x3ed   :  { %2821 = vmatprep.subr.bf16.mxu1 %v16696_v4 }
 0x3f0   :  { %2822 = vmatpush1.bf16.msra.mxu1 %v16702_v60 }
 0x3f1   :  { %2823 = vmatprep.subr.bf16.mxu1 %v16708_v0 }
 0x3f4   :  { %2824 = vmatpush1.bf16.msra.mxu1 %v16714_v25 }
 0x3f5   :  { %2825 = vmatprep.subr.bf16.mxu1 %v16720_v2 }
 0x3f8   :  { %2826 = vmatpush1.bf16.msra.mxu1 %v16726_v5 }
 0x3f9   :  { %2827 = vmatprep.subr.bf16.mxu1 %v16732_v36 }
 0x3fc   :  { %2828 = vmatpush1.bf16.msra.mxu1 %v16738_v11 }
 0x3fd   :  { %12196 = vmatprep.subr.msk.bf16.mxu1 %vm865_vm5, %v15606_v62 }
 0x3fe   :  { %v13417_v34 = vpop.permute.xlu1 %13416 }
 0x3ff   :  { %v13419_v39 = vunpack.i.h.bf16 %v13417_v34  ;;  %v13418_v24 = vunpack.i.l.bf16 %v13417_v34 }
 0x400   :  { %2830 = vmatpush1.bf16.msra.mxu1 %v15612_v7 }
 0x401   :  { %2866 = vmatprep.subr.bf16.mxu1 %v16747_v44  ;;  %v3485_v23 = vsel %vm681_vm6, %v13418_v24, %v13419_v39  ;;  %v3495_v37 = vmax.f32 %v16530_v27, %v13419_v39  ;;  %v16780_v24 = vld [vmem:[%s21365_s3 + $0x1f4] ss:$8 sps:$4 sm:$0xff]   ;;  %v21455_v39 = vrot.slane %v16560_v1, 2 }
 0x402   :  { %v3494_v28 = vmax.f32 %v16527_v32, %v3485_v23 }
 0x403   :  { %2834 = vmatmul.mubr.bf16.vlgmr.msra.gmra.mrb[52].mxu1 %v16567_v15 }
 0x404   :  { %12198 = vmatprep.mubr.msk.bf16.mxu1 %vm858_vm7, %v16560_v1  ;;  %2867 = vmatpush1.bf16.msra.mxu1 %v16756_v31 }
 0x405   :  { %2868 = vmatprep.subr.bf16.mxu1 %v16762_v8  ;;  %v13427_v6 = vpop.permute.xlu1 %13426 }
 0x406   :  { %v13429_v53 = vunpack.i.h.bf16 %v13427_v6  ;;  %v13428_v34 = vunpack.i.l.bf16 %v13427_v6  ;;  %v13422_v33 = vpop.permute.xlu0 %13421 }
 0x407   :  { %v13424_v40 = vunpack.i.h.bf16 %v13422_v33  ;;  %v13423_v17 = vunpack.i.l.bf16 %v13422_v33 }
 0x408   :  { %2869 = vmatpush1.bf16.msra.mxu1 %v16771_v54  ;;  %v3499_v20 = vmax.f32 %v16539_v50, %v13429_v53  ;;  %v3487_v6 = vsel %vm681_vm6, %v13428_v34, %v13429_v53  ;;  %v2857_v34 = vsel %vm195_vm0, %v2855_v48, %v21455_v39 }
 0x409   :  { %2870 = vmatprep.subr.bf16.mxu1 %v16780_v24  ;;  %v3498_v33 = vmax.f32 %v16536_v26, %v3487_v6  ;;  %v3497_v55 = vmax.f32 %v16544_v51, %v13424_v40  ;;  %v3486_v16 = vsel %vm681_vm6, %v13423_v17, %v13424_v40  ;;  %v16801_v17 = vld [vmem:[%s21365_s3 + $0x1f0] ss:$8 sps:$4 sm:$0xff]   ;;  %v16811_v40 = vld [vmem:[%s21365_s3 + $0x204] ss:$8 sps:$4 sm:$0xff]  }
 0x40a   :  { %v16787_v50 = vpack.c.bf16 %v3499_v20, %v3499_v20  ;;  %v3496_v53 = vmax.f32 %v16542_v35, %v3486_v16  ;;  %v16829_v35 = vld [vmem:[%s21365_s3 + $0x214] ss:$8 sps:$4 sm:$0xff]   ;;  %v16838_v51 = vld [vmem:[%s21365_s3 + $0x210] ss:$8 sps:$4 sm:$0xff]   ;;  %v16844_v6 = vld [vmem:[%s21365_s3 + $0x224] ss:$8 sps:$4 sm:$0xff]  }
 0x40b   :  { %2844 = vmatmul.mubr.bf16.gmra.mrb[60].mxu1 %v16563_v38  ;;  %v16791_v27 = vpack.c.bf16 %v3498_v33, %v3498_v33  ;;  %v16796_v22 = vpack.c.bf16 %v3497_v55, %v3495_v37  ;;  %v2853_v33 = vrot.slane %v16563_v38, 2  ;;  %v12233_v38 = vld [vmem:[%s21364_s0 + $0x98] sm:$0xf] }
 0x40c   :  { %2871 = vmatpush1.bf16.msra.mxu1 %v16801_v17  ;;  %12200 = vmatprep.mubr.msk.bf16.mxu1 %vm858_vm7, %v2857_v34  ;;  %v16805_v16 = vpack.c.bf16 %v3496_v53, %v3494_v28  ;;  %v3512_v20 = vrot.slane %v16787_v50, 1  ;;  %v16821_v28 = vld [vmem:[%s21365_s3 + $0x200] ss:$8 sps:$4 sm:$0xff]   ;;  %v16987_v53 = vld [vmem:[%s21363_s1 + $0x24] ss:$8 sps:$4 sm:$0xff]  }
 0x40d   :  { %2872 = vmatprep.subr.bf16.mxu1 %v16811_v40  ;;  %v3511_v37 = vrot.slane %v16796_v22, 1  ;;  %v3509_v48 = vrot.slane %v16791_v27, 1 }
 0x40e   :  { %v3508_v23 = vrot.slane %v16805_v16, 1 }
 0x40f   :  { %v3513_v32 = vsel %vm334_vm1, %v3511_v37, %v3512_v20 }
 0x410   :  { %2873 = vmatpush1.bf16.msra.mxu1 %v16821_v28  ;;  %12222 = vmatprep.mubr.msk.bf16.mxu0 %vm858_vm7, %v3513_v32  ;;  %v3510_v26 = vsel %vm334_vm1, %v3508_v23, %v3509_v48  ;;  %v17059_v32 = vld [vmem:[%s21363_s1 + $0x14] ss:$8 sps:$4 sm:$0x3f]  }
 0x411   :  { %2874 = vmatprep.subr.bf16.mxu1 %v16829_v35  ;;  %3555 = vmatmul.mubr.bf16.vlgmr.msra.gmra.mrb[80].mxu0 %v3510_v26 }
 0x412   :  { %3580 = vmatpush1.bf16.msra.mxu0 %v16579_v19  ;;  %12223 = vmatprep.mubr.msk.bf16.mxu0 %vm858_vm7, %v3512_v20  ;;  %v16852_v19 = vld [vmem:[%s21365_s3 + $0x220] ss:$8 sps:$4 sm:$0xff]  }
 0x413   :  { %3581 = vmatprep.subr.bf16.mxu0 %v16586_v56  ;;  %v16858_v56 = vld [vmem:[%s21365_s3 + $0x234] ss:$8 sps:$4 sm:$0xff]  }
 0x414   :  { %2875 = vmatpush1.bf16.msra.mxu1 %v16838_v51 }
 0x415   :  { %2876 = vmatprep.subr.bf16.mxu1 %v16844_v6 }
 0x416   :  { %3582 = vmatpush1.bf16.msra.mxu0 %v16592_v59  ;;  %v16868_v59 = vld [vmem:[%s21365_s3 + $0x230] ss:$8 sps:$4 sm:$0xff]  }
 0x417   :  { %3583 = vmatprep.subr.bf16.mxu0 %v16598_v29  ;;  %v16874_v29 = vld [vmem:[%s21365_s3 + $0x244] ss:$8 sps:$4 sm:$0xff]  }
 0x418   :  { %2877 = vmatpush1.bf16.msra.mxu1 %v16852_v19 }
 0x419   :  { %2878 = vmatprep.subr.bf16.mxu1 %v16858_v56  ;;  %3565 = vmatmul.mubr.bf16.gmra.mrb[84].mxu0 %v3509_v48  ;;  %v17028_v48 = vld [vmem:[%s21363_s1 + $0x4] ss:$8 sps:$4 sm:$0xff]  }
 0x41a   :  { %3584 = vmatpush1.bf16.msra.mxu0 %v16604_v63  ;;  %12225 = vmatprep.mubr.msk.bf16.mxu0 %vm858_vm7, %v16796_v22  ;;  %v16882_v63 = vld [vmem:[%s21365_s3 + $0x240] ss:$8 sps:$4 sm:$0xff]  }
 0x41b   :  { %3585 = vmatprep.subr.bf16.mxu0 %v16612_v47  ;;  %v16888_v47 = vld [vmem:[%s21365_s3 + $0x254] ss:$8 sps:$4 sm:$0xff]  }
 0x41c   :  { %2879 = vmatpush1.bf16.msra.mxu1 %v16868_v59 }
 0x41d   :  { %2880 = vmatprep.subr.bf16.mxu1 %v16874_v29 }
 0x41e   :  { %3586 = vmatpush1.bf16.msra.mxu0 %v16618_v46  ;;  %v16896_v46 = vld [vmem:[%s21365_s3 + $0x250] ss:$8 sps:$4 sm:$0xff]  }
 0x41f   :  { %3587 = vmatprep.subr.bf16.mxu0 %v16624_v10  ;;  %v16902_v10 = vld [vmem:[%s21365_s3 + $0x264] ss:$8 sps:$4 sm:$0xff]  }
 0x420   :  { %2881 = vmatpush1.bf16.msra.mxu1 %v16882_v63 }
 0x421   :  { %2882 = vmatprep.subr.bf16.mxu1 %v16888_v47 }
 0x422   :  { %3588 = vmatpush1.bf16.msra.mxu0 %v16630_v14  ;;  %v16910_v14 = vld [vmem:[%s21365_s3 + $0x260] ss:$8 sps:$4 sm:$0xff]  }
 0x423   :  { %3589 = vmatprep.subr.bf16.mxu0 %v16636_v57  ;;  %v16916_v57 = vld [vmem:[%s21365_s3 + $0x274] ss:$8 sps:$4 sm:$0xff]  }
 0x424   :  { %2883 = vmatpush1.bf16.msra.mxu1 %v16896_v46 }
 0x425   :  { %2884 = vmatprep.subr.bf16.mxu1 %v16902_v10 }
 0x426   :  { %3590 = vmatpush1.bf16.msra.mxu0 %v16642_v30  ;;  %v16924_v30 = vld [vmem:[%s21365_s3 + $0x270] ss:$8 sps:$4 sm:$0xff]  }
 0x427   :  { %3591 = vmatprep.subr.bf16.mxu0 %v16648_v45  ;;  %v16930_v45 = vld [vmem:[%s21365_s3 + $0x284] ss:$8 sps:$4 sm:$0xff]  }
 0x428   :  { %2885 = vmatpush1.bf16.msra.mxu1 %v16910_v14 }
 0x429   :  { %2886 = vmatprep.subr.bf16.mxu1 %v16916_v57 }
 0x42a   :  { %3592 = vmatpush1.bf16.msra.mxu0 %v16654_v49  ;;  %v16938_v49 = vld [vmem:[%s21365_s3 + $0x280] ss:$8 sps:$4 sm:$0xff]  }
 0x42b   :  { %3593 = vmatprep.subr.bf16.mxu0 %v16660_v9  ;;  %v16944_v9 = vld [vmem:[%s21365_s3 + $0x294] ss:$8 sps:$4 sm:$0xff]  }
 0x42c   :  { %2887 = vmatpush1.bf16.msra.mxu1 %v16924_v30 }
 0x42d   :  { %2888 = vmatprep.subr.bf16.mxu1 %v16930_v45 }
 0x42e   :  { %3594 = vmatpush1.bf16.msra.mxu0 %v16666_v12  ;;  %v16952_v12 = vld [vmem:[%s21365_s3 + $0x290] ss:$8 sps:$4 sm:$0xff]  }
 0x42f   :  { %3595 = vmatprep.subr.bf16.mxu0 %v16672_v18  ;;  %v16958_v18 = vld [vmem:[%s21365_s3 + $0x2a4] ss:$8 sps:$4 sm:$0xff]  }
 0x430   :  { %2889 = vmatpush1.bf16.msra.mxu1 %v16938_v49 }
 0x431   :  { %2890 = vmatprep.subr.bf16.mxu1 %v16944_v9 }
 0x432   :  { %3596 = vmatpush1.bf16.msra.mxu0 %v16678_v61  ;;  %v16966_v61 = vld [vmem:[%s21365_s3 + $0x2a0] ss:$8 sps:$4 sm:$0xff]  }
 0x433   :  { %3597 = vmatprep.subr.bf16.mxu0 %v16684_v58  ;;  %v12230_v58 = vld [vmem:[%s21364_s0 + $0x80] sm:$0xff] }
 0x434   :  { %2891 = vmatpush1.bf16.msra.mxu1 %v16952_v12 }
 0x435   :  { %2892 = vmatprep.subr.bf16.mxu1 %v16958_v18 }
 0x436   :  { %3598 = vmatpush1.bf16.msra.mxu0 %v16690_v21  ;;  %v12231_v21 = vld [vmem:[%s21364_s0 + $0x88] sm:$0xff] }
 0x437   :  { %3599 = vmatprep.subr.bf16.mxu0 %v16696_v4  ;;  %v2852_v4 = vrot.slane %v16567_v15, 2  ;;  %v16982_v55 = vpack.c.bf16 %v12231_v21, %v12230_v58  ;;  %v12232_v15 = vld [vmem:[%s21364_s0 + $0x90] sm:$0xff]  ;;  %v17075_v21 = vld [vmem:[%s21363_s1 + $0x44] ss:$8 sps:$4 sm:$0xff]  }
 0x438   :  { %2893 = vmatpush1.bf16.msra.mxu1 %v16966_v61  ;;  %v17008_v34 = vpack.c.bf16 %v12233_v38, %v12232_v15 }
 0x439   :  { %12199 = vmatprep.subr.msk.bf16.mxu1 %vm865_vm5, %v15838_v41  ;;  %v3877_v20 = vshll.u32 %v16982_v55, 16  ;;  %v3875_v1 = vshrl.u32 %v16982_v55, 16 }
 0x43a   :  { %3600 = vmatpush1.bf16.msra.mxu0 %v16702_v60  ;;  %v2854_v60 = vsel %vm195_vm0, %v2852_v4, %v2853_v33  ;;  %v3882_v37 = vshll.u32 %v17008_v34, 16  ;;  %v4140_v15 = vrot.slane %v17008_v34, 2 }
 0x43b   :  { %3601 = vmatprep.subr.bf16.mxu0 %v16708_v0  ;;  %v21456_v0 = vmov %v21455_v39  ;;  %v17005_v39 = vld [vmem:[%s21363_s1 + $0x20] ss:$8 sps:$4 sm:$0xff]  }
 0x43c   :  { %2895 = vmatpush1.bf16.msra.mxu1 %v15846_v42 }
 0x43d   :  { %3895 = vmatprep.subr.bf16.mxu1 %v16987_v53 }
 0x43e   :  { %3602 = vmatpush1.bf16.msra.mxu0 %v16714_v25  ;;  %v17014_v25 = vld [vmem:[%s21363_s1 + $0x34] ss:$8 sps:$4 sm:$0x3f]  }
 0x43f   :  { %2899 = vmatmul.mubr.bf16.vlgmr.msra.gmra.mrb[52].mxu1 %v2854_v60  ;;  %3603 = vmatprep.subr.bf16.mxu0 %v16720_v2  ;;  %v3879_v2 = vrot.slane %v3877_v20, 1 }
 0x440   :  { %12201 = vmatprep.mubr.msk.bf16.mxu1 %vm858_vm7, %v21456_v0  ;;  %3896 = vmatpush1.bf16.msra.mxu1 %v17005_v39 }
 0x441   :  { %12234 = vmatprep.subr.msk.bf16.mxu1 %vm195_vm0, %v17014_v25 }
 0x442   :  { %3604 = vmatpush1.bf16.msra.mxu0 %v16726_v5  ;;  %v3880_v5 = vor.u32 %v3879_v2, %v3875_v1  ;;  %v17255_v2 = vld [vmem:[%s21365_s3 + $0x10c] ss:$8 sps:$4 sm:$0xff]  }
 0x443   :  { %3605 = vmatprep.subr.bf16.mxu0 %v16732_v36  ;;  %v3884_v36 = vrot.slane %v3882_v37, 1 }
 0x444   :  { %3898 = vmatpush1.bf16.msra.mxu1 %v15027_v13 }
 0x445   :  { %3950 = vmatprep.subr.bf16.mxu1 %v17028_v48  ;;  %v3885_v23 = vsel %vm154_vm3, %v3880_v5, %v3884_v36 }
 0x446   :  { %3606 = vmatpush1.bf16.msra.mxu0 %v16738_v11  ;;  %v3886_v11 = vshrl.u32 %v17008_v34, 16 }
 0x447   :  { %2909 = vmatmul.mubr.bf16.gmra.mrb[64].mxu1 %v2853_v33  ;;  %12224 = vmatprep.subr.msk.bf16.mxu0 %vm865_vm5, %v15606_v62  ;;  %v4139_v33 = vrot.slane %v16982_v55, 2 }
 0x448   :  { %3927 = vmatprep.mubr.bf16.mxu1 %v21435_v52  ;;  %v3888_v26 = vor.u32 %v3886_v11, %v3884_v36  ;;  %v17271_v36 = vld [vmem:[%s21365_s3 + $0x11c] ss:$8 sps:$4 sm:$0xff]  }
 0x449   :  { %v4141_v60 = vsel %vm195_vm0, %v4139_v33, %v4140_v15  ;;  %v14756_v33 = vld [vmem:[%s21365_s3 + $0x1bc] ss:$8 sps:$4 sm:$0xff]  }
 0x44a   :  { %3608 = vmatpush1.bf16.msra.mxu0 %v15612_v7 }
 0x44b   :  { %3644 = vmatprep.subr.bf16.mxu0 %v16747_v44  ;;  %v17053_v44 = vld [vmem:[%s21363_s1] ss:$8 sps:$4 sm:$0xff]  }
 0x44d   :  { %3612 = vmatmul.mubr.bf16.vlgmr.msra.gmra.mrb[80].mxu0 %v16805_v16 }
 0x44e   :  { %12226 = vmatprep.mubr.msk.bf16.mxu0 %vm858_vm7, %v16787_v50  ;;  %3645 = vmatpush1.bf16.msra.mxu0 %v16756_v31  ;;  %v3633_v31 = vrot.slane %v16796_v22, 2  ;;  %v17093_v22 = vld [vmem:[%s21363_s1 + $0x40] ss:$8 sps:$4 sm:$0xff]  }
 0x44f   :  { %12235 = vmatmul.mubr.msk.bf16.vlgmr.msra.gmra.mrb[68].mxu1 %vm188_vm2, %v3885_v23  ;;  %3646 = vmatprep.subr.bf16.mxu0 %v16762_v8  ;;  %v3634_v8 = vrot.slane %v16787_v50, 2  ;;  %v17281_v23 = vld [vmem:[%s21365_s3 + $0x118] ss:$8 sps:$4 sm:$0xff]  }
 0x450   :  { %3937 = vmatprep.mubr.bf16.mxu1 %v21435_v52  ;;  %3951 = vmatpush1.bf16.msra.mxu1 %v17053_v44 }
 0x451   :  { %12237 = vmatprep.subr.msk.bf16.mxu1 %vm195_vm0, %v17059_v32  ;;  %v3635_v58 = vsel %vm195_vm0, %v3633_v31, %v3634_v8  ;;  %v17289_v31 = vld [vmem:[%s21365_s3 + $0x12c] ss:$8 sps:$4 sm:$0xff]  }
 0x452   :  { %3647 = vmatpush1.bf16.msra.mxu0 %v16771_v54  ;;  %v17099_v54 = vld [vmem:[%s21363_s1 + $0x54] ss:$8 sps:$4 sm:$0x3f]  }
 0x453   :  { %3648 = vmatprep.subr.bf16.mxu0 %v16780_v24  ;;  %v17109_v24 = vld [vmem:[%s21363_s1 + $0x64] ss:$8 sps:$4 sm:$0xff]  }
 0x454   :  { %3953 = vmatpush1.bf16.msra.mxu1 %v15107_v43 }
 0x455   :  { %3622 = vmatmul.mubr.bf16.gmra.mrb[88].mxu0 %v16791_v27  ;;  %4012 = vmatprep.subr.bf16.mxu1 %v17075_v21 }
 0x456   :  { %3649 = vmatpush1.bf16.msra.mxu0 %v16801_v17  ;;  %12228 = vmatprep.mubr.msk.bf16.mxu0 %vm858_vm7, %v3635_v58  ;;  %v4003_v17 = vrot.slane %v16982_v55, 1 }
 0x457   :  { %12236 = vmatmul.mubr.msk.bf16.gmra.mrb[72].mxu1 %vm188_vm2, %v3888_v26  ;;  %3650 = vmatprep.subr.bf16.mxu0 %v16811_v40  ;;  %v4004_v40 = vrot.slane %v17008_v34, 1 }
 0x458   :  { %3982 = vmatprep.mubr.bf16.mxu1 %v21435_v52 }
 0x45a   :  { %3651 = vmatpush1.bf16.msra.mxu0 %v16821_v28  ;;  %v4005_v28 = vsel %vm334_vm1, %v4003_v17, %v4004_v40 }
 0x45b   :  { %3652 = vmatprep.subr.bf16.mxu0 %v16829_v35  ;;  %v17129_v35 = vld [vmem:[%s21363_s1 + $0x60] ss:$8 sps:$4 sm:$0xff]  }
 0x45e   :  { %3653 = vmatpush1.bf16.msra.mxu0 %v16838_v51  ;;  %v17135_v51 = vld [vmem:[%s21363_s1 + $0x74] ss:$8 sps:$4 sm:$0x3f]  }
 0x45f   :  { %12238 = vmatmul.mubr.msk.bf16.vlgmr.msra.gmra.mrb[68].mxu1 %vm188_vm2, %v16982_v55  ;;  %3654 = vmatprep.subr.bf16.mxu0 %v16844_v6  ;;  %v4072_v6 = vrot.slane %v3886_v11, 1 }
 0x460   :  { %3992 = vmatprep.mubr.bf16.mxu1 %v21435_v52  ;;  %4013 = vmatpush1.bf16.msra.mxu1 %v17093_v22 }
 0x461   :  { %12240 = vmatprep.subr.msk.bf16.mxu1 %vm195_vm0, %v17099_v54 }
 0x462   :  { %3655 = vmatpush1.bf16.msra.mxu0 %v16852_v19  ;;  %v21457_v19 = vld [vmem:[#allocation4_spill] sm:$0xff] }
 0x463   :  { %3656 = vmatprep.subr.bf16.mxu0 %v16858_v56  ;;  %v4069_v56 = vrot.slane %v3875_v1, 1  ;;  %v17249_v1 = vld [vmem:[%s21365_s3 + $0xf8] ss:$8 sps:$4 sm:$0xff]  }
 0x464   :  { %4015 = vmatpush1.bf16.msra.mxu1 %v21436_v3 }
 0x465   :  { %4082 = vmatprep.subr.bf16.mxu1 %v17109_v24 }
 0x466   :  { %3657 = vmatpush1.bf16.msra.mxu0 %v16868_v59  ;;  %v4070_v59 = vrot.slane %v3877_v20, 2 }
 0x467   :  { %12239 = vmatmul.mubr.msk.bf16.gmra.mrb[76].mxu1 %vm188_vm2, %v17008_v34  ;;  %3658 = vmatprep.subr.bf16.mxu0 %v16874_v29  ;;  %v4073_v29 = vrot.slane %v3882_v37, 2  ;;  %v17238_v34 = vld [vmem:[%s21365_s3 + $0xfc] ss:$8 sps:$4 sm:$0xff]  }
 0x468   :  { %4044 = vmatprep.mubr.bf16.mxu1 %v21435_v52 }
 0x46a   :  { %3659 = vmatpush1.bf16.msra.mxu0 %v16882_v63  ;;  %v17151_v63 = vld [vmem:[%s21363_s1 + $0x84] ss:$8 sps:$4 sm:$0xff]  }
 0x46b   :  { %3660 = vmatprep.subr.bf16.mxu0 %v16888_v47  ;;  %v4071_v47 = vor.u32 %v4070_v59, %v4069_v56  ;;  %v17345_v56 = vld [vmem:[%s21365_s3 + $0x158] ss:$8 sps:$4 sm:$0xff]   ;;  %v17351_v59 = vld [vmem:[%s21365_s3 + $0x16c] ss:$8 sps:$4 sm:$0xff]  }
 0x46e   :  { %3661 = vmatpush1.bf16.msra.mxu0 %v16896_v46  ;;  %v4074_v46 = vor.u32 %v4073_v29, %v4072_v6  ;;  %v17335_v6 = vld [vmem:[%s21365_s3 + $0x15c] ss:$8 sps:$4 sm:$0xff]  }
 0x46f   :  { %12241 = vmatmul.mubr.msk.bf16.vlgmr.msra.gmra.mrb[68].mxu1 %vm188_vm2, %v4005_v28  ;;  %3662 = vmatprep.subr.bf16.mxu0 %v16902_v10  ;;  %v17327_v28 = vld [vmem:[%s21365_s3 + $0x148] ss:$8 sps:$4 sm:$0xff]  }
 0x470   :  { %4054 = vmatprep.mubr.bf16.mxu1 %v21435_v52  ;;  %4083 = vmatpush1.bf16.msra.mxu1 %v17129_v35  ;;  %v4075_v10 = vsel %vm425_vm4, %v4071_v47, %v4074_v46  ;;  %v17376_v47 = vld [vmem:[%s21365_s3 + $0x178] ss:$8 sps:$4 sm:$0xff]  }
 0x471   :  { %12243 = vmatprep.subr.msk.bf16.mxu1 %vm195_vm0, %v17135_v51 }
 0x472   :  { %3663 = vmatpush1.bf16.msra.mxu0 %v16910_v14  ;;  %v17168_v14 = vld [vmem:[%s21363_s1 + $0x80] ss:$8 sps:$4 sm:$0xff]  }
 0x473   :  { %3664 = vmatprep.subr.bf16.mxu0 %v16916_v57  ;;  %v17174_v57 = vld [vmem:[%s21363_s1 + $0x94] ss:$8 sps:$4 sm:$0x3f]  }
 0x474   :  { %4085 = vmatpush1.bf16.msra.mxu1 %v21457_v19 }
 0x475   :  { %4148 = vmatprep.subr.bf16.mxu1 %v17151_v63 }
 0x476   :  { %3665 = vmatpush1.bf16.msra.mxu0 %v16924_v30  ;;  %v12258_v30 = vld [vmem:[%s21364_s0 + $0xa0] sm:$0xff] }
 0x477   :  { %12242 = vmatmul.mubr.msk.bf16.gmra.mrb[80].mxu1 %vm188_vm2, %v4004_v40  ;;  %3666 = vmatprep.subr.bf16.mxu0 %v16930_v45  ;;  %v12259_v45 = vld [vmem:[%s21364_s0 + $0xa8] sm:$0xff] }
 0x478   :  { %4114 = vmatprep.mubr.bf16.mxu1 %v21435_v52  ;;  %v17321_v40 = vld [vmem:[%s21365_s3 + $0x14c] ss:$8 sps:$4 sm:$0xff]  }
 0x47a   :  { %3667 = vmatpush1.bf16.msra.mxu0 %v16938_v49  ;;  %v21458_v49 = vld [vmem:[#allocation5_spill] sm:$0xff] }
 0x47b   :  { %3668 = vmatprep.subr.bf16.mxu0 %v16944_v9  ;;  %v3630_v9 = vrot.slane %v16805_v16, 2  ;;  %v12260_v16 = vld [vmem:[%s21364_s0 + $0xb0] sm:$0xff] }
 0x47e   :  { %3669 = vmatpush1.bf16.msra.mxu0 %v16952_v12  ;;  %v3631_v12 = vrot.slane %v16791_v27, 2  ;;  %v12261_v27 = vld [vmem:[%s21364_s0 + $0xb8] sm:$0xf] }
 0x47f   :  { %12244 = vmatmul.mubr.msk.bf16.vlgmr.msra.gmra.mrb[68].mxu1 %vm188_vm2, %v4075_v10  ;;  %3670 = vmatprep.subr.bf16.mxu0 %v16958_v18  ;;  %v17193_v18 = vld [vmem:[%s21365_s3 + $0xec] ss:$8 sps:$4 sm:$0xff]  }
 0x480   :  { %4124 = vmatprep.mubr.bf16.mxu1 %v21435_v52  ;;  %4149 = vmatpush1.bf16.msra.mxu1 %v17168_v14  ;;  %v3632_v4 = vsel %vm195_vm0, %v3630_v9, %v3631_v12  ;;  %v17406_v9 = vld [vmem:[%s21365_s3 + $0x198] ss:$8 sps:$4 sm:$0xff]  }
 0x481   :  { %12246 = vmatprep.subr.msk.bf16.mxu1 %vm195_vm0, %v17174_v57 }
 0x482   :  { %3671 = vmatpush1.bf16.msra.mxu0 %v16966_v61  ;;  %v17197_v61 = vpack.c.bf16 %v12259_v45, %v12258_v30  ;;  %v17389_v30 = vld [vmem:[%s21365_s3 + $0x188] ss:$8 sps:$4 sm:$0xff]   ;;  %v17396_v45 = vld [vmem:[%s21365_s3 + $0x19c] ss:$8 sps:$4 sm:$0xff]  }
 0x483   :  { %12227 = vmatprep.subr.msk.bf16.mxu0 %vm865_vm5, %v15838_v41 }
 0x484   :  { %4151 = vmatpush1.bf16.msra.mxu1 %v21458_v49  ;;  %v4655_v38 = vshll.u32 %v17197_v61, 16  ;;  %v4653_v55 = vshrl.u32 %v17197_v61, 16 }
 0x485   :  { %4300 = vmatprep.subr.bf16.mxu1 %v17193_v18 }
 0x486   :  { %3673 = vmatpush1.bf16.msra.mxu0 %v15846_v42  ;;  %v4657_v50 = vrot.slane %v4655_v38, 1 }
 0x487   :  { %12245 = vmatmul.mubr.msk.bf16.gmra.mrb[84].mxu1 %vm188_vm2, %v4074_v46  ;;  %4673 = vmatprep.subr.bf16.mxu0 %v16987_v53  ;;  %v17215_v53 = vpack.c.bf16 %v12261_v27, %v12260_v16  ;;  %v17382_v46 = vld [vmem:[%s21365_s3 + $0x18c] ss:$8 sps:$4 sm:$0xff]   ;;  %v4848_v16 = vrot.slane %v4655_v38, 2 }
 0x488   :  { %4180 = vmatprep.mubr.bf16.mxu1 %v21435_v52  ;;  %v4658_v20 = vor.u32 %v4657_v50, %v4653_v55  ;;  %v21460_v50 = vld [vmem:[#allocation12_spill] sm:$0xff] }
 0x489   :  { %3677 = vmatmul.mubr.bf16.vlgmr.msra.gmra.mrb[80].mxu0 %v3632_v4  ;;  %v4660_v0 = vshll.u32 %v17215_v53, 16  ;;  %v4664_v5 = vshrl.u32 %v17215_v53, 16  ;;  %v4782_v29 = vrot.slane %v17215_v53, 1  ;;  %v14755_v4 = vld [vmem:[%s21365_s3 + $0x1a8] ss:$8 sps:$4 sm:$0xff]  }
 0x48a   :  { %12229 = vmatprep.mubr.msk.bf16.mxu0 %vm858_vm7, %v3634_v8  ;;  %4674 = vmatpush1.bf16.msra.mxu0 %v17005_v39  ;;  %v17232_v39 = vld [vmem:[%s21365_s3 + $0xe8] ss:$8 sps:$4 sm:$0xff]  }
 0x48b   :  { %12262 = vmatprep.subr.msk.bf16.mxu0 %vm195_vm0, %v17014_v25  ;;  %v4662_v25 = vrot.slane %v4660_v0, 1  ;;  %v4851_v27 = vrot.slane %v4660_v0, 2  ;;  %v14758_v0 = vld [vmem:[%s21365_s3 + $0x4] ss:$8 sps:$4 sm:$0xff]  }
 0x48d   :  { %v4663_v37 = vsel %vm154_vm3, %v4658_v20, %v4662_v25  ;;  %v4666_v11 = vor.u32 %v4664_v5, %v4662_v25  ;;  %v4917_v20 = vrot.slane %v17197_v61, 2  ;;  %v4918_v25 = vrot.slane %v17215_v53, 2 }
 0x48e   :  { %4676 = vmatpush1.bf16.msra.mxu0 %v15027_v13 }
 0x48f   :  { %12247 = vmatmul.mubr.msk.bf16.vlgmr.msra.gmra.mrb[68].mxu1 %vm188_vm2, %v4141_v60  ;;  %4728 = vmatprep.subr.bf16.mxu0 %v17028_v48  ;;  %v17263_v48 = vld [vmem:[%s21365_s3 + $0x108] ss:$8 sps:$4 sm:$0xff]   ;;  %v21459_v60 = vld [vmem:[#allocation11_spill] sm:$0xff] }
 0x490   :  { %4190 = vmatprep.mubr.bf16.mxu1 %v21435_v52  ;;  %4301 = vmatpush1.bf16.msra.mxu1 %v17232_v39 }
 0x491   :  { %3687 = vmatmul.mubr.bf16.gmra.mrb[92].mxu0 %v3631_v12  ;;  %4302 = vmatprep.subr.bf16.mxu1 %v17238_v34  ;;  %v17412_v12 = vld [vmem:[%s21365_s3 + $0x1ac] ss:$8 sps:$4 sm:$0xff]  }
 0x492   :  { %4705 = vmatprep.mubr.bf16.mxu0 %v21435_v52 }
 0x494   :  { %4303 = vmatpush1.bf16.msra.mxu1 %v17249_v1 }
 0x495   :  { %4304 = vmatprep.subr.bf16.mxu1 %v17255_v2 }
 0x497   :  { %12248 = vmatmul.mubr.msk.bf16.gmra.mrb[88].mxu1 %vm188_vm2, %v4140_v15 }
 0x498   :  { %4305 = vmatpush1.bf16.msra.mxu1 %v17263_v48 }
 0x499   :  { %12263 = vmatmul.mubr.msk.bf16.vlgmr.msra.gmra.mrb[96].mxu0 %vm188_vm2, %v4663_v37  ;;  %4306 = vmatprep.subr.bf16.mxu1 %v17271_v36  ;;  %v4919_v37 = vsel %vm195_vm0, %v4917_v20, %v4918_v25 }
 0x49a   :  { %4729 = vmatpush1.bf16.msra.mxu0 %v17053_v44  ;;  %4715 = vmatprep.mubr.bf16.mxu0 %v21435_v52  ;;  %v17297_v44 = vld [vmem:[%s21365_s3 + $0x128] ss:$8 sps:$4 sm:$0xff]  }
 0x49b   :  { %12265 = vmatprep.subr.msk.bf16.mxu0 %vm195_vm0, %v17059_v32  ;;  %v17304_v32 = vld [vmem:[%s21365_s3 + $0x13c] ss:$8 sps:$4 sm:$0xff]  }
 0x49c   :  { %4307 = vmatpush1.bf16.msra.mxu1 %v17281_v23 }
 0x49d   :  { %4308 = vmatprep.subr.bf16.mxu1 %v17289_v31 }
 0x49e   :  { %4731 = vmatpush1.bf16.msra.mxu0 %v15107_v43 }
 0x49f   :  { %4790 = vmatprep.subr.bf16.mxu0 %v17075_v21  ;;  %v17315_v21 = vld [vmem:[%s21365_s3 + $0x138] ss:$8 sps:$4 sm:$0xff]  }
 0x4a0   :  { %4309 = vmatpush1.bf16.msra.mxu1 %v17297_v44 }
 0x4a1   :  { %12264 = vmatmul.mubr.msk.bf16.gmra.mrb[100].mxu0 %vm188_vm2, %v4666_v11  ;;  %4310 = vmatprep.subr.bf16.mxu1 %v17304_v32 }
 0x4a2   :  { %v17307_v8 = vpop.f32.mrb[56].mxu1  ;;  %4760 = vmatprep.mubr.bf16.mxu0 %v21435_v52 }
 0x4a3   :  { %v17310_v26 = vpop.f32.mrb[57].mxu1 }
 0x4a4   :  { %v2792_v58 = vpop.f32.mrb[58].mxu1  ;;  %4311 = vmatpush1.bf16.msra.mxu1 %v17315_v21 }
 0x4a5   :  { %v2793_v17 = vpop.f32.mrb[59].mxu1  ;;  %4312 = vmatprep.subr.bf16.mxu1 %v17321_v40 }
 0x4a8   :  { %4313 = vmatpush1.bf16.msra.mxu1 %v17327_v28 }
 0x4a9   :  { %12266 = vmatmul.mubr.msk.bf16.vlgmr.msra.gmra.mrb[96].mxu0 %vm188_vm2, %v17197_v61  ;;  %4314 = vmatprep.subr.bf16.mxu1 %v17335_v6 }
 0x4aa   :  { %4791 = vmatpush1.bf16.msra.mxu0 %v17093_v22  ;;  %4770 = vmatprep.mubr.bf16.mxu0 %v21435_v52  ;;  %v17359_v22 = vld [vmem:[%s21365_s3 + $0x168] ss:$8 sps:$4 sm:$0xff]  }
 0x4ab   :  { %12268 = vmatprep.subr.msk.bf16.mxu0 %vm195_vm0, %v17099_v54  ;;  %v17367_v54 = vld [vmem:[%s21365_s3 + $0x17c] ss:$8 sps:$4 sm:$0xff]  }
 0x4ac   :  { %4315 = vmatpush1.bf16.msra.mxu1 %v17345_v56 }
 0x4ad   :  { %4316 = vmatprep.subr.bf16.mxu1 %v17351_v59 }
 0x4ae   :  { %4793 = vmatpush1.bf16.msra.mxu0 %v21436_v3 }
 0x4af   :  { %4860 = vmatprep.subr.bf16.mxu0 %v17109_v24  ;;  %v4781_v24 = vrot.slane %v17197_v61, 1 }
 0x4b0   :  { %4317 = vmatpush1.bf16.msra.mxu1 %v17359_v22 }
 0x4b1   :  { %12267 = vmatmul.mubr.msk.bf16.gmra.mrb[104].mxu0 %vm188_vm2, %v17215_v53  ;;  %4318 = vmatprep.subr.bf16.mxu1 %v17367_v54  ;;  %v4783_v10 = vsel %vm334_vm1, %v4781_v24, %v4782_v29 }
 0x4b2   :  { %4822 = vmatprep.mubr.bf16.mxu0 %v21435_v52 }
 0x4b4   :  { %4319 = vmatpush1.bf16.msra.mxu1 %v17376_v47 }
 0x4b5   :  { %4320 = vmatprep.subr.bf16.mxu1 %v17382_v46 }
 0x4b8   :  { %4321 = vmatpush1.bf16.msra.mxu1 %v17389_v30 }
 0x4b9   :  { %12269 = vmatmul.mubr.msk.bf16.vlgmr.msra.gmra.mrb[96].mxu0 %vm188_vm2, %v4783_v10  ;;  %4322 = vmatprep.subr.bf16.mxu1 %v17396_v45 }
 0x4ba   :  { %4861 = vmatpush1.bf16.msra.mxu0 %v17129_v35  ;;  %4832 = vmatprep.mubr.bf16.mxu0 %v21435_v52  ;;  %v4850_v35 = vrot.slane %v4664_v5, 1 }
 0x4bb   :  { %12271 = vmatprep.subr.msk.bf16.mxu0 %vm195_vm0, %v17135_v51  ;;  %v4847_v51 = vrot.slane %v4653_v55, 1 }
 0x4bc   :  { %4323 = vmatpush1.bf16.msra.mxu1 %v17406_v9  ;;  %v4852_v38 = vor.u32 %v4851_v27, %v4850_v35 }
 0x4bd   :  { %4324 = vmatprep.subr.bf16.mxu1 %v17412_v12  ;;  %v4849_v15 = vor.u32 %v4848_v16, %v4847_v51 }
 0x4be   :  { %4863 = vmatpush1.bf16.msra.mxu0 %v21457_v19 }
 0x4bf   :  { %4926 = vmatprep.subr.bf16.mxu0 %v17151_v63  ;;  %v14757_v63 = vld [vmem:[%s21365_s3 + $0x1b8] ss:$8 sps:$4 sm:$0xff]   ;;  %v4853_v55 = vsel %vm425_vm4, %v4849_v15, %v4852_v38 }
 0x4c0   :  { %4325 = vmatpush1.bf16.msra.mxu1 %v14755_v4 }
 0x4c1   :  { %12270 = vmatmul.mubr.msk.bf16.gmra.mrb[108].mxu0 %vm188_vm2, %v4782_v29  ;;  %4326 = vmatprep.subr.bf16.mxu1 %v14756_v33 }
 0x4c2   :  { %4892 = vmatprep.mubr.bf16.mxu0 %v21435_v52 }
 0x4c4   :  { %4327 = vmatpush1.bf16.msra.mxu1 %v14757_v63 }
 0x4c5   :  { %12249 = vmatprep.subr.msk.bf16.mxu1 %vm865_vm5, %v21459_v60 }
 0x4c8   :  { %4329 = vmatpush1.bf16.msra.mxu1 %v21460_v50 }
 0x4c9   :  { %12272 = vmatmul.mubr.msk.bf16.vlgmr.msra.gmra.mrb[96].mxu0 %vm188_vm2, %v4853_v55  ;;  %4357 = vmatprep.subr.bf16.mxu1 %v14758_v0 }
 0x4ca   :  { %4927 = vmatpush1.bf16.msra.mxu0 %v17168_v14  ;;  %4902 = vmatprep.mubr.bf16.mxu0 %v21435_v52 }
 0x4cb   :  { %12274 = vmatprep.subr.msk.bf16.mxu0 %vm195_vm0, %v17174_v57 }
 0x4ce   :  { %4929 = vmatpush1.bf16.msra.mxu0 %v21458_v49 }
 0x4cf   :  { %5078 = vmatprep.subr.bf16.mxu0 %v17193_v18 }
 0x4d1   :  { %12273 = vmatmul.mubr.msk.bf16.gmra.mrb[112].mxu0 %vm188_vm2, %v4852_v38 }
 0x4d2   :  { %4958 = vmatprep.mubr.bf16.mxu0 %v21435_v52 }
 0x4d9   :  { %12275 = vmatmul.mubr.msk.bf16.vlgmr.msra.gmra.mrb[96].mxu0 %vm188_vm2, %v4919_v37 }
 0x4da   :  { %4968 = vmatprep.mubr.bf16.mxu0 %v21435_v52  ;;  %5079 = vmatpush1.bf16.msra.mxu0 %v17232_v39 }
 0x4db   :  { %5080 = vmatprep.subr.bf16.mxu0 %v17238_v34 }
 0x4de   :  { %v2845_v14 = vpop.f32.mrb[60].mxu1  ;;  %5081 = vmatpush1.bf16.msra.mxu0 %v17249_v1 }
 0x4df   :  { %v17461_v57 = vadd.f32 %v2845_v14, %v17307_v8  ;;  %v2847_v18 = vpop.f32.mrb[61].mxu1  ;;  %5082 = vmatprep.subr.bf16.mxu0 %v17255_v2 }
 0x4e0   :  { %v17465_v61 = vadd.f32 %v2847_v18, %v17310_v26  ;;  %v2849_v53 = vpop.f32.mrb[62].mxu1 }
 0x4e1   :  { %v2850_v5 = vpop.f32.mrb[63].mxu1  ;;  %12276 = vmatmul.mubr.msk.bf16.gmra.mrb[116].mxu0 %vm188_vm2, %v4918_v25 }
 0x4e2   :  { %5083 = vmatpush1.bf16.msra.mxu0 %v17263_v48 }
 0x4e3   :  { %5084 = vmatprep.subr.bf16.mxu0 %v17271_v36  ;;  %v21461_v36 = vld [vmem:[#allocation3_spill] sm:$0xff] }
 0x4e6   :  { %5085 = vmatpush1.bf16.msra.mxu0 %v17281_v23 }
 0x4e7   :  { %5086 = vmatprep.subr.bf16.mxu0 %v17289_v31  ;;  %v21462_v31 = vld [vmem:[#allocation13_spill] sm:$0xff] }
 0x4ea   :  { %5087 = vmatpush1.bf16.msra.mxu0 %v17297_v44 }
 0x4eb   :  { %5088 = vmatprep.subr.bf16.mxu0 %v17304_v32 }
 0x4ec   :  { %v17474_v39 = vpop.f32.mrb[84].mxu0 }
 0x4ed   :  { %v17476_v34 = vpop.f32.mrb[85].mxu0 }
 0x4ee   :  { %v3570_v1 = vpop.f32.mrb[86].mxu0  ;;  %5089 = vmatpush1.bf16.msra.mxu0 %v17315_v21 }
 0x4ef   :  { %v3571_v2 = vpop.f32.mrb[87].mxu0  ;;  %5090 = vmatprep.subr.bf16.mxu0 %v17321_v40 }
 0x4f2   :  { %5091 = vmatpush1.bf16.msra.mxu0 %v17327_v28 }
 0x4f3   :  { %5092 = vmatprep.subr.bf16.mxu0 %v17335_v6 }
 0x4f6   :  { %5093 = vmatpush1.bf16.msra.mxu0 %v17345_v56 }
 0x4f7   :  { %5094 = vmatprep.subr.bf16.mxu0 %v17351_v59 }
 0x4fa   :  { %5095 = vmatpush1.bf16.msra.mxu0 %v17359_v22 }
 0x4fb   :  { %5096 = vmatprep.subr.bf16.mxu0 %v17367_v54 }
 0x4fe   :  { %5097 = vmatpush1.bf16.msra.mxu0 %v17376_v47 }
 0x4ff   :  { %5098 = vmatprep.subr.bf16.mxu0 %v17382_v46 }
 0x502   :  { %5099 = vmatpush1.bf16.msra.mxu0 %v17389_v30 }
 0x503   :  { %5100 = vmatprep.subr.bf16.mxu0 %v17396_v45 }
 0x506   :  { %5101 = vmatpush1.bf16.msra.mxu0 %v17406_v9 }
 0x507   :  { %5102 = vmatprep.subr.bf16.mxu0 %v17412_v12  ;;  %v21463_v12 = vld [vmem:[#allocation14_spill] sm:$0xff] }
 0x50a   :  { %5103 = vmatpush1.bf16.msra.mxu0 %v14755_v4 }
 0x50b   :  { %5104 = vmatprep.subr.bf16.mxu0 %v14756_v33 }
 0x50e   :  { %5105 = vmatpush1.bf16.msra.mxu0 %v14757_v63 }
 0x50f   :  { %12277 = vmatprep.subr.msk.bf16.mxu0 %vm865_vm5, %v21459_v60 }
 0x512   :  { %v2900_v48 = vpop.f32.mrb[52].mxu1  ;;  %5107 = vmatpush1.bf16.msra.mxu0 %v21460_v50 }
 0x513   :  { %v2923_v23 = vadd.f32 %v2900_v48, %v21461_v36  ;;  %v2902_v11 = vpop.f32.mrb[53].mxu1  ;;  %5135 = vmatprep.subr.bf16.mxu0 %v14758_v0 }
 0x514   :  { %v2924_v44 = vadd.f32 %v2902_v11, %v21462_v31  ;;  %v2904_v32 = vpop.f32.mrb[54].mxu1 }
 0x515   :  { %v2929_v8 = vmax.f32 %v2923_v23, 0.0  ;;  %v2925_v26 = vadd.f32 %v2904_v32, %v21461_v36  ;;  %v2906_v58 = vpop.f32.mrb[55].mxu1 }
 0x516   :  { %v2930_v21 = vmax.f32 %v2924_v44, 0.0  ;;  %v2926_v17 = vadd.f32 %v2906_v58, %v21462_v31 }
 0x517   :  { %v2937_v40 = vrot.slane %v2929_v8, 2  ;;  %v2939_v28 = vrot.slane %v2929_v8, 4  ;;  %v2941_v6 = vrot.slane %v2929_v8, 6  ;;  %v2931_v56 = vmax.f32 %v2925_v26, 0.0 }
 0x518   :  { %v2938_v59 = vrot.slane %v2930_v21, 2  ;;  %v2940_v22 = vrot.slane %v2930_v21, 4  ;;  %v2942_v54 = vrot.slane %v2930_v21, 6  ;;  %v2955_v24 = vcombine.low %v2929_v8, %v2930_v21 }
 0x519   :  { %v2945_v29 = vrot.slane %v2931_v56, 2  ;;  %v2947_v47 = vrot.slane %v2931_v56, 4  ;;  %v2949_v46 = vrot.slane %v2931_v56, 6  ;;  %v2932_v10 = vmax.f32 %v2926_v17, 0.0 }
 0x51a   :  { %v2956_v30 = vcombine.low %v2937_v40, %v2938_v59  ;;  %v2957_v45 = vcombine.low %v2939_v28, %v2940_v22  ;;  %v2958_v9 = vcombine.low %v2941_v6, %v2942_v54  ;;  %v2965_v35 = vrot.slane %v2955_v24, %v21463_v12  ;;  %v2910_v51 = vpop.f32.mrb[64].mxu1 }
 0x51b   :  { %v2946_v16 = vrot.slane %v2932_v10, 2  ;;  %v2948_v27 = vrot.slane %v2932_v10, 4  ;;  %v2950_v4 = vrot.slane %v2932_v10, 6  ;;  %v3004_v33 = vcombine.low %v2931_v56, %v2932_v10  ;;  %v2912_v15 = vpop.f32.mrb[65].mxu1 }
 0x51c   :  { %v2972_v38 = vrot.slane %v2956_v30, %v21463_v12  ;;  %v2979_v63 = vrot.slane %v2957_v45, %v21463_v12  ;;  %v2986_v55 = vrot.slane %v2958_v9, %v21463_v12  ;;  %v2921_v0 = vadd.f32 %v2910_v51, %v17461_v57  ;;  %v2914_v20 = vpop.f32.mrb[66].mxu1 }
 0x51d   :  { %v3005_v25 = vcombine.low %v2945_v29, %v2946_v16  ;;  %v3006_v37 = vcombine.low %v2947_v47, %v2948_v27  ;;  %v3007_v14 = vcombine.low %v2949_v46, %v2950_v4  ;;  %v2915_v18 = vpop.f32.mrb[67].mxu1  ;;  %v2922_v2 = vadd.f32 %v2912_v15, %v17465_v61 }
 0x51e   :  { %v2987_v53 = vcombine.low %v2965_v35, %v2972_v38  ;;  %v2988_v5 = vcombine.low %v2979_v63, %v2986_v55  ;;  %v2927_v1 = vadd.f32 %v2921_v0, %v21461_v36  ;;  %v3014_v48 = vrot.slane %v3004_v33, %v21463_v12 }
 0x51f   :  { %v3021_v23 = vrot.slane %v3005_v25, %v21463_v12  ;;  %v3028_v11 = vrot.slane %v3006_v37, %v21463_v12  ;;  %v3035_v44 = vrot.slane %v3007_v14, %v21463_v12  ;;  %v2928_v26 = vadd.f32 %v2922_v2, %v21462_v31 }
 0x520   :  { %v2995_v57 = vrot.slane %v2987_v53, %v21463_v12  ;;  %v3002_v32 = vrot.slane %v2988_v5, %v21463_v12  ;;  %v2933_v8 = vmax.f32 %v2927_v1, 0.0 }
 0x521   :  { %v3036_v58 = vcombine.low %v3014_v48, %v3021_v23  ;;  %v3037_v21 = vcombine.low %v3028_v11, %v3035_v44  ;;  %v2934_v61 = vmax.f32 %v2928_v26, 0.0 }
 0x522   :  { %v3003_v17 = vcombine.low %v2995_v57, %v3002_v32  ;;  %v2953_v40 = vrot.slane %v2933_v8, 2 }
 0x523   :  { %v3044_v28 = vrot.slane %v3036_v58, %v21463_v12  ;;  %v3051_v6 = vrot.slane %v3037_v21, %v21463_v12  ;;  %v2954_v56 = vrot.slane %v2934_v61, 2  ;;  %v3053_v59 = vcombine.low %v2933_v8, %v2934_v61 }
 0x524   :  { %3081 = vst [vmem:[#allocation2 + $0x2] ss:$8 sm:$0xf] %v3003_v17  ;;  %3082 = vst [vmem:[#allocation2 + $0x2] ss:$8 sm:$0xf0] %v3003_v17 }
 0x525   :  { %v3052_v22 = vcombine.low %v3044_v28, %v3051_v6  ;;  %v3054_v54 = vcombine.low %v2953_v40, %v2954_v56  ;;  %v3061_v24 = vrot.slane %v3053_v59, %v21463_v12 }
 0x527   :  { %3084 = vst [vmem:[#allocation2 + $0x42] ss:$8 sm:$0xf] %v3052_v22  ;;  %3085 = vst [vmem:[#allocation2 + $0x42] ss:$8 sm:$0xf0] %v3052_v22  ;;  %v3068_v29 = vrot.slane %v3054_v54, %v21463_v12 }
 0x528   :  { %v3623_v47 = vpop.f32.mrb[88].mxu0 }
 0x529   :  { %v17518_v46 = vadd.f32 %v3623_v47, %v17474_v39  ;;  %v3625_v10 = vpop.f32.mrb[89].mxu0  ;;  %v3069_v30 = vcombine.low %v3061_v24, %v3068_v29 }
 0x52a   :  { %v17521_v45 = vadd.f32 %v3625_v10, %v17476_v34  ;;  %v3627_v9 = vpop.f32.mrb[90].mxu0  ;;  %v3939_v35 = vpop.f32.mrb[72].mxu1  ;;  %v21465_v10 = vld [vmem:[#allocation9_spill] sm:$0xff] }
 0x52b   :  { %v3628_v51 = vpop.f32.mrb[91].mxu0  ;;  %v3941_v16 = vpop.f32.mrb[73].mxu1  ;;  %v3076_v27 = vrot.slane %v3069_v30, %v21463_v12 }
 0x52c   :  { %v3943_v4 = vpop.f32.mrb[74].mxu1 }
 0x52d   :  { %v3944_v33 = vpop.f32.mrb[75].mxu1  ;;  %3087 = vst.msk [vmem:[#allocation2 + $0x82] ss:$8 sm:$0xf] %vm16422_vm8, %v3076_v27 }
 0x53a   :  { %v3994_v38 = vpop.f32.mrb[76].mxu1 }
 0x53b   :  { %v3995_v63 = vadd.f32 %v3994_v38, %v3939_v35  ;;  %v3996_v39 = vpop.f32.mrb[77].mxu1 }
 0x53c   :  { %v3997_v55 = vadd.f32 %v3996_v39, %v3941_v16  ;;  %v3998_v0 = vpop.f32.mrb[78].mxu1 }
 0x53d   :  { %v3999_v20 = vpop.f32.mrb[79].mxu1  ;;  %v21466_v0 = vld [vmem:[#allocation10_spill] sm:$0xff] }
 0x54a   :  { %v4056_v25 = vpop.f32.mrb[80].mxu1 }
 0x54b   :  { %v4067_v34 = vadd.f32 %v4056_v25, %v3995_v63  ;;  %v4058_v37 = vpop.f32.mrb[81].mxu1 }
 0x54c   :  { %v4068_v14 = vadd.f32 %v4058_v37, %v3997_v55  ;;  %v4060_v18 = vpop.f32.mrb[82].mxu1 }
 0x54d   :  { %v4061_v53 = vpop.f32.mrb[83].mxu1 }
 0x55a   :  { %v4126_v5 = vpop.f32.mrb[84].mxu1 }
 0x55b   :  { %v17526_v1 = vadd.f32 %v4126_v5, %v4067_v34  ;;  %v4128_v2 = vpop.f32.mrb[85].mxu1 }
 0x55c   :  { %v17528_v48 = vadd.f32 %v4128_v2, %v4068_v14  ;;  %v4130_v23 = vpop.f32.mrb[86].mxu1  ;;  %v3678_v11 = vpop.f32.mrb[80].mxu0 }
 0x55d   :  { %v4131_v44 = vpop.f32.mrb[87].mxu1  ;;  %v3701_v57 = vadd.f32 %v3678_v11, %v21461_v36  ;;  %v3680_v32 = vpop.f32.mrb[81].mxu0 }
 0x55e   :  { %v3702_v8 = vadd.f32 %v3680_v32, %v21462_v31  ;;  %v3682_v26 = vpop.f32.mrb[82].mxu0 }
 0x55f   :  { %v3707_v58 = vmax.f32 %v3701_v57, 0.0  ;;  %v3703_v21 = vadd.f32 %v3682_v26, %v21461_v36  ;;  %v3684_v17 = vpop.f32.mrb[83].mxu0 }
 0x560   :  { %v3708_v40 = vmax.f32 %v3702_v8, 0.0  ;;  %v3704_v61 = vadd.f32 %v3684_v17, %v21462_v31 }
 0x561   :  { %v3715_v28 = vrot.slane %v3707_v58, 2  ;;  %v3717_v6 = vrot.slane %v3707_v58, 4  ;;  %v3719_v56 = vrot.slane %v3707_v58, 6  ;;  %v3709_v59 = vmax.f32 %v3703_v21, 0.0 }
 0x562   :  { %v4182_v22 = vpop.f32.mrb[68].mxu1  ;;  %v3716_v54 = vrot.slane %v3708_v40, 2  ;;  %v3718_v24 = vrot.slane %v3708_v40, 4  ;;  %v3720_v29 = vrot.slane %v3708_v40, 6  ;;  %v3733_v47 = vcombine.low %v3707_v58, %v3708_v40 }
 0x563   :  { %v17535_v30 = vadd.f32 %v4182_v22, %v21465_v10  ;;  %v4184_v9 = vpop.f32.mrb[69].mxu1  ;;  %v3723_v35 = vrot.slane %v3709_v59, 2  ;;  %v3725_v51 = vrot.slane %v3709_v59, 4  ;;  %v3727_v16 = vrot.slane %v3709_v59, 6 }
 0x564   :  { %v3734_v27 = vcombine.low %v3715_v28, %v3716_v54  ;;  %v3735_v4 = vcombine.low %v3717_v6, %v3718_v24  ;;  %v3736_v33 = vcombine.low %v3719_v56, %v3720_v29  ;;  %v3743_v38 = vrot.slane %v3733_v47, %v21463_v12  ;;  %v4186_v63 = vpop.f32.mrb[70].mxu1  ;;  %v3688_v39 = vpop.f32.mrb[92].mxu0 }
 0x565   :  { %v4211_v55 = vmax.f32 %v17535_v30, 0.0  ;;  %v4206_v20 = vadd.f32 %v4184_v9, %v21466_v0  ;;  %v17541_v25 = vadd.f32 %v4186_v63, %v21465_v10  ;;  %v3710_v34 = vmax.f32 %v3704_v61, 0.0  ;;  %v4188_v37 = vpop.f32.mrb[71].mxu1  ;;  %v3690_v14 = vpop.f32.mrb[93].mxu0 }
 0x566   :  { %v3750_v18 = vrot.slane %v3734_v27, %v21463_v12  ;;  %v3757_v53 = vrot.slane %v3735_v4, %v21463_v12  ;;  %v3764_v5 = vrot.slane %v3736_v33, %v21463_v12  ;;  %v17547_v2 = vadd.f32 %v4188_v37, %v21466_v0  ;;  %v3692_v23 = vpop.f32.mrb[94].mxu0 }
 0x567   :  { %v4223_v11 = vrot.slane %v4211_v55, 1  ;;  %v4212_v44 = vmax.f32 %v4206_v20, 0.0  ;;  %v4213_v57 = vmax.f32 %v17541_v25, 0.0  ;;  %v3724_v32 = vrot.slane %v3710_v34, 2  ;;  %v3693_v8 = vpop.f32.mrb[95].mxu0 }
 0x568   :  { %v3765_v26 = vcombine.low %v3743_v38, %v3750_v18  ;;  %v3766_v58 = vcombine.low %v3757_v53, %v3764_v5  ;;  %v3726_v21 = vrot.slane %v3710_v34, 4  ;;  %v3728_v17 = vrot.slane %v3710_v34, 6 }
 0x569   :  { %v4226_v40 = vrot.slane %v4212_v44, 1  ;;  %v4224_v61 = vrot.slane %v4213_v57, 1  ;;  %v3782_v28 = vcombine.low %v3709_v59, %v3710_v34  ;;  %v3783_v6 = vcombine.low %v3723_v35, %v3724_v32 }
 0x56a   :  { %v3773_v56 = vrot.slane %v3765_v26, %v21463_v12  ;;  %v3780_v22 = vrot.slane %v3766_v58, %v21463_v12  ;;  %v3784_v54 = vcombine.low %v3725_v51, %v3726_v21  ;;  %v3785_v24 = vcombine.low %v3727_v16, %v3728_v17  ;;  %v4192_v29 = vpop.f32.mrb[88].mxu1 }
 0x56b   :  { %v3792_v47 = vrot.slane %v3782_v28, %v21463_v12  ;;  %v3799_v30 = vrot.slane %v3783_v6, %v21463_v12  ;;  %v4214_v9 = vmax.f32 %v17547_v2, 0.0  ;;  %v3699_v27 = vadd.f32 %v3688_v39, %v17518_v46  ;;  %v4194_v4 = vpop.f32.mrb[89].mxu1 }
 0x56c   :  { %v3781_v33 = vcombine.low %v3773_v56, %v3780_v22  ;;  %v3806_v59 = vrot.slane %v3784_v54, %v21463_v12  ;;  %v3813_v35 = vrot.slane %v3785_v24, %v21463_v12  ;;  %v4203_v38 = vadd.f32 %v4192_v29, %v17526_v1  ;;  %v4196_v63 = vpop.f32.mrb[90].mxu1 }
 0x56d   :  { %v3814_v51 = vcombine.low %v3792_v47, %v3799_v30  ;;  %v4227_v16 = vrot.slane %v4214_v9, 1  ;;  %v3705_v20 = vadd.f32 %v3699_v27, %v21461_v36  ;;  %v3700_v25 = vadd.f32 %v3690_v14, %v17521_v45  ;;  %v4197_v34 = vpop.f32.mrb[91].mxu1 }
 0x56e   :  { %3859 = vst [vmem:[#allocation2 + $0x3] ss:$8 sm:$0xf] %v3781_v33  ;;  %3860 = vst [vmem:[#allocation2 + $0x3] ss:$8 sm:$0xf0] %v3781_v33  ;;  %v3815_v37 = vcombine.low %v3806_v59, %v3813_v35  ;;  %v4209_v46 = vadd.f32 %v4203_v38, %v21465_v10  ;;  %v4204_v39 = vadd.f32 %v4194_v4, %v17528_v48 }
 0x56f   :  { %v4225_v18 = vsel %vm334_vm1, %v4223_v11, %v4224_v61  ;;  %v3822_v53 = vrot.slane %v3814_v51, %v21463_v12  ;;  %v3711_v1 = vmax.f32 %v3705_v20, 0.0  ;;  %v3706_v5 = vadd.f32 %v3700_v25, %v21462_v31 }
 0x570   :  { %v4228_v2 = vsel %vm334_vm1, %v4226_v40, %v4227_v16  ;;  %v3829_v23 = vrot.slane %v3815_v37, %v21463_v12  ;;  %v4215_v45 = vmax.f32 %v4209_v46, 0.0  ;;  %v4210_v14 = vadd.f32 %v4204_v39, %v21466_v0 }
 0x571   :  { %v17569_v32 = vmax.f32 %v4211_v55, %v4225_v18  ;;  %v3731_v8 = vrot.slane %v3711_v1, 2  ;;  %v3712_v26 = vmax.f32 %v3706_v5, 0.0  ;;  %v17571_v58 = vmax.f32 %v4212_v44, %v4228_v2 }
 0x572   :  { %v3830_v48 = vcombine.low %v3822_v53, %v3829_v23  ;;  %v4229_v11 = vrot.slane %v4215_v45, 1  ;;  %v4216_v21 = vmax.f32 %v4210_v14, 0.0 }
 0x573   :  { %v3732_v17 = vrot.slane %v3712_v26, 2  ;;  %v3831_v28 = vcombine.low %v3711_v1, %v3712_v26  ;;  %v13430_v6 = vpack.i.bf16 %v17571_v58, %v17569_v32 }
 0x574   :  { %3862 = vst [vmem:[#allocation2 + $0x43] ss:$8 sm:$0xf] %v3830_v48  ;;  %3863 = vst [vmem:[#allocation2 + $0x43] ss:$8 sm:$0xf0] %v3830_v48  ;;  %v17575_v40 = vmax.f32 %v4215_v45, %v4229_v11  ;;  %v4230_v55 = vsel %vm334_vm1, %v4224_v61, %v4229_v11 }
 0x575   :  { %v4231_v56 = vrot.slane %v4216_v21, 1  ;;  %v4717_v22 = vpop.f32.mrb[100].mxu0  ;;  %v3832_v54 = vcombine.low %v3731_v8, %v3732_v17  ;;  %13431 = vrot.lane.b32.xlu0 %v13430_v6, %s14914_s19  ;;  %v17579_v44 = vmax.f32 %v4213_v57, %v4230_v55  ;;  %v3839_v27 = vrot.slane %v3831_v28, %v21463_v12 }
 0x576   :  { %v4719_v24 = vpop.f32.mrb[101].mxu0 }
 0x577   :  { %v17581_v29 = vmax.f32 %v4216_v21, %v4231_v56  ;;  %v4232_v47 = vsel %vm334_vm1, %v4227_v16, %v4231_v56  ;;  %v4721_v30 = vpop.f32.mrb[102].mxu0  ;;  %v3846_v4 = vrot.slane %v3832_v54, %v21463_v12 }
 0x578   :  { %v17586_v33 = vmax.f32 %v4214_v9, %v4232_v47  ;;  %v4722_v59 = vpop.f32.mrb[103].mxu0 }
 0x579   :  { %v13435_v61 = vpack.i.bf16 %v17581_v29, %v17575_v40  ;;  %v3847_v35 = vcombine.low %v3839_v27, %v3846_v4 }
 0x57a   :  { %v13440_v57 = vpack.i.bf16 %v17586_v33, %v17579_v44 }
 0x57b   :  { %13436 = vrot.lane.b32.xlu0 %v13435_v61, %s14914_s19  ;;  %v3854_v38 = vrot.slane %v3847_v35, %v21463_v12 }
 0x57c   :  { %13441 = vrot.lane.b32.xlu1 %v13440_v57, %s14914_s19 }
 0x57d   :  { %3865 = vst.msk [vmem:[#allocation2 + $0x83] ss:$8 sm:$0xf] %vm16422_vm8, %v3854_v38 }
 0x584   :  { %v4772_v63 = vpop.f32.mrb[104].mxu0 }
 0x585   :  { %v4773_v9 = vadd.f32 %v4772_v63, %v4717_v22  ;;  %v4774_v51 = vpop.f32.mrb[105].mxu0 }
 0x586   :  { %v4775_v16 = vadd.f32 %v4774_v51, %v4719_v24  ;;  %v4776_v20 = vpop.f32.mrb[106].mxu0 }
 0x587   :  { %v4777_v25 = vpop.f32.mrb[107].mxu0 }
 0x594   :  { %v4834_v34 = vpop.f32.mrb[108].mxu0 }
 0x595   :  { %v4845_v37 = vadd.f32 %v4834_v34, %v4773_v9  ;;  %v4836_v46 = vpop.f32.mrb[109].mxu0 }
 0x596   :  { %v4846_v39 = vadd.f32 %v4836_v46, %v4775_v16  ;;  %v4838_v18 = vpop.f32.mrb[110].mxu0 }
 0x597   :  { %v4839_v53 = vpop.f32.mrb[111].mxu0 }
 0x5a4   :  { %v4904_v1 = vpop.f32.mrb[112].mxu0 }
 0x5a5   :  { %v4915_v5 = vadd.f32 %v4904_v1, %v4845_v37  ;;  %v4906_v2 = vpop.f32.mrb[113].mxu0 }
 0x5a6   :  { %v4916_v23 = vadd.f32 %v4906_v2, %v4846_v39  ;;  %v4908_v45 = vpop.f32.mrb[114].mxu0 }
 0x5a7   :  { %v4909_v14 = vpop.f32.mrb[115].mxu0 }
 0x5ac   :  { %v4960_v8 = vpop.f32.mrb[96].mxu0 }
 0x5ad   :  { %v4983_v26 = vadd.f32 %v4960_v8, %v21465_v10  ;;  %v4962_v48 = vpop.f32.mrb[97].mxu0 }
 0x5ae   :  { %v4984_v11 = vadd.f32 %v4962_v48, %v21466_v0  ;;  %v4964_v21 = vpop.f32.mrb[98].mxu0 }
 0x5af   :  { %v4989_v17 = vmax.f32 %v4983_v26, 0.0  ;;  %v4985_v28 = vadd.f32 %v4964_v21, %v21465_v10  ;;  %v4966_v6 = vpop.f32.mrb[99].mxu0 }
 0x5b0   :  { %v4990_v56 = vmax.f32 %v4984_v11, 0.0  ;;  %v4986_v55 = vadd.f32 %v4966_v6, %v21466_v0 }
 0x5b1   :  { %v4991_v22 = vmax.f32 %v4985_v28, 0.0  ;;  %v5001_v24 = vrot.slane %v4989_v17, 1 }
 0x5b2   :  { %v4992_v54 = vmax.f32 %v4986_v55, 0.0  ;;  %v5004_v30 = vrot.slane %v4990_v56, 1 }
 0x5b3   :  { %v5002_v47 = vrot.slane %v4991_v22, 1 }
 0x5b4   :  { %v5005_v27 = vrot.slane %v4992_v54, 1  ;;  %v4970_v4 = vpop.f32.mrb[116].mxu0 }
 0x5b5   :  { %v4981_v59 = vadd.f32 %v4970_v4, %v4915_v5  ;;  %v4972_v61 = vpop.f32.mrb[117].mxu0  ;;  %v5003_v35 = vsel %vm334_vm1, %v5001_v24, %v5002_v47 }
 0x5b6   :  { %v4982_v57 = vadd.f32 %v4972_v61, %v4916_v23  ;;  %v4974_v38 = vpop.f32.mrb[118].mxu0  ;;  %v5006_v63 = vsel %vm334_vm1, %v5004_v30, %v5005_v27  ;;  %v17603_v9 = vmax.f32 %v4989_v17, %v5003_v35 }
 0x5b7   :  { %v4987_v51 = vadd.f32 %v4981_v59, %v21465_v10  ;;  %v4975_v16 = vpop.f32.mrb[119].mxu0  ;;  %v17606_v20 = vmax.f32 %v4990_v56, %v5006_v63 }
 0x5b8   :  { %v4988_v25 = vadd.f32 %v4982_v57, %v21466_v0  ;;  %v17662_v16 = vld [vmem:[%s21365_s3 + $0x14] ss:$8 sps:$4 sm:$0xff]  }
 0x5b9   :  { %v4993_v34 = vmax.f32 %v4987_v51, 0.0  ;;  %v13445_v37 = vpack.i.bf16 %v17606_v20, %v17603_v9  ;;  %v17655_v51 = vld [vmem:[%s21365_s3] ss:$8 sps:$4 sm:$0xff]  }
 0x5ba   :  { %v4994_v46 = vmax.f32 %v4988_v25, 0.0  ;;  %v17668_v25 = vld [vmem:[%s21365_s3 + $0x10] ss:$8 sps:$4 sm:$0xff]  }
 0x5bb   :  { %v5007_v39 = vrot.slane %v4993_v34, 1  ;;  %13446 = vrot.lane.b32.xlu1 %v13445_v37, %s14914_s19  ;;  %v17680_v37 = vld [vmem:[%s21365_s3 + $0x20] ss:$8 sps:$4 sm:$0xff]  }
 0x5bc   :  { %v5009_v18 = vrot.slane %v4994_v46, 1 }
 0x5bd   :  { %v17612_v53 = vmax.f32 %v4993_v34, %v5007_v39  ;;  %v5008_v1 = vsel %vm334_vm1, %v5002_v47, %v5007_v39  ;;  %v17674_v34 = vld [vmem:[%s21365_s3 + $0x24] ss:$8 sps:$4 sm:$0xff]   ;;  %v17694_v39 = vld [vmem:[%s21365_s3 + $0x30] ss:$8 sps:$4 sm:$0xff]  }
 0x5be   :  { %v17615_v5 = vmax.f32 %v4994_v46, %v5009_v18  ;;  %v5010_v2 = vsel %vm334_vm1, %v5005_v27, %v5009_v18  ;;  %v17618_v23 = vmax.f32 %v4991_v22, %v5008_v1  ;;  %v17688_v46 = vld [vmem:[%s21365_s3 + $0x34] ss:$8 sps:$4 sm:$0xff]   ;;  %v17700_v18 = vld [vmem:[%s21365_s3 + $0x44] ss:$8 sps:$4 sm:$0xff]   ;;  %v17706_v1 = vld [vmem:[%s21365_s3 + $0x40] ss:$8 sps:$4 sm:$0xff]  }
 0x5bf   :  { %v17620_v45 = vmax.f32 %v4992_v54, %v5010_v2  ;;  %v17712_v2 = vld [vmem:[%s21365_s3 + $0x54] ss:$8 sps:$4 sm:$0xff]  }
 0x5c0   :  { %v13455_v14 = vpack.i.bf16 %v17615_v5, %v17612_v53 }
 0x5c1   :  { %v13450_v8 = vpack.i.bf16 %v17620_v45, %v17618_v23 }
 0x5c2   :  { %13456 = vrot.lane.b32.xlu1 %v13455_v14, %s14914_s19  ;;  %v17718_v14 = vld [vmem:[%s21365_s3 + $0x50] ss:$8 sps:$4 sm:$0xff]  }
 0x5c3   :  { %13451 = vrot.lane.b32.xlu0 %v13450_v8, %s14914_s19  ;;  %v17724_v8 = vld [vmem:[%s21365_s3 + $0x64] ss:$8 sps:$4 sm:$0xff]  }
 0x5e7   :  { %v13432_v26 = vpop.permute.xlu0 %13431 }
 0x5e8   :  { %v13434_v48 = vunpack.i.h.bf16 %v13432_v26  ;;  %v13433_v11 = vunpack.i.l.bf16 %v13432_v26  ;;  %v17730_v26 = vld [vmem:[%s21365_s3 + $0x60] ss:$8 sps:$4 sm:$0xff]  }
 0x5ea   :  { %v4263_v56 = vsel %vm681_vm6, %v13433_v11, %v13434_v48  ;;  %v4273_v47 = vmax.f32 %v17571_v58, %v13434_v48  ;;  %v17736_v48 = vld [vmem:[%s21365_s3 + $0x74] ss:$8 sps:$4 sm:$0xff]   ;;  %v17742_v11 = vld [vmem:[%s21365_s3 + $0x70] ss:$8 sps:$4 sm:$0xff]  }
 0x5eb   :  { %v4272_v59 = vmax.f32 %v17569_v32, %v4263_v56  ;;  %v17772_v56 = vld [vmem:[%s21365_s3 + $0xa4] ss:$8 sps:$4 sm:$0xff]  }
 0x5ed   :  { %v13437_v21 = vpop.permute.xlu0 %13436 }
 0x5ee   :  { %v13439_v17 = vunpack.i.h.bf16 %v13437_v21  ;;  %v13438_v28 = vunpack.i.l.bf16 %v13437_v21  ;;  %v13442_v6 = vpop.permute.xlu1 %13441  ;;  %v17748_v21 = vld [vmem:[%s21365_s3 + $0x84] ss:$8 sps:$4 sm:$0xff]  }
 0x5ef   :  { %v13444_v55 = vunpack.i.h.bf16 %v13442_v6  ;;  %v13443_v22 = vunpack.i.l.bf16 %v13442_v6  ;;  %v17766_v6 = vld [vmem:[%s21365_s3 + $0x90] ss:$8 sps:$4 sm:$0xff]  }
 0x5f0   :  { %v4277_v54 = vmax.f32 %v17581_v29, %v13439_v17  ;;  %v4265_v24 = vsel %vm681_vm6, %v13438_v28, %v13439_v17  ;;  %v17754_v17 = vld [vmem:[%s21365_s3 + $0x80] ss:$8 sps:$4 sm:$0xff]   ;;  %v17760_v28 = vld [vmem:[%s21365_s3 + $0x94] ss:$8 sps:$4 sm:$0xff]  }
 0x5f1   :  { %v4276_v30 = vmax.f32 %v17575_v40, %v4265_v24  ;;  %v4275_v27 = vmax.f32 %v17586_v33, %v13444_v55  ;;  %v4264_v4 = vsel %vm681_vm6, %v13443_v22, %v13444_v55  ;;  %v17778_v55 = vld [vmem:[%s21365_s3 + $0xa0] ss:$8 sps:$4 sm:$0xff]   ;;  %v17784_v22 = vld [vmem:[%s21365_s3 + $0xb4] ss:$8 sps:$4 sm:$0xff]   ;;  %v17796_v24 = vld [vmem:[%s21365_s3 + $0xc4] ss:$8 sps:$4 sm:$0xff]  }
 0x5f2   :  { %v17636_v61 = vpack.c.bf16 %v4277_v54, %v4277_v54  ;;  %v4274_v35 = vmax.f32 %v17579_v44, %v4264_v4  ;;  %v17790_v54 = vld [vmem:[%s21365_s3 + $0xb0] ss:$8 sps:$4 sm:$0xff]  }
 0x5f3   :  { %v17639_v57 = vpack.c.bf16 %v4276_v30, %v4276_v30  ;;  %v17641_v38 = vpack.c.bf16 %v4275_v27, %v4273_v47  ;;  %v17802_v47 = vld [vmem:[%s21365_s3 + $0xc0] ss:$8 sps:$4 sm:$0xff]   ;;  %v17808_v30 = vld [vmem:[%s21365_s3 + $0xd4] ss:$8 sps:$4 sm:$0xff]   ;;  %v17814_v27 = vld [vmem:[%s21365_s3 + $0xd0] ss:$8 sps:$4 sm:$0xff]  }
 0x5f4   :  { %v17643_v29 = vpack.c.bf16 %v4274_v35, %v4272_v59  ;;  %v4290_v58 = vrot.slane %v17636_v61, 1  ;;  %v17823_v59 = vld [vmem:[%s21365_s3 + $0x1d4] ss:$8 sps:$4 sm:$0xff]  }
 0x5f5   :  { %v4289_v40 = vrot.slane %v17641_v38, 1  ;;  %v4287_v33 = vrot.slane %v17639_v57, 1  ;;  %v4411_v36 = vrot.slane %v17641_v38, 2 }
 0x5f6   :  { %v4286_v63 = vrot.slane %v17643_v29, 1 }
 0x5f7   :  { %v4291_v32 = vsel %vm334_vm1, %v4289_v40, %v4290_v58 }
 0x5f8   :  { %12250 = vmatprep.mubr.msk.bf16.mxu1 %vm858_vm7, %v4291_v32  ;;  %v4288_v44 = vsel %vm334_vm1, %v4286_v63, %v4287_v33 }
 0x5f9   :  { %4333 = vmatmul.mubr.bf16.vlgmr.msra.gmra.mrb[92].mxu1 %v4288_v44 }
 0x5fa   :  { %4358 = vmatpush1.bf16.msra.mxu1 %v17655_v51  ;;  %12251 = vmatprep.mubr.msk.bf16.mxu1 %vm858_vm7, %v4290_v58 }
 0x5fb   :  { %4359 = vmatprep.subr.bf16.mxu1 %v17662_v16 }
 0x5fe   :  { %4360 = vmatpush1.bf16.msra.mxu1 %v17668_v25 }
 0x5ff   :  { %4361 = vmatprep.subr.bf16.mxu1 %v17674_v34 }
 0x601   :  { %4343 = vmatmul.mubr.bf16.gmra.mrb[96].mxu1 %v4287_v33  ;;  %v17832_v33 = vld [vmem:[%s21365_s3 + $0x1d0] ss:$8 sps:$4 sm:$0xff]  }
 0x602   :  { %4362 = vmatpush1.bf16.msra.mxu1 %v17680_v37  ;;  %12253 = vmatprep.mubr.msk.bf16.mxu1 %vm858_vm7, %v17641_v38 }
 0x603   :  { %4363 = vmatprep.subr.bf16.mxu1 %v17688_v46 }
 0x606   :  { %4364 = vmatpush1.bf16.msra.mxu1 %v17694_v39 }
 0x607   :  { %4365 = vmatprep.subr.bf16.mxu1 %v17700_v18 }
 0x60a   :  { %4366 = vmatpush1.bf16.msra.mxu1 %v17706_v1 }
 0x60b   :  { %4367 = vmatprep.subr.bf16.mxu1 %v17712_v2 }
 0x60e   :  { %4368 = vmatpush1.bf16.msra.mxu1 %v17718_v14 }
 0x60f   :  { %4369 = vmatprep.subr.bf16.mxu1 %v17724_v8 }
 0x612   :  { %4370 = vmatpush1.bf16.msra.mxu1 %v17730_v26 }
 0x613   :  { %4371 = vmatprep.subr.bf16.mxu1 %v17736_v48 }
 0x616   :  { %4372 = vmatpush1.bf16.msra.mxu1 %v17742_v11 }
 0x617   :  { %4373 = vmatprep.subr.bf16.mxu1 %v17748_v21 }
 0x61a   :  { %4374 = vmatpush1.bf16.msra.mxu1 %v17754_v17 }
 0x61b   :  { %4375 = vmatprep.subr.bf16.mxu1 %v17760_v28 }
 0x61e   :  { %4376 = vmatpush1.bf16.msra.mxu1 %v17766_v6 }
 0x61f   :  { %4377 = vmatprep.subr.bf16.mxu1 %v17772_v56 }
 0x622   :  { %4378 = vmatpush1.bf16.msra.mxu1 %v17778_v55 }
 0x623   :  { %4379 = vmatprep.subr.bf16.mxu1 %v17784_v22 }
 0x626   :  { %4380 = vmatpush1.bf16.msra.mxu1 %v17790_v54 }
 0x627   :  { %4381 = vmatprep.subr.bf16.mxu1 %v17796_v24 }
 0x62a   :  { %4382 = vmatpush1.bf16.msra.mxu1 %v17802_v47 }
 0x62b   :  { %4383 = vmatprep.subr.bf16.mxu1 %v17808_v30 }
 0x62d   :  { %v13447_v4 = vpop.permute.xlu1 %13446 }
 0x62e   :  { %4384 = vmatpush1.bf16.msra.mxu1 %v17814_v27  ;;  %v13449_v35 = vunpack.i.h.bf16 %v13447_v4  ;;  %v13448_v58 = vunpack.i.l.bf16 %v13447_v4  ;;  %v17839_v4 = vld [vmem:[%s21365_s3 + $0x1e4] ss:$8 sps:$4 sm:$0xff]  }
 0x62f   :  { %12252 = vmatprep.subr.msk.bf16.mxu1 %vm865_vm5, %v15606_v62 }
 0x630   :  { %v5041_v0 = vsel %vm681_vm6, %v13448_v58, %v13449_v35  ;;  %v5051_v50 = vmax.f32 %v17606_v20, %v13449_v35  ;;  %v17914_v35 = vld [vmem:[%s21365_s3 + $0x210] ss:$8 sps:$4 sm:$0xff]  }
 0x631   :  { %v5050_v19 = vmax.f32 %v17603_v9, %v5041_v0 }
 0x632   :  { %4386 = vmatpush1.bf16.msra.mxu1 %v15612_v7 }
 0x633   :  { %4422 = vmatprep.subr.bf16.mxu1 %v17823_v59 }
 0x634   :  { %v13457_v40 = vpop.permute.xlu1 %13456 }
 0x635   :  { %4390 = vmatmul.mubr.bf16.vlgmr.msra.gmra.mrb[92].mxu1 %v17643_v29  ;;  %v13459_v63 = vunpack.i.h.bf16 %v13457_v40  ;;  %v13458_v32 = vunpack.i.l.bf16 %v13457_v40  ;;  %v13452_v44 = vpop.permute.xlu0 %13451  ;;  %v4412_v40 = vrot.slane %v17636_v61, 2 }
 0x636   :  { %12254 = vmatprep.mubr.msk.bf16.mxu1 %vm858_vm7, %v17636_v61  ;;  %4423 = vmatpush1.bf16.msra.mxu1 %v17832_v33  ;;  %v13454_v10 = vunpack.i.h.bf16 %v13452_v44  ;;  %v13453_v15 = vunpack.i.l.bf16 %v13452_v44  ;;  %v4409_v44 = vrot.slane %v17639_v57, 2  ;;  %v18092_v61 = vld [vmem:[%s21363_s1 + $0x34] ss:$8 sps:$4 sm:$0x3f]  }
 0x637   :  { %4424 = vmatprep.subr.bf16.mxu1 %v17839_v4  ;;  %v5055_v12 = vmax.f32 %v17615_v5, %v13459_v63  ;;  %v5043_v31 = vsel %vm681_vm6, %v13458_v32, %v13459_v63  ;;  %v17854_v5 = vld [vmem:[%s21365_s3 + $0x1e0] ss:$8 sps:$4 sm:$0xff]   ;;  %v4408_v32 = vrot.slane %v17643_v29, 2  ;;  %v12288_v29 = vld [vmem:[%s21364_s0 + $0xd0] sm:$0xff] }
 0x638   :  { %v5054_v58 = vmax.f32 %v17612_v53, %v5043_v31  ;;  %v5053_v60 = vmax.f32 %v17620_v45, %v13454_v10  ;;  %v5042_v49 = vsel %vm681_vm6, %v13453_v15, %v13454_v10  ;;  %v17863_v31 = vld [vmem:[%s21365_s3 + $0x1f4] ss:$8 sps:$4 sm:$0xff]   ;;  %v17882_v53 = vld [vmem:[%s21365_s3 + $0x1f0] ss:$8 sps:$4 sm:$0xff]  }
 0x639   :  { %v17857_v38 = vpack.c.bf16 %v5055_v12, %v5055_v12  ;;  %v5052_v63 = vmax.f32 %v17618_v23, %v5042_v49  ;;  %v4413_v49 = vsel %vm195_vm0, %v4411_v36, %v4412_v40  ;;  %v17899_v23 = vld [vmem:[%s21365_s3 + $0x200] ss:$8 sps:$4 sm:$0xff]   ;;  %v17906_v45 = vld [vmem:[%s21365_s3 + $0x214] ss:$8 sps:$4 sm:$0xff]  }
 0x63a   :  { %4425 = vmatpush1.bf16.msra.mxu1 %v17854_v5  ;;  %v17866_v15 = vpack.c.bf16 %v5054_v58, %v5054_v58  ;;  %v17868_v10 = vpack.c.bf16 %v5053_v60, %v5051_v50  ;;  %v17890_v60 = vld [vmem:[%s21365_s3 + $0x204] ss:$8 sps:$4 sm:$0xff]  }
 0x63b   :  { %4426 = vmatprep.subr.bf16.mxu1 %v17863_v31  ;;  %v17870_v0 = vpack.c.bf16 %v5052_v63, %v5050_v19  ;;  %v5068_v9 = vrot.slane %v17857_v38, 1  ;;  %v18085_v63 = vld [vmem:[%s21363_s1 + $0x20] ss:$8 sps:$4 sm:$0xff]  }
 0x63c   :  { %v5067_v12 = vrot.slane %v17868_v10, 1  ;;  %v5065_v20 = vrot.slane %v17866_v15, 1 }
 0x63d   :  { %4400 = vmatmul.mubr.bf16.gmra.mrb[100].mxu1 %v17639_v57  ;;  %v5064_v19 = vrot.slane %v17870_v0, 1  ;;  %v12289_v57 = vld [vmem:[%s21364_s0 + $0xd8] sm:$0xf] }
 0x63e   :  { %4427 = vmatpush1.bf16.msra.mxu1 %v17882_v53  ;;  %12256 = vmatprep.mubr.msk.bf16.mxu1 %vm858_vm7, %v4413_v49  ;;  %v5069_v50 = vsel %vm334_vm1, %v5067_v12, %v5068_v9 }
 0x63f   :  { %4428 = vmatprep.subr.bf16.mxu1 %v17890_v60  ;;  %12278 = vmatprep.mubr.msk.bf16.mxu0 %vm858_vm7, %v5069_v50  ;;  %v5066_v36 = vsel %vm334_vm1, %v5064_v19, %v5065_v20  ;;  %v5189_v19 = vrot.slane %v17868_v10, 2  ;;  %v5190_v50 = vrot.slane %v17857_v38, 2 }
 0x640   :  { %5111 = vmatmul.mubr.bf16.vlgmr.msra.gmra.mrb[120].mxu0 %v5066_v36 }
 0x641   :  { %5136 = vmatpush1.bf16.msra.mxu0 %v17655_v51  ;;  %12279 = vmatprep.mubr.msk.bf16.mxu0 %vm858_vm7, %v5068_v9  ;;  %v17921_v51 = vld [vmem:[%s21365_s3 + $0x224] ss:$8 sps:$4 sm:$0xff]  }
 0x642   :  { %4429 = vmatpush1.bf16.msra.mxu1 %v17899_v23  ;;  %5137 = vmatprep.subr.bf16.mxu0 %v17662_v16  ;;  %v17928_v16 = vld [vmem:[%s21365_s3 + $0x220] ss:$8 sps:$4 sm:$0xff]  }
 0x643   :  { %4430 = vmatprep.subr.bf16.mxu1 %v17906_v45 }
 0x645   :  { %5138 = vmatpush1.bf16.msra.mxu0 %v17668_v25  ;;  %v17935_v25 = vld [vmem:[%s21365_s3 + $0x234] ss:$8 sps:$4 sm:$0xff]  }
 0x646   :  { %4431 = vmatpush1.bf16.msra.mxu1 %v17914_v35  ;;  %5139 = vmatprep.subr.bf16.mxu0 %v17674_v34  ;;  %v17944_v34 = vld [vmem:[%s21365_s3 + $0x230] ss:$8 sps:$4 sm:$0xff]  }
 0x647   :  { %4432 = vmatprep.subr.bf16.mxu1 %v17921_v51 }
 0x648   :  { %5121 = vmatmul.mubr.bf16.gmra.mrb[124].mxu0 %v5065_v20 }
 0x649   :  { %5140 = vmatpush1.bf16.msra.mxu0 %v17680_v37  ;;  %12281 = vmatprep.mubr.msk.bf16.mxu0 %vm858_vm7, %v17868_v10  ;;  %v17951_v37 = vld [vmem:[%s21365_s3 + $0x244] ss:$8 sps:$4 sm:$0xff]   ;;  %v18170_v10 = vld [vmem:[%s21363_s1 + $0x40] ss:$8 sps:$4 sm:$0xff]  }
 0x64a   :  { %4433 = vmatpush1.bf16.msra.mxu1 %v17928_v16  ;;  %5141 = vmatprep.subr.bf16.mxu0 %v17688_v46  ;;  %v17958_v46 = vld [vmem:[%s21365_s3 + $0x240] ss:$8 sps:$4 sm:$0xff]  }
 0x64b   :  { %4434 = vmatprep.subr.bf16.mxu1 %v17935_v25 }
 0x64d   :  { %5142 = vmatpush1.bf16.msra.mxu0 %v17694_v39  ;;  %v17965_v39 = vld [vmem:[%s21365_s3 + $0x254] ss:$8 sps:$4 sm:$0xff]  }
 0x64e   :  { %4435 = vmatpush1.bf16.msra.mxu1 %v17944_v34  ;;  %5143 = vmatprep.subr.bf16.mxu0 %v17700_v18  ;;  %v17972_v18 = vld [vmem:[%s21365_s3 + $0x250] ss:$8 sps:$4 sm:$0xff]  }
 0x64f   :  { %4436 = vmatprep.subr.bf16.mxu1 %v17951_v37 }
 0x651   :  { %5144 = vmatpush1.bf16.msra.mxu0 %v17706_v1  ;;  %v17979_v1 = vld [vmem:[%s21365_s3 + $0x264] ss:$8 sps:$4 sm:$0xff]  }
 0x652   :  { %4437 = vmatpush1.bf16.msra.mxu1 %v17958_v46  ;;  %5145 = vmatprep.subr.bf16.mxu0 %v17712_v2  ;;  %v17986_v2 = vld [vmem:[%s21365_s3 + $0x260] ss:$8 sps:$4 sm:$0xff]  }
 0x653   :  { %4438 = vmatprep.subr.bf16.mxu1 %v17965_v39 }
 0x655   :  { %5146 = vmatpush1.bf16.msra.mxu0 %v17718_v14  ;;  %v17993_v14 = vld [vmem:[%s21365_s3 + $0x274] ss:$8 sps:$4 sm:$0xff]  }
 0x656   :  { %4439 = vmatpush1.bf16.msra.mxu1 %v17972_v18  ;;  %5147 = vmatprep.subr.bf16.mxu0 %v17724_v8  ;;  %v18000_v8 = vld [vmem:[%s21365_s3 + $0x270] ss:$8 sps:$4 sm:$0xff]  }
 0x657   :  { %4440 = vmatprep.subr.bf16.mxu1 %v17979_v1 }
 0x659   :  { %5148 = vmatpush1.bf16.msra.mxu0 %v17730_v26  ;;  %v18007_v26 = vld [vmem:[%s21365_s3 + $0x284] ss:$8 sps:$4 sm:$0xff]  }
 0x65a   :  { %4441 = vmatpush1.bf16.msra.mxu1 %v17986_v2  ;;  %5149 = vmatprep.subr.bf16.mxu0 %v17736_v48  ;;  %v18014_v48 = vld [vmem:[%s21365_s3 + $0x280] ss:$8 sps:$4 sm:$0xff]  }
 0x65b   :  { %4442 = vmatprep.subr.bf16.mxu1 %v17993_v14 }
 0x65d   :  { %5150 = vmatpush1.bf16.msra.mxu0 %v17742_v11  ;;  %v18021_v11 = vld [vmem:[%s21365_s3 + $0x294] ss:$8 sps:$4 sm:$0xff]  }
 0x65e   :  { %4443 = vmatpush1.bf16.msra.mxu1 %v18000_v8  ;;  %5151 = vmatprep.subr.bf16.mxu0 %v17748_v21  ;;  %v18028_v21 = vld [vmem:[%s21365_s3 + $0x290] ss:$8 sps:$4 sm:$0xff]  }
 0x65f   :  { %4444 = vmatprep.subr.bf16.mxu1 %v18007_v26 }
 0x661   :  { %5152 = vmatpush1.bf16.msra.mxu0 %v17754_v17  ;;  %v18035_v17 = vld [vmem:[%s21365_s3 + $0x2a4] ss:$8 sps:$4 sm:$0xff]  }
 0x662   :  { %4445 = vmatpush1.bf16.msra.mxu1 %v18014_v48  ;;  %5153 = vmatprep.subr.bf16.mxu0 %v17760_v28  ;;  %v18042_v28 = vld [vmem:[%s21365_s3 + $0x2a0] ss:$8 sps:$4 sm:$0xff]  }
 0x663   :  { %4446 = vmatprep.subr.bf16.mxu1 %v18021_v11 }
 0x665   :  { %5154 = vmatpush1.bf16.msra.mxu0 %v17766_v6  ;;  %v12286_v6 = vld [vmem:[%s21364_s0 + $0xc0] sm:$0xff] }
 0x666   :  { %4447 = vmatpush1.bf16.msra.mxu1 %v18028_v21  ;;  %5155 = vmatprep.subr.bf16.mxu0 %v17772_v56  ;;  %v12287_v56 = vld [vmem:[%s21364_s0 + $0xc8] sm:$0xff] }
 0x667   :  { %4448 = vmatprep.subr.bf16.mxu1 %v18035_v17 }
 0x669   :  { %5156 = vmatpush1.bf16.msra.mxu0 %v17778_v55  ;;  %v18059_v55 = vpack.c.bf16 %v12287_v56, %v12286_v6  ;;  %v12316_v6 = vld [vmem:[%s21364_s0 + $0xf0] sm:$0xff]  ;;  %v12317_v56 = vld [vmem:[%s21364_s0 + $0xf8] sm:$0xf] }
 0x66a   :  { %4449 = vmatpush1.bf16.msra.mxu1 %v18042_v28  ;;  %5157 = vmatprep.subr.bf16.mxu0 %v17784_v22  ;;  %v18065_v22 = vld [vmem:[%s21363_s1 + $0x24] ss:$8 sps:$4 sm:$0xff]  }
 0x66b   :  { %12255 = vmatprep.subr.msk.bf16.mxu1 %vm865_vm5, %v15838_v41  ;;  %v5433_v58 = vshll.u32 %v18059_v55, 16  ;;  %v5559_v36 = vrot.slane %v18059_v55, 1 }
 0x66d   :  { %5158 = vmatpush1.bf16.msra.mxu0 %v17790_v54  ;;  %v4410_v54 = vsel %vm195_vm0, %v4408_v32, %v4409_v44  ;;  %v5695_v32 = vrot.slane %v18059_v55, 2 }
 0x66e   :  { %4451 = vmatpush1.bf16.msra.mxu1 %v15846_v42  ;;  %5159 = vmatprep.subr.bf16.mxu0 %v17796_v24  ;;  %v18079_v24 = vpack.c.bf16 %v12289_v57, %v12288_v29 }
 0x66f   :  { %5451 = vmatprep.subr.bf16.mxu1 %v18065_v22 }
 0x670   :  { %v5438_v9 = vshll.u32 %v18079_v24, 16  ;;  %v5442_v20 = vshrl.u32 %v18079_v24, 16 }
 0x671   :  { %4455 = vmatmul.mubr.bf16.vlgmr.msra.gmra.mrb[92].mxu1 %v4410_v54  ;;  %5160 = vmatpush1.bf16.msra.mxu0 %v17802_v47  ;;  %v5431_v47 = vshrl.u32 %v18059_v55, 16 }
 0x672   :  { %12257 = vmatprep.mubr.msk.bf16.mxu1 %vm858_vm7, %v4412_v40  ;;  %5452 = vmatpush1.bf16.msra.mxu1 %v18085_v63  ;;  %v5435_v40 = vrot.slane %v5433_v58, 1  ;;  %v5440_v49 = vrot.slane %v5438_v9, 1 }
 0x673   :  { %5161 = vmatprep.subr.bf16.mxu0 %v17808_v30  ;;  %12290 = vmatprep.subr.msk.bf16.mxu1 %vm195_vm0, %v18092_v61  ;;  %v18107_v30 = vld [vmem:[%s21363_s1 + $0x4] ss:$8 sps:$4 sm:$0xff]  }
 0x675   :  { %5162 = vmatpush1.bf16.msra.mxu0 %v17814_v27  ;;  %v5436_v27 = vor.u32 %v5435_v40, %v5431_v47  ;;  %v18332_v40 = vld [vmem:[%s21365_s3 + $0x10c] ss:$8 sps:$4 sm:$0xff]  }
 0x676   :  { %5454 = vmatpush1.bf16.msra.mxu1 %v15027_v13  ;;  %12280 = vmatprep.subr.msk.bf16.mxu0 %vm865_vm5, %v15606_v62 }
 0x677   :  { %5506 = vmatprep.subr.bf16.mxu1 %v18107_v30  ;;  %v5441_v12 = vsel %vm154_vm3, %v5436_v27, %v5440_v49  ;;  %v18351_v27 = vld [vmem:[%s21365_s3 + $0x11c] ss:$8 sps:$4 sm:$0xff]  }
 0x679   :  { %4465 = vmatmul.mubr.bf16.gmra.mrb[104].mxu1 %v4409_v44  ;;  %5164 = vmatpush1.bf16.msra.mxu0 %v15612_v7  ;;  %v5696_v44 = vrot.slane %v18079_v24, 2 }
 0x67a   :  { %5483 = vmatprep.mubr.bf16.mxu1 %v21435_v52  ;;  %5200 = vmatprep.subr.bf16.mxu0 %v17823_v59  ;;  %v18132_v59 = vld [vmem:[%s21363_s1] ss:$8 sps:$4 sm:$0xff]  }
 0x67b   :  { %v5697_v57 = vsel %vm195_vm0, %v5695_v32, %v5696_v44  ;;  %v21469_v32 = vld [vmem:[#allocation11_spill] sm:$0xff] }
 0x67c   :  { %5168 = vmatmul.mubr.bf16.vlgmr.msra.gmra.mrb[120].mxu0 %v17870_v0 }
 0x67d   :  { %12282 = vmatprep.mubr.msk.bf16.mxu0 %vm858_vm7, %v17857_v38  ;;  %5201 = vmatpush1.bf16.msra.mxu0 %v17832_v33  ;;  %v18139_v33 = vld [vmem:[%s21363_s1 + $0x14] ss:$8 sps:$4 sm:$0x3f]  }
 0x67e   :  { %5202 = vmatprep.subr.bf16.mxu0 %v17839_v4  ;;  %v5444_v4 = vor.u32 %v5442_v20, %v5440_v49 }
 0x681   :  { %12291 = vmatmul.mubr.msk.bf16.vlgmr.msra.gmra.mrb[108].mxu1 %vm188_vm2, %v5441_v12  ;;  %5203 = vmatpush1.bf16.msra.mxu0 %v17854_v5  ;;  %v5191_v5 = vsel %vm195_vm0, %v5189_v19, %v5190_v50  ;;  %v18361_v12 = vld [vmem:[%s21365_s3 + $0x118] ss:$8 sps:$4 sm:$0xff]  }
 0x682   :  { %5493 = vmatprep.mubr.bf16.mxu1 %v21435_v52  ;;  %5507 = vmatpush1.bf16.msra.mxu1 %v18132_v59 }
 0x683   :  { %5204 = vmatprep.subr.bf16.mxu0 %v17863_v31  ;;  %12293 = vmatprep.subr.msk.bf16.mxu1 %vm195_vm0, %v18139_v33  ;;  %v18154_v31 = vld [vmem:[%s21363_s1 + $0x44] ss:$8 sps:$4 sm:$0xff]  }
 0x684   :  { %5178 = vmatmul.mubr.bf16.gmra.mrb[128].mxu0 %v17866_v15 }
 0x685   :  { %5205 = vmatpush1.bf16.msra.mxu0 %v17882_v53  ;;  %12284 = vmatprep.mubr.msk.bf16.mxu0 %vm858_vm7, %v5191_v5  ;;  %v18177_v53 = vld [vmem:[%s21363_s1 + $0x54] ss:$8 sps:$4 sm:$0x3f]   ;;  %v18391_v5 = vld [vmem:[%s21365_s3 + $0x138] ss:$8 sps:$4 sm:$0xff]  }
 0x686   :  { %5509 = vmatpush1.bf16.msra.mxu1 %v15107_v43  ;;  %5206 = vmatprep.subr.bf16.mxu0 %v17890_v60  ;;  %v18187_v60 = vld [vmem:[%s21363_s1 + $0x64] ss:$8 sps:$4 sm:$0xff]  }
 0x687   :  { %5568 = vmatprep.subr.bf16.mxu1 %v18154_v31 }
 0x689   :  { %12292 = vmatmul.mubr.msk.bf16.gmra.mrb[112].mxu1 %vm188_vm2, %v5444_v4  ;;  %5207 = vmatpush1.bf16.msra.mxu0 %v17899_v23  ;;  %v5560_v23 = vrot.slane %v18079_v24, 1 }
 0x68a   :  { %5538 = vmatprep.mubr.bf16.mxu1 %v21435_v52  ;;  %5208 = vmatprep.subr.bf16.mxu0 %v17906_v45 }
 0x68b   :  { %v5561_v45 = vsel %vm334_vm1, %v5559_v36, %v5560_v23  ;;  %v18409_v36 = vld [vmem:[%s21365_s3 + $0x148] ss:$8 sps:$4 sm:$0xff]  }
 0x68d   :  { %5209 = vmatpush1.bf16.msra.mxu0 %v17914_v35  ;;  %v18206_v35 = vld [vmem:[%s21363_s1 + $0x60] ss:$8 sps:$4 sm:$0xff]  }
 0x68e   :  { %5210 = vmatprep.subr.bf16.mxu0 %v17921_v51  ;;  %v18213_v51 = vld [vmem:[%s21363_s1 + $0x74] ss:$8 sps:$4 sm:$0x3f]  }
 0x691   :  { %12294 = vmatmul.mubr.msk.bf16.vlgmr.msra.gmra.mrb[108].mxu1 %vm188_vm2, %v18059_v55  ;;  %5211 = vmatpush1.bf16.msra.mxu0 %v17928_v16  ;;  %v5628_v16 = vrot.slane %v5442_v20, 1  ;;  %v18367_v20 = vld [vmem:[%s21365_s3 + $0x12c] ss:$8 sps:$4 sm:$0xff]  }
 0x692   :  { %5548 = vmatprep.mubr.bf16.mxu1 %v21435_v52  ;;  %5569 = vmatpush1.bf16.msra.mxu1 %v18170_v10 }
 0x693   :  { %5212 = vmatprep.subr.bf16.mxu0 %v17935_v25  ;;  %12296 = vmatprep.subr.msk.bf16.mxu1 %vm195_vm0, %v18177_v53  ;;  %v5625_v25 = vrot.slane %v5431_v47, 1  ;;  %v18326_v47 = vld [vmem:[%s21365_s3 + $0xf8] ss:$8 sps:$4 sm:$0xff]  }
 0x695   :  { %5213 = vmatpush1.bf16.msra.mxu0 %v17944_v34  ;;  %v5626_v34 = vrot.slane %v5433_v58, 2 }
 0x696   :  { %5571 = vmatpush1.bf16.msra.mxu1 %v21436_v3  ;;  %5214 = vmatprep.subr.bf16.mxu0 %v17951_v37  ;;  %v5629_v37 = vrot.slane %v5438_v9, 2 }
 0x697   :  { %5638 = vmatprep.subr.bf16.mxu1 %v18187_v60 }
 0x699   :  { %12295 = vmatmul.mubr.msk.bf16.gmra.mrb[116].mxu1 %vm188_vm2, %v18079_v24  ;;  %5215 = vmatpush1.bf16.msra.mxu0 %v17958_v46  ;;  %v21467_v46 = vld [vmem:[#allocation4_spill] sm:$0xff] }
 0x69a   :  { %5600 = vmatprep.mubr.bf16.mxu1 %v21435_v52  ;;  %5216 = vmatprep.subr.bf16.mxu0 %v17965_v39  ;;  %v18229_v39 = vld [vmem:[%s21363_s1 + $0x84] ss:$8 sps:$4 sm:$0xff]  }
 0x69d   :  { %5217 = vmatpush1.bf16.msra.mxu0 %v17972_v18  ;;  %v5627_v18 = vor.u32 %v5626_v34, %v5625_v25  ;;  %v18453_v34 = vld [vmem:[%s21365_s3 + $0x178] ss:$8 sps:$4 sm:$0xff]  }
 0x69e   :  { %5218 = vmatprep.subr.bf16.mxu0 %v17979_v1  ;;  %v5630_v1 = vor.u32 %v5629_v37, %v5628_v16  ;;  %v18446_v16 = vld [vmem:[%s21365_s3 + $0x17c] ss:$8 sps:$4 sm:$0xff]   ;;  %v18459_v37 = vld [vmem:[%s21365_s3 + $0x18c] ss:$8 sps:$4 sm:$0xff]  }
 0x6a1   :  { %12297 = vmatmul.mubr.msk.bf16.vlgmr.msra.gmra.mrb[108].mxu1 %vm188_vm2, %v5561_v45  ;;  %5219 = vmatpush1.bf16.msra.mxu0 %v17986_v2  ;;  %v5631_v2 = vsel %vm425_vm4, %v5627_v18, %v5630_v1  ;;  %v18440_v45 = vld [vmem:[%s21365_s3 + $0x168] ss:$8 sps:$4 sm:$0xff]  }
 0x6a2   :  { %5610 = vmatprep.mubr.bf16.mxu1 %v21435_v52  ;;  %5639 = vmatpush1.bf16.msra.mxu1 %v18206_v35  ;;  %v18470_v18 = vld [vmem:[%s21365_s3 + $0x188] ss:$8 sps:$4 sm:$0xff]  }
 0x6a3   :  { %5220 = vmatprep.subr.bf16.mxu0 %v17993_v14  ;;  %12299 = vmatprep.subr.msk.bf16.mxu1 %vm195_vm0, %v18213_v51  ;;  %v18245_v14 = vld [vmem:[%s21363_s1 + $0x80] ss:$8 sps:$4 sm:$0xff]  }
 0x6a5   :  { %5221 = vmatpush1.bf16.msra.mxu0 %v18000_v8  ;;  %v12314_v8 = vld [vmem:[%s21364_s0 + $0xe0] sm:$0xff] }
 0x6a6   :  { %5641 = vmatpush1.bf16.msra.mxu1 %v21467_v46  ;;  %5222 = vmatprep.subr.bf16.mxu0 %v18007_v26  ;;  %v12315_v26 = vld [vmem:[%s21364_s0 + $0xe8] sm:$0xff] }
 0x6a7   :  { %5704 = vmatprep.subr.bf16.mxu1 %v18229_v39 }
 0x6a9   :  { %12298 = vmatmul.mubr.msk.bf16.gmra.mrb[120].mxu1 %vm188_vm2, %v5560_v23  ;;  %5223 = vmatpush1.bf16.msra.mxu0 %v18014_v48  ;;  %v18259_v48 = vld [vmem:[%s21363_s1 + $0x94] ss:$8 sps:$4 sm:$0x3f]  }
 0x6aa   :  { %5670 = vmatprep.mubr.bf16.mxu1 %v21435_v52  ;;  %5224 = vmatprep.subr.bf16.mxu0 %v18021_v11  ;;  %v5186_v11 = vrot.slane %v17870_v0, 2  ;;  %v18415_v23 = vld [vmem:[%s21365_s3 + $0x15c] ss:$8 sps:$4 sm:$0xff]  }
 0x6ad   :  { %5225 = vmatpush1.bf16.msra.mxu0 %v18028_v21  ;;  %v5187_v21 = vrot.slane %v17866_v15, 2  ;;  %v18280_v15 = vld [vmem:[%s21365_s3 + $0xec] ss:$8 sps:$4 sm:$0xff]  }
 0x6ae   :  { %5226 = vmatprep.subr.bf16.mxu0 %v18035_v17  ;;  %v18266_v17 = vpack.c.bf16 %v12315_v26, %v12314_v8  ;;  %v18492_v26 = vld [vmem:[%s21365_s3 + $0x198] ss:$8 sps:$4 sm:$0xff]  }
 0x6af   :  { %v5188_v0 = vsel %vm195_vm0, %v5186_v11, %v5187_v21 }
 0x6b0   :  { %v6211_v29 = vshll.u32 %v18266_v17, 16  ;;  %v6209_v54 = vshrl.u32 %v18266_v17, 16 }
 0x6b1   :  { %12300 = vmatmul.mubr.msk.bf16.vlgmr.msra.gmra.mrb[108].mxu1 %vm188_vm2, %v5631_v2  ;;  %5227 = vmatpush1.bf16.msra.mxu0 %v18042_v28  ;;  %v21468_v28 = vld [vmem:[#allocation5_spill] sm:$0xff] }
 0x6b2   :  { %5680 = vmatprep.mubr.bf16.mxu1 %v21435_v52  ;;  %5705 = vmatpush1.bf16.msra.mxu1 %v18245_v14  ;;  %v6213_v55 = vrot.slane %v6211_v29, 1  ;;  %v6404_v2 = vrot.slane %v6211_v29, 2  ;;  %v14857_v29 = vld [vmem:[%s21365_s3 + $0x4] ss:$8 sps:$4 sm:$0xff]  }
 0x6b3   :  { %12283 = vmatprep.subr.msk.bf16.mxu0 %vm865_vm5, %v15838_v41  ;;  %12302 = vmatprep.subr.msk.bf16.mxu1 %vm195_vm0, %v18259_v48 }
 0x6b4   :  { %v6214_v24 = vor.u32 %v6213_v55, %v6209_v54 }
 0x6b5   :  { %5229 = vmatpush1.bf16.msra.mxu0 %v15846_v42 }
 0x6b6   :  { %5707 = vmatpush1.bf16.msra.mxu1 %v21468_v28  ;;  %6229 = vmatprep.subr.bf16.mxu0 %v18065_v22  ;;  %v18290_v22 = vpack.c.bf16 %v12317_v56, %v12316_v6  ;;  %v14855_v6 = vld [vmem:[%s21365_s3 + $0x1bc] ss:$8 sps:$4 sm:$0xff]  }
 0x6b7   :  { %5856 = vmatprep.subr.bf16.mxu1 %v18280_v15 }
 0x6b8   :  { %5233 = vmatmul.mubr.bf16.vlgmr.msra.gmra.mrb[120].mxu0 %v5188_v0  ;;  %v6216_v38 = vshll.u32 %v18290_v22, 16  ;;  %v6220_v9 = vshrl.u32 %v18290_v22, 16  ;;  %v14856_v0 = vld [vmem:[%s21365_s3 + $0x1b8] ss:$8 sps:$4 sm:$0xff]  }
 0x6b9   :  { %12301 = vmatmul.mubr.msk.bf16.gmra.mrb[124].mxu1 %vm188_vm2, %v5630_v1  ;;  %12285 = vmatprep.mubr.msk.bf16.mxu0 %vm858_vm7, %v5190_v50  ;;  %v18383_v50 = vld [vmem:[%s21365_s3 + $0x13c] ss:$8 sps:$4 sm:$0xff]  }
 0x6ba   :  { %5736 = vmatprep.mubr.bf16.mxu1 %v21435_v52  ;;  %6230 = vmatpush1.bf16.msra.mxu0 %v18085_v63  ;;  %v6218_v58 = vrot.slane %v6216_v38, 1  ;;  %v18313_v63 = vld [vmem:[%s21365_s3 + $0xe8] ss:$8 sps:$4 sm:$0xff]   ;;  %v18476_v1 = vld [vmem:[%s21365_s3 + $0x19c] ss:$8 sps:$4 sm:$0xff]   ;;  %v6407_v8 = vrot.slane %v6216_v38, 2 }
 0x6bb   :  { %12318 = vmatprep.subr.msk.bf16.mxu0 %vm195_vm0, %v18092_v61 }
 0x6bc   :  { %v6219_v61 = vsel %vm154_vm3, %v6214_v24, %v6218_v58  ;;  %v6222_v49 = vor.u32 %v6220_v9, %v6218_v58 }
 0x6be   :  { %6232 = vmatpush1.bf16.msra.mxu0 %v15027_v13  ;;  %v18319_v13 = vld [vmem:[%s21365_s3 + $0xfc] ss:$8 sps:$4 sm:$0xff]  }
 0x6bf   :  { %6284 = vmatprep.subr.bf16.mxu0 %v18107_v30  ;;  %v18345_v30 = vld [vmem:[%s21365_s3 + $0x108] ss:$8 sps:$4 sm:$0xff]  }
 0x6c0   :  { %5243 = vmatmul.mubr.bf16.gmra.mrb[132].mxu0 %v5187_v21  ;;  %v14854_v21 = vld [vmem:[%s21365_s3 + $0x1a8] ss:$8 sps:$4 sm:$0xff]  }
 0x6c1   :  { %12303 = vmatmul.mubr.msk.bf16.vlgmr.msra.gmra.mrb[108].mxu1 %vm188_vm2, %v5697_v57  ;;  %6261 = vmatprep.mubr.bf16.mxu0 %v21435_v52  ;;  %v6474_v57 = vrot.slane %v18290_v22, 2 }
 0x6c2   :  { %5746 = vmatprep.mubr.bf16.mxu1 %v21435_v52  ;;  %5857 = vmatpush1.bf16.msra.mxu1 %v18313_v63 }
 0x6c3   :  { %5858 = vmatprep.subr.bf16.mxu1 %v18319_v13 }
 0x6c6   :  { %5859 = vmatpush1.bf16.msra.mxu1 %v18326_v47 }
 0x6c7   :  { %5860 = vmatprep.subr.bf16.mxu1 %v18332_v40 }
 0x6c8   :  { %12319 = vmatmul.mubr.msk.bf16.vlgmr.msra.gmra.mrb[136].mxu0 %vm188_vm2, %v6219_v61 }
 0x6c9   :  { %12304 = vmatmul.mubr.msk.bf16.gmra.mrb[128].mxu1 %vm188_vm2, %v5696_v44  ;;  %6285 = vmatpush1.bf16.msra.mxu0 %v18132_v59  ;;  %v21470_v44 = vld [vmem:[#allocation12_spill] sm:$0xff] }
 0x6ca   :  { %6271 = vmatprep.mubr.bf16.mxu0 %v21435_v52  ;;  %12321 = vmatprep.subr.msk.bf16.mxu0 %vm195_vm0, %v18139_v33 }
 0x6cb   :  { %5861 = vmatpush1.bf16.msra.mxu1 %v18345_v30 }
 0x6cc   :  { %5862 = vmatprep.subr.bf16.mxu1 %v18351_v27 }
 0x6cd   :  { %6287 = vmatpush1.bf16.msra.mxu0 %v15107_v43  ;;  %v18375_v43 = vld [vmem:[%s21365_s3 + $0x128] ss:$8 sps:$4 sm:$0xff]  }
 0x6ce   :  { %6346 = vmatprep.subr.bf16.mxu0 %v18154_v31  ;;  %v18397_v31 = vld [vmem:[%s21365_s3 + $0x14c] ss:$8 sps:$4 sm:$0xff]  }
 0x6cf   :  { %5863 = vmatpush1.bf16.msra.mxu1 %v18361_v12 }
 0x6d0   :  { %5864 = vmatprep.subr.bf16.mxu1 %v18367_v20  ;;  %12320 = vmatmul.mubr.msk.bf16.gmra.mrb[140].mxu0 %vm188_vm2, %v6222_v49 }
 0x6d1   :  { %6316 = vmatprep.mubr.bf16.mxu0 %v21435_v52 }
 0x6d3   :  { %5865 = vmatpush1.bf16.msra.mxu1 %v18375_v43 }
 0x6d4   :  { %v18378_v19 = vpop.f32.mrb[96].mxu1  ;;  %5866 = vmatprep.subr.bf16.mxu1 %v18383_v50 }
 0x6d5   :  { %v18386_v59 = vpop.f32.mrb[97].mxu1 }
 0x6d6   :  { %v4348_v33 = vpop.f32.mrb[98].mxu1 }
 0x6d7   :  { %v4349_v4 = vpop.f32.mrb[99].mxu1  ;;  %5867 = vmatpush1.bf16.msra.mxu1 %v18391_v5 }
 0x6d8   :  { %5868 = vmatprep.subr.bf16.mxu1 %v18397_v31  ;;  %12322 = vmatmul.mubr.msk.bf16.vlgmr.msra.gmra.mrb[136].mxu0 %vm188_vm2, %v18266_v17 }
 0x6d9   :  { %6347 = vmatpush1.bf16.msra.mxu0 %v18170_v10  ;;  %6326 = vmatprep.mubr.bf16.mxu0 %v21435_v52  ;;  %v18423_v10 = vld [vmem:[%s21365_s3 + $0x158] ss:$8 sps:$4 sm:$0xff]  }
 0x6da   :  { %12324 = vmatprep.subr.msk.bf16.mxu0 %vm195_vm0, %v18177_v53  ;;  %v18429_v53 = vld [vmem:[%s21365_s3 + $0x16c] ss:$8 sps:$4 sm:$0xff]  }
 0x6db   :  { %5869 = vmatpush1.bf16.msra.mxu1 %v18409_v36 }
 0x6dc   :  { %5870 = vmatprep.subr.bf16.mxu1 %v18415_v23 }
 0x6dd   :  { %6349 = vmatpush1.bf16.msra.mxu0 %v21436_v3  ;;  %v6337_v3 = vrot.slane %v18266_v17, 1 }
 0x6de   :  { %6416 = vmatprep.subr.bf16.mxu0 %v18187_v60  ;;  %v6338_v60 = vrot.slane %v18290_v22, 1 }
 0x6df   :  { %5871 = vmatpush1.bf16.msra.mxu1 %v18423_v10 }
 0x6e0   :  { %5872 = vmatprep.subr.bf16.mxu1 %v18429_v53  ;;  %12323 = vmatmul.mubr.msk.bf16.gmra.mrb[144].mxu0 %vm188_vm2, %v18290_v22  ;;  %v6339_v25 = vsel %vm334_vm1, %v6337_v3, %v6338_v60 }
 0x6e1   :  { %6378 = vmatprep.mubr.bf16.mxu0 %v21435_v52 }
 0x6e3   :  { %5873 = vmatpush1.bf16.msra.mxu1 %v18440_v45 }
 0x6e4   :  { %5874 = vmatprep.subr.bf16.mxu1 %v18446_v16 }
 0x6e7   :  { %5875 = vmatpush1.bf16.msra.mxu1 %v18453_v34 }
 0x6e8   :  { %5876 = vmatprep.subr.bf16.mxu1 %v18459_v37  ;;  %12325 = vmatmul.mubr.msk.bf16.vlgmr.msra.gmra.mrb[136].mxu0 %vm188_vm2, %v6339_v25  ;;  %v21473_v25 = vld [vmem:[#allocation14_spill] sm:$0xff] }
 0x6e9   :  { %6417 = vmatpush1.bf16.msra.mxu0 %v18206_v35  ;;  %6388 = vmatprep.mubr.bf16.mxu0 %v21435_v52  ;;  %v6406_v35 = vrot.slane %v6220_v9, 1 }
 0x6ea   :  { %12327 = vmatprep.subr.msk.bf16.mxu0 %vm195_vm0, %v18213_v51  ;;  %v6403_v51 = vrot.slane %v6209_v54, 1 }
 0x6eb   :  { %5877 = vmatpush1.bf16.msra.mxu1 %v18470_v18 }
 0x6ec   :  { %5878 = vmatprep.subr.bf16.mxu1 %v18476_v1  ;;  %v6405_v11 = vor.u32 %v6404_v2, %v6403_v51 }
 0x6ed   :  { %6419 = vmatpush1.bf16.msra.mxu0 %v21467_v46  ;;  %v18498_v46 = vld [vmem:[%s21365_s3 + $0x1ac] ss:$8 sps:$4 sm:$0xff]  }
 0x6ee   :  { %6482 = vmatprep.subr.bf16.mxu0 %v18229_v39  ;;  %v6408_v39 = vor.u32 %v6407_v8, %v6406_v35 }
 0x6ef   :  { %5879 = vmatpush1.bf16.msra.mxu1 %v18492_v26 }
 0x6f0   :  { %5880 = vmatprep.subr.bf16.mxu1 %v18498_v46  ;;  %12326 = vmatmul.mubr.msk.bf16.gmra.mrb[148].mxu0 %vm188_vm2, %v6338_v60  ;;  %v6409_v56 = vsel %vm425_vm4, %v6405_v11, %v6408_v39 }
 0x6f1   :  { %6448 = vmatprep.mubr.bf16.mxu0 %v21435_v52 }
 0x6f3   :  { %5881 = vmatpush1.bf16.msra.mxu1 %v14854_v21 }
 0x6f4   :  { %5882 = vmatprep.subr.bf16.mxu1 %v14855_v6 }
 0x6f7   :  { %5883 = vmatpush1.bf16.msra.mxu1 %v14856_v0 }
 0x6f8   :  { %12305 = vmatprep.subr.msk.bf16.mxu1 %vm865_vm5, %v21469_v32  ;;  %12328 = vmatmul.mubr.msk.bf16.vlgmr.msra.gmra.mrb[136].mxu0 %vm188_vm2, %v6409_v56 }
 0x6f9   :  { %6483 = vmatpush1.bf16.msra.mxu0 %v18245_v14  ;;  %6458 = vmatprep.mubr.bf16.mxu0 %v21435_v52  ;;  %v6473_v14 = vrot.slane %v18266_v17, 2 }
 0x6fa   :  { %12330 = vmatprep.subr.msk.bf16.mxu0 %vm195_vm0, %v18259_v48 }
 0x6fb   :  { %5885 = vmatpush1.bf16.msra.mxu1 %v21470_v44  ;;  %v6475_v48 = vsel %vm195_vm0, %v6473_v14, %v6474_v57 }
 0x6fc   :  { %5913 = vmatprep.subr.bf16.mxu1 %v14857_v29 }
 0x6fd   :  { %6485 = vmatpush1.bf16.msra.mxu0 %v21468_v28 }
 0x6fe   :  { %6634 = vmatprep.subr.bf16.mxu0 %v18280_v15 }
 0x700   :  { %12329 = vmatmul.mubr.msk.bf16.gmra.mrb[152].mxu0 %vm188_vm2, %v6408_v39 }
 0x701   :  { %6514 = vmatprep.mubr.bf16.mxu0 %v21435_v52 }
 0x708   :  { %12331 = vmatmul.mubr.msk.bf16.vlgmr.msra.gmra.mrb[136].mxu0 %vm188_vm2, %v6475_v48 }
 0x709   :  { %6524 = vmatprep.mubr.bf16.mxu0 %v21435_v52  ;;  %6635 = vmatpush1.bf16.msra.mxu0 %v18313_v63 }
 0x70a   :  { %6636 = vmatprep.subr.bf16.mxu0 %v18319_v13  ;;  %v21471_v13 = vld [vmem:[#allocation3_spill] sm:$0xff] }
 0x70d   :  { %6637 = vmatpush1.bf16.msra.mxu0 %v18326_v47 }
 0x70e   :  { %6638 = vmatprep.subr.bf16.mxu0 %v18332_v40  ;;  %v21472_v40 = vld [vmem:[#allocation13_spill] sm:$0xff] }
 0x710   :  { %v4401_v28 = vpop.f32.mrb[100].mxu1  ;;  %12332 = vmatmul.mubr.msk.bf16.gmra.mrb[156].mxu0 %vm188_vm2, %v6474_v57 }
 0x711   :  { %v18538_v15 = vadd.f32 %v4401_v28, %v18378_v19  ;;  %v4403_v17 = vpop.f32.mrb[101].mxu1  ;;  %6639 = vmatpush1.bf16.msra.mxu0 %v18345_v30 }
 0x712   :  { %v18542_v22 = vadd.f32 %v4403_v17, %v18386_v59  ;;  %v4405_v54 = vpop.f32.mrb[102].mxu1  ;;  %6640 = vmatprep.subr.bf16.mxu0 %v18351_v27 }
 0x713   :  { %v4406_v52 = vpop.f32.mrb[103].mxu1 }
 0x715   :  { %6641 = vmatpush1.bf16.msra.mxu0 %v18361_v12 }
 0x716   :  { %6642 = vmatprep.subr.bf16.mxu0 %v18367_v20 }
 0x719   :  { %6643 = vmatpush1.bf16.msra.mxu0 %v18375_v43 }
 0x71a   :  { %6644 = vmatprep.subr.bf16.mxu0 %v18383_v50 }
 0x71b   :  { %v18550_v55 = vpop.f32.mrb[124].mxu0 }
 0x71c   :  { %v18552_v38 = vpop.f32.mrb[125].mxu0 }
 0x71d   :  { %v5126_v24 = vpop.f32.mrb[126].mxu0  ;;  %6645 = vmatpush1.bf16.msra.mxu0 %v18391_v5 }
 0x71e   :  { %v5127_v58 = vpop.f32.mrb[127].mxu0  ;;  %6646 = vmatprep.subr.bf16.mxu0 %v18397_v31 }
 0x721   :  { %6647 = vmatpush1.bf16.msra.mxu0 %v18409_v36 }
 0x722   :  { %6648 = vmatprep.subr.bf16.mxu0 %v18415_v23 }
 0x725   :  { %6649 = vmatpush1.bf16.msra.mxu0 %v18423_v10 }
 0x726   :  { %6650 = vmatprep.subr.bf16.mxu0 %v18429_v53 }
 0x729   :  { %6651 = vmatpush1.bf16.msra.mxu0 %v18440_v45 }
 0x72a   :  { %6652 = vmatprep.subr.bf16.mxu0 %v18446_v16 }
 0x72d   :  { %6653 = vmatpush1.bf16.msra.mxu0 %v18453_v34 }
 0x72e   :  { %6654 = vmatprep.subr.bf16.mxu0 %v18459_v37 }
 0x731   :  { %6655 = vmatpush1.bf16.msra.mxu0 %v18470_v18 }
 0x732   :  { %6656 = vmatprep.subr.bf16.mxu0 %v18476_v1 }
 0x735   :  { %6657 = vmatpush1.bf16.msra.mxu0 %v18492_v26 }
 0x736   :  { %6658 = vmatprep.subr.bf16.mxu0 %v18498_v46 }
 0x739   :  { %6659 = vmatpush1.bf16.msra.mxu0 %v14854_v21 }
 0x73a   :  { %6660 = vmatprep.subr.bf16.mxu0 %v14855_v6 }
 0x73d   :  { %6661 = vmatpush1.bf16.msra.mxu0 %v14856_v0 }
 0x73e   :  { %12333 = vmatprep.subr.msk.bf16.mxu0 %vm865_vm5, %v21469_v32 }
 0x741   :  { %6663 = vmatpush1.bf16.msra.mxu0 %v21470_v44 }
 0x742   :  { %6691 = vmatprep.subr.bf16.mxu0 %v14857_v29 }
 0x744   :  { %v4456_v63 = vpop.f32.mrb[92].mxu1 }
 0x745   :  { %v4479_v61 = vadd.f32 %v4456_v63, %v21471_v13  ;;  %v4458_v47 = vpop.f32.mrb[93].mxu1 }
 0x746   :  { %v4480_v9 = vadd.f32 %v4458_v47, %v21472_v40  ;;  %v4460_v30 = vpop.f32.mrb[94].mxu1 }
 0x747   :  { %v4485_v27 = vmax.f32 %v4479_v61, 0.0  ;;  %v4481_v49 = vadd.f32 %v4460_v30, %v21471_v13  ;;  %v4462_v12 = vpop.f32.mrb[95].mxu1 }
 0x748   :  { %v4486_v20 = vmax.f32 %v4480_v9, 0.0  ;;  %v4482_v43 = vadd.f32 %v4462_v12, %v21472_v40 }
 0x749   :  { %v4493_v19 = vrot.slane %v4485_v27, 2  ;;  %v4495_v50 = vrot.slane %v4485_v27, 4  ;;  %v4497_v59 = vrot.slane %v4485_v27, 6  ;;  %v4487_v33 = vmax.f32 %v4481_v49, 0.0 }
 0x74a   :  { %v4494_v4 = vrot.slane %v4486_v20, 2  ;;  %v4496_v5 = vrot.slane %v4486_v20, 4  ;;  %v4498_v31 = vrot.slane %v4486_v20, 6  ;;  %v4511_v36 = vcombine.low %v4485_v27, %v4486_v20 }
 0x74b   :  { %v4501_v23 = vrot.slane %v4487_v33, 2  ;;  %v4503_v10 = vrot.slane %v4487_v33, 4  ;;  %v4505_v53 = vrot.slane %v4487_v33, 6  ;;  %v4488_v3 = vmax.f32 %v4482_v43, 0.0 }
 0x74c   :  { %v4512_v60 = vcombine.low %v4493_v19, %v4494_v4  ;;  %v4513_v45 = vcombine.low %v4495_v50, %v4496_v5  ;;  %v4514_v16 = vcombine.low %v4497_v59, %v4498_v31  ;;  %v4521_v34 = vrot.slane %v4511_v36, %v21473_v25  ;;  %v4466_v37 = vpop.f32.mrb[104].mxu1 }
 0x74d   :  { %v4502_v18 = vrot.slane %v4488_v3, 2  ;;  %v4504_v1 = vrot.slane %v4488_v3, 4  ;;  %v4506_v35 = vrot.slane %v4488_v3, 6  ;;  %v4560_v51 = vcombine.low %v4487_v33, %v4488_v3  ;;  %v4468_v2 = vpop.f32.mrb[105].mxu1 }
 0x74e   :  { %v4528_v8 = vrot.slane %v4512_v60, %v21473_v25  ;;  %v4535_v26 = vrot.slane %v4513_v45, %v21473_v25  ;;  %v4542_v46 = vrot.slane %v4514_v16, %v21473_v25  ;;  %v4477_v11 = vadd.f32 %v4466_v37, %v18538_v15  ;;  %v4470_v39 = vpop.f32.mrb[106].mxu1  ;;  %v13757_v45 = vld [vmem:[%s21368_s5 + $0x228] ss:$16 sps:$4 sm:$0xff]  }
 0x74f   :  { %v4561_v21 = vcombine.low %v4501_v23, %v4502_v18  ;;  %v4562_v6 = vcombine.low %v4503_v10, %v4504_v1  ;;  %v4563_v56 = vcombine.low %v4505_v53, %v4506_v35  ;;  %v4471_v0 = vpop.f32.mrb[107].mxu1  ;;  %v4478_v14 = vadd.f32 %v4468_v2, %v18542_v22 }
 0x750   :  { %v4543_v32 = vcombine.low %v4521_v34, %v4528_v8  ;;  %v4544_v44 = vcombine.low %v4535_v26, %v4542_v46  ;;  %v4483_v29 = vadd.f32 %v4477_v11, %v21471_v13  ;;  %v4570_v57 = vrot.slane %v4560_v51, %v21473_v25 }
 0x751   :  { %v4577_v48 = vrot.slane %v4561_v21, %v21473_v25  ;;  %v4584_v28 = vrot.slane %v4562_v6, %v21473_v25  ;;  %v4591_v17 = vrot.slane %v4563_v56, %v21473_v25  ;;  %v4484_v24 = vadd.f32 %v4478_v14, %v21472_v40 }
 0x752   :  { %v4551_v15 = vrot.slane %v4543_v32, %v21473_v25  ;;  %v4558_v54 = vrot.slane %v4544_v44, %v21473_v25  ;;  %v4489_v52 = vmax.f32 %v4483_v29, 0.0 }
 0x753   :  { %v4592_v58 = vcombine.low %v4570_v57, %v4577_v48  ;;  %v4593_v63 = vcombine.low %v4584_v28, %v4591_v17  ;;  %v4490_v22 = vmax.f32 %v4484_v24, 0.0 }
 0x754   :  { %v4559_v61 = vcombine.low %v4551_v15, %v4558_v54  ;;  %v4509_v47 = vrot.slane %v4489_v52, 2 }
 0x755   :  { %v4600_v9 = vrot.slane %v4592_v58, %v21473_v25  ;;  %v4607_v30 = vrot.slane %v4593_v63, %v21473_v25  ;;  %v4510_v27 = vrot.slane %v4490_v22, 2  ;;  %v4609_v49 = vcombine.low %v4489_v52, %v4490_v22 }
 0x756   :  { %4637 = vst [vmem:[#allocation2 + $0x4] ss:$8 sm:$0xf] %v4559_v61  ;;  %4638 = vst [vmem:[#allocation2 + $0x4] ss:$8 sm:$0xf0] %v4559_v61 }
 0x757   :  { %v4608_v12 = vcombine.low %v4600_v9, %v4607_v30  ;;  %v4610_v20 = vcombine.low %v4509_v47, %v4510_v27  ;;  %v5179_v43 = vpop.f32.mrb[128].mxu0  ;;  %v4617_v59 = vrot.slane %v4609_v49, %v21473_v25 }
 0x758   :  { %v18592_v19 = vadd.f32 %v5179_v43, %v18550_v55  ;;  %v5181_v50 = vpop.f32.mrb[129].mxu0 }
 0x759   :  { %4640 = vst [vmem:[#allocation2 + $0x44] ss:$8 sm:$0xf] %v4608_v12  ;;  %4641 = vst [vmem:[#allocation2 + $0x44] ss:$8 sm:$0xf0] %v4608_v12  ;;  %v4624_v33 = vrot.slane %v4610_v20, %v21473_v25  ;;  %v18597_v4 = vadd.f32 %v5181_v50, %v18552_v38 }
 0x75a   :  { %v5183_v5 = vpop.f32.mrb[130].mxu0 }
 0x75b   :  { %v5184_v31 = vpop.f32.mrb[131].mxu0  ;;  %v4625_v36 = vcombine.low %v4617_v59, %v4624_v33  ;;  %v21475_v5 = vld [vmem:[#allocation9_spill] sm:$0xff] }
 0x75c   :  { %v5495_v23 = vpop.f32.mrb[112].mxu1 }
 0x75d   :  { %v5497_v10 = vpop.f32.mrb[113].mxu1  ;;  %v4632_v53 = vrot.slane %v4625_v36, %v21473_v25 }
 0x75e   :  { %v5499_v3 = vpop.f32.mrb[114].mxu1 }
 0x75f   :  { %v5500_v60 = vpop.f32.mrb[115].mxu1  ;;  %4643 = vst.msk [vmem:[#allocation2 + $0x84] ss:$8 sm:$0xf] %vm16422_vm8, %v4632_v53 }
 0x76c   :  { %v5550_v55 = vpop.f32.mrb[116].mxu1 }
 0x76d   :  { %v5551_v16 = vadd.f32 %v5550_v55, %v5495_v23  ;;  %v5552_v34 = vpop.f32.mrb[117].mxu1 }
 0x76e   :  { %v5553_v37 = vadd.f32 %v5552_v34, %v5497_v10  ;;  %v5554_v18 = vpop.f32.mrb[118].mxu1  ;;  %v21476_v34 = vld [vmem:[#allocation10_spill] sm:$0xff] }
 0x76f   :  { %v5555_v1 = vpop.f32.mrb[119].mxu1 }
 0x77c   :  { %v5612_v38 = vpop.f32.mrb[120].mxu1 }
 0x77d   :  { %v5623_v35 = vadd.f32 %v5612_v38, %v5551_v16  ;;  %v5614_v51 = vpop.f32.mrb[121].mxu1 }
 0x77e   :  { %v5624_v2 = vadd.f32 %v5614_v51, %v5553_v37  ;;  %v5616_v8 = vpop.f32.mrb[122].mxu1 }
 0x77f   :  { %v5617_v26 = vpop.f32.mrb[123].mxu1 }
 0x78b   :  { %v5234_v11 = vpop.f32.mrb[120].mxu0 }
 0x78c   :  { %v5682_v46 = vpop.f32.mrb[124].mxu1  ;;  %v5257_v6 = vadd.f32 %v5234_v11, %v21471_v13  ;;  %v5236_v56 = vpop.f32.mrb[121].mxu0 }
 0x78d   :  { %v18602_v39 = vadd.f32 %v5682_v46, %v5623_v35  ;;  %v5684_v21 = vpop.f32.mrb[125].mxu1  ;;  %v5258_v44 = vadd.f32 %v5236_v56, %v21472_v40  ;;  %v5238_v29 = vpop.f32.mrb[122].mxu0 }
 0x78e   :  { %v18605_v0 = vadd.f32 %v5684_v21, %v5624_v2  ;;  %v5686_v32 = vpop.f32.mrb[126].mxu1  ;;  %v5263_v57 = vmax.f32 %v5257_v6, 0.0  ;;  %v5259_v48 = vadd.f32 %v5238_v29, %v21471_v13  ;;  %v5240_v28 = vpop.f32.mrb[123].mxu0 }
 0x78f   :  { %v5687_v14 = vpop.f32.mrb[127].mxu1  ;;  %v5264_v17 = vmax.f32 %v5258_v44, 0.0  ;;  %v5260_v15 = vadd.f32 %v5240_v28, %v21472_v40 }
 0x790   :  { %v5271_v54 = vrot.slane %v5263_v57, 2  ;;  %v5273_v52 = vrot.slane %v5263_v57, 4  ;;  %v5275_v24 = vrot.slane %v5263_v57, 6  ;;  %v5265_v58 = vmax.f32 %v5259_v48, 0.0 }
 0x791   :  { %v5272_v63 = vrot.slane %v5264_v17, 2  ;;  %v5274_v61 = vrot.slane %v5264_v17, 4  ;;  %v5276_v47 = vrot.slane %v5264_v17, 6  ;;  %v5289_v22 = vcombine.low %v5263_v57, %v5264_v17 }
 0x792   :  { %v5279_v9 = vrot.slane %v5265_v58, 2  ;;  %v5281_v30 = vrot.slane %v5265_v58, 4  ;;  %v5283_v27 = vrot.slane %v5265_v58, 6  ;;  %v5266_v49 = vmax.f32 %v5260_v15, 0.0 }
 0x793   :  { %v5290_v20 = vcombine.low %v5271_v54, %v5272_v63  ;;  %v5291_v43 = vcombine.low %v5273_v52, %v5274_v61  ;;  %v5292_v50 = vcombine.low %v5275_v24, %v5276_v47  ;;  %v5299_v59 = vrot.slane %v5289_v22, %v21473_v25  ;;  %v5244_v33 = vpop.f32.mrb[132].mxu0 }
 0x794   :  { %v5738_v12 = vpop.f32.mrb[108].mxu1  ;;  %v5280_v23 = vrot.slane %v5266_v49, 2  ;;  %v5282_v10 = vrot.slane %v5266_v49, 4  ;;  %v5284_v53 = vrot.slane %v5266_v49, 6  ;;  %v5246_v3 = vpop.f32.mrb[133].mxu0  ;;  %v5338_v51 = vcombine.low %v5265_v58, %v5266_v49 }
 0x795   :  { %v5761_v31 = vadd.f32 %v5738_v12, %v21475_v5  ;;  %v5740_v36 = vpop.f32.mrb[109].mxu1  ;;  %v5306_v60 = vrot.slane %v5290_v20, %v21473_v25  ;;  %v5313_v55 = vrot.slane %v5291_v43, %v21473_v25  ;;  %v5320_v16 = vrot.slane %v5292_v50, %v21473_v25  ;;  %v5248_v1 = vpop.f32.mrb[134].mxu0 }
 0x796   :  { %v5762_v37 = vadd.f32 %v5740_v36, %v21476_v34  ;;  %v5742_v18 = vpop.f32.mrb[110].mxu1  ;;  %v5339_v2 = vcombine.low %v5279_v9, %v5280_v23  ;;  %v5249_v26 = vpop.f32.mrb[135].mxu0  ;;  %v5340_v6 = vcombine.low %v5281_v30, %v5282_v10  ;;  %v5341_v44 = vcombine.low %v5283_v27, %v5284_v53 }
 0x797   :  { %v5767_v38 = vmax.f32 %v5761_v31, 0.0  ;;  %v18617_v35 = vadd.f32 %v5742_v18, %v21475_v5  ;;  %v5744_v8 = vpop.f32.mrb[111].mxu1  ;;  %v5321_v46 = vcombine.low %v5299_v59, %v5306_v60  ;;  %v5322_v11 = vcombine.low %v5313_v55, %v5320_v16 }
 0x798   :  { %v5768_v21 = vmax.f32 %v5762_v37, 0.0  ;;  %v5348_v29 = vrot.slane %v5338_v51, %v21473_v25  ;;  %v5355_v28 = vrot.slane %v5339_v2, %v21473_v25  ;;  %v5362_v15 = vrot.slane %v5340_v6, %v21473_v25 }
 0x799   :  { %v5779_v56 = vrot.slane %v5767_v38, 1  ;;  %v5769_v32 = vmax.f32 %v18617_v35, 0.0  ;;  %v5329_v14 = vrot.slane %v5321_v46, %v21473_v25  ;;  %v5336_v57 = vrot.slane %v5322_v11, %v21473_v25 }
 0x79a   :  { %v5782_v48 = vrot.slane %v5768_v21, 1  ;;  %v5369_v54 = vrot.slane %v5341_v44, %v21473_v25  ;;  %v5764_v52 = vadd.f32 %v5744_v8, %v21476_v34  ;;  %v5370_v58 = vcombine.low %v5348_v29, %v5355_v28 }
 0x79b   :  { %v5780_v17 = vrot.slane %v5769_v32, 1  ;;  %v5337_v24 = vcombine.low %v5329_v14, %v5336_v57  ;;  %v5255_v63 = vadd.f32 %v5244_v33, %v18592_v19  ;;  %v5256_v47 = vadd.f32 %v5246_v3, %v18597_v4 }
 0x79c   :  { %v5748_v61 = vpop.f32.mrb[128].mxu1  ;;  %v5371_v22 = vcombine.low %v5362_v15, %v5369_v54  ;;  %v5770_v9 = vmax.f32 %v5764_v52, 0.0  ;;  %v5378_v12 = vrot.slane %v5370_v58, %v21473_v25 }
 0x79d   :  { %v5759_v30 = vadd.f32 %v5748_v61, %v18602_v39  ;;  %v5750_v27 = vpop.f32.mrb[129].mxu1  ;;  %v5781_v49 = vsel %vm334_vm1, %v5779_v56, %v5780_v17  ;;  %5415 = vst [vmem:[#allocation2 + $0x5] ss:$8 sm:$0xf] %v5337_v24  ;;  %v5261_v20 = vadd.f32 %v5255_v63, %v21471_v13  ;;  %v5262_v43 = vadd.f32 %v5256_v47, %v21472_v40 }
 0x79e   :  { %5416 = vst [vmem:[#allocation2 + $0x5] ss:$8 sm:$0xf0] %v5337_v24  ;;  %v5760_v19 = vadd.f32 %v5750_v27, %v18605_v0  ;;  %v5752_v50 = vpop.f32.mrb[130].mxu1  ;;  %v5385_v4 = vrot.slane %v5371_v22, %v21473_v25  ;;  %v5783_v59 = vrot.slane %v5770_v9, 1  ;;  %v18637_v39 = vmax.f32 %v5767_v38, %v5781_v49 }
 0x79f   :  { %v5765_v33 = vadd.f32 %v5759_v30, %v21475_v5  ;;  %v5753_v31 = vpop.f32.mrb[131].mxu1  ;;  %v5267_v36 = vmax.f32 %v5261_v20, 0.0  ;;  %v5268_v23 = vmax.f32 %v5262_v43, 0.0 }
 0x7a0   :  { %v5766_v10 = vadd.f32 %v5760_v19, %v21476_v34  ;;  %v5386_v53 = vcombine.low %v5378_v12, %v5385_v4  ;;  %v5784_v60 = vsel %vm334_vm1, %v5782_v48, %v5783_v59 }
 0x7a1   :  { %v5771_v3 = vmax.f32 %v5765_v33, 0.0  ;;  %v5287_v55 = vrot.slane %v5267_v36, 2  ;;  %v5288_v16 = vrot.slane %v5268_v23, 2  ;;  %v5387_v0 = vcombine.low %v5267_v36, %v5268_v23 }
 0x7a2   :  { %v5772_v37 = vmax.f32 %v5766_v10, 0.0  ;;  %5418 = vst [vmem:[#allocation2 + $0x45] ss:$8 sm:$0xf] %v5386_v53  ;;  %v18641_v1 = vmax.f32 %v5768_v21, %v5784_v60 }
 0x7a3   :  { %5419 = vst [vmem:[#allocation2 + $0x45] ss:$8 sm:$0xf0] %v5386_v53  ;;  %v5785_v18 = vrot.slane %v5771_v3, 1  ;;  %v5388_v38 = vcombine.low %v5287_v55, %v5288_v16  ;;  %v6273_v51 = vpop.f32.mrb[140].mxu0  ;;  %v5395_v8 = vrot.slane %v5387_v0, %v21473_v25 }
 0x7a4   :  { %v5787_v35 = vrot.slane %v5772_v37, 1  ;;  %v13460_v26 = vpack.i.bf16 %v18641_v1, %v18637_v39  ;;  %v6275_v11 = vpop.f32.mrb[141].mxu0 }
 0x7a5   :  { %v18643_v2 = vmax.f32 %v5771_v3, %v5785_v18  ;;  %v5786_v46 = vsel %vm334_vm1, %v5780_v17, %v5785_v18  ;;  %v5402_v6 = vrot.slane %v5388_v38, %v21473_v25  ;;  %v6277_v29 = vpop.f32.mrb[142].mxu0 }
 0x7a6   :  { %v18650_v56 = vmax.f32 %v5772_v37, %v5787_v35  ;;  %v5788_v21 = vsel %vm334_vm1, %v5783_v59, %v5787_v35  ;;  %v18653_v44 = vmax.f32 %v5769_v32, %v5786_v46  ;;  %13461 = vrot.lane.b32.xlu0 %v13460_v26, %s14914_s19  ;;  %v6278_v57 = vpop.f32.mrb[143].mxu0 }
 0x7a7   :  { %v18656_v14 = vmax.f32 %v5770_v9, %v5788_v21  ;;  %v5403_v48 = vcombine.low %v5395_v8, %v5402_v6 }
 0x7a8   :  { %v13465_v28 = vpack.i.bf16 %v18650_v56, %v18643_v2 }
 0x7a9   :  { %v13470_v17 = vpack.i.bf16 %v18656_v14, %v18653_v44  ;;  %v5410_v15 = vrot.slane %v5403_v48, %v21473_v25 }
 0x7aa   :  { %13466 = vrot.lane.b32.xlu0 %v13465_v28, %s14914_s19 }
 0x7ab   :  { %13471 = vrot.lane.b32.xlu1 %v13470_v17, %s14914_s19  ;;  %5421 = vst.msk [vmem:[#allocation2 + $0x85] ss:$8 sm:$0xf] %vm16422_vm8, %v5410_v15 }
 0x7b3   :  { %v6328_v32 = vpop.f32.mrb[144].mxu0 }
 0x7b4   :  { %v6329_v54 = vadd.f32 %v6328_v32, %v6273_v51  ;;  %v6330_v52 = vpop.f32.mrb[145].mxu0 }
 0x7b5   :  { %v6331_v24 = vadd.f32 %v6330_v52, %v6275_v11  ;;  %v6332_v58 = vpop.f32.mrb[146].mxu0 }
 0x7b6   :  { %v6333_v63 = vpop.f32.mrb[147].mxu0 }
 0x7c3   :  { %v6390_v61 = vpop.f32.mrb[148].mxu0 }
 0x7c4   :  { %v6401_v47 = vadd.f32 %v6390_v61, %v6329_v54  ;;  %v6392_v22 = vpop.f32.mrb[149].mxu0 }
 0x7c5   :  { %v6402_v9 = vadd.f32 %v6392_v22, %v6331_v24  ;;  %v6394_v30 = vpop.f32.mrb[150].mxu0 }
 0x7c6   :  { %v6395_v27 = vpop.f32.mrb[151].mxu0 }
 0x7d3   :  { %v6460_v49 = vpop.f32.mrb[152].mxu0 }
 0x7d4   :  { %v6471_v12 = vadd.f32 %v6460_v49, %v6401_v47  ;;  %v6462_v20 = vpop.f32.mrb[153].mxu0 }
 0x7d5   :  { %v6472_v43 = vadd.f32 %v6462_v20, %v6402_v9  ;;  %v6464_v19 = vpop.f32.mrb[154].mxu0 }
 0x7d6   :  { %v6465_v50 = vpop.f32.mrb[155].mxu0 }
 0x7db   :  { %v6516_v4 = vpop.f32.mrb[136].mxu0 }
 0x7dc   :  { %v6539_v59 = vadd.f32 %v6516_v4, %v21475_v5  ;;  %v6518_v33 = vpop.f32.mrb[137].mxu0 }
 0x7dd   :  { %v6540_v31 = vadd.f32 %v6518_v33, %v21476_v34  ;;  %v6520_v36 = vpop.f32.mrb[138].mxu0 }
 0x7de   :  { %v6545_v23 = vmax.f32 %v6539_v59, 0.0  ;;  %v6541_v10 = vadd.f32 %v6520_v36, %v21475_v5  ;;  %v6522_v53 = vpop.f32.mrb[139].mxu0 }
 0x7df   :  { %v6546_v3 = vmax.f32 %v6540_v31, 0.0  ;;  %v6542_v60 = vadd.f32 %v6522_v53, %v21476_v34 }
 0x7e0   :  { %v6547_v55 = vmax.f32 %v6541_v10, 0.0  ;;  %v6557_v0 = vrot.slane %v6545_v23, 1 }
 0x7e1   :  { %v6548_v16 = vmax.f32 %v6542_v60, 0.0  ;;  %v6560_v18 = vrot.slane %v6546_v3, 1 }
 0x7e2   :  { %v6558_v37 = vrot.slane %v6547_v55, 1 }
 0x7e3   :  { %v6561_v38 = vrot.slane %v6548_v16, 1  ;;  %v6526_v35 = vpop.f32.mrb[156].mxu0 }
 0x7e4   :  { %v6537_v51 = vadd.f32 %v6526_v35, %v6471_v12  ;;  %v6528_v8 = vpop.f32.mrb[157].mxu0  ;;  %v6559_v26 = vsel %vm334_vm1, %v6557_v0, %v6558_v37  ;;  %v18744_v35 = vld [vmem:[%s21365_s3 + $0x24] ss:$8 sps:$4 sm:$0xff]  }
 0x7e5   :  { %v6538_v46 = vadd.f32 %v6528_v8, %v6472_v43  ;;  %v6530_v11 = vpop.f32.mrb[158].mxu0  ;;  %v6562_v6 = vsel %vm334_vm1, %v6560_v18, %v6561_v38  ;;  %v18673_v21 = vmax.f32 %v6545_v23, %v6559_v26  ;;  %v18732_v18 = vld [vmem:[%s21365_s3 + $0x14] ss:$8 sps:$4 sm:$0xff]   ;;  %v18764_v26 = vld [vmem:[%s21365_s3 + $0x30] ss:$8 sps:$4 sm:$0xff]  }
 0x7e6   :  { %v6543_v29 = vadd.f32 %v6537_v51, %v21475_v5  ;;  %v6531_v57 = vpop.f32.mrb[159].mxu0  ;;  %v18676_v48 = vmax.f32 %v6546_v3, %v6562_v6  ;;  %v18750_v51 = vld [vmem:[%s21365_s3 + $0x20] ss:$8 sps:$4 sm:$0xff]   ;;  %v18758_v8 = vld [vmem:[%s21365_s3 + $0x34] ss:$8 sps:$4 sm:$0xff]  }
 0x7e7   :  { %v6544_v28 = vadd.f32 %v6538_v46, %v21476_v34  ;;  %v18770_v46 = vld [vmem:[%s21365_s3 + $0x44] ss:$8 sps:$4 sm:$0xff]   ;;  %v18776_v11 = vld [vmem:[%s21365_s3 + $0x40] ss:$8 sps:$4 sm:$0xff]   ;;  %v18782_v6 = vld [vmem:[%s21365_s3 + $0x54] ss:$8 sps:$4 sm:$0xff]  }
 0x7e8   :  { %v6549_v17 = vmax.f32 %v6543_v29, 0.0  ;;  %v13475_v15 = vpack.i.bf16 %v18676_v48, %v18673_v21  ;;  %v18788_v29 = vld [vmem:[%s21365_s3 + $0x50] ss:$8 sps:$4 sm:$0xff]   ;;  %v18794_v57 = vld [vmem:[%s21365_s3 + $0x64] ss:$8 sps:$4 sm:$0xff]  }
 0x7e9   :  { %v6550_v32 = vmax.f32 %v6544_v28, 0.0  ;;  %v18800_v28 = vld [vmem:[%s21365_s3 + $0x60] ss:$8 sps:$4 sm:$0xff]  }
 0x7ea   :  { %v6563_v54 = vrot.slane %v6549_v17, 1  ;;  %13476 = vrot.lane.b32.xlu1 %v13475_v15, %s14914_s19  ;;  %v18812_v15 = vld [vmem:[%s21365_s3 + $0x70] ss:$8 sps:$4 sm:$0xff]  }
 0x7eb   :  { %v6565_v52 = vrot.slane %v6550_v32, 1 }
 0x7ec   :  { %v18682_v24 = vmax.f32 %v6549_v17, %v6563_v54  ;;  %v6564_v58 = vsel %vm334_vm1, %v6558_v37, %v6563_v54  ;;  %v18725_v37 = vld [vmem:[%s21365_s3] ss:$8 sps:$4 sm:$0xff]   ;;  %v18806_v17 = vld [vmem:[%s21365_s3 + $0x74] ss:$8 sps:$4 sm:$0xff]  }
 0x7ed   :  { %v18685_v63 = vmax.f32 %v6550_v32, %v6565_v52  ;;  %v6566_v5 = vsel %vm334_vm1, %v6561_v38, %v6565_v52  ;;  %v18688_v61 = vmax.f32 %v6547_v55, %v6564_v58  ;;  %v18738_v38 = vld [vmem:[%s21365_s3 + $0x10] ss:$8 sps:$4 sm:$0xff]   ;;  %v18818_v32 = vld [vmem:[%s21365_s3 + $0x84] ss:$8 sps:$4 sm:$0xff]   ;;  %v18824_v54 = vld [vmem:[%s21365_s3 + $0x80] ss:$8 sps:$4 sm:$0xff]  }
 0x7ee   :  { %v18690_v34 = vmax.f32 %v6548_v16, %v6566_v5  ;;  %v18830_v52 = vld [vmem:[%s21365_s3 + $0x94] ss:$8 sps:$4 sm:$0xff]   ;;  %v18836_v58 = vld [vmem:[%s21365_s3 + $0x90] ss:$8 sps:$4 sm:$0xff]   ;;  %v18842_v5 = vld [vmem:[%s21365_s3 + $0xa4] ss:$8 sps:$4 sm:$0xff]  }
 0x7ef   :  { %v13485_v47 = vpack.i.bf16 %v18685_v63, %v18682_v24 }
 0x7f0   :  { %v13480_v22 = vpack.i.bf16 %v18690_v34, %v18688_v61 }
 0x7f1   :  { %13486 = vrot.lane.b32.xlu1 %v13485_v47, %s14914_s19  ;;  %v18848_v47 = vld [vmem:[%s21365_s3 + $0xa0] ss:$8 sps:$4 sm:$0xff]  }
 0x7f2   :  { %13481 = vrot.lane.b32.xlu0 %v13480_v22, %s14914_s19  ;;  %v18854_v22 = vld [vmem:[%s21365_s3 + $0xb4] ss:$8 sps:$4 sm:$0xff]  }
 0x818   :  { %v13462_v9 = vpop.permute.xlu0 %13461 }
 0x819   :  { %v13464_v30 = vunpack.i.h.bf16 %v13462_v9  ;;  %v13463_v27 = vunpack.i.l.bf16 %v13462_v9  ;;  %v18860_v9 = vld [vmem:[%s21365_s3 + $0xb0] ss:$8 sps:$4 sm:$0xff]  }
 0x81b   :  { %v5819_v49 = vsel %vm681_vm6, %v13463_v27, %v13464_v30  ;;  %v5829_v59 = vmax.f32 %v18641_v1, %v13464_v30  ;;  %v18866_v30 = vld [vmem:[%s21365_s3 + $0xc4] ss:$8 sps:$4 sm:$0xff]   ;;  %v18872_v27 = vld [vmem:[%s21365_s3 + $0xc0] ss:$8 sps:$4 sm:$0xff]  }
 0x81c   :  { %v13467_v12 = vpop.permute.xlu0 %13466  ;;  %v5828_v10 = vmax.f32 %v18637_v39, %v5819_v49  ;;  %v18878_v49 = vld [vmem:[%s21365_s3 + $0xd4] ss:$8 sps:$4 sm:$0xff]  }
 0x81d   :  { %v13472_v20 = vpop.permute.xlu1 %13471  ;;  %v13469_v43 = vunpack.i.h.bf16 %v13467_v12  ;;  %v13468_v19 = vunpack.i.l.bf16 %v13467_v12  ;;  %v18884_v12 = vld [vmem:[%s21365_s3 + $0xd0] ss:$8 sps:$4 sm:$0xff]  }
 0x81e   :  { %v13474_v50 = vunpack.i.h.bf16 %v13472_v20  ;;  %v13473_v4 = vunpack.i.l.bf16 %v13472_v20 }
 0x81f   :  { %v5833_v33 = vmax.f32 %v18650_v56, %v13469_v43  ;;  %v5821_v31 = vsel %vm681_vm6, %v13468_v19, %v13469_v43  ;;  %v18893_v43 = vld [vmem:[%s21365_s3 + $0x1d4] ss:$8 sps:$4 sm:$0xff]  }
 0x820   :  { %v5831_v36 = vmax.f32 %v18656_v14, %v13474_v50  ;;  %v5820_v23 = vsel %vm681_vm6, %v13473_v4, %v13474_v50  ;;  %v5832_v53 = vmax.f32 %v18643_v2, %v5821_v31 }
 0x821   :  { %v5830_v3 = vmax.f32 %v18653_v44, %v5820_v23  ;;  %v18707_v60 = vpack.c.bf16 %v5833_v33, %v5833_v33 }
 0x822   :  { %v18709_v55 = vpack.c.bf16 %v5831_v36, %v5829_v59  ;;  %v18711_v16 = vpack.c.bf16 %v5832_v53, %v5832_v53  ;;  %v18902_v59 = vld [vmem:[%s21365_s3 + $0x1d0] ss:$8 sps:$4 sm:$0xff]  }
 0x823   :  { %v18713_v1 = vpack.c.bf16 %v5830_v3, %v5828_v10  ;;  %v5846_v14 = vrot.slane %v18707_v60, 1  ;;  %v18909_v10 = vld [vmem:[%s21365_s3 + $0x1e4] ss:$8 sps:$4 sm:$0xff]  }
 0x824   :  { %v5845_v56 = vrot.slane %v18709_v55, 1  ;;  %v5843_v39 = vrot.slane %v18711_v16, 1 }
 0x825   :  { %v5842_v0 = vrot.slane %v18713_v1, 1 }
 0x826   :  { %v5847_v2 = vsel %vm334_vm1, %v5845_v56, %v5846_v14 }
 0x827   :  { %12306 = vmatprep.mubr.msk.bf16.mxu1 %vm858_vm7, %v5847_v2  ;;  %v5844_v44 = vsel %vm334_vm1, %v5842_v0, %v5843_v39  ;;  %v5967_v0 = vrot.slane %v18709_v55, 2 }
 0x828   :  { %5889 = vmatmul.mubr.bf16.vlgmr.msra.gmra.mrb[132].mxu1 %v5844_v44 }
 0x829   :  { %5914 = vmatpush1.bf16.msra.mxu1 %v18725_v37  ;;  %12307 = vmatprep.mubr.msk.bf16.mxu1 %vm858_vm7, %v5846_v14 }
 0x82a   :  { %5915 = vmatprep.subr.bf16.mxu1 %v18732_v18 }
 0x82d   :  { %5916 = vmatpush1.bf16.msra.mxu1 %v18738_v38 }
 0x82e   :  { %5917 = vmatprep.subr.bf16.mxu1 %v18744_v35 }
 0x830   :  { %5899 = vmatmul.mubr.bf16.gmra.mrb[136].mxu1 %v5843_v39  ;;  %v5968_v39 = vrot.slane %v18707_v60, 2 }
 0x831   :  { %5918 = vmatpush1.bf16.msra.mxu1 %v18750_v51  ;;  %12309 = vmatprep.mubr.msk.bf16.mxu1 %vm858_vm7, %v18709_v55 }
 0x832   :  { %5919 = vmatprep.subr.bf16.mxu1 %v18758_v8 }
 0x835   :  { %5920 = vmatpush1.bf16.msra.mxu1 %v18764_v26 }
 0x836   :  { %5921 = vmatprep.subr.bf16.mxu1 %v18770_v46 }
 0x839   :  { %5922 = vmatpush1.bf16.msra.mxu1 %v18776_v11 }
 0x83a   :  { %5923 = vmatprep.subr.bf16.mxu1 %v18782_v6 }
 0x83d   :  { %5924 = vmatpush1.bf16.msra.mxu1 %v18788_v29 }
 0x83e   :  { %5925 = vmatprep.subr.bf16.mxu1 %v18794_v57 }
 0x841   :  { %5926 = vmatpush1.bf16.msra.mxu1 %v18800_v28 }
 0x842   :  { %5927 = vmatprep.subr.bf16.mxu1 %v18806_v17 }
 0x845   :  { %5928 = vmatpush1.bf16.msra.mxu1 %v18812_v15 }
 0x846   :  { %5929 = vmatprep.subr.bf16.mxu1 %v18818_v32 }
 0x849   :  { %5930 = vmatpush1.bf16.msra.mxu1 %v18824_v54 }
 0x84a   :  { %5931 = vmatprep.subr.bf16.mxu1 %v18830_v52 }
 0x84d   :  { %5932 = vmatpush1.bf16.msra.mxu1 %v18836_v58 }
 0x84e   :  { %5933 = vmatprep.subr.bf16.mxu1 %v18842_v5 }
 0x851   :  { %5934 = vmatpush1.bf16.msra.mxu1 %v18848_v47 }
 0x852   :  { %5935 = vmatprep.subr.bf16.mxu1 %v18854_v22 }
 0x855   :  { %5936 = vmatpush1.bf16.msra.mxu1 %v18860_v9 }
 0x856   :  { %5937 = vmatprep.subr.bf16.mxu1 %v18866_v30 }
 0x859   :  { %5938 = vmatpush1.bf16.msra.mxu1 %v18872_v27 }
 0x85a   :  { %5939 = vmatprep.subr.bf16.mxu1 %v18878_v49 }
 0x85c   :  { %v13477_v20 = vpop.permute.xlu1 %13476 }
 0x85d   :  { %5940 = vmatpush1.bf16.msra.mxu1 %v18884_v12  ;;  %v13479_v19 = vunpack.i.h.bf16 %v13477_v20  ;;  %v13478_v50 = vunpack.i.l.bf16 %v13477_v20 }
 0x85e   :  { %12308 = vmatprep.subr.msk.bf16.mxu1 %vm865_vm5, %v15606_v62 }
 0x85f   :  { %v6597_v23 = vsel %vm681_vm6, %v13478_v50, %v13479_v19  ;;  %v6607_v2 = vmax.f32 %v18676_v48, %v13479_v19  ;;  %v18933_v48 = vld [vmem:[%s21365_s3 + $0x1f4] ss:$8 sps:$4 sm:$0xff]  }
 0x861   :  { %5942 = vmatpush1.bf16.msra.mxu1 %v15612_v7 }
 0x862   :  { %5978 = vmatprep.subr.bf16.mxu1 %v18893_v43 }
 0x863   :  { %v13487_v4 = vpop.permute.xlu1 %13486 }
 0x864   :  { %5946 = vmatmul.mubr.bf16.vlgmr.msra.gmra.mrb[132].mxu1 %v18713_v1  ;;  %v13489_v33 = vunpack.i.h.bf16 %v13487_v4  ;;  %v13488_v31 = vunpack.i.l.bf16 %v13487_v4  ;;  %v13482_v36 = vpop.permute.xlu0 %13481  ;;  %v6606_v4 = vmax.f32 %v18673_v21, %v6597_v23  ;;  %v18952_v23 = vld [vmem:[%s21365_s3 + $0x1f0] ss:$8 sps:$4 sm:$0xff]  }
 0x865   :  { %12310 = vmatprep.mubr.msk.bf16.mxu1 %vm858_vm7, %v18707_v60  ;;  %5979 = vmatpush1.bf16.msra.mxu1 %v18902_v59  ;;  %v13484_v53 = vunpack.i.h.bf16 %v13482_v36  ;;  %v13483_v3 = vunpack.i.l.bf16 %v13482_v36 }
 0x866   :  { %5980 = vmatprep.subr.bf16.mxu1 %v18909_v10  ;;  %v6611_v56 = vmax.f32 %v18685_v63, %v13489_v33  ;;  %v6599_v14 = vsel %vm681_vm6, %v13488_v31, %v13489_v33  ;;  %v18924_v63 = vld [vmem:[%s21365_s3 + $0x1e0] ss:$8 sps:$4 sm:$0xff]  }
 0x867   :  { %v6610_v44 = vmax.f32 %v18682_v24, %v6599_v14  ;;  %v6609_v20 = vmax.f32 %v18690_v34, %v13484_v53  ;;  %v6598_v50 = vsel %vm681_vm6, %v13483_v3, %v13484_v53  ;;  %v18960_v3 = vld [vmem:[%s21365_s3 + $0x204] ss:$8 sps:$4 sm:$0xff]  }
 0x868   :  { %v18927_v55 = vpack.c.bf16 %v6611_v56, %v6611_v56  ;;  %v6608_v33 = vmax.f32 %v18688_v61, %v6598_v50  ;;  %v5969_v61 = vsel %vm195_vm0, %v5967_v0, %v5968_v39  ;;  %v18969_v0 = vld [vmem:[%s21365_s3 + $0x200] ss:$8 sps:$4 sm:$0xff]   ;;  %v13666_v50 = vld [vmem:[%s21368_s5 + $0x44] ss:$16 sps:$4 sm:$0xff]  }
 0x869   :  { %5981 = vmatpush1.bf16.msra.mxu1 %v18924_v63  ;;  %v18936_v24 = vpack.c.bf16 %v6610_v44, %v6610_v44  ;;  %v18938_v21 = vpack.c.bf16 %v6609_v20, %v6607_v2  ;;  %v18976_v2 = vld [vmem:[%s21365_s3 + $0x214] ss:$8 sps:$4 sm:$0xff]   ;;  %v18984_v44 = vld [vmem:[%s21365_s3 + $0x210] ss:$8 sps:$4 sm:$0xff]  }
 0x86a   :  { %5982 = vmatprep.subr.bf16.mxu1 %v18933_v48  ;;  %v18940_v34 = vpack.c.bf16 %v6608_v33, %v6606_v4  ;;  %v6624_v19 = vrot.slane %v18927_v55, 1  ;;  %v14909_v20 = vld [vmem:[%s21365_s3 + $0x294] ss:$8 sps:$4 sm:$0xff]   ;;  %v13664_v4 = vld [vmem:[%s21368_s5 + $0x40] ss:$16 sps:$4 sm:$0xff]  }
 0x86b   :  { %v6623_v31 = vrot.slane %v18938_v21, 1  ;;  %v6621_v36 = vrot.slane %v18936_v24, 1  ;;  %v6745_v60 = vrot.slane %v18938_v21, 2  ;;  %v13672_v33 = vld [vmem:[%s21368_s5 + $0x64] ss:$16 sps:$4 sm:$0xff]  }
 0x86c   :  { %5956 = vmatmul.mubr.bf16.gmra.mrb[140].mxu1 %v18711_v16  ;;  %v6620_v53 = vrot.slane %v18940_v34, 1 }
 0x86d   :  { %5983 = vmatpush1.bf16.msra.mxu1 %v18952_v23  ;;  %12312 = vmatprep.mubr.msk.bf16.mxu1 %vm858_vm7, %v5969_v61  ;;  %v6625_v56 = vsel %vm334_vm1, %v6623_v31, %v6624_v19  ;;  %v13676_v61 = vld [vmem:[%s21368_s5 + $0x80] ss:$16 sps:$4 sm:$0xff]   ;;  %v13679_v31 = vld [vmem:[%s21368_s5 + $0x88] ss:$16 sps:$4 sm:$0xff]  }
 0x86e   :  { %5984 = vmatprep.subr.bf16.mxu1 %v18960_v3  ;;  %12334 = vmatprep.mubr.msk.bf16.mxu0 %vm858_vm7, %v6625_v56  ;;  %v6622_v14 = vsel %vm334_vm1, %v6620_v53, %v6621_v36  ;;  %v13682_v53 = vld [vmem:[%s21368_s5 + $0xa0] ss:$16 sps:$4 sm:$0xff]   ;;  %v13690_v56 = vld [vmem:[%s21368_s5 + $0xc4] ss:$16 sps:$4 sm:$0xff]  }
 0x86f   :  { %6667 = vmatmul.mubr.bf16.vlgmr.msra.gmra.mrb[160].mxu0 %v6622_v14  ;;  %v13688_v14 = vld [vmem:[%s21368_s5 + $0xc0] ss:$16 sps:$4 sm:$0xff]  }
 0x870   :  { %6692 = vmatpush1.bf16.msra.mxu0 %v18725_v37  ;;  %12335 = vmatprep.mubr.msk.bf16.mxu0 %vm858_vm7, %v6624_v19  ;;  %v18991_v37 = vld [vmem:[%s21365_s3 + $0x224] ss:$8 sps:$4 sm:$0xff]  }
 0x871   :  { %5985 = vmatpush1.bf16.msra.mxu1 %v18969_v0  ;;  %6693 = vmatprep.subr.bf16.mxu0 %v18732_v18  ;;  %v18998_v18 = vld [vmem:[%s21365_s3 + $0x220] ss:$8 sps:$4 sm:$0xff]   ;;  %v13681_v19 = vld [vmem:[%s21368_s5 + $0x8c] ss:$16 sps:$4 sm:$0xff]  }
 0x872   :  { %5986 = vmatprep.subr.bf16.mxu1 %v18976_v2 }
 0x874   :  { %6694 = vmatpush1.bf16.msra.mxu0 %v18738_v38  ;;  %v19005_v38 = vld [vmem:[%s21365_s3 + $0x234] ss:$8 sps:$4 sm:$0xff]  }
 0x875   :  { %5987 = vmatpush1.bf16.msra.mxu1 %v18984_v44  ;;  %6695 = vmatprep.subr.bf16.mxu0 %v18744_v35  ;;  %v19014_v35 = vld [vmem:[%s21365_s3 + $0x230] ss:$8 sps:$4 sm:$0xff]  }
 0x876   :  { %5988 = vmatprep.subr.bf16.mxu1 %v18991_v37 }
 0x877   :  { %6677 = vmatmul.mubr.bf16.gmra.mrb[164].mxu0 %v6621_v36  ;;  %v13684_v36 = vld [vmem:[%s21368_s5 + $0xa4] ss:$16 sps:$4 sm:$0xff]  }
 0x878   :  { %6696 = vmatpush1.bf16.msra.mxu0 %v18750_v51  ;;  %12337 = vmatprep.mubr.msk.bf16.mxu0 %vm858_vm7, %v18938_v21  ;;  %v19021_v51 = vld [vmem:[%s21365_s3 + $0x244] ss:$8 sps:$4 sm:$0xff]   ;;  %v13673_v21 = vld [vmem:[%s21368_s5 + $0x68] ss:$16 sps:$4 sm:$0xff]  }
 0x879   :  { %5989 = vmatpush1.bf16.msra.mxu1 %v18998_v18  ;;  %6697 = vmatprep.subr.bf16.mxu0 %v18758_v8  ;;  %v19028_v8 = vld [vmem:[%s21365_s3 + $0x240] ss:$8 sps:$4 sm:$0xff]  }
 0x87a   :  { %5990 = vmatprep.subr.bf16.mxu1 %v19005_v38 }
 0x87c   :  { %6698 = vmatpush1.bf16.msra.mxu0 %v18764_v26  ;;  %v19035_v26 = vld [vmem:[%s21365_s3 + $0x254] ss:$8 sps:$4 sm:$0xff]  }
 0x87d   :  { %5991 = vmatpush1.bf16.msra.mxu1 %v19014_v35  ;;  %6699 = vmatprep.subr.bf16.mxu0 %v18770_v46  ;;  %v19042_v46 = vld [vmem:[%s21365_s3 + $0x250] ss:$8 sps:$4 sm:$0xff]  }
 0x87e   :  { %5992 = vmatprep.subr.bf16.mxu1 %v19021_v51 }
 0x880   :  { %6700 = vmatpush1.bf16.msra.mxu0 %v18776_v11  ;;  %v19049_v11 = vld [vmem:[%s21365_s3 + $0x264] ss:$8 sps:$4 sm:$0xff]  }
 0x881   :  { %5993 = vmatpush1.bf16.msra.mxu1 %v19028_v8  ;;  %6701 = vmatprep.subr.bf16.mxu0 %v18782_v6  ;;  %v19056_v6 = vld [vmem:[%s21365_s3 + $0x260] ss:$8 sps:$4 sm:$0xff]  }
 0x882   :  { %5994 = vmatprep.subr.bf16.mxu1 %v19035_v26 }
 0x884   :  { %6702 = vmatpush1.bf16.msra.mxu0 %v18788_v29  ;;  %v19063_v29 = vld [vmem:[%s21365_s3 + $0x274] ss:$8 sps:$4 sm:$0xff]  }
 0x885   :  { %5995 = vmatpush1.bf16.msra.mxu1 %v19042_v46  ;;  %6703 = vmatprep.subr.bf16.mxu0 %v18794_v57  ;;  %v19070_v57 = vld [vmem:[%s21365_s3 + $0x270] ss:$8 sps:$4 sm:$0xff]  }
 0x886   :  { %5996 = vmatprep.subr.bf16.mxu1 %v19049_v11 }
 0x888   :  { %6704 = vmatpush1.bf16.msra.mxu0 %v18800_v28  ;;  %v14907_v28 = vld [vmem:[%s21365_s3 + $0x284] ss:$8 sps:$4 sm:$0xff]  }
 0x889   :  { %5997 = vmatpush1.bf16.msra.mxu1 %v19056_v6  ;;  %6705 = vmatprep.subr.bf16.mxu0 %v18806_v17  ;;  %v14908_v17 = vld [vmem:[%s21365_s3 + $0x280] ss:$8 sps:$4 sm:$0xff]  }
 0x88a   :  { %5998 = vmatprep.subr.bf16.mxu1 %v19063_v29 }
 0x88c   :  { %6706 = vmatpush1.bf16.msra.mxu0 %v18812_v15  ;;  %v14910_v15 = vld [vmem:[%s21365_s3 + $0x290] ss:$8 sps:$4 sm:$0xff]  }
 0x88d   :  { %5999 = vmatpush1.bf16.msra.mxu1 %v19070_v57  ;;  %6707 = vmatprep.subr.bf16.mxu0 %v18818_v32  ;;  %v14911_v32 = vld [vmem:[%s21365_s3 + $0x2a4] ss:$8 sps:$4 sm:$0xff]  }
 0x88e   :  { %6000 = vmatprep.subr.bf16.mxu1 %v14907_v28 }
 0x890   :  { %6708 = vmatpush1.bf16.msra.mxu0 %v18824_v54  ;;  %v14912_v54 = vld [vmem:[%s21365_s3 + $0x2a0] ss:$8 sps:$4 sm:$0xff]  }
 0x891   :  { %6001 = vmatpush1.bf16.msra.mxu1 %v14908_v17  ;;  %6709 = vmatprep.subr.bf16.mxu0 %v18830_v52  ;;  %v5964_v52 = vrot.slane %v18713_v1, 2  ;;  %v6743_v1 = vrot.slane %v18936_v24, 2 }
 0x892   :  { %6002 = vmatprep.subr.bf16.mxu1 %v14909_v20 }
 0x894   :  { %6710 = vmatpush1.bf16.msra.mxu0 %v18836_v58  ;;  %v5965_v58 = vrot.slane %v18711_v16, 2  ;;  %v6746_v16 = vrot.slane %v18927_v55, 2 }
 0x895   :  { %6003 = vmatpush1.bf16.msra.mxu1 %v14910_v15  ;;  %6711 = vmatprep.subr.bf16.mxu0 %v18842_v5 }
 0x896   :  { %6004 = vmatprep.subr.bf16.mxu1 %v14911_v32  ;;  %v5966_v5 = vsel %vm195_vm0, %v5964_v52, %v5965_v58  ;;  %v13717_v52 = vld [vmem:[%s21368_s5 + $0x14c] ss:$16 sps:$4 sm:$0xff]  }
 0x898   :  { %6712 = vmatpush1.bf16.msra.mxu0 %v18848_v47 }
 0x899   :  { %6005 = vmatpush1.bf16.msra.mxu1 %v14912_v54  ;;  %6713 = vmatprep.subr.bf16.mxu0 %v18854_v22 }
 0x89a   :  { %12311 = vmatprep.subr.msk.bf16.mxu1 %vm865_vm5, %v15838_v41 }
 0x89c   :  { %6714 = vmatpush1.bf16.msra.mxu0 %v18860_v9 }
 0x89d   :  { %6007 = vmatpush1.bf16.msra.mxu1 %v15846_v42  ;;  %6715 = vmatprep.subr.bf16.mxu0 %v18866_v30 }
 0x8a0   :  { %6011 = vmatmul.mubr.bf16.vlgmr.msra.gmra.mrb[132].mxu1 %v5966_v5  ;;  %6716 = vmatpush1.bf16.msra.mxu0 %v18872_v27  ;;  %v13715_v5 = vld [vmem:[%s21368_s5 + $0x148] ss:$16 sps:$4 sm:$0xff]  }
 0x8a1   :  { %12313 = vmatprep.mubr.msk.bf16.mxu1 %vm858_vm7, %v5968_v39  ;;  %6717 = vmatprep.subr.bf16.mxu0 %v18878_v49  ;;  %v13655_v49 = vld [vmem:[%s21368_s5 + $0x8] ss:$16 sps:$4 sm:$0xff]   ;;  %v13663_v39 = vld [vmem:[%s21368_s5 + $0x2c] ss:$16 sps:$4 sm:$0xff]  }
 0x8a4   :  { %6718 = vmatpush1.bf16.msra.mxu0 %v18884_v12  ;;  %v13657_v12 = vld [vmem:[%s21368_s5 + $0xc] ss:$16 sps:$4 sm:$0xff]  }
 0x8a5   :  { %12336 = vmatprep.subr.msk.bf16.mxu0 %vm865_vm5, %v15606_v62  ;;  %v6747_v62 = vsel %vm195_vm0, %v6745_v60, %v6746_v16 }
 0x8a8   :  { %6021 = vmatmul.mubr.bf16.gmra.mrb[144].mxu1 %v5965_v58  ;;  %6720 = vmatpush1.bf16.msra.mxu0 %v15612_v7  ;;  %v6742_v7 = vrot.slane %v18940_v34, 2  ;;  %v13712_v58 = vld [vmem:[%s21368_s5 + $0x140] ss:$16 sps:$4 sm:$0xff]  }
 0x8a9   :  { %6756 = vmatprep.subr.bf16.mxu0 %v18893_v43  ;;  %v13658_v43 = vld [vmem:[%s21368_s5 + $0x20] ss:$16 sps:$4 sm:$0xff]  }
 0x8aa   :  { %v6744_v47 = vsel %vm195_vm0, %v6742_v7, %v6743_v1  ;;  %v13723_v7 = vld [vmem:[%s21368_s5 + $0x16c] ss:$16 sps:$4 sm:$0xff]  }
 0x8ab   :  { %6724 = vmatmul.mubr.bf16.vlgmr.msra.gmra.mrb[160].mxu0 %v18940_v34  ;;  %v13678_v34 = vld [vmem:[%s21368_s5 + $0x84] ss:$16 sps:$4 sm:$0xff]  }
 0x8ac   :  { %12338 = vmatprep.mubr.msk.bf16.mxu0 %vm858_vm7, %v18927_v55  ;;  %6757 = vmatpush1.bf16.msra.mxu0 %v18902_v59  ;;  %v13660_v59 = vld [vmem:[%s21368_s5 + $0x24] ss:$16 sps:$4 sm:$0xff]   ;;  %v13667_v55 = vld [vmem:[%s21368_s5 + $0x48] ss:$16 sps:$4 sm:$0xff]  }
 0x8ad   :  { %6758 = vmatprep.subr.bf16.mxu0 %v18909_v10  ;;  %v13661_v10 = vld [vmem:[%s21368_s5 + $0x28] ss:$16 sps:$4 sm:$0xff]  }
 0x8b0   :  { %6759 = vmatpush1.bf16.msra.mxu0 %v18924_v63  ;;  %v13669_v63 = vld [vmem:[%s21368_s5 + $0x4c] ss:$16 sps:$4 sm:$0xff]  }
 0x8b1   :  { %6760 = vmatprep.subr.bf16.mxu0 %v18933_v48  ;;  %v13675_v48 = vld [vmem:[%s21368_s5 + $0x6c] ss:$16 sps:$4 sm:$0xff]  }
 0x8b3   :  { %6734 = vmatmul.mubr.bf16.gmra.mrb[168].mxu0 %v18936_v24  ;;  %v13670_v24 = vld [vmem:[%s21368_s5 + $0x60] ss:$16 sps:$4 sm:$0xff]  }
 0x8b4   :  { %6761 = vmatpush1.bf16.msra.mxu0 %v18952_v23  ;;  %12340 = vmatprep.mubr.msk.bf16.mxu0 %vm858_vm7, %v6747_v62  ;;  %v13687_v23 = vld [vmem:[%s21368_s5 + $0xac] ss:$16 sps:$4 sm:$0xff]   ;;  %v13720_v62 = vld [vmem:[%s21368_s5 + $0x164] ss:$16 sps:$4 sm:$0xff]  }
 0x8b5   :  { %6762 = vmatprep.subr.bf16.mxu0 %v18960_v3  ;;  %v13685_v3 = vld [vmem:[%s21368_s5 + $0xa8] ss:$16 sps:$4 sm:$0xff]  }
 0x8b8   :  { %6763 = vmatpush1.bf16.msra.mxu0 %v18969_v0  ;;  %v13693_v0 = vld [vmem:[%s21368_s5 + $0xcc] ss:$16 sps:$4 sm:$0xff]  }
 0x8b9   :  { %6764 = vmatprep.subr.bf16.mxu0 %v18976_v2  ;;  %v13691_v2 = vld [vmem:[%s21368_s5 + $0xc8] ss:$16 sps:$4 sm:$0xff]  }
 0x8bc   :  { %6765 = vmatpush1.bf16.msra.mxu0 %v18984_v44  ;;  %v13696_v44 = vld [vmem:[%s21368_s5 + $0xe4] ss:$16 sps:$4 sm:$0xff]  }
 0x8bd   :  { %6766 = vmatprep.subr.bf16.mxu0 %v18991_v37  ;;  %v13699_v37 = vld [vmem:[%s21368_s5 + $0xec] ss:$16 sps:$4 sm:$0xff]  }
 0x8c0   :  { %6767 = vmatpush1.bf16.msra.mxu0 %v18998_v18  ;;  %v13694_v18 = vld [vmem:[%s21368_s5 + $0xe0] ss:$16 sps:$4 sm:$0xff]  }
 0x8c1   :  { %6768 = vmatprep.subr.bf16.mxu0 %v19005_v38  ;;  %v13697_v38 = vld [vmem:[%s21368_s5 + $0xe8] ss:$16 sps:$4 sm:$0xff]  }
 0x8c4   :  { %6769 = vmatpush1.bf16.msra.mxu0 %v19014_v35  ;;  %v13702_v35 = vld [vmem:[%s21368_s5 + $0x104] ss:$16 sps:$4 sm:$0xff]  }
 0x8c5   :  { %6770 = vmatprep.subr.bf16.mxu0 %v19021_v51  ;;  %v13705_v51 = vld [vmem:[%s21368_s5 + $0x10c] ss:$16 sps:$4 sm:$0xff]  }
 0x8c8   :  { %6771 = vmatpush1.bf16.msra.mxu0 %v19028_v8  ;;  %v13700_v8 = vld [vmem:[%s21368_s5 + $0x100] ss:$16 sps:$4 sm:$0xff]  }
 0x8c9   :  { %6772 = vmatprep.subr.bf16.mxu0 %v19035_v26  ;;  %v13703_v26 = vld [vmem:[%s21368_s5 + $0x108] ss:$16 sps:$4 sm:$0xff]  }
 0x8cc   :  { %6773 = vmatpush1.bf16.msra.mxu0 %v19042_v46 }
 0x8cd   :  { %6774 = vmatprep.subr.bf16.mxu0 %v19049_v11 }
 0x8d0   :  { %6775 = vmatpush1.bf16.msra.mxu0 %v19056_v6 }
 0x8d1   :  { %6776 = vmatprep.subr.bf16.mxu0 %v19063_v29  ;;  %v13706_v29 = vld [vmem:[%s21368_s5 + $0x120] ss:$16 sps:$4 sm:$0xff]  }
 0x8d4   :  { %6777 = vmatpush1.bf16.msra.mxu0 %v19070_v57  ;;  %v13708_v57 = vld [vmem:[%s21368_s5 + $0x124] ss:$16 sps:$4 sm:$0xff]  }
 0x8d5   :  { %6778 = vmatprep.subr.bf16.mxu0 %v14907_v28 }
 0x8d8   :  { %6779 = vmatpush1.bf16.msra.mxu0 %v14908_v17 }
 0x8d9   :  { %6780 = vmatprep.subr.bf16.mxu0 %v14909_v20  ;;  %v13709_v20 = vld [vmem:[%s21368_s5 + $0x128] ss:$16 sps:$4 sm:$0xff]  }
 0x8dc   :  { %6781 = vmatpush1.bf16.msra.mxu0 %v14910_v15  ;;  %v13711_v15 = vld [vmem:[%s21368_s5 + $0x12c] ss:$16 sps:$4 sm:$0xff]  }
 0x8dd   :  { %6782 = vmatprep.subr.bf16.mxu0 %v14911_v32 }
 0x8e0   :  { %6783 = vmatpush1.bf16.msra.mxu0 %v14912_v54  ;;  %v13714_v54 = vld [vmem:[%s21368_s5 + $0x144] ss:$16 sps:$4 sm:$0xff]  }
 0x8e1   :  { %12339 = vmatprep.subr.msk.bf16.mxu0 %vm865_vm5, %v15838_v41  ;;  %v13652_v41 = vld [vmem:[%s21368_s5] ss:$16 sps:$4 sm:$0xff]  }
 0x8e4   :  { %6785 = vmatpush1.bf16.msra.mxu0 %v15846_v42  ;;  %v13654_v42 = vld [vmem:[%s21368_s5 + $0x4] ss:$16 sps:$4 sm:$0xff]  }
 0x8e5   :  { %10881 = vmatprep.subr.bf16.mxu1 %v13654_v42  ;;  %11291 = vmatprep.subr.bf16.mxu0 %v13657_v12  ;;  %v13727_v42 = vld [vmem:[%s21368_s5 + $0x188] ss:$16 sps:$4 sm:$0xff]   ;;  %v13735_v12 = vld [vmem:[%s21368_s5 + $0x1ac] ss:$16 sps:$4 sm:$0xff]  }
 0x8e6   :  { %10882 = vmatpush1.bf16.msra.mxu1 %v13652_v41  ;;  %v13724_v41 = vld [vmem:[%s21368_s5 + $0x180] ss:$16 sps:$4 sm:$0xff]  }
 0x8e7   :  { %6789 = vmatmul.mubr.bf16.vlgmr.msra.gmra.mrb[160].mxu0 %v6744_v47  ;;  %10883 = vmatprep.subr.bf16.mxu1 %v13660_v59  ;;  %v13718_v47 = vld [vmem:[%s21368_s5 + $0x160] ss:$16 sps:$4 sm:$0xff]   ;;  %v13733_v59 = vld [vmem:[%s21368_s5 + $0x1a8] ss:$16 sps:$4 sm:$0xff]  }
 0x8e8   :  { %12341 = vmatprep.mubr.msk.bf16.mxu0 %vm858_vm7, %v6746_v16  ;;  %11292 = vmatpush1.bf16.msra.mxu0 %v13655_v49  ;;  %v13732_v49 = vld [vmem:[%s21368_s5 + $0x1a4] ss:$16 sps:$4 sm:$0xff]  }
 0x8e9   :  { %11293 = vmatprep.subr.bf16.mxu0 %v13663_v39  ;;  %v13738_v39 = vld [vmem:[%s21368_s5 + $0x1c4] ss:$16 sps:$4 sm:$0xff]  }
 0x8ea   :  { %10884 = vmatpush1.bf16.msra.mxu1 %v13658_v43  ;;  %v13730_v43 = vld [vmem:[%s21368_s5 + $0x1a0] ss:$16 sps:$4 sm:$0xff]  }
 0x8eb   :  { %10885 = vmatprep.subr.bf16.mxu1 %v13666_v50  ;;  %v13739_v50 = vld [vmem:[%s21368_s5 + $0x1c8] ss:$16 sps:$4 sm:$0xff]  }
 0x8ec   :  { %11294 = vmatpush1.bf16.msra.mxu0 %v13661_v10  ;;  %v13736_v10 = vld [vmem:[%s21368_s5 + $0x1c0] ss:$16 sps:$4 sm:$0xff]  }
 0x8ed   :  { %11295 = vmatprep.subr.bf16.mxu0 %v13669_v63  ;;  %v13744_v63 = vld [vmem:[%s21368_s5 + $0x1e4] ss:$16 sps:$4 sm:$0xff]  }
 0x8ee   :  { %10886 = vmatpush1.bf16.msra.mxu1 %v13664_v4  ;;  %v13741_v4 = vld [vmem:[%s21368_s5 + $0x1cc] ss:$16 sps:$4 sm:$0xff]  }
 0x8ef   :  { %6799 = vmatmul.mubr.bf16.gmra.mrb[172].mxu0 %v6743_v1  ;;  %10887 = vmatprep.subr.bf16.mxu1 %v13672_v33  ;;  %v13742_v33 = vld [vmem:[%s21368_s5 + $0x1e0] ss:$16 sps:$4 sm:$0xff]  }
 0x8f0   :  { %11296 = vmatpush1.bf16.msra.mxu0 %v13667_v55  ;;  %v13747_v55 = vld [vmem:[%s21368_s5 + $0x1ec] ss:$16 sps:$4 sm:$0xff]  }
 0x8f1   :  { %11297 = vmatprep.subr.bf16.mxu0 %v13675_v48  ;;  %v13745_v48 = vld [vmem:[%s21368_s5 + $0x1e8] ss:$16 sps:$4 sm:$0xff]  }
 0x8f2   :  { %10888 = vmatpush1.bf16.msra.mxu1 %v13670_v24  ;;  %v13750_v24 = vld [vmem:[%s21368_s5 + $0x204] ss:$16 sps:$4 sm:$0xff]  }
 0x8f3   :  { %10889 = vmatprep.subr.bf16.mxu1 %v13678_v34 }
 0x8f4   :  { %11298 = vmatpush1.bf16.msra.mxu0 %v13673_v21  ;;  %v13753_v21 = vld [vmem:[%s21368_s5 + $0x20c] ss:$16 sps:$4 sm:$0xff]  }
 0x8f5   :  { %11299 = vmatprep.subr.bf16.mxu0 %v13681_v19 }
 0x8f6   :  { %10890 = vmatpush1.bf16.msra.mxu1 %v13676_v61 }
 0x8f7   :  { %10891 = vmatprep.subr.bf16.mxu1 %v13684_v36 }
 0x8f8   :  { %11300 = vmatpush1.bf16.msra.mxu0 %v13679_v31 }
 0x8f9   :  { %11301 = vmatprep.subr.bf16.mxu0 %v13687_v23 }
 0x8fa   :  { %10892 = vmatpush1.bf16.msra.mxu1 %v13682_v53 }
 0x8fb   :  { %10893 = vmatprep.subr.bf16.mxu1 %v13690_v56 }
 0x8fc   :  { %11302 = vmatpush1.bf16.msra.mxu0 %v13685_v3 }
 0x8fd   :  { %11303 = vmatprep.subr.bf16.mxu0 %v13693_v0 }
 0x8fe   :  { %10894 = vmatpush1.bf16.msra.mxu1 %v13688_v14 }
 0x8ff   :  { %10895 = vmatprep.subr.bf16.mxu1 %v13696_v44 }
 0x900   :  { %11304 = vmatpush1.bf16.msra.mxu0 %v13691_v2 }
 0x901   :  { %11305 = vmatprep.subr.bf16.mxu0 %v13699_v37 }
 0x902   :  { %10896 = vmatpush1.bf16.msra.mxu1 %v13694_v18 }
 0x903   :  { %v19153_v22 = vpop.f32.mrb[136].mxu1  ;;  %10897 = vmatprep.subr.bf16.mxu1 %v13702_v35 }
 0x904   :  { %v19155_v9 = vpop.f32.mrb[137].mxu1  ;;  %11306 = vmatpush1.bf16.msra.mxu0 %v13697_v38 }
 0x905   :  { %v5904_v30 = vpop.f32.mrb[138].mxu1  ;;  %11307 = vmatprep.subr.bf16.mxu0 %v13705_v51 }
 0x906   :  { %v5905_v27 = vpop.f32.mrb[139].mxu1  ;;  %10898 = vmatpush1.bf16.msra.mxu1 %v13700_v8  ;;  %v13726_v30 = vld [vmem:[%s21368_s5 + $0x184] ss:$16 sps:$4 sm:$0xff]  }
 0x907   :  { %10899 = vmatprep.subr.bf16.mxu1 %v13708_v57  ;;  %v13729_v27 = vld [vmem:[%s21368_s5 + $0x18c] ss:$16 sps:$4 sm:$0xff]  }
 0x908   :  { %11308 = vmatpush1.bf16.msra.mxu0 %v13703_v26 }
 0x909   :  { %11309 = vmatprep.subr.bf16.mxu0 %v13711_v15 }
 0x90a   :  { %10900 = vmatpush1.bf16.msra.mxu1 %v13706_v29 }
 0x90b   :  { %10901 = vmatprep.subr.bf16.mxu1 %v13714_v54 }
 0x90c   :  { %11310 = vmatpush1.bf16.msra.mxu0 %v13709_v20 }
 0x90d   :  { %11311 = vmatprep.subr.bf16.mxu0 %v13717_v52 }
 0x90e   :  { %10902 = vmatpush1.bf16.msra.mxu1 %v13712_v58 }
 0x90f   :  { %10903 = vmatprep.subr.bf16.mxu1 %v13720_v62 }
 0x910   :  { %11312 = vmatpush1.bf16.msra.mxu0 %v13715_v5 }
 0x911   :  { %11313 = vmatprep.subr.bf16.mxu0 %v13723_v7 }
 0x912   :  { %10904 = vmatpush1.bf16.msra.mxu1 %v13718_v47 }
 0x913   :  { %10905 = vmatprep.subr.bf16.mxu1 %v13726_v30 }
 0x916   :  { %10906 = vmatpush1.bf16.msra.mxu1 %v13724_v41 }
 0x917   :  { %10907 = vmatprep.subr.bf16.mxu1 %v13732_v49 }
 0x91a   :  { %10908 = vmatpush1.bf16.msra.mxu1 %v13730_v43 }
 0x91b   :  { %10909 = vmatprep.subr.bf16.mxu1 %v13738_v39 }
 0x91e   :  { %10910 = vmatpush1.bf16.msra.mxu1 %v13736_v10 }
 0x91f   :  { %10911 = vmatprep.subr.bf16.mxu1 %v13744_v63 }
 0x922   :  { %10912 = vmatpush1.bf16.msra.mxu1 %v13742_v33 }
 0x923   :  { %10922 = vmatprep.subr.bf16.mxu1 %v13750_v24 }
 0x93f   :  { %v5957_v46 = vpop.f32.mrb[140].mxu1 }
 0x940   :  { %v19266_v11 = vadd.f32 %v5957_v46, %v19153_v22  ;;  %v5959_v6 = vpop.f32.mrb[141].mxu1  ;;  %v13721_v22 = vld [vmem:[%s21368_s5 + $0x168] ss:$16 sps:$4 sm:$0xff]  }
 0x941   :  { %v19275_v28 = vadd.f32 %v5959_v6, %v19155_v9  ;;  %v5961_v17 = vpop.f32.mrb[142].mxu1  ;;  %11314 = vmatpush1.bf16.msra.mxu0 %v13721_v22 }
 0x942   :  { %v5962_v32 = vpop.f32.mrb[143].mxu1  ;;  %11315 = vmatprep.subr.bf16.mxu0 %v13729_v27 }
 0x945   :  { %11316 = vmatpush1.bf16.msra.mxu0 %v13727_v42 }
 0x946   :  { %11317 = vmatprep.subr.bf16.mxu0 %v13735_v12 }
 0x949   :  { %11318 = vmatpush1.bf16.msra.mxu0 %v13733_v59 }
 0x94a   :  { %v19295_v60 = vpop.f32.mrb[164].mxu0  ;;  %11319 = vmatprep.subr.bf16.mxu0 %v13741_v4 }
 0x94b   :  { %v19297_v16 = vpop.f32.mrb[165].mxu0 }
 0x94c   :  { %v6682_v1 = vpop.f32.mrb[166].mxu0 }
 0x94d   :  { %v6683_v9 = vpop.f32.mrb[167].mxu0  ;;  %11320 = vmatpush1.bf16.msra.mxu0 %v13739_v50 }
 0x94e   :  { %11321 = vmatprep.subr.bf16.mxu0 %v13747_v55 }
 0x951   :  { %11322 = vmatpush1.bf16.msra.mxu0 %v13745_v48 }
 0x952   :  { %11332 = vmatprep.subr.bf16.mxu0 %v13753_v21 }
 0x973   :  { %v6012_v34 = vpop.f32.mrb[132].mxu1 }
 0x974   :  { %v6035_v19 = vadd.f32 %v6012_v34, %v21471_v13  ;;  %v6014_v61 = vpop.f32.mrb[133].mxu1 }
 0x975   :  { %v6036_v31 = vadd.f32 %v6014_v61, %v21472_v40  ;;  %v6016_v36 = vpop.f32.mrb[134].mxu1 }
 0x976   :  { %v6041_v23 = vmax.f32 %v6035_v19, 0.0  ;;  %v6037_v53 = vadd.f32 %v6016_v36, %v21471_v13  ;;  %v6018_v3 = vpop.f32.mrb[135].mxu1 }
 0x977   :  { %v6042_v56 = vmax.f32 %v6036_v31, 0.0  ;;  %v6038_v14 = vadd.f32 %v6018_v3, %v21472_v40 }
 0x978   :  { %v6049_v0 = vrot.slane %v6041_v23, 2  ;;  %v6051_v2 = vrot.slane %v6041_v23, 4  ;;  %v6053_v44 = vrot.slane %v6041_v23, 6  ;;  %v6043_v37 = vmax.f32 %v6037_v53, 0.0 }
 0x979   :  { %v6050_v18 = vrot.slane %v6042_v56, 2  ;;  %v6052_v38 = vrot.slane %v6042_v56, 4  ;;  %v6054_v35 = vrot.slane %v6042_v56, 6  ;;  %v6067_v51 = vcombine.low %v6041_v23, %v6042_v56 }
 0x97a   :  { %v6057_v8 = vrot.slane %v6043_v37, 2  ;;  %v6059_v26 = vrot.slane %v6043_v37, 4  ;;  %v6061_v46 = vrot.slane %v6043_v37, 6  ;;  %v6044_v6 = vmax.f32 %v6038_v14, 0.0 }
 0x97b   :  { %v6068_v29 = vcombine.low %v6049_v0, %v6050_v18  ;;  %v6069_v57 = vcombine.low %v6051_v2, %v6052_v38  ;;  %v6070_v17 = vcombine.low %v6053_v44, %v6054_v35  ;;  %v6077_v20 = vrot.slane %v6067_v51, %v21473_v25  ;;  %v6022_v15 = vpop.f32.mrb[144].mxu1 }
 0x97c   :  { %v6058_v32 = vrot.slane %v6044_v6, 2  ;;  %v6060_v54 = vrot.slane %v6044_v6, 4  ;;  %v6062_v52 = vrot.slane %v6044_v6, 6  ;;  %v6116_v58 = vcombine.low %v6043_v37, %v6044_v6  ;;  %v6024_v5 = vpop.f32.mrb[145].mxu1 }
 0x97d   :  { %v6084_v62 = vrot.slane %v6068_v29, %v21473_v25  ;;  %v6091_v7 = vrot.slane %v6069_v57, %v21473_v25  ;;  %v6098_v1 = vrot.slane %v6070_v17, %v21473_v25  ;;  %v6033_v47 = vadd.f32 %v6022_v15, %v19266_v11  ;;  %v6026_v22 = vpop.f32.mrb[146].mxu1 }
 0x97e   :  { %v6117_v9 = vcombine.low %v6057_v8, %v6058_v32  ;;  %v6118_v30 = vcombine.low %v6059_v26, %v6060_v54  ;;  %v6119_v27 = vcombine.low %v6061_v46, %v6062_v52  ;;  %v6027_v41 = vpop.f32.mrb[147].mxu1  ;;  %v6034_v43 = vadd.f32 %v6024_v5, %v19275_v28 }
 0x97f   :  { %v6099_v42 = vcombine.low %v6077_v20, %v6084_v62  ;;  %v6100_v49 = vcombine.low %v6091_v7, %v6098_v1  ;;  %v6039_v12 = vadd.f32 %v6033_v47, %v21471_v13  ;;  %v6126_v59 = vrot.slane %v6116_v58, %v21473_v25 }
 0x980   :  { %v6133_v10 = vrot.slane %v6117_v9, %v21473_v25  ;;  %v6140_v39 = vrot.slane %v6118_v30, %v21473_v25  ;;  %v6147_v50 = vrot.slane %v6119_v27, %v21473_v25  ;;  %v6040_v55 = vadd.f32 %v6034_v43, %v21472_v40 }
 0x981   :  { %v6107_v11 = vrot.slane %v6099_v42, %v21473_v25  ;;  %v6114_v4 = vrot.slane %v6100_v49, %v21473_v25  ;;  %v6045_v63 = vmax.f32 %v6039_v12, 0.0 }
 0x982   :  { %v6148_v33 = vcombine.low %v6126_v59, %v6133_v10  ;;  %v6149_v48 = vcombine.low %v6140_v39, %v6147_v50  ;;  %v6046_v28 = vmax.f32 %v6040_v55, 0.0 }
 0x983   :  { %v6115_v24 = vcombine.low %v6107_v11, %v6114_v4  ;;  %v6065_v21 = vrot.slane %v6045_v63, 2 }
 0x984   :  { %v6156_v34 = vrot.slane %v6148_v33, %v21473_v25  ;;  %v6163_v19 = vrot.slane %v6149_v48, %v21473_v25  ;;  %v6066_v61 = vrot.slane %v6046_v28, 2  ;;  %v6165_v31 = vcombine.low %v6045_v63, %v6046_v28 }
 0x985   :  { %6193 = vst [vmem:[#allocation2 + $0x6] ss:$8 sm:$0xf] %v6115_v24  ;;  %6194 = vst [vmem:[#allocation2 + $0x6] ss:$8 sm:$0xf0] %v6115_v24 }
 0x986   :  { %v6164_v36 = vcombine.low %v6156_v34, %v6163_v19  ;;  %v6166_v23 = vcombine.low %v6065_v21, %v6066_v61  ;;  %v6735_v53 = vpop.f32.mrb[168].mxu0  ;;  %v6173_v14 = vrot.slane %v6165_v31, %v21473_v25 }
 0x987   :  { %v6736_v3 = vadd.f32 %v6735_v53, %v19295_v60  ;;  %v6737_v56 = vpop.f32.mrb[169].mxu0 }
 0x988   :  { %6196 = vst [vmem:[#allocation2 + $0x46] ss:$8 sm:$0xf] %v6164_v36  ;;  %6197 = vst [vmem:[#allocation2 + $0x46] ss:$8 sm:$0xf0] %v6164_v36  ;;  %v6180_v0 = vrot.slane %v6166_v23, %v21473_v25  ;;  %v6738_v2 = vadd.f32 %v6737_v56, %v19297_v16 }
 0x989   :  { %v6739_v44 = vpop.f32.mrb[170].mxu0 }
 0x98a   :  { %v6740_v37 = vpop.f32.mrb[171].mxu0  ;;  %v6181_v18 = vcombine.low %v6173_v14, %v6180_v0 }
 0x98c   :  { %v6188_v38 = vrot.slane %v6181_v18, %v21473_v25 }
 0x98e   :  { %6199 = vst.msk [vmem:[#allocation2 + $0x86] ss:$8 sm:$0xf] %vm16422_vm8, %v6188_v38 }
 0x9ba   :  { %v6790_v35 = vpop.f32.mrb[160].mxu0 }
 0x9bb   :  { %v6813_v51 = vadd.f32 %v6790_v35, %v21471_v13  ;;  %v6792_v8 = vpop.f32.mrb[161].mxu0 }
 0x9bc   :  { %v6814_v60 = vadd.f32 %v6792_v8, %v21472_v40  ;;  %v6794_v26 = vpop.f32.mrb[162].mxu0 }
 0x9bd   :  { %v6819_v46 = vmax.f32 %v6813_v51, 0.0  ;;  %v6815_v6 = vadd.f32 %v6794_v26, %v21471_v13  ;;  %v6796_v29 = vpop.f32.mrb[163].mxu0 }
 0x9be   :  { %v6820_v16 = vmax.f32 %v6814_v60, 0.0  ;;  %v6816_v57 = vadd.f32 %v6796_v29, %v21472_v40 }
 0x9bf   :  { %v6827_v17 = vrot.slane %v6819_v46, 2  ;;  %v6829_v20 = vrot.slane %v6819_v46, 4  ;;  %v6831_v15 = vrot.slane %v6819_v46, 6  ;;  %v6821_v32 = vmax.f32 %v6815_v6, 0.0 }
 0x9c0   :  { %v6828_v54 = vrot.slane %v6820_v16, 2  ;;  %v6830_v52 = vrot.slane %v6820_v16, 4  ;;  %v6832_v58 = vrot.slane %v6820_v16, 6  ;;  %v6845_v5 = vcombine.low %v6819_v46, %v6820_v16 }
 0x9c1   :  { %v6835_v62 = vrot.slane %v6821_v32, 2  ;;  %v6837_v7 = vrot.slane %v6821_v32, 4  ;;  %v6839_v1 = vrot.slane %v6821_v32, 6  ;;  %v6822_v47 = vmax.f32 %v6816_v57, 0.0  ;;  %v13748_v57 = vld [vmem:[%s21368_s5 + $0x200] ss:$16 sps:$4 sm:$0xff]  }
 0x9c2   :  { %v6846_v22 = vcombine.low %v6827_v17, %v6828_v54  ;;  %v6847_v9 = vcombine.low %v6829_v20, %v6830_v52  ;;  %v6848_v30 = vcombine.low %v6831_v15, %v6832_v58  ;;  %v6855_v27 = vrot.slane %v6845_v5, %v21473_v25  ;;  %v6800_v41 = vpop.f32.mrb[172].mxu0  ;;  %v13751_v17 = vld [vmem:[%s21368_s5 + $0x208] ss:$16 sps:$4 sm:$0xff]   ;;  %v13754_v52 = vld [vmem:[%s21368_s5 + $0x220] ss:$16 sps:$4 sm:$0xff]  }
 0x9c3   :  { %v6836_v42 = vrot.slane %v6822_v47, 2  ;;  %v6838_v49 = vrot.slane %v6822_v47, 4  ;;  %v6840_v12 = vrot.slane %v6822_v47, 6  ;;  %v6894_v43 = vcombine.low %v6821_v32, %v6822_v47  ;;  %v6802_v59 = vpop.f32.mrb[173].mxu0  ;;  %v13759_v32 = vld [vmem:[%s21368_s5 + $0x22c] ss:$16 sps:$4 sm:$0xff]  }
 0x9c4   :  { %v6862_v10 = vrot.slane %v6846_v22, %v21473_v25  ;;  %v6869_v39 = vrot.slane %v6847_v9, %v21473_v25  ;;  %v6876_v50 = vrot.slane %v6848_v30, %v21473_v25  ;;  %v6811_v11 = vadd.f32 %v6800_v41, %v6736_v3  ;;  %v6804_v4 = vpop.f32.mrb[174].mxu0  ;;  %v13762_v58 = vld [vmem:[%s21368_s5 + $0x244] ss:$16 sps:$4 sm:$0xff]   ;;  %v13765_v5 = vld [vmem:[%s21368_s5 + $0x24c] ss:$16 sps:$4 sm:$0xff]  }
 0x9c5   :  { %v6895_v63 = vcombine.low %v6835_v62, %v6836_v42  ;;  %v6896_v55 = vcombine.low %v6837_v7, %v6838_v49  ;;  %v6897_v33 = vcombine.low %v6839_v1, %v6840_v12  ;;  %v6805_v48 = vpop.f32.mrb[175].mxu0  ;;  %v6812_v34 = vadd.f32 %v6802_v59, %v6738_v2  ;;  %v13760_v62 = vld [vmem:[%s21368_s5 + $0x240] ss:$16 sps:$4 sm:$0xff]   ;;  %v13763_v7 = vld [vmem:[%s21368_s5 + $0x248] ss:$16 sps:$4 sm:$0xff]  }
 0x9c6   :  { %v6877_v24 = vcombine.low %v6855_v27, %v6862_v10  ;;  %v6878_v21 = vcombine.low %v6869_v39, %v6876_v50  ;;  %v6817_v28 = vadd.f32 %v6811_v11, %v21471_v13  ;;  %v6904_v19 = vrot.slane %v6894_v43, %v21473_v25  ;;  %v13768_v1 = vld [vmem:[%s21368_s5 + $0x264] ss:$16 sps:$4 sm:$0xff]   ;;  %v13771_v47 = vld [vmem:[%s21368_s5 + $0x26c] ss:$16 sps:$4 sm:$0xff]   ;;  %v13766_v22 = vld [vmem:[%s21368_s5 + $0x260] ss:$16 sps:$4 sm:$0xff]  }
 0x9c7   :  { %v6911_v61 = vrot.slane %v6895_v63, %v21473_v25  ;;  %v6918_v31 = vrot.slane %v6896_v55, %v21473_v25  ;;  %v6925_v36 = vrot.slane %v6897_v33, %v21473_v25  ;;  %v6818_v56 = vadd.f32 %v6812_v34, %v21472_v40  ;;  %v13769_v9 = vld [vmem:[%s21368_s5 + $0x268] ss:$16 sps:$4 sm:$0xff]   ;;  %v13774_v30 = vld [vmem:[%s21368_s5 + $0x284] ss:$16 sps:$4 sm:$0xff]   ;;  %v13777_v27 = vld [vmem:[%s21368_s5 + $0x28c] ss:$16 sps:$4 sm:$0xff]  }
 0x9c8   :  { %v6885_v23 = vrot.slane %v6877_v24, %v21473_v25  ;;  %v6892_v53 = vrot.slane %v6878_v21, %v21473_v25  ;;  %v6823_v3 = vmax.f32 %v6817_v28, 0.0  ;;  %v13772_v41 = vld [vmem:[%s21368_s5 + $0x280] ss:$16 sps:$4 sm:$0xff]   ;;  %v13775_v42 = vld [vmem:[%s21368_s5 + $0x288] ss:$16 sps:$4 sm:$0xff]  }
 0x9c9   :  { %v6926_v14 = vcombine.low %v6904_v19, %v6911_v61  ;;  %v6927_v0 = vcombine.low %v6918_v31, %v6925_v36  ;;  %v6824_v2 = vmax.f32 %v6818_v56, 0.0  ;;  %v13780_v49 = vld [vmem:[%s21368_s5 + $0x2a4] ss:$16 sps:$4 sm:$0xff]   ;;  %v13783_v12 = vld [vmem:[%s21368_s5 + $0x2ac] ss:$16 sps:$4 sm:$0xff]  }
 0x9ca   :  { %v6893_v44 = vcombine.low %v6885_v23, %v6892_v53  ;;  %v6843_v13 = vrot.slane %v6823_v3, 2  ;;  %v13778_v43 = vld [vmem:[%s21368_s5 + $0x2a0] ss:$16 sps:$4 sm:$0xff]   ;;  %v13781_v59 = vld [vmem:[%s21368_s5 + $0x2a8] ss:$16 sps:$4 sm:$0xff]  }
 0x9cb   :  { %v6934_v37 = vrot.slane %v6926_v14, %v21473_v25  ;;  %v6941_v18 = vrot.slane %v6927_v0, %v21473_v25  ;;  %v6844_v38 = vrot.slane %v6824_v2, 2  ;;  %v6943_v35 = vcombine.low %v6823_v3, %v6824_v2  ;;  %v13786_v10 = vld [vmem:[%s21368_s5 + $0x2c4] ss:$16 sps:$4 sm:$0xff]   ;;  %v13789_v39 = vld [vmem:[%s21368_s5 + $0x2cc] ss:$16 sps:$4 sm:$0xff]  }
 0x9cc   :  { %6971 = vst [vmem:[#allocation2 + $0x7] ss:$8 sm:$0xf] %v6893_v44  ;;  %6972 = vst [vmem:[#allocation2 + $0x7] ss:$8 sm:$0xf0] %v6893_v44 }
 0x9cd   :  { %v6942_v51 = vcombine.low %v6934_v37, %v6941_v18  ;;  %v6944_v8 = vcombine.low %v6843_v13, %v6844_v38  ;;  %v6951_v60 = vrot.slane %v6943_v35, %v21473_v25  ;;  %v13784_v50 = vld [vmem:[%s21368_s5 + $0x2c0] ss:$16 sps:$4 sm:$0xff]   ;;  %v13787_v11 = vld [vmem:[%s21368_s5 + $0x2c8] ss:$16 sps:$4 sm:$0xff]   ;;  %v13792_v4 = vld [vmem:[%s21368_s5 + $0x2e4] ss:$16 sps:$4 sm:$0xff]  }
 0x9ce   :  { %v13795_v63 = vld [vmem:[%s21368_s5 + $0x2ec] ss:$16 sps:$4 sm:$0xff]   ;;  %v13790_v55 = vld [vmem:[%s21368_s5 + $0x2e0] ss:$16 sps:$4 sm:$0xff]   ;;  %v13793_v33 = vld [vmem:[%s21368_s5 + $0x2e8] ss:$16 sps:$4 sm:$0xff]  }
 0x9cf   :  { %6974 = vst [vmem:[#allocation2 + $0x47] ss:$8 sm:$0xf] %v6942_v51  ;;  %6975 = vst [vmem:[#allocation2 + $0x47] ss:$8 sm:$0xf0] %v6942_v51  ;;  %v6958_v40 = vrot.slane %v6944_v8, %v21473_v25 }
 0x9d0   :  { %v13798_v48 = vld [vmem:[%s21368_s5 + $0x304] ss:$16 sps:$4 sm:$0xff]   ;;  %v13801_v24 = vld [vmem:[%s21368_s5 + $0x30c] ss:$16 sps:$4 sm:$0xff]   ;;  %v13796_v21 = vld [vmem:[%s21368_s5 + $0x300] ss:$16 sps:$4 sm:$0xff]  }
 0x9d1   :  { %v6959_v26 = vcombine.low %v6951_v60, %v6958_v40  ;;  %v13799_v28 = vld [vmem:[%s21368_s5 + $0x308] ss:$16 sps:$4 sm:$0xff]   ;;  %v13804_v34 = vld [vmem:[%s21368_s5 + $0x324] ss:$16 sps:$4 sm:$0xff]   ;;  %v13807_v19 = vld [vmem:[%s21368_s5 + $0x32c] ss:$16 sps:$4 sm:$0xff]  }
 0x9d2   :  { %v13802_v61 = vld [vmem:[%s21368_s5 + $0x320] ss:$16 sps:$4 sm:$0xff]   ;;  %v13805_v31 = vld [vmem:[%s21368_s5 + $0x328] ss:$16 sps:$4 sm:$0xff]   ;;  %v13810_v36 = vld [vmem:[%s21368_s5 + $0x344] ss:$16 sps:$4 sm:$0xff]  }
 0x9d3   :  { %v6980_v46 = vld [vmem:[#allocation2 + $0x8] sm:$0xff]  ;;  %v6979_v6 = vld [vmem:[#allocation2] sm:$0xff]  ;;  %v6966_v29 = vrot.slane %v6959_v26, %v21473_v25  ;;  %v6982_v15 = vld [vmem:[#allocation2 + $0x18] sm:$0xff] }
 0x9d4   :  { %v7000_v16 = vpack.c.bf16 %v6980_v46, %v6980_v46  ;;  %v6999_v20 = vpack.c.bf16 %v6979_v6, %v6979_v6  ;;  %v13756_v25 = vld [vmem:[%s21368_s5 + $0x224] ss:$16 sps:$4 sm:$0xff]   ;;  %v7002_v54 = vpack.c.bf16 %v6982_v15, %v6982_v15  ;;  %v13813_v23 = vld [vmem:[%s21368_s5 + $0x34c] ss:$16 sps:$4 sm:$0xff]   ;;  %v13808_v53 = vld [vmem:[%s21368_s5 + $0x340] ss:$16 sps:$4 sm:$0xff]  }
 0x9d5   :  { %6977 = vst.msk [vmem:[#allocation2 + $0x87] ss:$8 sm:$0xf] %vm16422_vm8, %v6966_v29  ;;  %v13811_v3 = vld [vmem:[%s21368_s5 + $0x348] ss:$16 sps:$4 sm:$0xff]  }
 0x9d6   :  { %10913 = vmatprep.mubr.bf16.mxu1 %v7000_v16  ;;  %11323 = vmatprep.mubr.bf16.mxu0 %v7000_v16  ;;  %v13816_v56 = vld [vmem:[%s21368_s5 + $0x364] ss:$16 sps:$4 sm:$0xff]   ;;  %v13819_v14 = vld [vmem:[%s21368_s5 + $0x36c] ss:$16 sps:$4 sm:$0xff]   ;;  %v13814_v0 = vld [vmem:[%s21368_s5 + $0x360] ss:$16 sps:$4 sm:$0xff]  }
 0x9d7   :  { %10914 = vmatmul.mubr.bf16.vlgmr.msra.gmra.mrb[148].mxu1 %v6999_v20  ;;  %11324 = vmatmul.mubr.bf16.vlgmr.msra.gmra.mrb[176].mxu0 %v6999_v20  ;;  %v13817_v44 = vld [vmem:[%s21368_s5 + $0x368] ss:$16 sps:$4 sm:$0xff]   ;;  %v13822_v13 = vld [vmem:[%s21368_s5 + $0x384] ss:$16 sps:$4 sm:$0xff]   ;;  %v13825_v2 = vld [vmem:[%s21368_s5 + $0x38c] ss:$16 sps:$4 sm:$0xff]  }
 0x9d8   :  { %10923 = vmatpush1.bf16.msra.mxu1 %v13748_v57  ;;  %11333 = vmatpush1.bf16.msra.mxu0 %v13751_v17  ;;  %v13820_v37 = vld [vmem:[%s21368_s5 + $0x380] ss:$16 sps:$4 sm:$0xff]   ;;  %v13823_v18 = vld [vmem:[%s21368_s5 + $0x388] ss:$16 sps:$4 sm:$0xff]   ;;  %v13828_v38 = vld [vmem:[%s21368_s5 + $0x3a4] ss:$16 sps:$4 sm:$0xff]  }
 0x9d9   :  { %10954 = vmatprep.mubr.bf16.mxu1 %v7002_v54  ;;  %11364 = vmatprep.mubr.bf16.mxu0 %v7002_v54  ;;  %v13831_v35 = vld [vmem:[%s21368_s5 + $0x3ac] ss:$16 sps:$4 sm:$0xff]   ;;  %v13826_v51 = vld [vmem:[%s21368_s5 + $0x3a0] ss:$16 sps:$4 sm:$0xff]   ;;  %v13829_v8 = vld [vmem:[%s21368_s5 + $0x3a8] ss:$16 sps:$4 sm:$0xff]  }
 0x9da   :  { %10924 = vmatprep.subr.bf16.mxu1 %v13756_v25  ;;  %11334 = vmatprep.subr.bf16.mxu0 %v13759_v32  ;;  %v13834_v60 = vld [vmem:[%s21368_s5 + $0x3c4] ss:$16 sps:$4 sm:$0xff]   ;;  %v13837_v40 = vld [vmem:[%s21368_s5 + $0x3cc] ss:$16 sps:$4 sm:$0xff]   ;;  %v13832_v26 = vld [vmem:[%s21368_s5 + $0x3c0] ss:$16 sps:$4 sm:$0xff]  }
 0x9db   :  { %v13835_v46 = vld [vmem:[%s21368_s5 + $0x3c8] ss:$16 sps:$4 sm:$0xff]   ;;  %v13840_v6 = vld [vmem:[%s21368_s5 + $0x3e4] ss:$16 sps:$4 sm:$0xff]   ;;  %v13843_v29 = vld [vmem:[%s21368_s5 + $0x3ec] ss:$16 sps:$4 sm:$0xff]  }
 0x9dc   :  { %10925 = vmatpush1.bf16.msra.mxu1 %v13754_v52  ;;  %11335 = vmatpush1.bf16.msra.mxu0 %v13757_v45  ;;  %v13838_v16 = vld [vmem:[%s21368_s5 + $0x3e0] ss:$16 sps:$4 sm:$0xff]   ;;  %v13841_v57 = vld [vmem:[%s21368_s5 + $0x3e8] ss:$16 sps:$4 sm:$0xff]   ;;  %v13846_v20 = vld [vmem:[%s21368_s5 + $0x404] ss:$16 sps:$4 sm:$0xff]  }
 0x9dd   :  { %10926 = vmatprep.subr.bf16.mxu1 %v13762_v58  ;;  %11336 = vmatprep.subr.bf16.mxu0 %v13765_v5  ;;  %v6981_v17 = vld [vmem:[#allocation2 + $0x10] sm:$0xff]  ;;  %v13849_v15 = vld [vmem:[%s21368_s5 + $0x40c] ss:$16 sps:$4 sm:$0xff]   ;;  %v13847_v54 = vld [vmem:[%s21368_s5 + $0x408] ss:$16 sps:$4 sm:$0xff]  }
 0x9de   :  { %v13844_v25 = vld [vmem:[%s21368_s5 + $0x400] ss:$16 sps:$4 sm:$0xff]   ;;  %v6984_v32 = vld [vmem:[#allocation2 + $0x28] sm:$0xff]  ;;  %v13852_v52 = vld [vmem:[%s21368_s5 + $0x424] ss:$16 sps:$4 sm:$0xff]   ;;  %v7001_v58 = vpack.c.bf16 %v6981_v17, %v6981_v17 }
 0x9df   :  { %v13855_v45 = vld [vmem:[%s21368_s5 + $0x42c] ss:$16 sps:$4 sm:$0xff]   ;;  %v7004_v5 = vpack.c.bf16 %v6984_v32, %v6984_v32  ;;  %v13936_v17 = vld [vmem:[%s21368_s5 + $0x5e4] ss:$16 sps:$4 sm:$0xff]  }
 0x9e0   :  { %10927 = vmatpush1.bf16.msra.mxu1 %v13760_v62  ;;  %11337 = vmatpush1.bf16.msra.mxu0 %v13763_v7  ;;  %v13850_v62 = vld [vmem:[%s21368_s5 + $0x420] ss:$16 sps:$4 sm:$0xff]   ;;  %v13853_v7 = vld [vmem:[%s21368_s5 + $0x428] ss:$16 sps:$4 sm:$0xff]  }
 0x9e1   :  { %10928 = vmatprep.subr.bf16.mxu1 %v13768_v1  ;;  %11338 = vmatprep.subr.bf16.mxu0 %v13771_v47  ;;  %v13858_v1 = vld [vmem:[%s21368_s5 + $0x444] ss:$16 sps:$4 sm:$0xff]   ;;  %v13861_v47 = vld [vmem:[%s21368_s5 + $0x44c] ss:$16 sps:$4 sm:$0xff]  }
 0x9e2   :  { %v6983_v32 = vld [vmem:[#allocation2 + $0x20] sm:$0xff] }
 0x9e4   :  { %10929 = vmatpush1.bf16.msra.mxu1 %v13766_v22  ;;  %11339 = vmatpush1.bf16.msra.mxu0 %v13769_v9  ;;  %v13856_v22 = vld [vmem:[%s21368_s5 + $0x440] ss:$16 sps:$4 sm:$0xff]   ;;  %v13859_v9 = vld [vmem:[%s21368_s5 + $0x448] ss:$16 sps:$4 sm:$0xff]  }
 0x9e5   :  { %10930 = vmatprep.subr.bf16.mxu1 %v13774_v30  ;;  %11340 = vmatprep.subr.bf16.mxu0 %v13777_v27  ;;  %v13864_v30 = vld [vmem:[%s21368_s5 + $0x464] ss:$16 sps:$4 sm:$0xff]   ;;  %v13862_v27 = vld [vmem:[%s21368_s5 + $0x460] ss:$16 sps:$4 sm:$0xff]  }
 0x9e8   :  { %10931 = vmatpush1.bf16.msra.mxu1 %v13772_v41  ;;  %11341 = vmatpush1.bf16.msra.mxu0 %v13775_v42  ;;  %v13867_v41 = vld [vmem:[%s21368_s5 + $0x46c] ss:$16 sps:$4 sm:$0xff]   ;;  %v13865_v42 = vld [vmem:[%s21368_s5 + $0x468] ss:$16 sps:$4 sm:$0xff]  }
 0x9e9   :  { %10932 = vmatprep.subr.bf16.mxu1 %v13780_v49  ;;  %11342 = vmatprep.subr.bf16.mxu0 %v13783_v12  ;;  %v13870_v49 = vld [vmem:[%s21368_s5 + $0x484] ss:$16 sps:$4 sm:$0xff]   ;;  %v13868_v12 = vld [vmem:[%s21368_s5 + $0x480] ss:$16 sps:$4 sm:$0xff]  }
 0x9ec   :  { %10933 = vmatpush1.bf16.msra.mxu1 %v13778_v43  ;;  %11343 = vmatpush1.bf16.msra.mxu0 %v13781_v59  ;;  %v13873_v43 = vld [vmem:[%s21368_s5 + $0x48c] ss:$16 sps:$4 sm:$0xff]   ;;  %v13871_v59 = vld [vmem:[%s21368_s5 + $0x488] ss:$16 sps:$4 sm:$0xff]  }
 0x9ed   :  { %10934 = vmatprep.subr.bf16.mxu1 %v13786_v10  ;;  %11344 = vmatprep.subr.bf16.mxu0 %v13789_v39  ;;  %v13876_v10 = vld [vmem:[%s21368_s5 + $0x4a4] ss:$16 sps:$4 sm:$0xff]   ;;  %v13874_v39 = vld [vmem:[%s21368_s5 + $0x4a0] ss:$16 sps:$4 sm:$0xff]  }
 0x9f0   :  { %10935 = vmatpush1.bf16.msra.mxu1 %v13784_v50  ;;  %11345 = vmatpush1.bf16.msra.mxu0 %v13787_v11  ;;  %v13879_v50 = vld [vmem:[%s21368_s5 + $0x4ac] ss:$16 sps:$4 sm:$0xff]   ;;  %v13877_v11 = vld [vmem:[%s21368_s5 + $0x4a8] ss:$16 sps:$4 sm:$0xff]  }
 0x9f1   :  { %10936 = vmatprep.subr.bf16.mxu1 %v13792_v4  ;;  %11346 = vmatprep.subr.bf16.mxu0 %v13795_v63  ;;  %v13882_v4 = vld [vmem:[%s21368_s5 + $0x4c4] ss:$16 sps:$4 sm:$0xff]   ;;  %v13880_v63 = vld [vmem:[%s21368_s5 + $0x4c0] ss:$16 sps:$4 sm:$0xff]  }
 0x9f4   :  { %10937 = vmatpush1.bf16.msra.mxu1 %v13790_v55  ;;  %11347 = vmatpush1.bf16.msra.mxu0 %v13793_v33  ;;  %v13885_v55 = vld [vmem:[%s21368_s5 + $0x4cc] ss:$16 sps:$4 sm:$0xff]   ;;  %v13883_v33 = vld [vmem:[%s21368_s5 + $0x4c8] ss:$16 sps:$4 sm:$0xff]  }
 0x9f5   :  { %10938 = vmatprep.subr.bf16.mxu1 %v13798_v48  ;;  %11348 = vmatprep.subr.bf16.mxu0 %v13801_v24  ;;  %v13888_v48 = vld [vmem:[%s21368_s5 + $0x4e4] ss:$16 sps:$4 sm:$0xff]   ;;  %v13886_v24 = vld [vmem:[%s21368_s5 + $0x4e0] ss:$16 sps:$4 sm:$0xff]  }
 0x9f8   :  { %10939 = vmatpush1.bf16.msra.mxu1 %v13796_v21  ;;  %11349 = vmatpush1.bf16.msra.mxu0 %v13799_v28  ;;  %v13891_v21 = vld [vmem:[%s21368_s5 + $0x4ec] ss:$16 sps:$4 sm:$0xff]   ;;  %v13889_v28 = vld [vmem:[%s21368_s5 + $0x4e8] ss:$16 sps:$4 sm:$0xff]  }
 0x9f9   :  { %10940 = vmatprep.subr.bf16.mxu1 %v13804_v34  ;;  %11350 = vmatprep.subr.bf16.mxu0 %v13807_v19  ;;  %v13894_v34 = vld [vmem:[%s21368_s5 + $0x504] ss:$16 sps:$4 sm:$0xff]   ;;  %v13892_v19 = vld [vmem:[%s21368_s5 + $0x500] ss:$16 sps:$4 sm:$0xff]  }
 0x9fc   :  { %10941 = vmatpush1.bf16.msra.mxu1 %v13802_v61  ;;  %11351 = vmatpush1.bf16.msra.mxu0 %v13805_v31  ;;  %v13897_v61 = vld [vmem:[%s21368_s5 + $0x50c] ss:$16 sps:$4 sm:$0xff]   ;;  %v13895_v31 = vld [vmem:[%s21368_s5 + $0x508] ss:$16 sps:$4 sm:$0xff]  }
 0x9fd   :  { %10942 = vmatprep.subr.bf16.mxu1 %v13810_v36  ;;  %11352 = vmatprep.subr.bf16.mxu0 %v13813_v23  ;;  %v13900_v36 = vld [vmem:[%s21368_s5 + $0x524] ss:$16 sps:$4 sm:$0xff]   ;;  %v13898_v23 = vld [vmem:[%s21368_s5 + $0x520] ss:$16 sps:$4 sm:$0xff]  }
 0xa00   :  { %10943 = vmatpush1.bf16.msra.mxu1 %v13808_v53  ;;  %11353 = vmatpush1.bf16.msra.mxu0 %v13811_v3  ;;  %v13903_v53 = vld [vmem:[%s21368_s5 + $0x52c] ss:$16 sps:$4 sm:$0xff]   ;;  %v13901_v3 = vld [vmem:[%s21368_s5 + $0x528] ss:$16 sps:$4 sm:$0xff]  }
 0xa01   :  { %10944 = vmatprep.subr.bf16.mxu1 %v13816_v56  ;;  %11354 = vmatprep.subr.bf16.mxu0 %v13819_v14  ;;  %v13906_v56 = vld [vmem:[%s21368_s5 + $0x544] ss:$16 sps:$4 sm:$0xff]   ;;  %v13909_v14 = vld [vmem:[%s21368_s5 + $0x54c] ss:$16 sps:$4 sm:$0xff]  }
 0xa04   :  { %10945 = vmatpush1.bf16.msra.mxu1 %v13814_v0  ;;  %11355 = vmatpush1.bf16.msra.mxu0 %v13817_v44  ;;  %v13904_v0 = vld [vmem:[%s21368_s5 + $0x540] ss:$16 sps:$4 sm:$0xff]   ;;  %v13907_v44 = vld [vmem:[%s21368_s5 + $0x548] ss:$16 sps:$4 sm:$0xff]  }
 0xa05   :  { %10946 = vmatprep.subr.bf16.mxu1 %v13822_v13  ;;  %11356 = vmatprep.subr.bf16.mxu0 %v13825_v2  ;;  %v13912_v13 = vld [vmem:[%s21368_s5 + $0x564] ss:$16 sps:$4 sm:$0xff]   ;;  %v13910_v2 = vld [vmem:[%s21368_s5 + $0x560] ss:$16 sps:$4 sm:$0xff]  }
 0xa08   :  { %10947 = vmatpush1.bf16.msra.mxu1 %v13820_v37  ;;  %11357 = vmatpush1.bf16.msra.mxu0 %v13823_v18  ;;  %v13915_v37 = vld [vmem:[%s21368_s5 + $0x56c] ss:$16 sps:$4 sm:$0xff]   ;;  %v13913_v18 = vld [vmem:[%s21368_s5 + $0x568] ss:$16 sps:$4 sm:$0xff]  }
 0xa09   :  { %10948 = vmatprep.subr.bf16.mxu1 %v13828_v38  ;;  %11358 = vmatprep.subr.bf16.mxu0 %v13831_v35  ;;  %v13918_v38 = vld [vmem:[%s21368_s5 + $0x584] ss:$16 sps:$4 sm:$0xff]   ;;  %v13916_v35 = vld [vmem:[%s21368_s5 + $0x580] ss:$16 sps:$4 sm:$0xff]  }
 0xa0c   :  { %10949 = vmatpush1.bf16.msra.mxu1 %v13826_v51  ;;  %11359 = vmatpush1.bf16.msra.mxu0 %v13829_v8  ;;  %v13921_v51 = vld [vmem:[%s21368_s5 + $0x58c] ss:$16 sps:$4 sm:$0xff]   ;;  %v13919_v8 = vld [vmem:[%s21368_s5 + $0x588] ss:$16 sps:$4 sm:$0xff]  }
 0xa0d   :  { %10950 = vmatprep.subr.bf16.mxu1 %v13834_v60  ;;  %11360 = vmatprep.subr.bf16.mxu0 %v13837_v40  ;;  %v13924_v60 = vld [vmem:[%s21368_s5 + $0x5a4] ss:$16 sps:$4 sm:$0xff]   ;;  %v13922_v40 = vld [vmem:[%s21368_s5 + $0x5a0] ss:$16 sps:$4 sm:$0xff]  }
 0xa10   :  { %10951 = vmatpush1.bf16.msra.mxu1 %v13832_v26  ;;  %11361 = vmatpush1.bf16.msra.mxu0 %v13835_v46  ;;  %v13927_v26 = vld [vmem:[%s21368_s5 + $0x5ac] ss:$16 sps:$4 sm:$0xff]   ;;  %v13925_v46 = vld [vmem:[%s21368_s5 + $0x5a8] ss:$16 sps:$4 sm:$0xff]  }
 0xa11   :  { %10952 = vmatprep.subr.bf16.mxu1 %v13840_v6  ;;  %11362 = vmatprep.subr.bf16.mxu0 %v13843_v29  ;;  %v13930_v6 = vld [vmem:[%s21368_s5 + $0x5c4] ss:$16 sps:$4 sm:$0xff]   ;;  %v13928_v29 = vld [vmem:[%s21368_s5 + $0x5c0] ss:$16 sps:$4 sm:$0xff]  }
 0xa14   :  { %10953 = vmatpush1.bf16.msra.mxu1 %v13838_v16  ;;  %11363 = vmatpush1.bf16.msra.mxu0 %v13841_v57  ;;  %v13933_v16 = vld [vmem:[%s21368_s5 + $0x5cc] ss:$16 sps:$4 sm:$0xff]   ;;  %v13931_v57 = vld [vmem:[%s21368_s5 + $0x5c8] ss:$16 sps:$4 sm:$0xff]  }
 0xa15   :  { %10963 = vmatprep.subr.bf16.mxu1 %v13846_v20  ;;  %11373 = vmatprep.subr.bf16.mxu0 %v13849_v15  ;;  %v13934_v20 = vld [vmem:[%s21368_s5 + $0x5e0] ss:$16 sps:$4 sm:$0xff]   ;;  %v13939_v15 = vld [vmem:[%s21368_s5 + $0x5ec] ss:$16 sps:$4 sm:$0xff]  }
 0xa17   :  { %10955 = vmatmul.mubr.bf16.vlgmr.msra.gmra.mrb[148].mxu1 %v7001_v58  ;;  %11365 = vmatmul.mubr.bf16.vlgmr.msra.gmra.mrb[176].mxu0 %v7001_v58  ;;  %v6986_v58 = vld [vmem:[#allocation2 + $0x38] sm:$0xff] }
 0xa18   :  { %10964 = vmatpush1.bf16.msra.mxu1 %v13844_v25  ;;  %10995 = vmatprep.mubr.bf16.mxu1 %v7004_v5  ;;  %v13937_v25 = vld [vmem:[%s21368_s5 + $0x5e8] ss:$16 sps:$4 sm:$0xff]  }
 0xa19   :  { %11374 = vmatpush1.bf16.msra.mxu0 %v13847_v54  ;;  %11405 = vmatprep.mubr.bf16.mxu0 %v7004_v5  ;;  %v13942_v54 = vld [vmem:[%s21368_s5 + $0x604] ss:$16 sps:$4 sm:$0xff]   ;;  %v13943_v5 = vld [vmem:[%s21368_s5 + $0x608] ss:$16 sps:$4 sm:$0xff]  }
 0xa1a   :  { %10965 = vmatprep.subr.bf16.mxu1 %v13852_v52  ;;  %11375 = vmatprep.subr.bf16.mxu0 %v13855_v45  ;;  %v13940_v52 = vld [vmem:[%s21368_s5 + $0x600] ss:$16 sps:$4 sm:$0xff]   ;;  %v13945_v45 = vld [vmem:[%s21368_s5 + $0x60c] ss:$16 sps:$4 sm:$0xff]  }
 0xa1c   :  { %10966 = vmatpush1.bf16.msra.mxu1 %v13850_v62  ;;  %v13948_v62 = vld [vmem:[%s21368_s5 + $0x624] ss:$16 sps:$4 sm:$0xff]  }
 0xa1d   :  { %11376 = vmatpush1.bf16.msra.mxu0 %v13853_v7  ;;  %10967 = vmatprep.subr.bf16.mxu1 %v13858_v1  ;;  %v7003_v7 = vpack.c.bf16 %v6983_v32, %v6983_v32  ;;  %v7006_v1 = vpack.c.bf16 %v6986_v58, %v6986_v58  ;;  %v14032_v32 = vld [vmem:[%s21368_s5 + $0x7e4] ss:$16 sps:$4 sm:$0xff]  }
 0xa1e   :  { %11377 = vmatprep.subr.bf16.mxu0 %v13861_v47  ;;  %v13946_v47 = vld [vmem:[%s21368_s5 + $0x620] ss:$16 sps:$4 sm:$0xff]   ;;  %v14038_v58 = vld [vmem:[%s21368_s5 + $0x804] ss:$16 sps:$4 sm:$0xff]  }
 0xa20   :  { %10968 = vmatpush1.bf16.msra.mxu1 %v13856_v22  ;;  %v13951_v22 = vld [vmem:[%s21368_s5 + $0x62c] ss:$16 sps:$4 sm:$0xff]  }
 0xa21   :  { %11378 = vmatpush1.bf16.msra.mxu0 %v13859_v9  ;;  %10969 = vmatprep.subr.bf16.mxu1 %v13864_v30  ;;  %v13949_v9 = vld [vmem:[%s21368_s5 + $0x628] ss:$16 sps:$4 sm:$0xff]   ;;  %v13954_v30 = vld [vmem:[%s21368_s5 + $0x644] ss:$16 sps:$4 sm:$0xff]  }
 0xa22   :  { %11379 = vmatprep.subr.bf16.mxu0 %v13867_v41  ;;  %v13952_v41 = vld [vmem:[%s21368_s5 + $0x640] ss:$16 sps:$4 sm:$0xff]  }
 0xa24   :  { %10970 = vmatpush1.bf16.msra.mxu1 %v13862_v27  ;;  %v13957_v27 = vld [vmem:[%s21368_s5 + $0x64c] ss:$16 sps:$4 sm:$0xff]  }
 0xa25   :  { %11380 = vmatpush1.bf16.msra.mxu0 %v13865_v42  ;;  %10971 = vmatprep.subr.bf16.mxu1 %v13870_v49  ;;  %v13955_v42 = vld [vmem:[%s21368_s5 + $0x648] ss:$16 sps:$4 sm:$0xff]   ;;  %v13960_v49 = vld [vmem:[%s21368_s5 + $0x664] ss:$16 sps:$4 sm:$0xff]  }
 0xa26   :  { %11381 = vmatprep.subr.bf16.mxu0 %v13873_v43  ;;  %v13958_v43 = vld [vmem:[%s21368_s5 + $0x660] ss:$16 sps:$4 sm:$0xff]  }
 0xa28   :  { %10972 = vmatpush1.bf16.msra.mxu1 %v13868_v12  ;;  %v13963_v12 = vld [vmem:[%s21368_s5 + $0x66c] ss:$16 sps:$4 sm:$0xff]  }
 0xa29   :  { %11382 = vmatpush1.bf16.msra.mxu0 %v13871_v59  ;;  %10973 = vmatprep.subr.bf16.mxu1 %v13876_v10  ;;  %v13961_v59 = vld [vmem:[%s21368_s5 + $0x668] ss:$16 sps:$4 sm:$0xff]   ;;  %v13966_v10 = vld [vmem:[%s21368_s5 + $0x684] ss:$16 sps:$4 sm:$0xff]  }
 0xa2a   :  { %11383 = vmatprep.subr.bf16.mxu0 %v13879_v50  ;;  %v13964_v50 = vld [vmem:[%s21368_s5 + $0x680] ss:$16 sps:$4 sm:$0xff]  }
 0xa2c   :  { %10974 = vmatpush1.bf16.msra.mxu1 %v13874_v39  ;;  %v13969_v39 = vld [vmem:[%s21368_s5 + $0x68c] ss:$16 sps:$4 sm:$0xff]  }
 0xa2d   :  { %11384 = vmatpush1.bf16.msra.mxu0 %v13877_v11  ;;  %10975 = vmatprep.subr.bf16.mxu1 %v13882_v4  ;;  %v13967_v11 = vld [vmem:[%s21368_s5 + $0x688] ss:$16 sps:$4 sm:$0xff]   ;;  %v13972_v4 = vld [vmem:[%s21368_s5 + $0x6a4] ss:$16 sps:$4 sm:$0xff]  }
 0xa2e   :  { %11385 = vmatprep.subr.bf16.mxu0 %v13885_v55  ;;  %v13970_v55 = vld [vmem:[%s21368_s5 + $0x6a0] ss:$16 sps:$4 sm:$0xff]  }
 0xa30   :  { %10976 = vmatpush1.bf16.msra.mxu1 %v13880_v63  ;;  %v13975_v63 = vld [vmem:[%s21368_s5 + $0x6ac] ss:$16 sps:$4 sm:$0xff]  }
 0xa31   :  { %11386 = vmatpush1.bf16.msra.mxu0 %v13883_v33  ;;  %10977 = vmatprep.subr.bf16.mxu1 %v13888_v48  ;;  %v13973_v33 = vld [vmem:[%s21368_s5 + $0x6a8] ss:$16 sps:$4 sm:$0xff]   ;;  %v13978_v48 = vld [vmem:[%s21368_s5 + $0x6c4] ss:$16 sps:$4 sm:$0xff]  }
 0xa32   :  { %11387 = vmatprep.subr.bf16.mxu0 %v13891_v21  ;;  %v13976_v21 = vld [vmem:[%s21368_s5 + $0x6c0] ss:$16 sps:$4 sm:$0xff]  }
 0xa34   :  { %10978 = vmatpush1.bf16.msra.mxu1 %v13886_v24  ;;  %v13981_v24 = vld [vmem:[%s21368_s5 + $0x6cc] ss:$16 sps:$4 sm:$0xff]  }
 0xa35   :  { %11388 = vmatpush1.bf16.msra.mxu0 %v13889_v28  ;;  %10979 = vmatprep.subr.bf16.mxu1 %v13894_v34  ;;  %v13979_v28 = vld [vmem:[%s21368_s5 + $0x6c8] ss:$16 sps:$4 sm:$0xff]   ;;  %v13984_v34 = vld [vmem:[%s21368_s5 + $0x6e4] ss:$16 sps:$4 sm:$0xff]  }
 0xa36   :  { %11389 = vmatprep.subr.bf16.mxu0 %v13897_v61  ;;  %v13982_v61 = vld [vmem:[%s21368_s5 + $0x6e0] ss:$16 sps:$4 sm:$0xff]  }
 0xa38   :  { %10980 = vmatpush1.bf16.msra.mxu1 %v13892_v19  ;;  %v13987_v19 = vld [vmem:[%s21368_s5 + $0x6ec] ss:$16 sps:$4 sm:$0xff]  }
 0xa39   :  { %11390 = vmatpush1.bf16.msra.mxu0 %v13895_v31  ;;  %10981 = vmatprep.subr.bf16.mxu1 %v13900_v36  ;;  %v13985_v31 = vld [vmem:[%s21368_s5 + $0x6e8] ss:$16 sps:$4 sm:$0xff]   ;;  %v13990_v36 = vld [vmem:[%s21368_s5 + $0x704] ss:$16 sps:$4 sm:$0xff]  }
 0xa3a   :  { %11391 = vmatprep.subr.bf16.mxu0 %v13903_v53  ;;  %v13988_v53 = vld [vmem:[%s21368_s5 + $0x700] ss:$16 sps:$4 sm:$0xff]  }
 0xa3c   :  { %10982 = vmatpush1.bf16.msra.mxu1 %v13898_v23  ;;  %v13993_v23 = vld [vmem:[%s21368_s5 + $0x70c] ss:$16 sps:$4 sm:$0xff]  }
 0xa3d   :  { %11392 = vmatpush1.bf16.msra.mxu0 %v13901_v3  ;;  %10983 = vmatprep.subr.bf16.mxu1 %v13906_v56  ;;  %v13991_v3 = vld [vmem:[%s21368_s5 + $0x708] ss:$16 sps:$4 sm:$0xff]   ;;  %v13996_v56 = vld [vmem:[%s21368_s5 + $0x724] ss:$16 sps:$4 sm:$0xff]  }
 0xa3e   :  { %11393 = vmatprep.subr.bf16.mxu0 %v13909_v14  ;;  %v13999_v14 = vld [vmem:[%s21368_s5 + $0x72c] ss:$16 sps:$4 sm:$0xff]  }
 0xa40   :  { %10984 = vmatpush1.bf16.msra.mxu1 %v13904_v0  ;;  %v13994_v0 = vld [vmem:[%s21368_s5 + $0x720] ss:$16 sps:$4 sm:$0xff]  }
 0xa41   :  { %11394 = vmatpush1.bf16.msra.mxu0 %v13907_v44  ;;  %10985 = vmatprep.subr.bf16.mxu1 %v13912_v13  ;;  %v13997_v44 = vld [vmem:[%s21368_s5 + $0x728] ss:$16 sps:$4 sm:$0xff]   ;;  %v14002_v13 = vld [vmem:[%s21368_s5 + $0x744] ss:$16 sps:$4 sm:$0xff]  }
 0xa42   :  { %11395 = vmatprep.subr.bf16.mxu0 %v13915_v37  ;;  %v14000_v37 = vld [vmem:[%s21368_s5 + $0x740] ss:$16 sps:$4 sm:$0xff]  }
 0xa44   :  { %10986 = vmatpush1.bf16.msra.mxu1 %v13910_v2  ;;  %v14005_v2 = vld [vmem:[%s21368_s5 + $0x74c] ss:$16 sps:$4 sm:$0xff]  }
 0xa45   :  { %11396 = vmatpush1.bf16.msra.mxu0 %v13913_v18  ;;  %10987 = vmatprep.subr.bf16.mxu1 %v13918_v38  ;;  %v14003_v18 = vld [vmem:[%s21368_s5 + $0x748] ss:$16 sps:$4 sm:$0xff]   ;;  %v14008_v38 = vld [vmem:[%s21368_s5 + $0x764] ss:$16 sps:$4 sm:$0xff]  }
 0xa46   :  { %11397 = vmatprep.subr.bf16.mxu0 %v13921_v51  ;;  %v14006_v51 = vld [vmem:[%s21368_s5 + $0x760] ss:$16 sps:$4 sm:$0xff]  }
 0xa48   :  { %10988 = vmatpush1.bf16.msra.mxu1 %v13916_v35  ;;  %v14011_v35 = vld [vmem:[%s21368_s5 + $0x76c] ss:$16 sps:$4 sm:$0xff]  }
 0xa49   :  { %11398 = vmatpush1.bf16.msra.mxu0 %v13919_v8  ;;  %10989 = vmatprep.subr.bf16.mxu1 %v13924_v60  ;;  %v14009_v8 = vld [vmem:[%s21368_s5 + $0x768] ss:$16 sps:$4 sm:$0xff]   ;;  %v14014_v60 = vld [vmem:[%s21368_s5 + $0x784] ss:$16 sps:$4 sm:$0xff]  }
 0xa4a   :  { %11399 = vmatprep.subr.bf16.mxu0 %v13927_v26  ;;  %v14012_v26 = vld [vmem:[%s21368_s5 + $0x780] ss:$16 sps:$4 sm:$0xff]  }
 0xa4c   :  { %10990 = vmatpush1.bf16.msra.mxu1 %v13922_v40  ;;  %v14017_v40 = vld [vmem:[%s21368_s5 + $0x78c] ss:$16 sps:$4 sm:$0xff]  }
 0xa4d   :  { %11400 = vmatpush1.bf16.msra.mxu0 %v13925_v46  ;;  %10991 = vmatprep.subr.bf16.mxu1 %v13930_v6  ;;  %v14015_v46 = vld [vmem:[%s21368_s5 + $0x788] ss:$16 sps:$4 sm:$0xff]   ;;  %v14020_v6 = vld [vmem:[%s21368_s5 + $0x7a4] ss:$16 sps:$4 sm:$0xff]  }
 0xa4e   :  { %11401 = vmatprep.subr.bf16.mxu0 %v13933_v16  ;;  %v14018_v16 = vld [vmem:[%s21368_s5 + $0x7a0] ss:$16 sps:$4 sm:$0xff]  }
 0xa50   :  { %10992 = vmatpush1.bf16.msra.mxu1 %v13928_v29  ;;  %v14023_v29 = vld [vmem:[%s21368_s5 + $0x7ac] ss:$16 sps:$4 sm:$0xff]  }
 0xa51   :  { %11402 = vmatpush1.bf16.msra.mxu0 %v13931_v57  ;;  %10993 = vmatprep.subr.bf16.mxu1 %v13936_v17  ;;  %v14021_v57 = vld [vmem:[%s21368_s5 + $0x7a8] ss:$16 sps:$4 sm:$0xff]   ;;  %v14026_v17 = vld [vmem:[%s21368_s5 + $0x7c4] ss:$16 sps:$4 sm:$0xff]  }
 0xa52   :  { %11403 = vmatprep.subr.bf16.mxu0 %v13939_v15  ;;  %v14024_v15 = vld [vmem:[%s21368_s5 + $0x7c0] ss:$16 sps:$4 sm:$0xff]  }
 0xa54   :  { %10994 = vmatpush1.bf16.msra.mxu1 %v13934_v20  ;;  %v14029_v20 = vld [vmem:[%s21368_s5 + $0x7cc] ss:$16 sps:$4 sm:$0xff]  }
 0xa55   :  { %11404 = vmatpush1.bf16.msra.mxu0 %v13937_v25  ;;  %11004 = vmatprep.subr.bf16.mxu1 %v13942_v54  ;;  %v14027_v25 = vld [vmem:[%s21368_s5 + $0x7c8] ss:$16 sps:$4 sm:$0xff]   ;;  %v14035_v54 = vld [vmem:[%s21368_s5 + $0x7ec] ss:$16 sps:$4 sm:$0xff]  }
 0xa56   :  { %11414 = vmatprep.subr.bf16.mxu0 %v13945_v45  ;;  %v14033_v45 = vld [vmem:[%s21368_s5 + $0x7e8] ss:$16 sps:$4 sm:$0xff]  }
 0xa57   :  { %10996 = vmatmul.mubr.bf16.vlgmr.msra.gmra.mrb[148].mxu1 %v7003_v7 }
 0xa58   :  { %11406 = vmatmul.mubr.bf16.vlgmr.msra.gmra.mrb[176].mxu0 %v7003_v7  ;;  %11005 = vmatpush1.bf16.msra.mxu1 %v13940_v52  ;;  %v14030_v52 = vld [vmem:[%s21368_s5 + $0x7e0] ss:$16 sps:$4 sm:$0xff]  }
 0xa59   :  { %11036 = vmatprep.mubr.bf16.mxu1 %v7006_v1  ;;  %11415 = vmatpush1.bf16.msra.mxu0 %v13943_v5  ;;  %v6985_v5 = vld [vmem:[#allocation2 + $0x30] sm:$0xff] }
 0xa5a   :  { %11446 = vmatprep.mubr.bf16.mxu0 %v7006_v1  ;;  %11006 = vmatprep.subr.bf16.mxu1 %v13948_v62  ;;  %v14041_v62 = vld [vmem:[%s21368_s5 + $0x80c] ss:$16 sps:$4 sm:$0xff]   ;;  %v14036_v7 = vld [vmem:[%s21368_s5 + $0x800] ss:$16 sps:$4 sm:$0xff]  }
 0xa5b   :  { %11416 = vmatprep.subr.bf16.mxu0 %v13951_v22  ;;  %v6988_v1 = vld [vmem:[#allocation2 + $0x48] sm:$0xff] }
 0xa5c   :  { %11007 = vmatpush1.bf16.msra.mxu1 %v13946_v47  ;;  %v7005_v47 = vpack.c.bf16 %v6985_v5, %v6985_v5  ;;  %v14039_v22 = vld [vmem:[%s21368_s5 + $0x808] ss:$16 sps:$4 sm:$0xff]   ;;  %v14131_v5 = vld [vmem:[%s21368_s5 + $0x9ec] ss:$16 sps:$4 sm:$0xff]  }
 0xa5d   :  { %11417 = vmatpush1.bf16.msra.mxu0 %v13949_v9  ;;  %11008 = vmatprep.subr.bf16.mxu1 %v13954_v30  ;;  %v14044_v9 = vld [vmem:[%s21368_s5 + $0x824] ss:$16 sps:$4 sm:$0xff]   ;;  %v7008_v30 = vpack.c.bf16 %v6988_v1, %v6988_v1 }
 0xa5e   :  { %11418 = vmatprep.subr.bf16.mxu0 %v13957_v27  ;;  %v14047_v27 = vld [vmem:[%s21368_s5 + $0x82c] ss:$16 sps:$4 sm:$0xff]   ;;  %v14134_v1 = vld [vmem:[%s21368_s5 + $0xa04] ss:$16 sps:$4 sm:$0xff]  }
 0xa60   :  { %11009 = vmatpush1.bf16.msra.mxu1 %v13952_v41  ;;  %v14042_v41 = vld [vmem:[%s21368_s5 + $0x820] ss:$16 sps:$4 sm:$0xff]  }
 0xa61   :  { %11419 = vmatpush1.bf16.msra.mxu0 %v13955_v42  ;;  %11010 = vmatprep.subr.bf16.mxu1 %v13960_v49  ;;  %v14045_v42 = vld [vmem:[%s21368_s5 + $0x828] ss:$16 sps:$4 sm:$0xff]   ;;  %v14050_v49 = vld [vmem:[%s21368_s5 + $0x844] ss:$16 sps:$4 sm:$0xff]  }
 0xa62   :  { %11420 = vmatprep.subr.bf16.mxu0 %v13963_v12  ;;  %v14053_v12 = vld [vmem:[%s21368_s5 + $0x84c] ss:$16 sps:$4 sm:$0xff]  }
 0xa64   :  { %11011 = vmatpush1.bf16.msra.mxu1 %v13958_v43  ;;  %v14048_v43 = vld [vmem:[%s21368_s5 + $0x840] ss:$16 sps:$4 sm:$0xff]  }
 0xa65   :  { %11421 = vmatpush1.bf16.msra.mxu0 %v13961_v59  ;;  %11012 = vmatprep.subr.bf16.mxu1 %v13966_v10  ;;  %v14051_v59 = vld [vmem:[%s21368_s5 + $0x848] ss:$16 sps:$4 sm:$0xff]   ;;  %v14056_v10 = vld [vmem:[%s21368_s5 + $0x864] ss:$16 sps:$4 sm:$0xff]  }
 0xa66   :  { %11422 = vmatprep.subr.bf16.mxu0 %v13969_v39  ;;  %v14059_v39 = vld [vmem:[%s21368_s5 + $0x86c] ss:$16 sps:$4 sm:$0xff]  }
 0xa68   :  { %11013 = vmatpush1.bf16.msra.mxu1 %v13964_v50  ;;  %v14054_v50 = vld [vmem:[%s21368_s5 + $0x860] ss:$16 sps:$4 sm:$0xff]  }
 0xa69   :  { %11423 = vmatpush1.bf16.msra.mxu0 %v13967_v11  ;;  %11014 = vmatprep.subr.bf16.mxu1 %v13972_v4  ;;  %v14057_v11 = vld [vmem:[%s21368_s5 + $0x868] ss:$16 sps:$4 sm:$0xff]   ;;  %v14062_v4 = vld [vmem:[%s21368_s5 + $0x884] ss:$16 sps:$4 sm:$0xff]  }
 0xa6a   :  { %11424 = vmatprep.subr.bf16.mxu0 %v13975_v63  ;;  %v14065_v63 = vld [vmem:[%s21368_s5 + $0x88c] ss:$16 sps:$4 sm:$0xff]  }
 0xa6c   :  { %11015 = vmatpush1.bf16.msra.mxu1 %v13970_v55  ;;  %v14060_v55 = vld [vmem:[%s21368_s5 + $0x880] ss:$16 sps:$4 sm:$0xff]  }
 0xa6d   :  { %11425 = vmatpush1.bf16.msra.mxu0 %v13973_v33  ;;  %11016 = vmatprep.subr.bf16.mxu1 %v13978_v48  ;;  %v14063_v33 = vld [vmem:[%s21368_s5 + $0x888] ss:$16 sps:$4 sm:$0xff]   ;;  %v14068_v48 = vld [vmem:[%s21368_s5 + $0x8a4] ss:$16 sps:$4 sm:$0xff]  }
 0xa6e   :  { %11426 = vmatprep.subr.bf16.mxu0 %v13981_v24  ;;  %v14071_v24 = vld [vmem:[%s21368_s5 + $0x8ac] ss:$16 sps:$4 sm:$0xff]  }
 0xa70   :  { %11017 = vmatpush1.bf16.msra.mxu1 %v13976_v21  ;;  %v14066_v21 = vld [vmem:[%s21368_s5 + $0x8a0] ss:$16 sps:$4 sm:$0xff]  }
 0xa71   :  { %11427 = vmatpush1.bf16.msra.mxu0 %v13979_v28  ;;  %11018 = vmatprep.subr.bf16.mxu1 %v13984_v34  ;;  %v14069_v28 = vld [vmem:[%s21368_s5 + $0x8a8] ss:$16 sps:$4 sm:$0xff]   ;;  %v14074_v34 = vld [vmem:[%s21368_s5 + $0x8c4] ss:$16 sps:$4 sm:$0xff]  }
 0xa72   :  { %11428 = vmatprep.subr.bf16.mxu0 %v13987_v19  ;;  %v14077_v19 = vld [vmem:[%s21368_s5 + $0x8cc] ss:$16 sps:$4 sm:$0xff]  }
 0xa74   :  { %11019 = vmatpush1.bf16.msra.mxu1 %v13982_v61  ;;  %v14072_v61 = vld [vmem:[%s21368_s5 + $0x8c0] ss:$16 sps:$4 sm:$0xff]  }
 0xa75   :  { %11429 = vmatpush1.bf16.msra.mxu0 %v13985_v31  ;;  %11020 = vmatprep.subr.bf16.mxu1 %v13990_v36  ;;  %v14075_v31 = vld [vmem:[%s21368_s5 + $0x8c8] ss:$16 sps:$4 sm:$0xff]   ;;  %v14080_v36 = vld [vmem:[%s21368_s5 + $0x8e4] ss:$16 sps:$4 sm:$0xff]  }
 0xa76   :  { %11430 = vmatprep.subr.bf16.mxu0 %v13993_v23  ;;  %v14083_v23 = vld [vmem:[%s21368_s5 + $0x8ec] ss:$16 sps:$4 sm:$0xff]  }
 0xa78   :  { %11021 = vmatpush1.bf16.msra.mxu1 %v13988_v53  ;;  %v14078_v53 = vld [vmem:[%s21368_s5 + $0x8e0] ss:$16 sps:$4 sm:$0xff]  }
 0xa79   :  { %11431 = vmatpush1.bf16.msra.mxu0 %v13991_v3  ;;  %11022 = vmatprep.subr.bf16.mxu1 %v13996_v56  ;;  %v14081_v3 = vld [vmem:[%s21368_s5 + $0x8e8] ss:$16 sps:$4 sm:$0xff]   ;;  %v14086_v56 = vld [vmem:[%s21368_s5 + $0x904] ss:$16 sps:$4 sm:$0xff]  }
 0xa7a   :  { %11432 = vmatprep.subr.bf16.mxu0 %v13999_v14  ;;  %v14089_v14 = vld [vmem:[%s21368_s5 + $0x90c] ss:$16 sps:$4 sm:$0xff]  }
 0xa7c   :  { %11023 = vmatpush1.bf16.msra.mxu1 %v13994_v0  ;;  %v14084_v0 = vld [vmem:[%s21368_s5 + $0x900] ss:$16 sps:$4 sm:$0xff]  }
 0xa7d   :  { %11433 = vmatpush1.bf16.msra.mxu0 %v13997_v44  ;;  %11024 = vmatprep.subr.bf16.mxu1 %v14002_v13  ;;  %v14087_v44 = vld [vmem:[%s21368_s5 + $0x908] ss:$16 sps:$4 sm:$0xff]   ;;  %v14092_v13 = vld [vmem:[%s21368_s5 + $0x924] ss:$16 sps:$4 sm:$0xff]  }
 0xa7e   :  { %11434 = vmatprep.subr.bf16.mxu0 %v14005_v2  ;;  %v14095_v2 = vld [vmem:[%s21368_s5 + $0x92c] ss:$16 sps:$4 sm:$0xff]  }
 0xa80   :  { %11025 = vmatpush1.bf16.msra.mxu1 %v14000_v37  ;;  %v14090_v37 = vld [vmem:[%s21368_s5 + $0x920] ss:$16 sps:$4 sm:$0xff]  }
 0xa81   :  { %11435 = vmatpush1.bf16.msra.mxu0 %v14003_v18  ;;  %11026 = vmatprep.subr.bf16.mxu1 %v14008_v38  ;;  %v14093_v18 = vld [vmem:[%s21368_s5 + $0x928] ss:$16 sps:$4 sm:$0xff]   ;;  %v14098_v38 = vld [vmem:[%s21368_s5 + $0x944] ss:$16 sps:$4 sm:$0xff]  }
 0xa82   :  { %11436 = vmatprep.subr.bf16.mxu0 %v14011_v35  ;;  %v14101_v35 = vld [vmem:[%s21368_s5 + $0x94c] ss:$16 sps:$4 sm:$0xff]  }
 0xa84   :  { %11027 = vmatpush1.bf16.msra.mxu1 %v14006_v51  ;;  %v14096_v51 = vld [vmem:[%s21368_s5 + $0x940] ss:$16 sps:$4 sm:$0xff]  }
 0xa85   :  { %11437 = vmatpush1.bf16.msra.mxu0 %v14009_v8  ;;  %11028 = vmatprep.subr.bf16.mxu1 %v14014_v60  ;;  %v14099_v8 = vld [vmem:[%s21368_s5 + $0x948] ss:$16 sps:$4 sm:$0xff]   ;;  %v14104_v60 = vld [vmem:[%s21368_s5 + $0x964] ss:$16 sps:$4 sm:$0xff]  }
 0xa86   :  { %11438 = vmatprep.subr.bf16.mxu0 %v14017_v40  ;;  %v14107_v40 = vld [vmem:[%s21368_s5 + $0x96c] ss:$16 sps:$4 sm:$0xff]  }
 0xa88   :  { %11029 = vmatpush1.bf16.msra.mxu1 %v14012_v26  ;;  %v14102_v26 = vld [vmem:[%s21368_s5 + $0x960] ss:$16 sps:$4 sm:$0xff]  }
 0xa89   :  { %11439 = vmatpush1.bf16.msra.mxu0 %v14015_v46  ;;  %11030 = vmatprep.subr.bf16.mxu1 %v14020_v6  ;;  %v14105_v46 = vld [vmem:[%s21368_s5 + $0x968] ss:$16 sps:$4 sm:$0xff]   ;;  %v14110_v6 = vld [vmem:[%s21368_s5 + $0x984] ss:$16 sps:$4 sm:$0xff]  }
 0xa8a   :  { %11440 = vmatprep.subr.bf16.mxu0 %v14023_v29  ;;  %v14113_v29 = vld [vmem:[%s21368_s5 + $0x98c] ss:$16 sps:$4 sm:$0xff]  }
 0xa8c   :  { %11031 = vmatpush1.bf16.msra.mxu1 %v14018_v16  ;;  %v14108_v16 = vld [vmem:[%s21368_s5 + $0x980] ss:$16 sps:$4 sm:$0xff]  }
 0xa8d   :  { %11441 = vmatpush1.bf16.msra.mxu0 %v14021_v57  ;;  %11032 = vmatprep.subr.bf16.mxu1 %v14026_v17  ;;  %v14111_v57 = vld [vmem:[%s21368_s5 + $0x988] ss:$16 sps:$4 sm:$0xff]   ;;  %v14116_v17 = vld [vmem:[%s21368_s5 + $0x9a4] ss:$16 sps:$4 sm:$0xff]  }
 0xa8e   :  { %11442 = vmatprep.subr.bf16.mxu0 %v14029_v20  ;;  %v14119_v20 = vld [vmem:[%s21368_s5 + $0x9ac] ss:$16 sps:$4 sm:$0xff]  }
 0xa90   :  { %11033 = vmatpush1.bf16.msra.mxu1 %v14024_v15  ;;  %v14114_v15 = vld [vmem:[%s21368_s5 + $0x9a0] ss:$16 sps:$4 sm:$0xff]  }
 0xa91   :  { %11443 = vmatpush1.bf16.msra.mxu0 %v14027_v25  ;;  %11034 = vmatprep.subr.bf16.mxu1 %v14032_v32  ;;  %v14117_v25 = vld [vmem:[%s21368_s5 + $0x9a8] ss:$16 sps:$4 sm:$0xff]   ;;  %v14122_v32 = vld [vmem:[%s21368_s5 + $0x9c4] ss:$16 sps:$4 sm:$0xff]  }
 0xa92   :  { %11444 = vmatprep.subr.bf16.mxu0 %v14035_v54  ;;  %v14125_v54 = vld [vmem:[%s21368_s5 + $0x9cc] ss:$16 sps:$4 sm:$0xff]  }
 0xa94   :  { %11035 = vmatpush1.bf16.msra.mxu1 %v14030_v52  ;;  %v14120_v52 = vld [vmem:[%s21368_s5 + $0x9c0] ss:$16 sps:$4 sm:$0xff]  }
 0xa95   :  { %11445 = vmatpush1.bf16.msra.mxu0 %v14033_v45  ;;  %11045 = vmatprep.subr.bf16.mxu1 %v14038_v58  ;;  %v14123_v45 = vld [vmem:[%s21368_s5 + $0x9c8] ss:$16 sps:$4 sm:$0xff]   ;;  %v14128_v58 = vld [vmem:[%s21368_s5 + $0x9e4] ss:$16 sps:$4 sm:$0xff]  }
 0xa96   :  { %11455 = vmatprep.subr.bf16.mxu0 %v14041_v62  ;;  %v14126_v62 = vld [vmem:[%s21368_s5 + $0x9e0] ss:$16 sps:$4 sm:$0xff]  }
 0xa97   :  { %11037 = vmatmul.mubr.bf16.vlgmr.msra.gmra.mrb[148].mxu1 %v7005_v47 }
 0xa98   :  { %11447 = vmatmul.mubr.bf16.vlgmr.msra.gmra.mrb[176].mxu0 %v7005_v47  ;;  %11046 = vmatpush1.bf16.msra.mxu1 %v14036_v7  ;;  %v14129_v7 = vld [vmem:[%s21368_s5 + $0x9e8] ss:$16 sps:$4 sm:$0xff]   ;;  %v6987_v47 = vld [vmem:[#allocation2 + $0x40] sm:$0xff] }
 0xa99   :  { %11077 = vmatprep.mubr.bf16.mxu1 %v7008_v30  ;;  %11456 = vmatpush1.bf16.msra.mxu0 %v14039_v22  ;;  %v14137_v22 = vld [vmem:[%s21368_s5 + $0xa0c] ss:$16 sps:$4 sm:$0xff]  }
 0xa9a   :  { %11487 = vmatprep.mubr.bf16.mxu0 %v7008_v30  ;;  %11047 = vmatprep.subr.bf16.mxu1 %v14044_v9  ;;  %v14132_v9 = vld [vmem:[%s21368_s5 + $0xa00] ss:$16 sps:$4 sm:$0xff]   ;;  %v6990_v30 = vld [vmem:[#allocation2 + $0x58] sm:$0xff] }
 0xa9b   :  { %11457 = vmatprep.subr.bf16.mxu0 %v14047_v27  ;;  %v7007_v27 = vpack.c.bf16 %v6987_v47, %v6987_v47  ;;  %v14227_v47 = vld [vmem:[%s21368_s5 + $0xbec] ss:$16 sps:$4 sm:$0xff]  }
 0xa9c   :  { %11048 = vmatpush1.bf16.msra.mxu1 %v14042_v41  ;;  %v14135_v41 = vld [vmem:[%s21368_s5 + $0xa08] ss:$16 sps:$4 sm:$0xff]  }
 0xa9d   :  { %11458 = vmatpush1.bf16.msra.mxu0 %v14045_v42  ;;  %11049 = vmatprep.subr.bf16.mxu1 %v14050_v49  ;;  %v14140_v42 = vld [vmem:[%s21368_s5 + $0xa24] ss:$16 sps:$4 sm:$0xff]   ;;  %v7010_v49 = vpack.c.bf16 %v6990_v30, %v6990_v30 }
 0xa9e   :  { %11459 = vmatprep.subr.bf16.mxu0 %v14053_v12  ;;  %v14143_v12 = vld [vmem:[%s21368_s5 + $0xa2c] ss:$16 sps:$4 sm:$0xff]   ;;  %v14230_v30 = vld [vmem:[%s21368_s5 + $0xc04] ss:$16 sps:$4 sm:$0xff]  }
 0xaa0   :  { %11050 = vmatpush1.bf16.msra.mxu1 %v14048_v43  ;;  %v14138_v43 = vld [vmem:[%s21368_s5 + $0xa20] ss:$16 sps:$4 sm:$0xff]  }
 0xaa1   :  { %11460 = vmatpush1.bf16.msra.mxu0 %v14051_v59  ;;  %11051 = vmatprep.subr.bf16.mxu1 %v14056_v10  ;;  %v14141_v59 = vld [vmem:[%s21368_s5 + $0xa28] ss:$16 sps:$4 sm:$0xff]   ;;  %v14146_v10 = vld [vmem:[%s21368_s5 + $0xa44] ss:$16 sps:$4 sm:$0xff]  }
 0xaa2   :  { %11461 = vmatprep.subr.bf16.mxu0 %v14059_v39  ;;  %v14149_v39 = vld [vmem:[%s21368_s5 + $0xa4c] ss:$16 sps:$4 sm:$0xff]  }
 0xaa4   :  { %11052 = vmatpush1.bf16.msra.mxu1 %v14054_v50  ;;  %v14144_v50 = vld [vmem:[%s21368_s5 + $0xa40] ss:$16 sps:$4 sm:$0xff]  }
 0xaa5   :  { %11462 = vmatpush1.bf16.msra.mxu0 %v14057_v11  ;;  %11053 = vmatprep.subr.bf16.mxu1 %v14062_v4  ;;  %v14147_v11 = vld [vmem:[%s21368_s5 + $0xa48] ss:$16 sps:$4 sm:$0xff]   ;;  %v14152_v4 = vld [vmem:[%s21368_s5 + $0xa64] ss:$16 sps:$4 sm:$0xff]  }
 0xaa6   :  { %11463 = vmatprep.subr.bf16.mxu0 %v14065_v63  ;;  %v14155_v63 = vld [vmem:[%s21368_s5 + $0xa6c] ss:$16 sps:$4 sm:$0xff]  }
 0xaa8   :  { %11054 = vmatpush1.bf16.msra.mxu1 %v14060_v55  ;;  %v14150_v55 = vld [vmem:[%s21368_s5 + $0xa60] ss:$16 sps:$4 sm:$0xff]  }
 0xaa9   :  { %11464 = vmatpush1.bf16.msra.mxu0 %v14063_v33  ;;  %11055 = vmatprep.subr.bf16.mxu1 %v14068_v48  ;;  %v14153_v33 = vld [vmem:[%s21368_s5 + $0xa68] ss:$16 sps:$4 sm:$0xff]   ;;  %v14158_v48 = vld [vmem:[%s21368_s5 + $0xa84] ss:$16 sps:$4 sm:$0xff]  }
 0xaaa   :  { %11465 = vmatprep.subr.bf16.mxu0 %v14071_v24  ;;  %v14161_v24 = vld [vmem:[%s21368_s5 + $0xa8c] ss:$16 sps:$4 sm:$0xff]  }
 0xaac   :  { %11056 = vmatpush1.bf16.msra.mxu1 %v14066_v21  ;;  %v14156_v21 = vld [vmem:[%s21368_s5 + $0xa80] ss:$16 sps:$4 sm:$0xff]  }
 0xaad   :  { %11466 = vmatpush1.bf16.msra.mxu0 %v14069_v28  ;;  %11057 = vmatprep.subr.bf16.mxu1 %v14074_v34  ;;  %v14159_v28 = vld [vmem:[%s21368_s5 + $0xa88] ss:$16 sps:$4 sm:$0xff]   ;;  %v14164_v34 = vld [vmem:[%s21368_s5 + $0xaa4] ss:$16 sps:$4 sm:$0xff]  }
 0xaae   :  { %11467 = vmatprep.subr.bf16.mxu0 %v14077_v19  ;;  %v14167_v19 = vld [vmem:[%s21368_s5 + $0xaac] ss:$16 sps:$4 sm:$0xff]  }
 0xab0   :  { %11058 = vmatpush1.bf16.msra.mxu1 %v14072_v61  ;;  %v14162_v61 = vld [vmem:[%s21368_s5 + $0xaa0] ss:$16 sps:$4 sm:$0xff]  }
 0xab1   :  { %11468 = vmatpush1.bf16.msra.mxu0 %v14075_v31  ;;  %11059 = vmatprep.subr.bf16.mxu1 %v14080_v36  ;;  %v14165_v31 = vld [vmem:[%s21368_s5 + $0xaa8] ss:$16 sps:$4 sm:$0xff]   ;;  %v14170_v36 = vld [vmem:[%s21368_s5 + $0xac4] ss:$16 sps:$4 sm:$0xff]  }
 0xab2   :  { %11469 = vmatprep.subr.bf16.mxu0 %v14083_v23  ;;  %v14173_v23 = vld [vmem:[%s21368_s5 + $0xacc] ss:$16 sps:$4 sm:$0xff]  }
 0xab4   :  { %11060 = vmatpush1.bf16.msra.mxu1 %v14078_v53  ;;  %v14168_v53 = vld [vmem:[%s21368_s5 + $0xac0] ss:$16 sps:$4 sm:$0xff]  }
 0xab5   :  { %11470 = vmatpush1.bf16.msra.mxu0 %v14081_v3  ;;  %11061 = vmatprep.subr.bf16.mxu1 %v14086_v56  ;;  %v14171_v3 = vld [vmem:[%s21368_s5 + $0xac8] ss:$16 sps:$4 sm:$0xff]   ;;  %v14176_v56 = vld [vmem:[%s21368_s5 + $0xae4] ss:$16 sps:$4 sm:$0xff]  }
 0xab6   :  { %11471 = vmatprep.subr.bf16.mxu0 %v14089_v14  ;;  %v14179_v14 = vld [vmem:[%s21368_s5 + $0xaec] ss:$16 sps:$4 sm:$0xff]  }
 0xab8   :  { %11062 = vmatpush1.bf16.msra.mxu1 %v14084_v0  ;;  %v14174_v0 = vld [vmem:[%s21368_s5 + $0xae0] ss:$16 sps:$4 sm:$0xff]  }
 0xab9   :  { %11472 = vmatpush1.bf16.msra.mxu0 %v14087_v44  ;;  %11063 = vmatprep.subr.bf16.mxu1 %v14092_v13  ;;  %v14177_v44 = vld [vmem:[%s21368_s5 + $0xae8] ss:$16 sps:$4 sm:$0xff]   ;;  %v14182_v13 = vld [vmem:[%s21368_s5 + $0xb04] ss:$16 sps:$4 sm:$0xff]  }
 0xaba   :  { %11473 = vmatprep.subr.bf16.mxu0 %v14095_v2  ;;  %v14185_v2 = vld [vmem:[%s21368_s5 + $0xb0c] ss:$16 sps:$4 sm:$0xff]  }
 0xabc   :  { %11064 = vmatpush1.bf16.msra.mxu1 %v14090_v37  ;;  %v14180_v37 = vld [vmem:[%s21368_s5 + $0xb00] ss:$16 sps:$4 sm:$0xff]  }
 0xabd   :  { %11474 = vmatpush1.bf16.msra.mxu0 %v14093_v18  ;;  %11065 = vmatprep.subr.bf16.mxu1 %v14098_v38  ;;  %v14183_v18 = vld [vmem:[%s21368_s5 + $0xb08] ss:$16 sps:$4 sm:$0xff]   ;;  %v14188_v38 = vld [vmem:[%s21368_s5 + $0xb24] ss:$16 sps:$4 sm:$0xff]  }
 0xabe   :  { %11475 = vmatprep.subr.bf16.mxu0 %v14101_v35  ;;  %v14191_v35 = vld [vmem:[%s21368_s5 + $0xb2c] ss:$16 sps:$4 sm:$0xff]  }
 0xac0   :  { %11066 = vmatpush1.bf16.msra.mxu1 %v14096_v51  ;;  %v14186_v51 = vld [vmem:[%s21368_s5 + $0xb20] ss:$16 sps:$4 sm:$0xff]  }
 0xac1   :  { %11476 = vmatpush1.bf16.msra.mxu0 %v14099_v8  ;;  %11067 = vmatprep.subr.bf16.mxu1 %v14104_v60  ;;  %v14189_v8 = vld [vmem:[%s21368_s5 + $0xb28] ss:$16 sps:$4 sm:$0xff]   ;;  %v14194_v60 = vld [vmem:[%s21368_s5 + $0xb44] ss:$16 sps:$4 sm:$0xff]  }
 0xac2   :  { %11477 = vmatprep.subr.bf16.mxu0 %v14107_v40  ;;  %v14197_v40 = vld [vmem:[%s21368_s5 + $0xb4c] ss:$16 sps:$4 sm:$0xff]  }
 0xac4   :  { %11068 = vmatpush1.bf16.msra.mxu1 %v14102_v26  ;;  %v14192_v26 = vld [vmem:[%s21368_s5 + $0xb40] ss:$16 sps:$4 sm:$0xff]  }
 0xac5   :  { %11478 = vmatpush1.bf16.msra.mxu0 %v14105_v46  ;;  %11069 = vmatprep.subr.bf16.mxu1 %v14110_v6  ;;  %v14195_v46 = vld [vmem:[%s21368_s5 + $0xb48] ss:$16 sps:$4 sm:$0xff]   ;;  %v14200_v6 = vld [vmem:[%s21368_s5 + $0xb64] ss:$16 sps:$4 sm:$0xff]  }
 0xac6   :  { %11479 = vmatprep.subr.bf16.mxu0 %v14113_v29  ;;  %v14203_v29 = vld [vmem:[%s21368_s5 + $0xb6c] ss:$16 sps:$4 sm:$0xff]  }
 0xac8   :  { %11070 = vmatpush1.bf16.msra.mxu1 %v14108_v16  ;;  %v14198_v16 = vld [vmem:[%s21368_s5 + $0xb60] ss:$16 sps:$4 sm:$0xff]  }
 0xac9   :  { %11480 = vmatpush1.bf16.msra.mxu0 %v14111_v57  ;;  %11071 = vmatprep.subr.bf16.mxu1 %v14116_v17  ;;  %v14201_v57 = vld [vmem:[%s21368_s5 + $0xb68] ss:$16 sps:$4 sm:$0xff]   ;;  %v14206_v17 = vld [vmem:[%s21368_s5 + $0xb84] ss:$16 sps:$4 sm:$0xff]  }
 0xaca   :  { %11481 = vmatprep.subr.bf16.mxu0 %v14119_v20  ;;  %v14209_v20 = vld [vmem:[%s21368_s5 + $0xb8c] ss:$16 sps:$4 sm:$0xff]  }
 0xacc   :  { %11072 = vmatpush1.bf16.msra.mxu1 %v14114_v15  ;;  %v14204_v15 = vld [vmem:[%s21368_s5 + $0xb80] ss:$16 sps:$4 sm:$0xff]  }
 0xacd   :  { %11482 = vmatpush1.bf16.msra.mxu0 %v14117_v25  ;;  %11073 = vmatprep.subr.bf16.mxu1 %v14122_v32  ;;  %v14207_v25 = vld [vmem:[%s21368_s5 + $0xb88] ss:$16 sps:$4 sm:$0xff]   ;;  %v14212_v32 = vld [vmem:[%s21368_s5 + $0xba4] ss:$16 sps:$4 sm:$0xff]  }
 0xace   :  { %11483 = vmatprep.subr.bf16.mxu0 %v14125_v54  ;;  %v14215_v54 = vld [vmem:[%s21368_s5 + $0xbac] ss:$16 sps:$4 sm:$0xff]  }
 0xad0   :  { %11074 = vmatpush1.bf16.msra.mxu1 %v14120_v52  ;;  %v14210_v52 = vld [vmem:[%s21368_s5 + $0xba0] ss:$16 sps:$4 sm:$0xff]  }
 0xad1   :  { %11484 = vmatpush1.bf16.msra.mxu0 %v14123_v45  ;;  %11075 = vmatprep.subr.bf16.mxu1 %v14128_v58  ;;  %v14213_v45 = vld [vmem:[%s21368_s5 + $0xba8] ss:$16 sps:$4 sm:$0xff]   ;;  %v14218_v58 = vld [vmem:[%s21368_s5 + $0xbc4] ss:$16 sps:$4 sm:$0xff]  }
 0xad2   :  { %11485 = vmatprep.subr.bf16.mxu0 %v14131_v5  ;;  %v14221_v5 = vld [vmem:[%s21368_s5 + $0xbcc] ss:$16 sps:$4 sm:$0xff]  }
 0xad4   :  { %11076 = vmatpush1.bf16.msra.mxu1 %v14126_v62  ;;  %v14216_v62 = vld [vmem:[%s21368_s5 + $0xbc0] ss:$16 sps:$4 sm:$0xff]  }
 0xad5   :  { %11486 = vmatpush1.bf16.msra.mxu0 %v14129_v7  ;;  %11086 = vmatprep.subr.bf16.mxu1 %v14134_v1  ;;  %v14219_v7 = vld [vmem:[%s21368_s5 + $0xbc8] ss:$16 sps:$4 sm:$0xff]   ;;  %v14224_v1 = vld [vmem:[%s21368_s5 + $0xbe4] ss:$16 sps:$4 sm:$0xff]  }
 0xad6   :  { %11496 = vmatprep.subr.bf16.mxu0 %v14137_v22  ;;  %v14222_v22 = vld [vmem:[%s21368_s5 + $0xbe0] ss:$16 sps:$4 sm:$0xff]  }
 0xad7   :  { %11078 = vmatmul.mubr.bf16.vlgmr.msra.gmra.mrb[148].mxu1 %v7007_v27 }
 0xad8   :  { %11488 = vmatmul.mubr.bf16.vlgmr.msra.gmra.mrb[176].mxu0 %v7007_v27  ;;  %11087 = vmatpush1.bf16.msra.mxu1 %v14132_v9  ;;  %v14225_v9 = vld [vmem:[%s21368_s5 + $0xbe8] ss:$16 sps:$4 sm:$0xff]   ;;  %v6989_v27 = vld [vmem:[#allocation2 + $0x50] sm:$0xff] }
 0xad9   :  { %11118 = vmatprep.mubr.bf16.mxu1 %v7010_v49  ;;  %11497 = vmatpush1.bf16.msra.mxu0 %v14135_v41  ;;  %v14233_v41 = vld [vmem:[%s21368_s5 + $0xc0c] ss:$16 sps:$4 sm:$0xff]  }
 0xada   :  { %11528 = vmatprep.mubr.bf16.mxu0 %v7010_v49  ;;  %11088 = vmatprep.subr.bf16.mxu1 %v14140_v42  ;;  %v14228_v42 = vld [vmem:[%s21368_s5 + $0xc00] ss:$16 sps:$4 sm:$0xff]   ;;  %v6992_v49 = vld [vmem:[#allocation2 + $0x68] sm:$0xff] }
 0xadb   :  { %11498 = vmatprep.subr.bf16.mxu0 %v14143_v12  ;;  %v7009_v12 = vpack.c.bf16 %v6989_v27, %v6989_v27  ;;  %v14323_v27 = vld [vmem:[%s21368_s5 + $0xdec] ss:$16 sps:$4 sm:$0xff]  }
 0xadc   :  { %11089 = vmatpush1.bf16.msra.mxu1 %v14138_v43  ;;  %v14231_v43 = vld [vmem:[%s21368_s5 + $0xc08] ss:$16 sps:$4 sm:$0xff]  }
 0xadd   :  { %11499 = vmatpush1.bf16.msra.mxu0 %v14141_v59  ;;  %11090 = vmatprep.subr.bf16.mxu1 %v14146_v10  ;;  %v14236_v59 = vld [vmem:[%s21368_s5 + $0xc24] ss:$16 sps:$4 sm:$0xff]   ;;  %v7012_v10 = vpack.c.bf16 %v6992_v49, %v6992_v49 }
 0xade   :  { %11500 = vmatprep.subr.bf16.mxu0 %v14149_v39  ;;  %v14239_v39 = vld [vmem:[%s21368_s5 + $0xc2c] ss:$16 sps:$4 sm:$0xff]   ;;  %v14326_v49 = vld [vmem:[%s21368_s5 + $0xe04] ss:$16 sps:$4 sm:$0xff]  }
 0xae0   :  { %11091 = vmatpush1.bf16.msra.mxu1 %v14144_v50  ;;  %v14234_v50 = vld [vmem:[%s21368_s5 + $0xc20] ss:$16 sps:$4 sm:$0xff]  }
 0xae1   :  { %11501 = vmatpush1.bf16.msra.mxu0 %v14147_v11  ;;  %11092 = vmatprep.subr.bf16.mxu1 %v14152_v4  ;;  %v14237_v11 = vld [vmem:[%s21368_s5 + $0xc28] ss:$16 sps:$4 sm:$0xff]   ;;  %v14242_v4 = vld [vmem:[%s21368_s5 + $0xc44] ss:$16 sps:$4 sm:$0xff]  }
 0xae2   :  { %11502 = vmatprep.subr.bf16.mxu0 %v14155_v63  ;;  %v14245_v63 = vld [vmem:[%s21368_s5 + $0xc4c] ss:$16 sps:$4 sm:$0xff]  }
 0xae4   :  { %11093 = vmatpush1.bf16.msra.mxu1 %v14150_v55  ;;  %v14240_v55 = vld [vmem:[%s21368_s5 + $0xc40] ss:$16 sps:$4 sm:$0xff]  }
 0xae5   :  { %11503 = vmatpush1.bf16.msra.mxu0 %v14153_v33  ;;  %11094 = vmatprep.subr.bf16.mxu1 %v14158_v48  ;;  %v14243_v33 = vld [vmem:[%s21368_s5 + $0xc48] ss:$16 sps:$4 sm:$0xff]   ;;  %v14248_v48 = vld [vmem:[%s21368_s5 + $0xc64] ss:$16 sps:$4 sm:$0xff]  }
 0xae6   :  { %11504 = vmatprep.subr.bf16.mxu0 %v14161_v24  ;;  %v14251_v24 = vld [vmem:[%s21368_s5 + $0xc6c] ss:$16 sps:$4 sm:$0xff]  }
 0xae8   :  { %11095 = vmatpush1.bf16.msra.mxu1 %v14156_v21  ;;  %v14246_v21 = vld [vmem:[%s21368_s5 + $0xc60] ss:$16 sps:$4 sm:$0xff]  }
 0xae9   :  { %11505 = vmatpush1.bf16.msra.mxu0 %v14159_v28  ;;  %11096 = vmatprep.subr.bf16.mxu1 %v14164_v34  ;;  %v14249_v28 = vld [vmem:[%s21368_s5 + $0xc68] ss:$16 sps:$4 sm:$0xff]   ;;  %v14254_v34 = vld [vmem:[%s21368_s5 + $0xc84] ss:$16 sps:$4 sm:$0xff]  }
 0xaea   :  { %11506 = vmatprep.subr.bf16.mxu0 %v14167_v19  ;;  %v14257_v19 = vld [vmem:[%s21368_s5 + $0xc8c] ss:$16 sps:$4 sm:$0xff]  }
 0xaec   :  { %11097 = vmatpush1.bf16.msra.mxu1 %v14162_v61  ;;  %v14252_v61 = vld [vmem:[%s21368_s5 + $0xc80] ss:$16 sps:$4 sm:$0xff]  }
 0xaed   :  { %11507 = vmatpush1.bf16.msra.mxu0 %v14165_v31  ;;  %11098 = vmatprep.subr.bf16.mxu1 %v14170_v36  ;;  %v14255_v31 = vld [vmem:[%s21368_s5 + $0xc88] ss:$16 sps:$4 sm:$0xff]   ;;  %v14260_v36 = vld [vmem:[%s21368_s5 + $0xca4] ss:$16 sps:$4 sm:$0xff]  }
 0xaee   :  { %11508 = vmatprep.subr.bf16.mxu0 %v14173_v23  ;;  %v14263_v23 = vld [vmem:[%s21368_s5 + $0xcac] ss:$16 sps:$4 sm:$0xff]  }
 0xaf0   :  { %11099 = vmatpush1.bf16.msra.mxu1 %v14168_v53  ;;  %v14258_v53 = vld [vmem:[%s21368_s5 + $0xca0] ss:$16 sps:$4 sm:$0xff]  }
 0xaf1   :  { %11509 = vmatpush1.bf16.msra.mxu0 %v14171_v3  ;;  %11100 = vmatprep.subr.bf16.mxu1 %v14176_v56  ;;  %v14261_v3 = vld [vmem:[%s21368_s5 + $0xca8] ss:$16 sps:$4 sm:$0xff]   ;;  %v14266_v56 = vld [vmem:[%s21368_s5 + $0xcc4] ss:$16 sps:$4 sm:$0xff]  }
 0xaf2   :  { %11510 = vmatprep.subr.bf16.mxu0 %v14179_v14  ;;  %v14269_v14 = vld [vmem:[%s21368_s5 + $0xccc] ss:$16 sps:$4 sm:$0xff]  }
 0xaf4   :  { %11101 = vmatpush1.bf16.msra.mxu1 %v14174_v0  ;;  %v14264_v0 = vld [vmem:[%s21368_s5 + $0xcc0] ss:$16 sps:$4 sm:$0xff]  }
 0xaf5   :  { %11511 = vmatpush1.bf16.msra.mxu0 %v14177_v44  ;;  %11102 = vmatprep.subr.bf16.mxu1 %v14182_v13  ;;  %v14267_v44 = vld [vmem:[%s21368_s5 + $0xcc8] ss:$16 sps:$4 sm:$0xff]   ;;  %v14272_v13 = vld [vmem:[%s21368_s5 + $0xce4] ss:$16 sps:$4 sm:$0xff]  }
 0xaf6   :  { %11512 = vmatprep.subr.bf16.mxu0 %v14185_v2  ;;  %v14275_v2 = vld [vmem:[%s21368_s5 + $0xcec] ss:$16 sps:$4 sm:$0xff]  }
 0xaf8   :  { %11103 = vmatpush1.bf16.msra.mxu1 %v14180_v37  ;;  %v14270_v37 = vld [vmem:[%s21368_s5 + $0xce0] ss:$16 sps:$4 sm:$0xff]  }
 0xaf9   :  { %11513 = vmatpush1.bf16.msra.mxu0 %v14183_v18  ;;  %11104 = vmatprep.subr.bf16.mxu1 %v14188_v38  ;;  %v14273_v18 = vld [vmem:[%s21368_s5 + $0xce8] ss:$16 sps:$4 sm:$0xff]   ;;  %v14278_v38 = vld [vmem:[%s21368_s5 + $0xd04] ss:$16 sps:$4 sm:$0xff]  }
 0xafa   :  { %11514 = vmatprep.subr.bf16.mxu0 %v14191_v35  ;;  %v14281_v35 = vld [vmem:[%s21368_s5 + $0xd0c] ss:$16 sps:$4 sm:$0xff]  }
 0xafc   :  { %11105 = vmatpush1.bf16.msra.mxu1 %v14186_v51  ;;  %v14276_v51 = vld [vmem:[%s21368_s5 + $0xd00] ss:$16 sps:$4 sm:$0xff]  }
 0xafd   :  { %11515 = vmatpush1.bf16.msra.mxu0 %v14189_v8  ;;  %11106 = vmatprep.subr.bf16.mxu1 %v14194_v60  ;;  %v14279_v8 = vld [vmem:[%s21368_s5 + $0xd08] ss:$16 sps:$4 sm:$0xff]   ;;  %v14284_v60 = vld [vmem:[%s21368_s5 + $0xd24] ss:$16 sps:$4 sm:$0xff]  }
 0xafe   :  { %11516 = vmatprep.subr.bf16.mxu0 %v14197_v40  ;;  %v14287_v40 = vld [vmem:[%s21368_s5 + $0xd2c] ss:$16 sps:$4 sm:$0xff]  }
 0xb00   :  { %11107 = vmatpush1.bf16.msra.mxu1 %v14192_v26  ;;  %v14282_v26 = vld [vmem:[%s21368_s5 + $0xd20] ss:$16 sps:$4 sm:$0xff]  }
 0xb01   :  { %11517 = vmatpush1.bf16.msra.mxu0 %v14195_v46  ;;  %11108 = vmatprep.subr.bf16.mxu1 %v14200_v6  ;;  %v14285_v46 = vld [vmem:[%s21368_s5 + $0xd28] ss:$16 sps:$4 sm:$0xff]   ;;  %v14290_v6 = vld [vmem:[%s21368_s5 + $0xd44] ss:$16 sps:$4 sm:$0xff]  }
 0xb02   :  { %11518 = vmatprep.subr.bf16.mxu0 %v14203_v29  ;;  %v14293_v29 = vld [vmem:[%s21368_s5 + $0xd4c] ss:$16 sps:$4 sm:$0xff]  }
 0xb04   :  { %11109 = vmatpush1.bf16.msra.mxu1 %v14198_v16  ;;  %v14288_v16 = vld [vmem:[%s21368_s5 + $0xd40] ss:$16 sps:$4 sm:$0xff]  }
 0xb05   :  { %11519 = vmatpush1.bf16.msra.mxu0 %v14201_v57  ;;  %11110 = vmatprep.subr.bf16.mxu1 %v14206_v17  ;;  %v14291_v57 = vld [vmem:[%s21368_s5 + $0xd48] ss:$16 sps:$4 sm:$0xff]   ;;  %v14296_v17 = vld [vmem:[%s21368_s5 + $0xd64] ss:$16 sps:$4 sm:$0xff]  }
 0xb06   :  { %11520 = vmatprep.subr.bf16.mxu0 %v14209_v20  ;;  %v14299_v20 = vld [vmem:[%s21368_s5 + $0xd6c] ss:$16 sps:$4 sm:$0xff]  }
 0xb08   :  { %11111 = vmatpush1.bf16.msra.mxu1 %v14204_v15  ;;  %v14294_v15 = vld [vmem:[%s21368_s5 + $0xd60] ss:$16 sps:$4 sm:$0xff]  }
 0xb09   :  { %11521 = vmatpush1.bf16.msra.mxu0 %v14207_v25  ;;  %11112 = vmatprep.subr.bf16.mxu1 %v14212_v32  ;;  %v14297_v25 = vld [vmem:[%s21368_s5 + $0xd68] ss:$16 sps:$4 sm:$0xff]   ;;  %v14302_v32 = vld [vmem:[%s21368_s5 + $0xd84] ss:$16 sps:$4 sm:$0xff]  }
 0xb0a   :  { %11522 = vmatprep.subr.bf16.mxu0 %v14215_v54  ;;  %v14305_v54 = vld [vmem:[%s21368_s5 + $0xd8c] ss:$16 sps:$4 sm:$0xff]  }
 0xb0c   :  { %11113 = vmatpush1.bf16.msra.mxu1 %v14210_v52  ;;  %v14300_v52 = vld [vmem:[%s21368_s5 + $0xd80] ss:$16 sps:$4 sm:$0xff]  }
 0xb0d   :  { %11523 = vmatpush1.bf16.msra.mxu0 %v14213_v45  ;;  %11114 = vmatprep.subr.bf16.mxu1 %v14218_v58  ;;  %v14303_v45 = vld [vmem:[%s21368_s5 + $0xd88] ss:$16 sps:$4 sm:$0xff]   ;;  %v14308_v58 = vld [vmem:[%s21368_s5 + $0xda4] ss:$16 sps:$4 sm:$0xff]  }
 0xb0e   :  { %11524 = vmatprep.subr.bf16.mxu0 %v14221_v5  ;;  %v14311_v5 = vld [vmem:[%s21368_s5 + $0xdac] ss:$16 sps:$4 sm:$0xff]  }
 0xb10   :  { %11115 = vmatpush1.bf16.msra.mxu1 %v14216_v62  ;;  %v14306_v62 = vld [vmem:[%s21368_s5 + $0xda0] ss:$16 sps:$4 sm:$0xff]  }
 0xb11   :  { %11525 = vmatpush1.bf16.msra.mxu0 %v14219_v7  ;;  %11116 = vmatprep.subr.bf16.mxu1 %v14224_v1  ;;  %v14309_v7 = vld [vmem:[%s21368_s5 + $0xda8] ss:$16 sps:$4 sm:$0xff]   ;;  %v14314_v1 = vld [vmem:[%s21368_s5 + $0xdc4] ss:$16 sps:$4 sm:$0xff]  }
 0xb12   :  { %11526 = vmatprep.subr.bf16.mxu0 %v14227_v47  ;;  %v14317_v47 = vld [vmem:[%s21368_s5 + $0xdcc] ss:$16 sps:$4 sm:$0xff]  }
 0xb14   :  { %11117 = vmatpush1.bf16.msra.mxu1 %v14222_v22  ;;  %v14312_v22 = vld [vmem:[%s21368_s5 + $0xdc0] ss:$16 sps:$4 sm:$0xff]  }
 0xb15   :  { %11527 = vmatpush1.bf16.msra.mxu0 %v14225_v9  ;;  %11127 = vmatprep.subr.bf16.mxu1 %v14230_v30  ;;  %v14315_v9 = vld [vmem:[%s21368_s5 + $0xdc8] ss:$16 sps:$4 sm:$0xff]   ;;  %v14320_v30 = vld [vmem:[%s21368_s5 + $0xde4] ss:$16 sps:$4 sm:$0xff]  }
 0xb16   :  { %11537 = vmatprep.subr.bf16.mxu0 %v14233_v41  ;;  %v14318_v41 = vld [vmem:[%s21368_s5 + $0xde0] ss:$16 sps:$4 sm:$0xff]  }
 0xb17   :  { %11119 = vmatmul.mubr.bf16.vlgmr.msra.gmra.mrb[148].mxu1 %v7009_v12 }
 0xb18   :  { %11529 = vmatmul.mubr.bf16.vlgmr.msra.gmra.mrb[176].mxu0 %v7009_v12  ;;  %11128 = vmatpush1.bf16.msra.mxu1 %v14228_v42  ;;  %v14321_v42 = vld [vmem:[%s21368_s5 + $0xde8] ss:$16 sps:$4 sm:$0xff]   ;;  %v6991_v12 = vld [vmem:[#allocation2 + $0x60] sm:$0xff] }
 0xb19   :  { %11159 = vmatprep.mubr.bf16.mxu1 %v7012_v10  ;;  %11538 = vmatpush1.bf16.msra.mxu0 %v14231_v43  ;;  %v14329_v43 = vld [vmem:[%s21368_s5 + $0xe0c] ss:$16 sps:$4 sm:$0xff]  }
 0xb1a   :  { %11569 = vmatprep.mubr.bf16.mxu0 %v7012_v10  ;;  %11129 = vmatprep.subr.bf16.mxu1 %v14236_v59  ;;  %v14324_v59 = vld [vmem:[%s21368_s5 + $0xe00] ss:$16 sps:$4 sm:$0xff]   ;;  %v6994_v10 = vld [vmem:[#allocation2 + $0x78] sm:$0xff] }
 0xb1b   :  { %11539 = vmatprep.subr.bf16.mxu0 %v14239_v39  ;;  %v7011_v39 = vpack.c.bf16 %v6991_v12, %v6991_v12  ;;  %v14419_v12 = vld [vmem:[%s21368_s5 + $0xfec] ss:$16 sps:$4 sm:$0xff]  }
 0xb1c   :  { %11130 = vmatpush1.bf16.msra.mxu1 %v14234_v50  ;;  %v14327_v50 = vld [vmem:[%s21368_s5 + $0xe08] ss:$16 sps:$4 sm:$0xff]  }
 0xb1d   :  { %11540 = vmatpush1.bf16.msra.mxu0 %v14237_v11  ;;  %11131 = vmatprep.subr.bf16.mxu1 %v14242_v4  ;;  %v14332_v11 = vld [vmem:[%s21368_s5 + $0xe24] ss:$16 sps:$4 sm:$0xff]   ;;  %v7014_v4 = vpack.c.bf16 %v6994_v10, %v6994_v10 }
 0xb1e   :  { %11541 = vmatprep.subr.bf16.mxu0 %v14245_v63  ;;  %v14335_v63 = vld [vmem:[%s21368_s5 + $0xe2c] ss:$16 sps:$4 sm:$0xff]   ;;  %v14422_v10 = vld [vmem:[%s21368_s5 + $0x1004] ss:$16 sps:$4 sm:$0xff]  }
 0xb20   :  { %11132 = vmatpush1.bf16.msra.mxu1 %v14240_v55  ;;  %v14330_v55 = vld [vmem:[%s21368_s5 + $0xe20] ss:$16 sps:$4 sm:$0xff]  }
 0xb21   :  { %11542 = vmatpush1.bf16.msra.mxu0 %v14243_v33  ;;  %11133 = vmatprep.subr.bf16.mxu1 %v14248_v48  ;;  %v14333_v33 = vld [vmem:[%s21368_s5 + $0xe28] ss:$16 sps:$4 sm:$0xff]   ;;  %v14338_v48 = vld [vmem:[%s21368_s5 + $0xe44] ss:$16 sps:$4 sm:$0xff]  }
 0xb22   :  { %11543 = vmatprep.subr.bf16.mxu0 %v14251_v24  ;;  %v14341_v24 = vld [vmem:[%s21368_s5 + $0xe4c] ss:$16 sps:$4 sm:$0xff]  }
 0xb24   :  { %11134 = vmatpush1.bf16.msra.mxu1 %v14246_v21  ;;  %v14336_v21 = vld [vmem:[%s21368_s5 + $0xe40] ss:$16 sps:$4 sm:$0xff]  }
 0xb25   :  { %11544 = vmatpush1.bf16.msra.mxu0 %v14249_v28  ;;  %11135 = vmatprep.subr.bf16.mxu1 %v14254_v34  ;;  %v14339_v28 = vld [vmem:[%s21368_s5 + $0xe48] ss:$16 sps:$4 sm:$0xff]   ;;  %v14344_v34 = vld [vmem:[%s21368_s5 + $0xe64] ss:$16 sps:$4 sm:$0xff]  }
 0xb26   :  { %11545 = vmatprep.subr.bf16.mxu0 %v14257_v19  ;;  %v14347_v19 = vld [vmem:[%s21368_s5 + $0xe6c] ss:$16 sps:$4 sm:$0xff]  }
 0xb28   :  { %11136 = vmatpush1.bf16.msra.mxu1 %v14252_v61  ;;  %v14342_v61 = vld [vmem:[%s21368_s5 + $0xe60] ss:$16 sps:$4 sm:$0xff]  }
 0xb29   :  { %11546 = vmatpush1.bf16.msra.mxu0 %v14255_v31  ;;  %11137 = vmatprep.subr.bf16.mxu1 %v14260_v36  ;;  %v14345_v31 = vld [vmem:[%s21368_s5 + $0xe68] ss:$16 sps:$4 sm:$0xff]   ;;  %v14350_v36 = vld [vmem:[%s21368_s5 + $0xe84] ss:$16 sps:$4 sm:$0xff]  }
 0xb2a   :  { %11547 = vmatprep.subr.bf16.mxu0 %v14263_v23  ;;  %v14353_v23 = vld [vmem:[%s21368_s5 + $0xe8c] ss:$16 sps:$4 sm:$0xff]  }
 0xb2c   :  { %11138 = vmatpush1.bf16.msra.mxu1 %v14258_v53  ;;  %v14348_v53 = vld [vmem:[%s21368_s5 + $0xe80] ss:$16 sps:$4 sm:$0xff]  }
 0xb2d   :  { %11548 = vmatpush1.bf16.msra.mxu0 %v14261_v3  ;;  %11139 = vmatprep.subr.bf16.mxu1 %v14266_v56  ;;  %v14351_v3 = vld [vmem:[%s21368_s5 + $0xe88] ss:$16 sps:$4 sm:$0xff]   ;;  %v14356_v56 = vld [vmem:[%s21368_s5 + $0xea4] ss:$16 sps:$4 sm:$0xff]  }
 0xb2e   :  { %11549 = vmatprep.subr.bf16.mxu0 %v14269_v14  ;;  %v14359_v14 = vld [vmem:[%s21368_s5 + $0xeac] ss:$16 sps:$4 sm:$0xff]  }
 0xb30   :  { %11140 = vmatpush1.bf16.msra.mxu1 %v14264_v0  ;;  %v14354_v0 = vld [vmem:[%s21368_s5 + $0xea0] ss:$16 sps:$4 sm:$0xff]  }
 0xb31   :  { %11550 = vmatpush1.bf16.msra.mxu0 %v14267_v44  ;;  %11141 = vmatprep.subr.bf16.mxu1 %v14272_v13  ;;  %v14357_v44 = vld [vmem:[%s21368_s5 + $0xea8] ss:$16 sps:$4 sm:$0xff]   ;;  %v14362_v13 = vld [vmem:[%s21368_s5 + $0xec4] ss:$16 sps:$4 sm:$0xff]  }
 0xb32   :  { %11551 = vmatprep.subr.bf16.mxu0 %v14275_v2  ;;  %v14365_v2 = vld [vmem:[%s21368_s5 + $0xecc] ss:$16 sps:$4 sm:$0xff]  }
 0xb34   :  { %11142 = vmatpush1.bf16.msra.mxu1 %v14270_v37  ;;  %v14360_v37 = vld [vmem:[%s21368_s5 + $0xec0] ss:$16 sps:$4 sm:$0xff]  }
 0xb35   :  { %11552 = vmatpush1.bf16.msra.mxu0 %v14273_v18  ;;  %11143 = vmatprep.subr.bf16.mxu1 %v14278_v38  ;;  %v14363_v18 = vld [vmem:[%s21368_s5 + $0xec8] ss:$16 sps:$4 sm:$0xff]   ;;  %v14368_v38 = vld [vmem:[%s21368_s5 + $0xee4] ss:$16 sps:$4 sm:$0xff]  }
 0xb36   :  { %11553 = vmatprep.subr.bf16.mxu0 %v14281_v35  ;;  %v14371_v35 = vld [vmem:[%s21368_s5 + $0xeec] ss:$16 sps:$4 sm:$0xff]  }
 0xb38   :  { %11144 = vmatpush1.bf16.msra.mxu1 %v14276_v51  ;;  %v14366_v51 = vld [vmem:[%s21368_s5 + $0xee0] ss:$16 sps:$4 sm:$0xff]  }
 0xb39   :  { %11554 = vmatpush1.bf16.msra.mxu0 %v14279_v8  ;;  %11145 = vmatprep.subr.bf16.mxu1 %v14284_v60  ;;  %v14369_v8 = vld [vmem:[%s21368_s5 + $0xee8] ss:$16 sps:$4 sm:$0xff]   ;;  %v14374_v60 = vld [vmem:[%s21368_s5 + $0xf04] ss:$16 sps:$4 sm:$0xff]  }
 0xb3a   :  { %11555 = vmatprep.subr.bf16.mxu0 %v14287_v40  ;;  %v14377_v40 = vld [vmem:[%s21368_s5 + $0xf0c] ss:$16 sps:$4 sm:$0xff]  }
 0xb3c   :  { %11146 = vmatpush1.bf16.msra.mxu1 %v14282_v26  ;;  %v14372_v26 = vld [vmem:[%s21368_s5 + $0xf00] ss:$16 sps:$4 sm:$0xff]  }
 0xb3d   :  { %11556 = vmatpush1.bf16.msra.mxu0 %v14285_v46  ;;  %11147 = vmatprep.subr.bf16.mxu1 %v14290_v6  ;;  %v14375_v46 = vld [vmem:[%s21368_s5 + $0xf08] ss:$16 sps:$4 sm:$0xff]   ;;  %v14380_v6 = vld [vmem:[%s21368_s5 + $0xf24] ss:$16 sps:$4 sm:$0xff]  }
 0xb3e   :  { %11557 = vmatprep.subr.bf16.mxu0 %v14293_v29  ;;  %v14383_v29 = vld [vmem:[%s21368_s5 + $0xf2c] ss:$16 sps:$4 sm:$0xff]  }
 0xb40   :  { %11148 = vmatpush1.bf16.msra.mxu1 %v14288_v16  ;;  %v14378_v16 = vld [vmem:[%s21368_s5 + $0xf20] ss:$16 sps:$4 sm:$0xff]  }
 0xb41   :  { %11558 = vmatpush1.bf16.msra.mxu0 %v14291_v57  ;;  %11149 = vmatprep.subr.bf16.mxu1 %v14296_v17  ;;  %v14381_v57 = vld [vmem:[%s21368_s5 + $0xf28] ss:$16 sps:$4 sm:$0xff]   ;;  %v14386_v17 = vld [vmem:[%s21368_s5 + $0xf44] ss:$16 sps:$4 sm:$0xff]  }
 0xb42   :  { %11559 = vmatprep.subr.bf16.mxu0 %v14299_v20  ;;  %v14389_v20 = vld [vmem:[%s21368_s5 + $0xf4c] ss:$16 sps:$4 sm:$0xff]  }
 0xb44   :  { %11150 = vmatpush1.bf16.msra.mxu1 %v14294_v15  ;;  %v14384_v15 = vld [vmem:[%s21368_s5 + $0xf40] ss:$16 sps:$4 sm:$0xff]  }
 0xb45   :  { %11560 = vmatpush1.bf16.msra.mxu0 %v14297_v25  ;;  %11151 = vmatprep.subr.bf16.mxu1 %v14302_v32  ;;  %v14387_v25 = vld [vmem:[%s21368_s5 + $0xf48] ss:$16 sps:$4 sm:$0xff]   ;;  %v14392_v32 = vld [vmem:[%s21368_s5 + $0xf64] ss:$16 sps:$4 sm:$0xff]  }
 0xb46   :  { %11561 = vmatprep.subr.bf16.mxu0 %v14305_v54  ;;  %v14395_v54 = vld [vmem:[%s21368_s5 + $0xf6c] ss:$16 sps:$4 sm:$0xff]  }
 0xb48   :  { %11152 = vmatpush1.bf16.msra.mxu1 %v14300_v52  ;;  %v14390_v52 = vld [vmem:[%s21368_s5 + $0xf60] ss:$16 sps:$4 sm:$0xff]  }
 0xb49   :  { %11562 = vmatpush1.bf16.msra.mxu0 %v14303_v45  ;;  %11153 = vmatprep.subr.bf16.mxu1 %v14308_v58  ;;  %v14393_v45 = vld [vmem:[%s21368_s5 + $0xf68] ss:$16 sps:$4 sm:$0xff]   ;;  %v14398_v58 = vld [vmem:[%s21368_s5 + $0xf84] ss:$16 sps:$4 sm:$0xff]  }
 0xb4a   :  { %11563 = vmatprep.subr.bf16.mxu0 %v14311_v5  ;;  %v14401_v5 = vld [vmem:[%s21368_s5 + $0xf8c] ss:$16 sps:$4 sm:$0xff]  }
 0xb4c   :  { %11154 = vmatpush1.bf16.msra.mxu1 %v14306_v62  ;;  %v14396_v62 = vld [vmem:[%s21368_s5 + $0xf80] ss:$16 sps:$4 sm:$0xff]  }
 0xb4d   :  { %11564 = vmatpush1.bf16.msra.mxu0 %v14309_v7  ;;  %11155 = vmatprep.subr.bf16.mxu1 %v14314_v1  ;;  %v14399_v7 = vld [vmem:[%s21368_s5 + $0xf88] ss:$16 sps:$4 sm:$0xff]   ;;  %v14404_v1 = vld [vmem:[%s21368_s5 + $0xfa4] ss:$16 sps:$4 sm:$0xff]  }
 0xb4e   :  { %11565 = vmatprep.subr.bf16.mxu0 %v14317_v47  ;;  %v14407_v47 = vld [vmem:[%s21368_s5 + $0xfac] ss:$16 sps:$4 sm:$0xff]  }
 0xb50   :  { %11156 = vmatpush1.bf16.msra.mxu1 %v14312_v22  ;;  %v14402_v22 = vld [vmem:[%s21368_s5 + $0xfa0] ss:$16 sps:$4 sm:$0xff]  }
 0xb51   :  { %11566 = vmatpush1.bf16.msra.mxu0 %v14315_v9  ;;  %11157 = vmatprep.subr.bf16.mxu1 %v14320_v30  ;;  %v14405_v9 = vld [vmem:[%s21368_s5 + $0xfa8] ss:$16 sps:$4 sm:$0xff]   ;;  %v14410_v30 = vld [vmem:[%s21368_s5 + $0xfc4] ss:$16 sps:$4 sm:$0xff]  }
 0xb52   :  { %11567 = vmatprep.subr.bf16.mxu0 %v14323_v27  ;;  %v14413_v27 = vld [vmem:[%s21368_s5 + $0xfcc] ss:$16 sps:$4 sm:$0xff]  }
 0xb54   :  { %11158 = vmatpush1.bf16.msra.mxu1 %v14318_v41  ;;  %v14408_v41 = vld [vmem:[%s21368_s5 + $0xfc0] ss:$16 sps:$4 sm:$0xff]  }
 0xb55   :  { %11568 = vmatpush1.bf16.msra.mxu0 %v14321_v42  ;;  %11168 = vmatprep.subr.bf16.mxu1 %v14326_v49  ;;  %v14411_v42 = vld [vmem:[%s21368_s5 + $0xfc8] ss:$16 sps:$4 sm:$0xff]   ;;  %v14416_v49 = vld [vmem:[%s21368_s5 + $0xfe4] ss:$16 sps:$4 sm:$0xff]  }
 0xb56   :  { %11578 = vmatprep.subr.bf16.mxu0 %v14329_v43  ;;  %v14414_v43 = vld [vmem:[%s21368_s5 + $0xfe0] ss:$16 sps:$4 sm:$0xff]  }
 0xb57   :  { %11160 = vmatmul.mubr.bf16.vlgmr.msra.gmra.mrb[148].mxu1 %v7011_v39 }
 0xb58   :  { %11570 = vmatmul.mubr.bf16.vlgmr.msra.gmra.mrb[176].mxu0 %v7011_v39  ;;  %11169 = vmatpush1.bf16.msra.mxu1 %v14324_v59  ;;  %v14417_v59 = vld [vmem:[%s21368_s5 + $0xfe8] ss:$16 sps:$4 sm:$0xff]   ;;  %v6993_v39 = vld [vmem:[#allocation2 + $0x70] sm:$0xff] }
 0xb59   :  { %11200 = vmatprep.mubr.bf16.mxu1 %v7014_v4  ;;  %11579 = vmatpush1.bf16.msra.mxu0 %v14327_v50  ;;  %v14425_v50 = vld [vmem:[%s21368_s5 + $0x100c] ss:$16 sps:$4 sm:$0xff]  }
 0xb5a   :  { %11610 = vmatprep.mubr.bf16.mxu0 %v7014_v4  ;;  %11170 = vmatprep.subr.bf16.mxu1 %v14332_v11  ;;  %v14420_v11 = vld [vmem:[%s21368_s5 + $0x1000] ss:$16 sps:$4 sm:$0xff]   ;;  %v6996_v4 = vld [vmem:[#allocation2 + $0x88] sm:$0xff] }
 0xb5b   :  { %11580 = vmatprep.subr.bf16.mxu0 %v14335_v63  ;;  %v7013_v63 = vpack.c.bf16 %v6993_v39, %v6993_v39  ;;  %v14515_v39 = vld [vmem:[%s21368_s5 + $0x11ec] ss:$16 sps:$4 sm:$0xff]  }
 0xb5c   :  { %11171 = vmatpush1.bf16.msra.mxu1 %v14330_v55  ;;  %v14423_v55 = vld [vmem:[%s21368_s5 + $0x1008] ss:$16 sps:$4 sm:$0xff]  }
 0xb5d   :  { %11581 = vmatpush1.bf16.msra.mxu0 %v14333_v33  ;;  %11172 = vmatprep.subr.bf16.mxu1 %v14338_v48  ;;  %v14428_v33 = vld [vmem:[%s21368_s5 + $0x1024] ss:$16 sps:$4 sm:$0xff]   ;;  %v7016_v48 = vpack.c.bf16 %v6996_v4, %v6996_v4 }
 0xb5e   :  { %11582 = vmatprep.subr.bf16.mxu0 %v14341_v24  ;;  %v14431_v24 = vld [vmem:[%s21368_s5 + $0x102c] ss:$16 sps:$4 sm:$0xff]   ;;  %v14518_v4 = vld [vmem:[%s21368_s5 + $0x1204] ss:$16 sps:$4 sm:$0xff]  }
 0xb60   :  { %11173 = vmatpush1.bf16.msra.mxu1 %v14336_v21  ;;  %v14426_v21 = vld [vmem:[%s21368_s5 + $0x1020] ss:$16 sps:$4 sm:$0xff]  }
 0xb61   :  { %11583 = vmatpush1.bf16.msra.mxu0 %v14339_v28  ;;  %11174 = vmatprep.subr.bf16.mxu1 %v14344_v34  ;;  %v14429_v28 = vld [vmem:[%s21368_s5 + $0x1028] ss:$16 sps:$4 sm:$0xff]   ;;  %v14434_v34 = vld [vmem:[%s21368_s5 + $0x1044] ss:$16 sps:$4 sm:$0xff]  }
 0xb62   :  { %11584 = vmatprep.subr.bf16.mxu0 %v14347_v19  ;;  %v14437_v19 = vld [vmem:[%s21368_s5 + $0x104c] ss:$16 sps:$4 sm:$0xff]  }
 0xb64   :  { %11175 = vmatpush1.bf16.msra.mxu1 %v14342_v61  ;;  %v14432_v61 = vld [vmem:[%s21368_s5 + $0x1040] ss:$16 sps:$4 sm:$0xff]  }
 0xb65   :  { %11585 = vmatpush1.bf16.msra.mxu0 %v14345_v31  ;;  %11176 = vmatprep.subr.bf16.mxu1 %v14350_v36  ;;  %v14435_v31 = vld [vmem:[%s21368_s5 + $0x1048] ss:$16 sps:$4 sm:$0xff]   ;;  %v14440_v36 = vld [vmem:[%s21368_s5 + $0x1064] ss:$16 sps:$4 sm:$0xff]  }
 0xb66   :  { %11586 = vmatprep.subr.bf16.mxu0 %v14353_v23  ;;  %v14443_v23 = vld [vmem:[%s21368_s5 + $0x106c] ss:$16 sps:$4 sm:$0xff]  }
 0xb68   :  { %11177 = vmatpush1.bf16.msra.mxu1 %v14348_v53  ;;  %v14438_v53 = vld [vmem:[%s21368_s5 + $0x1060] ss:$16 sps:$4 sm:$0xff]  }
 0xb69   :  { %11587 = vmatpush1.bf16.msra.mxu0 %v14351_v3  ;;  %11178 = vmatprep.subr.bf16.mxu1 %v14356_v56  ;;  %v14441_v3 = vld [vmem:[%s21368_s5 + $0x1068] ss:$16 sps:$4 sm:$0xff]   ;;  %v14446_v56 = vld [vmem:[%s21368_s5 + $0x1084] ss:$16 sps:$4 sm:$0xff]  }
 0xb6a   :  { %11588 = vmatprep.subr.bf16.mxu0 %v14359_v14  ;;  %v14449_v14 = vld [vmem:[%s21368_s5 + $0x108c] ss:$16 sps:$4 sm:$0xff]  }
 0xb6c   :  { %11179 = vmatpush1.bf16.msra.mxu1 %v14354_v0  ;;  %v14444_v0 = vld [vmem:[%s21368_s5 + $0x1080] ss:$16 sps:$4 sm:$0xff]  }
 0xb6d   :  { %11589 = vmatpush1.bf16.msra.mxu0 %v14357_v44  ;;  %11180 = vmatprep.subr.bf16.mxu1 %v14362_v13  ;;  %v14447_v44 = vld [vmem:[%s21368_s5 + $0x1088] ss:$16 sps:$4 sm:$0xff]   ;;  %v14452_v13 = vld [vmem:[%s21368_s5 + $0x10a4] ss:$16 sps:$4 sm:$0xff]  }
 0xb6e   :  { %11590 = vmatprep.subr.bf16.mxu0 %v14365_v2  ;;  %v14455_v2 = vld [vmem:[%s21368_s5 + $0x10ac] ss:$16 sps:$4 sm:$0xff]  }
 0xb70   :  { %11181 = vmatpush1.bf16.msra.mxu1 %v14360_v37  ;;  %v14450_v37 = vld [vmem:[%s21368_s5 + $0x10a0] ss:$16 sps:$4 sm:$0xff]  }
 0xb71   :  { %11591 = vmatpush1.bf16.msra.mxu0 %v14363_v18  ;;  %11182 = vmatprep.subr.bf16.mxu1 %v14368_v38  ;;  %v14453_v18 = vld [vmem:[%s21368_s5 + $0x10a8] ss:$16 sps:$4 sm:$0xff]   ;;  %v14458_v38 = vld [vmem:[%s21368_s5 + $0x10c4] ss:$16 sps:$4 sm:$0xff]  }
 0xb72   :  { %11592 = vmatprep.subr.bf16.mxu0 %v14371_v35  ;;  %v14461_v35 = vld [vmem:[%s21368_s5 + $0x10cc] ss:$16 sps:$4 sm:$0xff]  }
 0xb74   :  { %11183 = vmatpush1.bf16.msra.mxu1 %v14366_v51  ;;  %v14456_v51 = vld [vmem:[%s21368_s5 + $0x10c0] ss:$16 sps:$4 sm:$0xff]  }
 0xb75   :  { %11593 = vmatpush1.bf16.msra.mxu0 %v14369_v8  ;;  %11184 = vmatprep.subr.bf16.mxu1 %v14374_v60  ;;  %v14459_v8 = vld [vmem:[%s21368_s5 + $0x10c8] ss:$16 sps:$4 sm:$0xff]   ;;  %v14464_v60 = vld [vmem:[%s21368_s5 + $0x10e4] ss:$16 sps:$4 sm:$0xff]  }
 0xb76   :  { %11594 = vmatprep.subr.bf16.mxu0 %v14377_v40  ;;  %v14467_v40 = vld [vmem:[%s21368_s5 + $0x10ec] ss:$16 sps:$4 sm:$0xff]  }
 0xb78   :  { %11185 = vmatpush1.bf16.msra.mxu1 %v14372_v26  ;;  %v14462_v26 = vld [vmem:[%s21368_s5 + $0x10e0] ss:$16 sps:$4 sm:$0xff]  }
 0xb79   :  { %11595 = vmatpush1.bf16.msra.mxu0 %v14375_v46  ;;  %11186 = vmatprep.subr.bf16.mxu1 %v14380_v6  ;;  %v14465_v46 = vld [vmem:[%s21368_s5 + $0x10e8] ss:$16 sps:$4 sm:$0xff]   ;;  %v14470_v6 = vld [vmem:[%s21368_s5 + $0x1104] ss:$16 sps:$4 sm:$0xff]  }
 0xb7a   :  { %11596 = vmatprep.subr.bf16.mxu0 %v14383_v29  ;;  %v14473_v29 = vld [vmem:[%s21368_s5 + $0x110c] ss:$16 sps:$4 sm:$0xff]  }
 0xb7c   :  { %11187 = vmatpush1.bf16.msra.mxu1 %v14378_v16  ;;  %v14468_v16 = vld [vmem:[%s21368_s5 + $0x1100] ss:$16 sps:$4 sm:$0xff]  }
 0xb7d   :  { %11597 = vmatpush1.bf16.msra.mxu0 %v14381_v57  ;;  %11188 = vmatprep.subr.bf16.mxu1 %v14386_v17  ;;  %v14471_v57 = vld [vmem:[%s21368_s5 + $0x1108] ss:$16 sps:$4 sm:$0xff]   ;;  %v14476_v17 = vld [vmem:[%s21368_s5 + $0x1124] ss:$16 sps:$4 sm:$0xff]  }
 0xb7e   :  { %11598 = vmatprep.subr.bf16.mxu0 %v14389_v20  ;;  %v14479_v20 = vld [vmem:[%s21368_s5 + $0x112c] ss:$16 sps:$4 sm:$0xff]  }
 0xb80   :  { %11189 = vmatpush1.bf16.msra.mxu1 %v14384_v15  ;;  %v14474_v15 = vld [vmem:[%s21368_s5 + $0x1120] ss:$16 sps:$4 sm:$0xff]  }
 0xb81   :  { %11599 = vmatpush1.bf16.msra.mxu0 %v14387_v25  ;;  %11190 = vmatprep.subr.bf16.mxu1 %v14392_v32  ;;  %v14477_v25 = vld [vmem:[%s21368_s5 + $0x1128] ss:$16 sps:$4 sm:$0xff]   ;;  %v14482_v32 = vld [vmem:[%s21368_s5 + $0x1144] ss:$16 sps:$4 sm:$0xff]  }
 0xb82   :  { %11600 = vmatprep.subr.bf16.mxu0 %v14395_v54  ;;  %v14485_v54 = vld [vmem:[%s21368_s5 + $0x114c] ss:$16 sps:$4 sm:$0xff]  }
 0xb84   :  { %11191 = vmatpush1.bf16.msra.mxu1 %v14390_v52  ;;  %v14480_v52 = vld [vmem:[%s21368_s5 + $0x1140] ss:$16 sps:$4 sm:$0xff]  }
 0xb85   :  { %11601 = vmatpush1.bf16.msra.mxu0 %v14393_v45  ;;  %11192 = vmatprep.subr.bf16.mxu1 %v14398_v58  ;;  %v14483_v45 = vld [vmem:[%s21368_s5 + $0x1148] ss:$16 sps:$4 sm:$0xff]   ;;  %v14488_v58 = vld [vmem:[%s21368_s5 + $0x1164] ss:$16 sps:$4 sm:$0xff]  }
 0xb86   :  { %11602 = vmatprep.subr.bf16.mxu0 %v14401_v5  ;;  %v14491_v5 = vld [vmem:[%s21368_s5 + $0x116c] ss:$16 sps:$4 sm:$0xff]  }
 0xb88   :  { %11193 = vmatpush1.bf16.msra.mxu1 %v14396_v62  ;;  %v14486_v62 = vld [vmem:[%s21368_s5 + $0x1160] ss:$16 sps:$4 sm:$0xff]  }
 0xb89   :  { %11603 = vmatpush1.bf16.msra.mxu0 %v14399_v7  ;;  %11194 = vmatprep.subr.bf16.mxu1 %v14404_v1  ;;  %v14489_v7 = vld [vmem:[%s21368_s5 + $0x1168] ss:$16 sps:$4 sm:$0xff]   ;;  %v14494_v1 = vld [vmem:[%s21368_s5 + $0x1184] ss:$16 sps:$4 sm:$0xff]  }
 0xb8a   :  { %11604 = vmatprep.subr.bf16.mxu0 %v14407_v47  ;;  %v14497_v47 = vld [vmem:[%s21368_s5 + $0x118c] ss:$16 sps:$4 sm:$0xff]  }
 0xb8c   :  { %11195 = vmatpush1.bf16.msra.mxu1 %v14402_v22  ;;  %v14492_v22 = vld [vmem:[%s21368_s5 + $0x1180] ss:$16 sps:$4 sm:$0xff]  }
 0xb8d   :  { %11605 = vmatpush1.bf16.msra.mxu0 %v14405_v9  ;;  %11196 = vmatprep.subr.bf16.mxu1 %v14410_v30  ;;  %v14495_v9 = vld [vmem:[%s21368_s5 + $0x1188] ss:$16 sps:$4 sm:$0xff]   ;;  %v14500_v30 = vld [vmem:[%s21368_s5 + $0x11a4] ss:$16 sps:$4 sm:$0xff]  }
 0xb8e   :  { %11606 = vmatprep.subr.bf16.mxu0 %v14413_v27  ;;  %v14503_v27 = vld [vmem:[%s21368_s5 + $0x11ac] ss:$16 sps:$4 sm:$0xff]  }
 0xb90   :  { %11197 = vmatpush1.bf16.msra.mxu1 %v14408_v41  ;;  %v14498_v41 = vld [vmem:[%s21368_s5 + $0x11a0] ss:$16 sps:$4 sm:$0xff]  }
 0xb91   :  { %11607 = vmatpush1.bf16.msra.mxu0 %v14411_v42  ;;  %11198 = vmatprep.subr.bf16.mxu1 %v14416_v49  ;;  %v14501_v42 = vld [vmem:[%s21368_s5 + $0x11a8] ss:$16 sps:$4 sm:$0xff]   ;;  %v14506_v49 = vld [vmem:[%s21368_s5 + $0x11c4] ss:$16 sps:$4 sm:$0xff]  }
 0xb92   :  { %11608 = vmatprep.subr.bf16.mxu0 %v14419_v12  ;;  %v14509_v12 = vld [vmem:[%s21368_s5 + $0x11cc] ss:$16 sps:$4 sm:$0xff]  }
 0xb94   :  { %11199 = vmatpush1.bf16.msra.mxu1 %v14414_v43  ;;  %v14504_v43 = vld [vmem:[%s21368_s5 + $0x11c0] ss:$16 sps:$4 sm:$0xff]  }
 0xb95   :  { %11609 = vmatpush1.bf16.msra.mxu0 %v14417_v59  ;;  %11209 = vmatprep.subr.bf16.mxu1 %v14422_v10  ;;  %v14507_v59 = vld [vmem:[%s21368_s5 + $0x11c8] ss:$16 sps:$4 sm:$0xff]   ;;  %v14512_v10 = vld [vmem:[%s21368_s5 + $0x11e4] ss:$16 sps:$4 sm:$0xff]  }
 0xb96   :  { %11619 = vmatprep.subr.bf16.mxu0 %v14425_v50  ;;  %v14510_v50 = vld [vmem:[%s21368_s5 + $0x11e0] ss:$16 sps:$4 sm:$0xff]  }
 0xb97   :  { %11201 = vmatmul.mubr.bf16.vlgmr.msra.gmra.mrb[148].mxu1 %v7013_v63 }
 0xb98   :  { %11611 = vmatmul.mubr.bf16.vlgmr.msra.gmra.mrb[176].mxu0 %v7013_v63  ;;  %11210 = vmatpush1.bf16.msra.mxu1 %v14420_v11  ;;  %v14513_v11 = vld [vmem:[%s21368_s5 + $0x11e8] ss:$16 sps:$4 sm:$0xff]   ;;  %v6995_v63 = vld [vmem:[#allocation2 + $0x80] sm:$0xff] }
 0xb99   :  { %11241 = vmatprep.mubr.bf16.mxu1 %v7016_v48  ;;  %11620 = vmatpush1.bf16.msra.mxu0 %v14423_v55  ;;  %v14521_v55 = vld [vmem:[%s21368_s5 + $0x120c] ss:$16 sps:$4 sm:$0xff]  }
 0xb9a   :  { %11651 = vmatprep.mubr.bf16.mxu0 %v7016_v48  ;;  %11211 = vmatprep.subr.bf16.mxu1 %v14428_v33  ;;  %v14516_v33 = vld [vmem:[%s21368_s5 + $0x1200] ss:$16 sps:$4 sm:$0xff]   ;;  %v6998_v48 = vld [vmem:[#allocation2 + $0x98] sm:$0xff] }
 0xb9b   :  { %11621 = vmatprep.subr.bf16.mxu0 %v14431_v24  ;;  %v7015_v24 = vpack.c.bf16 %v6995_v63, %v6995_v63  ;;  %v14611_v63 = vld [vmem:[%s21368_s5 + $0x13ec] ss:$16 sps:$4 sm:$0xff]  }
 0xb9c   :  { %11212 = vmatpush1.bf16.msra.mxu1 %v14426_v21  ;;  %v14519_v21 = vld [vmem:[%s21368_s5 + $0x1208] ss:$16 sps:$4 sm:$0xff]  }
 0xb9d   :  { %11622 = vmatpush1.bf16.msra.mxu0 %v14429_v28  ;;  %11213 = vmatprep.subr.bf16.mxu1 %v14434_v34  ;;  %v14524_v28 = vld [vmem:[%s21368_s5 + $0x1224] ss:$16 sps:$4 sm:$0xff]   ;;  %v7018_v34 = vpack.c.bf16 %v6998_v48, %v6998_v48  ;;  %v14606_v48 = vld [vmem:[%s21368_s5 + $0x13e0] ss:$16 sps:$4 sm:$0xff]  }
 0xb9e   :  { %11623 = vmatprep.subr.bf16.mxu0 %v14437_v19  ;;  %v14527_v19 = vld [vmem:[%s21368_s5 + $0x122c] ss:$16 sps:$4 sm:$0xff]  }
 0xba0   :  { %11214 = vmatpush1.bf16.msra.mxu1 %v14432_v61  ;;  %v14522_v61 = vld [vmem:[%s21368_s5 + $0x1220] ss:$16 sps:$4 sm:$0xff]  }
 0xba1   :  { %11624 = vmatpush1.bf16.msra.mxu0 %v14435_v31  ;;  %11215 = vmatprep.subr.bf16.mxu1 %v14440_v36  ;;  %v14525_v31 = vld [vmem:[%s21368_s5 + $0x1228] ss:$16 sps:$4 sm:$0xff]   ;;  %v14530_v36 = vld [vmem:[%s21368_s5 + $0x1244] ss:$16 sps:$4 sm:$0xff]  }
 0xba2   :  { %11625 = vmatprep.subr.bf16.mxu0 %v14443_v23  ;;  %v14533_v23 = vld [vmem:[%s21368_s5 + $0x124c] ss:$16 sps:$4 sm:$0xff]  }
 0xba4   :  { %11216 = vmatpush1.bf16.msra.mxu1 %v14438_v53  ;;  %v14528_v53 = vld [vmem:[%s21368_s5 + $0x1240] ss:$16 sps:$4 sm:$0xff]  }
 0xba5   :  { %11626 = vmatpush1.bf16.msra.mxu0 %v14441_v3  ;;  %11217 = vmatprep.subr.bf16.mxu1 %v14446_v56  ;;  %v14531_v3 = vld [vmem:[%s21368_s5 + $0x1248] ss:$16 sps:$4 sm:$0xff]   ;;  %v14536_v56 = vld [vmem:[%s21368_s5 + $0x1264] ss:$16 sps:$4 sm:$0xff]  }
 0xba6   :  { %11627 = vmatprep.subr.bf16.mxu0 %v14449_v14  ;;  %v14539_v14 = vld [vmem:[%s21368_s5 + $0x126c] ss:$16 sps:$4 sm:$0xff]  }
 0xba8   :  { %11218 = vmatpush1.bf16.msra.mxu1 %v14444_v0  ;;  %v14534_v0 = vld [vmem:[%s21368_s5 + $0x1260] ss:$16 sps:$4 sm:$0xff]  }
 0xba9   :  { %11628 = vmatpush1.bf16.msra.mxu0 %v14447_v44  ;;  %11219 = vmatprep.subr.bf16.mxu1 %v14452_v13  ;;  %v14537_v44 = vld [vmem:[%s21368_s5 + $0x1268] ss:$16 sps:$4 sm:$0xff]   ;;  %v14542_v13 = vld [vmem:[%s21368_s5 + $0x1284] ss:$16 sps:$4 sm:$0xff]  }
 0xbaa   :  { %11629 = vmatprep.subr.bf16.mxu0 %v14455_v2  ;;  %v14545_v2 = vld [vmem:[%s21368_s5 + $0x128c] ss:$16 sps:$4 sm:$0xff]  }
 0xbac   :  { %11220 = vmatpush1.bf16.msra.mxu1 %v14450_v37  ;;  %v14540_v37 = vld [vmem:[%s21368_s5 + $0x1280] ss:$16 sps:$4 sm:$0xff]  }
 0xbad   :  { %11630 = vmatpush1.bf16.msra.mxu0 %v14453_v18  ;;  %11221 = vmatprep.subr.bf16.mxu1 %v14458_v38  ;;  %v14543_v18 = vld [vmem:[%s21368_s5 + $0x1288] ss:$16 sps:$4 sm:$0xff]   ;;  %v14548_v38 = vld [vmem:[%s21368_s5 + $0x12a4] ss:$16 sps:$4 sm:$0xff]  }
 0xbae   :  { %11631 = vmatprep.subr.bf16.mxu0 %v14461_v35  ;;  %v14551_v35 = vld [vmem:[%s21368_s5 + $0x12ac] ss:$16 sps:$4 sm:$0xff]  }
 0xbb0   :  { %11222 = vmatpush1.bf16.msra.mxu1 %v14456_v51  ;;  %v14546_v51 = vld [vmem:[%s21368_s5 + $0x12a0] ss:$16 sps:$4 sm:$0xff]  }
 0xbb1   :  { %11632 = vmatpush1.bf16.msra.mxu0 %v14459_v8  ;;  %11223 = vmatprep.subr.bf16.mxu1 %v14464_v60  ;;  %v14549_v8 = vld [vmem:[%s21368_s5 + $0x12a8] ss:$16 sps:$4 sm:$0xff]   ;;  %v14554_v60 = vld [vmem:[%s21368_s5 + $0x12c4] ss:$16 sps:$4 sm:$0xff]  }
 0xbb2   :  { %11633 = vmatprep.subr.bf16.mxu0 %v14467_v40  ;;  %v14557_v40 = vld [vmem:[%s21368_s5 + $0x12cc] ss:$16 sps:$4 sm:$0xff]  }
 0xbb4   :  { %11224 = vmatpush1.bf16.msra.mxu1 %v14462_v26  ;;  %v14552_v26 = vld [vmem:[%s21368_s5 + $0x12c0] ss:$16 sps:$4 sm:$0xff]  }
 0xbb5   :  { %11634 = vmatpush1.bf16.msra.mxu0 %v14465_v46  ;;  %11225 = vmatprep.subr.bf16.mxu1 %v14470_v6  ;;  %v14555_v46 = vld [vmem:[%s21368_s5 + $0x12c8] ss:$16 sps:$4 sm:$0xff]   ;;  %v14560_v6 = vld [vmem:[%s21368_s5 + $0x12e4] ss:$16 sps:$4 sm:$0xff]  }
 0xbb6   :  { %11635 = vmatprep.subr.bf16.mxu0 %v14473_v29  ;;  %v14563_v29 = vld [vmem:[%s21368_s5 + $0x12ec] ss:$16 sps:$4 sm:$0xff]  }
 0xbb8   :  { %11226 = vmatpush1.bf16.msra.mxu1 %v14468_v16  ;;  %v14558_v16 = vld [vmem:[%s21368_s5 + $0x12e0] ss:$16 sps:$4 sm:$0xff]  }
 0xbb9   :  { %11636 = vmatpush1.bf16.msra.mxu0 %v14471_v57  ;;  %11227 = vmatprep.subr.bf16.mxu1 %v14476_v17  ;;  %v14561_v57 = vld [vmem:[%s21368_s5 + $0x12e8] ss:$16 sps:$4 sm:$0xff]   ;;  %v14566_v17 = vld [vmem:[%s21368_s5 + $0x1304] ss:$16 sps:$4 sm:$0xff]  }
 0xbba   :  { %11637 = vmatprep.subr.bf16.mxu0 %v14479_v20  ;;  %v14569_v20 = vld [vmem:[%s21368_s5 + $0x130c] ss:$16 sps:$4 sm:$0xff]  }
 0xbbc   :  { %11228 = vmatpush1.bf16.msra.mxu1 %v14474_v15  ;;  %v14564_v15 = vld [vmem:[%s21368_s5 + $0x1300] ss:$16 sps:$4 sm:$0xff]  }
 0xbbd   :  { %11638 = vmatpush1.bf16.msra.mxu0 %v14477_v25  ;;  %11229 = vmatprep.subr.bf16.mxu1 %v14482_v32  ;;  %v14567_v25 = vld [vmem:[%s21368_s5 + $0x1308] ss:$16 sps:$4 sm:$0xff]   ;;  %v14572_v32 = vld [vmem:[%s21368_s5 + $0x1324] ss:$16 sps:$4 sm:$0xff]  }
 0xbbe   :  { %11639 = vmatprep.subr.bf16.mxu0 %v14485_v54  ;;  %v14575_v54 = vld [vmem:[%s21368_s5 + $0x132c] ss:$16 sps:$4 sm:$0xff]  }
 0xbc0   :  { %11230 = vmatpush1.bf16.msra.mxu1 %v14480_v52  ;;  %v14570_v52 = vld [vmem:[%s21368_s5 + $0x1320] ss:$16 sps:$4 sm:$0xff]  }
 0xbc1   :  { %11640 = vmatpush1.bf16.msra.mxu0 %v14483_v45  ;;  %11231 = vmatprep.subr.bf16.mxu1 %v14488_v58  ;;  %v14573_v45 = vld [vmem:[%s21368_s5 + $0x1328] ss:$16 sps:$4 sm:$0xff]   ;;  %v14578_v58 = vld [vmem:[%s21368_s5 + $0x1344] ss:$16 sps:$4 sm:$0xff]  }
 0xbc2   :  { %11641 = vmatprep.subr.bf16.mxu0 %v14491_v5  ;;  %v14581_v5 = vld [vmem:[%s21368_s5 + $0x134c] ss:$16 sps:$4 sm:$0xff]  }
 0xbc4   :  { %11232 = vmatpush1.bf16.msra.mxu1 %v14486_v62  ;;  %v14576_v62 = vld [vmem:[%s21368_s5 + $0x1340] ss:$16 sps:$4 sm:$0xff]  }
 0xbc5   :  { %11642 = vmatpush1.bf16.msra.mxu0 %v14489_v7  ;;  %11233 = vmatprep.subr.bf16.mxu1 %v14494_v1  ;;  %v14579_v7 = vld [vmem:[%s21368_s5 + $0x1348] ss:$16 sps:$4 sm:$0xff]   ;;  %v14584_v1 = vld [vmem:[%s21368_s5 + $0x1364] ss:$16 sps:$4 sm:$0xff]  }
 0xbc6   :  { %11643 = vmatprep.subr.bf16.mxu0 %v14497_v47  ;;  %v14587_v47 = vld [vmem:[%s21368_s5 + $0x136c] ss:$16 sps:$4 sm:$0xff]  }
 0xbc8   :  { %11234 = vmatpush1.bf16.msra.mxu1 %v14492_v22  ;;  %v14582_v22 = vld [vmem:[%s21368_s5 + $0x1360] ss:$16 sps:$4 sm:$0xff]  }
 0xbc9   :  { %11644 = vmatpush1.bf16.msra.mxu0 %v14495_v9  ;;  %11235 = vmatprep.subr.bf16.mxu1 %v14500_v30  ;;  %v14585_v9 = vld [vmem:[%s21368_s5 + $0x1368] ss:$16 sps:$4 sm:$0xff]   ;;  %v14590_v30 = vld [vmem:[%s21368_s5 + $0x1384] ss:$16 sps:$4 sm:$0xff]  }
 0xbca   :  { %11645 = vmatprep.subr.bf16.mxu0 %v14503_v27  ;;  %v14593_v27 = vld [vmem:[%s21368_s5 + $0x138c] ss:$16 sps:$4 sm:$0xff]  }
 0xbcc   :  { %11236 = vmatpush1.bf16.msra.mxu1 %v14498_v41  ;;  %v14588_v41 = vld [vmem:[%s21368_s5 + $0x1380] ss:$16 sps:$4 sm:$0xff]  }
 0xbcd   :  { %11646 = vmatpush1.bf16.msra.mxu0 %v14501_v42  ;;  %11237 = vmatprep.subr.bf16.mxu1 %v14506_v49  ;;  %v14591_v42 = vld [vmem:[%s21368_s5 + $0x1388] ss:$16 sps:$4 sm:$0xff]   ;;  %v14596_v49 = vld [vmem:[%s21368_s5 + $0x13a4] ss:$16 sps:$4 sm:$0xff]  }
 0xbce   :  { %11647 = vmatprep.subr.bf16.mxu0 %v14509_v12  ;;  %v14599_v12 = vld [vmem:[%s21368_s5 + $0x13ac] ss:$16 sps:$4 sm:$0xff]  }
 0xbd0   :  { %11238 = vmatpush1.bf16.msra.mxu1 %v14504_v43  ;;  %v14594_v43 = vld [vmem:[%s21368_s5 + $0x13a0] ss:$16 sps:$4 sm:$0xff]  }
 0xbd1   :  { %11648 = vmatpush1.bf16.msra.mxu0 %v14507_v59  ;;  %11239 = vmatprep.subr.bf16.mxu1 %v14512_v10  ;;  %v14597_v59 = vld [vmem:[%s21368_s5 + $0x13a8] ss:$16 sps:$4 sm:$0xff]   ;;  %v14602_v10 = vld [vmem:[%s21368_s5 + $0x13c4] ss:$16 sps:$4 sm:$0xff]  }
 0xbd2   :  { %11649 = vmatprep.subr.bf16.mxu0 %v14515_v39  ;;  %v14605_v39 = vld [vmem:[%s21368_s5 + $0x13cc] ss:$16 sps:$4 sm:$0xff]  }
 0xbd4   :  { %11240 = vmatpush1.bf16.msra.mxu1 %v14510_v50  ;;  %v14600_v50 = vld [vmem:[%s21368_s5 + $0x13c0] ss:$16 sps:$4 sm:$0xff]  }
 0xbd5   :  { %11650 = vmatpush1.bf16.msra.mxu0 %v14513_v11  ;;  %11250 = vmatprep.subr.bf16.mxu1 %v14518_v4  ;;  %v14603_v11 = vld [vmem:[%s21368_s5 + $0x13c8] ss:$16 sps:$4 sm:$0xff]   ;;  %v14608_v4 = vld [vmem:[%s21368_s5 + $0x13e4] ss:$16 sps:$4 sm:$0xff]  }
 0xbd6   :  { %11660 = vmatprep.subr.bf16.mxu0 %v14521_v55  ;;  %v11721_v55 = vld [vmem:[%s21369_s7 + $0x80] sm:$0xff] }
 0xbd7   :  { %11242 = vmatmul.mubr.bf16.vlgmr.msra.gmra.mrb[148].mxu1 %v7015_v24 }
 0xbd8   :  { %11652 = vmatmul.mubr.bf16.vlgmr.msra.gmra.mrb[176].mxu0 %v7015_v24  ;;  %11251 = vmatpush1.bf16.msra.mxu1 %v14516_v33  ;;  %v11722_v33 = vld [vmem:[%s21369_s7 + $0x88] sm:$0xff] }
 0xbd9   :  { %11282 = vmatprep.mubr.bf16.mxu1 %v7018_v34  ;;  %11661 = vmatpush1.bf16.msra.mxu0 %v14519_v21  ;;  %v14609_v24 = vld [vmem:[%s21368_s5 + $0x13e8] ss:$16 sps:$4 sm:$0xff]   ;;  %v13020_v21 = vpack.c.bf16 %v11722_v33, %v11721_v55  ;;  %v11737_v33 = vld [vmem:[%s21369_s7 + $0x100] sm:$0xff] }
 0xbda   :  { %11692 = vmatprep.mubr.bf16.mxu0 %v7018_v34  ;;  %11252 = vmatprep.subr.bf16.mxu1 %v14524_v28  ;;  %v11705_v28 = vld [vmem:[%s21369_s7] sm:$0xff]  ;;  %v11706_v34 = vld [vmem:[%s21369_s7 + $0x8] sm:$0xff] }
 0xbdb   :  { %11662 = vmatprep.subr.bf16.mxu0 %v14527_v19  ;;  %v6997_v19 = vld [vmem:[#allocation2 + $0x90] sm:$0xff] }
 0xbdc   :  { %11253 = vmatpush1.bf16.msra.mxu1 %v14522_v61  ;;  %v11723_v61 = vld [vmem:[%s21369_s7 + $0x90] sm:$0xff] }
 0xbdd   :  { %11663 = vmatpush1.bf16.msra.mxu0 %v14525_v31  ;;  %11254 = vmatprep.subr.bf16.mxu1 %v14530_v36  ;;  %v11724_v31 = vld [vmem:[%s21369_s7 + $0x98] sm:$0xff]  ;;  %v13022_v36 = vpack.c.bf16 %v11706_v34, %v11705_v28 }
 0xbde   :  { %11664 = vmatprep.subr.bf16.mxu0 %v14533_v23  ;;  %v7017_v23 = vpack.c.bf16 %v6997_v19, %v6997_v19 }
 0xbe0   :  { %11255 = vmatpush1.bf16.msra.mxu1 %v14528_v53  ;;  %v13024_v53 = vpack.c.bf16 %v11724_v31, %v11723_v61 }
 0xbe1   :  { %11665 = vmatpush1.bf16.msra.mxu0 %v14531_v3  ;;  %11256 = vmatprep.subr.bf16.mxu1 %v14536_v56  ;;  %v11707_v3 = vld [vmem:[%s21369_s7 + $0x10] sm:$0xff]  ;;  %v11708_v56 = vld [vmem:[%s21369_s7 + $0x18] sm:$0xff] }
 0xbe2   :  { %11666 = vmatprep.subr.bf16.mxu0 %v14539_v14  ;;  %v11725_v14 = vld [vmem:[%s21369_s7 + $0xa0] sm:$0xff] }
 0xbe4   :  { %11257 = vmatpush1.bf16.msra.mxu1 %v14534_v0  ;;  %v11726_v0 = vld [vmem:[%s21369_s7 + $0xa8] sm:$0xff] }
 0xbe5   :  { %11667 = vmatpush1.bf16.msra.mxu0 %v14537_v44  ;;  %11258 = vmatprep.subr.bf16.mxu1 %v14542_v13  ;;  %v13026_v44 = vpack.c.bf16 %v11708_v56, %v11707_v3  ;;  %v13028_v13 = vpack.c.bf16 %v11726_v0, %v11725_v14  ;;  %v11739_v3 = vld [vmem:[%s21369_s7 + $0x110] sm:$0xff]  ;;  %v11740_v56 = vld [vmem:[%s21369_s7 + $0x118] sm:$0xff] }
 0xbe6   :  { %11668 = vmatprep.subr.bf16.mxu0 %v14545_v2  ;;  %v11709_v2 = vld [vmem:[%s21369_s7 + $0x20] sm:$0xff]  ;;  %v13056_v0 = vpack.c.bf16 %v11740_v56, %v11739_v3 }
 0xbe8   :  { %11259 = vmatpush1.bf16.msra.mxu1 %v14540_v37  ;;  %v11710_v37 = vld [vmem:[%s21369_s7 + $0x28] sm:$0xff] }
 0xbe9   :  { %11669 = vmatpush1.bf16.msra.mxu0 %v14543_v18  ;;  %11260 = vmatprep.subr.bf16.mxu1 %v14548_v38  ;;  %v11727_v18 = vld [vmem:[%s21369_s7 + $0xb0] sm:$0xff]  ;;  %v11728_v38 = vld [vmem:[%s21369_s7 + $0xb8] sm:$0xff] }
 0xbea   :  { %11670 = vmatprep.subr.bf16.mxu0 %v14551_v35  ;;  %v13030_v35 = vpack.c.bf16 %v11710_v37, %v11709_v2  ;;  %v11743_v37 = vld [vmem:[%s21369_s7 + $0x130] sm:$0xff] }
 0xbec   :  { %11261 = vmatpush1.bf16.msra.mxu1 %v14546_v51  ;;  %v13032_v51 = vpack.c.bf16 %v11728_v38, %v11727_v18  ;;  %v11744_v18 = vld [vmem:[%s21369_s7 + $0x138] sm:$0xff] }
 0xbed   :  { %11671 = vmatpush1.bf16.msra.mxu0 %v14549_v8  ;;  %11262 = vmatprep.subr.bf16.mxu1 %v14554_v60  ;;  %v11711_v8 = vld [vmem:[%s21369_s7 + $0x30] sm:$0xff]  ;;  %v11712_v60 = vld [vmem:[%s21369_s7 + $0x38] sm:$0xff]  ;;  %v13062_v38 = vpack.c.bf16 %v11744_v18, %v11743_v37 }
 0xbee   :  { %11672 = vmatprep.subr.bf16.mxu0 %v14557_v40  ;;  %v11729_v40 = vld [vmem:[%s21369_s7 + $0xc0] sm:$0xff] }
 0xbf0   :  { %11263 = vmatpush1.bf16.msra.mxu1 %v14552_v26  ;;  %v11730_v26 = vld [vmem:[%s21369_s7 + $0xc8] sm:$0xff] }
 0xbf1   :  { %11673 = vmatpush1.bf16.msra.mxu0 %v14555_v46  ;;  %11264 = vmatprep.subr.bf16.mxu1 %v14560_v6  ;;  %v13034_v46 = vpack.c.bf16 %v11712_v60, %v11711_v8  ;;  %v13036_v6 = vpack.c.bf16 %v11730_v26, %v11729_v40  ;;  %v11747_v60 = vld [vmem:[%s21369_s7 + $0x150] sm:$0xff]  ;;  %v11748_v40 = vld [vmem:[%s21369_s7 + $0x158] sm:$0xff] }
 0xbf2   :  { %11674 = vmatprep.subr.bf16.mxu0 %v14563_v29  ;;  %v11713_v29 = vld [vmem:[%s21369_s7 + $0x40] sm:$0xff]  ;;  %v13068_v26 = vpack.c.bf16 %v11748_v40, %v11747_v60 }
 0xbf4   :  { %11265 = vmatpush1.bf16.msra.mxu1 %v14558_v16  ;;  %v11714_v16 = vld [vmem:[%s21369_s7 + $0x48] sm:$0xff] }
 0xbf5   :  { %11675 = vmatpush1.bf16.msra.mxu0 %v14561_v57  ;;  %11266 = vmatprep.subr.bf16.mxu1 %v14566_v17  ;;  %v11731_v57 = vld [vmem:[%s21369_s7 + $0xd0] sm:$0xff]  ;;  %v11732_v17 = vld [vmem:[%s21369_s7 + $0xd8] sm:$0xff] }
 0xbf6   :  { %11676 = vmatprep.subr.bf16.mxu0 %v14569_v20  ;;  %v13038_v20 = vpack.c.bf16 %v11714_v16, %v11713_v29  ;;  %v11751_v16 = vld [vmem:[%s21369_s7 + $0x170] sm:$0xff] }
 0xbf8   :  { %11267 = vmatpush1.bf16.msra.mxu1 %v14564_v15  ;;  %v13040_v15 = vpack.c.bf16 %v11732_v17, %v11731_v57  ;;  %v11752_v57 = vld [vmem:[%s21369_s7 + $0x178] sm:$0xff] }
 0xbf9   :  { %11677 = vmatpush1.bf16.msra.mxu0 %v14567_v25  ;;  %11268 = vmatprep.subr.bf16.mxu1 %v14572_v32  ;;  %v11715_v25 = vld [vmem:[%s21369_s7 + $0x50] sm:$0xff]  ;;  %v11716_v32 = vld [vmem:[%s21369_s7 + $0x58] sm:$0xff]  ;;  %v13074_v17 = vpack.c.bf16 %v11752_v57, %v11751_v16 }
 0xbfa   :  { %11678 = vmatprep.subr.bf16.mxu0 %v14575_v54  ;;  %v11733_v54 = vld [vmem:[%s21369_s7 + $0xe0] sm:$0xff] }
 0xbfc   :  { %11269 = vmatpush1.bf16.msra.mxu1 %v14570_v52  ;;  %v11734_v52 = vld [vmem:[%s21369_s7 + $0xe8] sm:$0xff] }
 0xbfd   :  { %11679 = vmatpush1.bf16.msra.mxu0 %v14573_v45  ;;  %11270 = vmatprep.subr.bf16.mxu1 %v14578_v58  ;;  %v13042_v45 = vpack.c.bf16 %v11716_v32, %v11715_v25  ;;  %v13044_v58 = vpack.c.bf16 %v11734_v52, %v11733_v54  ;;  %v11755_v32 = vld [vmem:[%s21369_s7 + $0x190] sm:$0xff]  ;;  %v11756_v54 = vld [vmem:[%s21369_s7 + $0x198] sm:$0xff] }
 0xbfe   :  { %11680 = vmatprep.subr.bf16.mxu0 %v14581_v5  ;;  %v11717_v5 = vld [vmem:[%s21369_s7 + $0x60] sm:$0xff]  ;;  %v13080_v52 = vpack.c.bf16 %v11756_v54, %v11755_v32 }
 0xc00   :  { %11271 = vmatpush1.bf16.msra.mxu1 %v14576_v62  ;;  %v11718_v62 = vld [vmem:[%s21369_s7 + $0x68] sm:$0xff] }
 0xc01   :  { %11681 = vmatpush1.bf16.msra.mxu0 %v14579_v7  ;;  %11272 = vmatprep.subr.bf16.mxu1 %v14584_v1  ;;  %v13046_v7 = vpack.c.bf16 %v11718_v62, %v11717_v5  ;;  %v11735_v1 = vld [vmem:[%s21369_s7 + $0xf0] sm:$0xff] }
 0xc02   :  { %11682 = vmatprep.subr.bf16.mxu0 %v14587_v47  ;;  %v11736_v47 = vld [vmem:[%s21369_s7 + $0xf8] sm:$0xff]  ;;  %v11759_v62 = vld [vmem:[%s21369_s7 + $0x1b0] sm:$0xff] }
 0xc04   :  { %11273 = vmatpush1.bf16.msra.mxu1 %v14582_v22  ;;  %v11719_v22 = vld [vmem:[%s21369_s7 + $0x70] sm:$0xff] }
 0xc05   :  { %11683 = vmatpush1.bf16.msra.mxu0 %v14585_v9  ;;  %11274 = vmatprep.subr.bf16.mxu1 %v14590_v30  ;;  %v13048_v9 = vpack.c.bf16 %v11736_v47, %v11735_v1  ;;  %v11720_v30 = vld [vmem:[%s21369_s7 + $0x78] sm:$0xff]  ;;  %v11761_v47 = vld [vmem:[%s21369_s7 + $0x1c0] sm:$0xff] }
 0xc06   :  { %11684 = vmatprep.subr.bf16.mxu0 %v14593_v27  ;;  %v13050_v27 = vpack.c.bf16 %v11720_v30, %v11719_v22  ;;  %v11762_v22 = vld [vmem:[%s21369_s7 + $0x1c8] sm:$0xff]  ;;  %v11763_v30 = vld [vmem:[%s21369_s7 + $0x1d0] sm:$0xff] }
 0xc08   :  { %11275 = vmatpush1.bf16.msra.mxu1 %v14588_v41  ;;  %v14916_v41 = vmov 0.0|0.0  }
 0xc09   :  { %11685 = vmatpush1.bf16.msra.mxu0 %v14591_v42  ;;  %11276 = vmatprep.subr.bf16.mxu1 %v14596_v49  ;;  %v21237_v42 = vld [vmem:[%s21370_s6] sm:$0xf]  ;;  %v21477_v49 = vld [vmem:[#allocation6_spill] sm:$0xff] }
 0xc0a   :  { %11686 = vmatprep.subr.bf16.mxu0 %v14599_v12  ;;  %v7675_v12 = vsub.s32 3, %v21477_v49 }
 0xc0c   :  { %11277 = vmatpush1.bf16.msra.mxu1 %v14594_v43  ;;  %v21478_v43 = vld [vmem:[#allocation7_spill] sm:$0xff] }
 0xc0d   :  { %11687 = vmatpush1.bf16.msra.mxu0 %v14597_v59  ;;  %11278 = vmatprep.subr.bf16.mxu1 %v14602_v10  ;;  %v7664_v59 = vrot.slane %v21237_v42, %v21478_v43  ;;  %v21479_v10 = vld [vmem:[#allocation8_spill] sm:$0xff] }
 0xc0e   :  { %11688 = vmatprep.subr.bf16.mxu0 %v14605_v39  ;;  %v7668_v39 = vrot.slane %v21237_v42, %v21479_v10  ;;  %v11766_v10 = vld [vmem:[%s21369_s7 + $0x1e8] sm:$0xff] }
 0xc10   :  { %11279 = vmatpush1.bf16.msra.mxu1 %v14600_v50  ;;  %v7676_v50 = vrot.slane %v21237_v42, %v7675_v12  ;;  %v7671_v12 = vsub.s32 2, %v21477_v49 }
 0xc11   :  { %11689 = vmatpush1.bf16.msra.mxu0 %v14603_v11  ;;  %11280 = vmatprep.subr.bf16.mxu1 %v14608_v4 }
 0xc12   :  { %11690 = vmatprep.subr.bf16.mxu0 %v14611_v63 }
 0xc14   :  { %11281 = vmatpush1.bf16.msra.mxu1 %v14606_v48  ;;  %v11738_v48 = vld [vmem:[%s21369_s7 + $0x108] sm:$0xff] }
 0xc15   :  { %11691 = vmatpush1.bf16.msra.mxu0 %v14609_v24  ;;  %13021 = vmatprep.subr.bf16.mxu1 %v13020_v21 }
 0xc17   :  { %11283 = vmatmul.mubr.bf16.vlgmr.msra.gmra.mrb[148].mxu1 %v7017_v23 }
 0xc18   :  { %11693 = vmatmul.mubr.bf16.vlgmr.msra.gmra.mrb[176].mxu0 %v7017_v23  ;;  %13023 = vmatpush3.bf16.msra.mxu1 %v13022_v36  ;;  %v13053_v23 = vpack.c.bf16 %v11738_v48, %v11737_v33 }
 0xc19   :  { %13025 = vmatprep.subr.bf16.mxu1 %v13024_v53 }
 0xc1c   :  { %13027 = vmatpush3.bf16.msra.mxu1 %v13026_v44  ;;  %v11741_v44 = vld [vmem:[%s21369_s7 + $0x120] sm:$0xff] }
 0xc1d   :  { %13029 = vmatprep.subr.bf16.mxu1 %v13028_v13  ;;  %v11742_v13 = vld [vmem:[%s21369_s7 + $0x128] sm:$0xff] }
 0xc1e   :  { %v13059_v2 = vpack.c.bf16 %v11742_v13, %v11741_v44 }
 0xc20   :  { %13031 = vmatpush3.bf16.msra.mxu1 %v13030_v35  ;;  %v11745_v35 = vld [vmem:[%s21369_s7 + $0x140] sm:$0xff] }
 0xc21   :  { %13033 = vmatprep.subr.bf16.mxu1 %v13032_v51  ;;  %v11746_v51 = vld [vmem:[%s21369_s7 + $0x148] sm:$0xff] }
 0xc22   :  { %v13065_v8 = vpack.c.bf16 %v11746_v51, %v11745_v35 }
 0xc24   :  { %13035 = vmatpush3.bf16.msra.mxu1 %v13034_v46  ;;  %v11749_v46 = vld [vmem:[%s21369_s7 + $0x160] sm:$0xff] }
 0xc25   :  { %13037 = vmatprep.subr.bf16.mxu1 %v13036_v6  ;;  %v11750_v6 = vld [vmem:[%s21369_s7 + $0x168] sm:$0xff] }
 0xc26   :  { %v13071_v29 = vpack.c.bf16 %v11750_v6, %v11749_v46 }
 0xc28   :  { %13039 = vmatpush3.bf16.msra.mxu1 %v13038_v20  ;;  %v11753_v20 = vld [vmem:[%s21369_s7 + $0x180] sm:$0xff] }
 0xc29   :  { %13041 = vmatprep.subr.bf16.mxu1 %v13040_v15  ;;  %v11754_v15 = vld [vmem:[%s21369_s7 + $0x188] sm:$0xff] }
 0xc2a   :  { %v13077_v25 = vpack.c.bf16 %v11754_v15, %v11753_v20 }
 0xc2c   :  { %13043 = vmatpush3.bf16.msra.mxu1 %v13042_v45  ;;  %v11757_v45 = vld [vmem:[%s21369_s7 + $0x1a0] sm:$0xff] }
 0xc2d   :  { %13045 = vmatprep.subr.bf16.mxu1 %v13044_v58  ;;  %v11758_v58 = vld [vmem:[%s21369_s7 + $0x1a8] sm:$0xff] }
 0xc2e   :  { %v13083_v5 = vpack.c.bf16 %v11758_v58, %v11757_v45 }
 0xc30   :  { %13047 = vmatpush3.bf16.msra.mxu1 %v13046_v7  ;;  %v11760_v7 = vld [vmem:[%s21369_s7 + $0x1b8] sm:$0xff] }
 0xc31   :  { %13049 = vmatprep.subr.bf16.mxu1 %v13048_v9  ;;  %v13086_v1 = vpack.c.bf16 %v11760_v7, %v11759_v62  ;;  %v13089_v9 = vpack.c.bf16 %v11762_v22, %v11761_v47 }
 0xc34   :  { %13051 = vmatpush3.bf16.msra.mxu1 %v13050_v27  ;;  %v11764_v27 = vld [vmem:[%s21369_s7 + $0x1d8] sm:$0xff] }
 0xc35   :  { %13052 = vmatprep.subr.bf16.mxu1 %v14916_v41  ;;  %v13092_v43 = vpack.c.bf16 %v11764_v27, %v11763_v30 }
 0xcea   :  { %v11284_v11 = vpop.f32.mrb[148].mxu1 }
 0xceb   :  { %v13101_v4 = vadd.f32 %v11284_v11, %v7664_v59  ;;  %v21245_v63 = vpop.f32.mrb[176].mxu0  ;;  %v11286_v55 = vpop.f32.mrb[149].mxu1  ;;  %v11765_v59 = vld [vmem:[%s21369_s7 + $0x1e0] sm:$0xff]  ;;  %v14917_v11 = vmov 0.0  }
 0xcec   :  { %v13102_v24 = vadd.f32 %v11286_v55, %v7668_v39  ;;  %v11696_v21 = vpop.f32.mrb[177].mxu0  ;;  %v11288_v28 = vpop.f32.mrb[150].mxu1  ;;  %v7672_v39 = vrot.slane %v21237_v42, %v7671_v12 }
 0xced   :  { %v13104_v34 = vadd.f32 %v11696_v21, %v7676_v50  ;;  %v11698_v19 = vpop.f32.mrb[178].mxu0  ;;  %v11289_v61 = vpop.f32.mrb[151].mxu1  ;;  %v11701_v53 = vmax.f32 %v13101_v4, 0.0  ;;  %v13095_v50 = vpack.c.bf16 %v11766_v10, %v11765_v59  ;;  %v11767_v4 = vld [vmem:[%s21369_s7 + $0x1f0] sm:$0xf] }
 0xcee   :  { %v11702_v31 = vmax.f32 %v13102_v24, 0.0  ;;  %v11699_v36 = vpop.f32.mrb[179].mxu0  ;;  %v13103_v49 = vadd.f32 %v21245_v63, %v7672_v39 }
 0xcef   :  { %v11704_v14 = vmax.f32 %v13104_v34, 0.0 }
 0xcf0   :  { %11847 = vmatprep.mubr.f32.mxu1 %v11702_v31  ;;  %v11703_v55 = vmax.f32 %v13103_v49, 0.0 }
 0xcf1   :  { %11848 = vmatmul.mubr.f32.vlgmr.msra.gmra.mrb[152].mxu1 %v11701_v53 }
 0xcf2   :  { %13054 = vmatpush1.bf16.msra.mxu1 %v13053_v23  ;;  %12984 = vmatprep.mubr.msk.f32.mxu1 %vm11775_vm9, %v11704_v14 }
 0xcf3   :  { %13055 = vmatprep.subr.bf16.mxu1 %v14916_v41 }
 0xcf6   :  { %13057 = vmatpush1.bf16.msra.mxu1 %v13056_v0 }
 0xcf7   :  { %13058 = vmatprep.subr.bf16.mxu1 %v14916_v41 }
 0xcfa   :  { %13060 = vmatpush1.bf16.msra.mxu1 %v13059_v2 }
 0xcfb   :  { %13061 = vmatprep.subr.bf16.mxu1 %v14916_v41 }
 0xcfe   :  { %13063 = vmatpush1.bf16.msra.mxu1 %v13062_v38 }
 0xcff   :  { %13064 = vmatprep.subr.bf16.mxu1 %v14916_v41 }
 0xd02   :  { %13066 = vmatpush1.bf16.msra.mxu1 %v13065_v8 }
 0xd03   :  { %13067 = vmatprep.subr.bf16.mxu1 %v14916_v41 }
 0xd06   :  { %13069 = vmatpush1.bf16.msra.mxu1 %v13068_v26 }
 0xd07   :  { %13070 = vmatprep.subr.bf16.mxu1 %v14916_v41 }
 0xd0a   :  { %13072 = vmatpush1.bf16.msra.mxu1 %v13071_v29 }
 0xd0b   :  { %13073 = vmatprep.subr.bf16.mxu1 %v14916_v41 }
 0xd0e   :  { %13075 = vmatpush1.bf16.msra.mxu1 %v13074_v17 }
 0xd0f   :  { %13076 = vmatprep.subr.bf16.mxu1 %v14916_v41 }
 0xd12   :  { %13078 = vmatpush1.bf16.msra.mxu1 %v13077_v25 }
 0xd13   :  { %13079 = vmatprep.subr.bf16.mxu1 %v14916_v41 }
 0xd16   :  { %13081 = vmatpush1.bf16.msra.mxu1 %v13080_v52 }
 0xd17   :  { %13082 = vmatprep.subr.bf16.mxu1 %v14916_v41 }
 0xd1a   :  { %13084 = vmatpush1.bf16.msra.mxu1 %v13083_v5 }
 0xd1b   :  { %13085 = vmatprep.subr.bf16.mxu1 %v14916_v41 }
 0xd1e   :  { %13087 = vmatpush1.bf16.msra.mxu1 %v13086_v1 }
 0xd1f   :  { %13088 = vmatprep.subr.bf16.mxu1 %v14916_v41 }
 0xd22   :  { %13090 = vmatpush1.bf16.msra.mxu1 %v13089_v9 }
 0xd23   :  { %13091 = vmatprep.subr.bf16.mxu1 %v14916_v41 }
 0xd26   :  { %13093 = vmatpush1.bf16.msra.mxu1 %v13092_v43 }
 0xd27   :  { %13094 = vmatprep.subr.bf16.mxu1 %v14916_v41  ;;  %v12982_v41 = vld [vmem:[%s21371_s8] ss:$0 sm:$0xff] }
 0xd2a   :  { %13096 = vmatpush1.bf16.msra.mxu1 %v13095_v50 }
 0xd2b   :  { %11913 = vmatprep.subr.mxu1 %v14917_v11 }
 0xd2e   :  { %12983 = vmatpush1.msk.msra.mxu1 %vm11779_vm10, %v11767_v4 }
 0xd2f   :  { %11918 = vmatmul.mubr.f32.vlgmr.msra.gmra.mrb[154].mxu1 %v11703_v55 }
 0xdc4   :  { %v13017_v33 = vpop.f32.mrb[152].mxu1 }
 0xdc5   :  { %v13018_v48 = vpop.f32.mrb[153].mxu1 }
 0xdc6   :  { %v13019_v42 = vadd.f32 %v13018_v48, %v13017_v33 }
 0xdc8   :  { %v11850_v24 = vadd.f32 %v13019_v42, %v12982_v41 }
 0xe02   :  { %v11919_v63 = vpop.f32.mrb[154].mxu1 }
 0xe03   :  { %v11920_v21 = vadd.f32 %v11919_v63, %v11850_v24  ;;  %v11921_v28 = vpop.f32.mrb[155].mxu1 }
 0xe05   :  { %11923 = vmax.xlane.f32.xlu0 %v11920_v21 }
 0xe92   :  { %v11924_v34 = vpop.xlane.xlu0 %11923 }
 0xe93   :  { %v11925_v19 = vsub.f32 %v11920_v21, %v11924_v34 }
 0xe95   :  { %v11926_v61 = vmul.f32 1.442695, %v11925_v19 }
 0xe97   :  { %14612 = vpow2.f32 %v11926_v61 }
 0xea1   :  { %v14613_v31 = vpop.eup %14612 }
 0xea2   :  { %11928 = vadd.xlane.f32.xlu1 %v14613_v31 }
 0xf2f   :  { %v11929_v36 = vpop.xlane.xlu1 %11928 }
 0xf30   :  { %14614 = vlog2.f32 %v11929_v36 }
 0xf3a   :  { %v14615_v23 = vpop.eup %14614 }
 0xf3b   :  { %v11931_v53 = vmul.f32 0.6931472, %v14615_v23 }
 0xf3d   :  { %v11932_v3 = vsub.f32 %v11925_v19, %v11931_v53 }
 0xf3f   :  { %11933 = vst [vmem:[%s21372_s9] sm:$0xff] %v11932_v3 }

</bundles_post_ra>
